<compile_context>
chip_gen: v7x
topology: tpu7x:2x2x1
jax: 0.10.0
libtpu: 0.0.40
codegen_flags: <defaults>
</compile_context>

<pallas_src>
import functools

import jax
import jax.numpy as jnp
from jax import lax
from jax.experimental import pallas as pl
from jax.experimental.pallas import tpu as pltpu

# ----------------------------- model config (small, synthetic) -----------------
VOCAB_SIZE = 1000
EMBEDDING_DIM = 128     # PyTorch module uses 300; reduced for lane-aligned tiles.
HIDDEN_DIM = 64
OUTPUT_DIM = 1
N_LAYERS = 2
BIDIRECTIONAL = True

BATCH = 2
BATCH_PAD = 8           # pad batch to one full sublane tile
SEQ_LEN = 8


def _sig(x):
    # sigmoid(x) == 0.5 * tanh(0.5 * x) + 0.5  -> single EUP transcendental per gate.
    return 0.5 * jnp.tanh(0.5 * x) + 0.5


# ----------------------------- fused Pallas kernel ------------------------------
def _lstm_net_kernel(ids_ref, len_ref, emb_hbm,
                     w0_ref, b0_ref, whh0_ref,
                     w1_ref, b1_ref, whh1_ref,
                     fcw_ref, fcb_ref,
                     out_ref,
                     x_emb_ref, x0_ref, x1_ref, gates_ref, dma_sems,
                     *, T, B, B_real, H, E):
    """Fused embedding gather + 2-layer bidirectional LSTM + fc + sigmoid.

    Layouts (H=64, H2=2H=128, B=8 padded batch, G=8H=512):
      ids_ref  : (B_real, T) int32 in SMEM  (token ids)
      len_ref  : (B, 1) int32 in VMEM       (per-row valid length, 0 for padded rows)
      emb_hbm  : (V, E) f32 in HBM          (embedding table, gathered by DMA)
      w0_ref   : (2E, 8H)  layer-0 input weights, fwd/bwd interleaved per gate
      whh*_ref : (2H, 8H)  block-diagonal recurrent weights
      w1_ref   : (4H, 8H)  layer-1 input weights matched to x1_ref's staging layout
      b*_ref   : (1, 8H)   combined biases (b_ih + b_hh), interleaved
      fcw_ref  : (2H, 1), fcb_ref: (1, 1)
      out_ref  : (B, 1)
      scratch  : x_emb (T*B, E), x0 (T*B, 2E), x1 (T*B, 4H), gates (T*B, 8H)

    Fused gate layout along the 8H axis: [i_f i_b f_f f_b g_f g_b o_f o_b] so each gate
    spans a full 128-lane vreg covering both directions, aligned with the fused state
    layout h = [h_fwd | h_bwd] (B, 128).  Unrolled step i: fwd processes t=i, bwd t=T-1-i.
    """
    H2 = 2 * H

    # ---- fused embedding gather: one small DMA per real token, straight from HBM ----
    copies = []
    for t in range(T):
        for b in range(B_real):
            k = t * B_real + b
            cp = pltpu.make_async_copy(emb_hbm.at[ids_ref[b, t]],      # (E,) row in HBM
                                       x_emb_ref.at[t * B + b],        # (E,) row in VMEM
                                       dma_sems.at[k])
            cp.start()
            copies.append(cp)
    for cp in copies:
        cp.wait()
    # Rows for padded batch entries (b >= B_real) stay uninitialized: every state update
    # below is a select against a length mask that is always False for those rows, so any
    # garbage never reaches h/c or the returned rows.

    # ---- stage [x(t) | x(T-1-t)] pairs: full (8,128)-tile VMEM copies -----------------
    x0_ref[:, 0:E] = x_emb_ref[...]
    for j in range(T):
        x0_ref[j * B:(j + 1) * B, E:2 * E] = x_emb_ref[(T - 1 - j) * B:(T - j) * B, :]

    # ---- loop-invariant mask helpers ---------------------------------------------------
    lane = lax.broadcasted_iota(jnp.int32, (B, H2), 1)
    is_fwd = lane < H                      # lanes [0:H) -> fwd direction, [H:2H) -> bwd
    len_v = len_ref[...]                   # (B, 1) int32

    def step_mask(i):
        t_eff = jnp.where(is_fwd, i, T - 1 - i)
        return t_eff < len_v               # (B, 2H) bool validity mask for this step

    def cell(g, h, c, m):
        i_g = _sig(g[:, 0:H2])
        f_g = _sig(g[:, H2:2 * H2])
        g_g = jnp.tanh(g[:, 2 * H2:3 * H2])
        o_g = _sig(g[:, 3 * H2:4 * H2])
        c_new = f_g * c + i_g * g_g
        h_new = o_g * jnp.tanh(c_new)
        h_nxt = jnp.where(m, h_new, h)     # freeze state outside the packed length
        c_nxt = jnp.where(m, c_new, c)
        h_out = jnp.where(m, h_new, 0.0)   # packed output: zero at padded steps
        return h_nxt, c_nxt, h_out

    zeros = jnp.zeros((B, H2), jnp.float32)

    # ---- layer 0: hoisted input projection (one MXU matmul), then serial recurrence ----
    gates_ref[...] = (jnp.dot(x0_ref[...], w0_ref[...],
                              preferred_element_type=jnp.float32) + b0_ref[...])
    whh0 = whh0_ref[...]

    def step0(i, carry):
        h, c = carry
        r = pl.multiple_of(i * B, B)
        rr = pl.multiple_of((T - 1 - i) * B, B)
        g = gates_ref[pl.ds(r, B), :] + jnp.dot(h, whh0,
                                                preferred_element_type=jnp.float32)
        h, c, h_out = cell(g, h, c, step_mask(i))
        # Stage layer-0 outputs for layer 1 (both stores are full (8,128) tiles):
        #   row-block j lanes [0:2H)  = [out_f(j)     | out_b(T-1-j)]   (written at i=j)
        #   row-block j lanes [2H:4H) = [out_f(T-1-j) | out_b(j)]       (written at i=T-1-j)
        x1_ref[pl.ds(r, B), 0:H2] = h_out
        x1_ref[pl.ds(rr, B), H2:2 * H2] = h_out
        return h, c

    lax.fori_loop(0, T, step0, (zeros, zeros), unroll=True)

    # ---- layer 1: hoisted input projection on staged layer-0 output --------------------
    gates_ref[...] = (jnp.dot(x1_ref[...], w1_ref[...],
                              preferred_element_type=jnp.float32) + b1_ref[...])
    whh1 = whh1_ref[...]

    def step1(i, carry):
        h, c = carry
        r = pl.multiple_of(i * B, B)
        g = gates_ref[pl.ds(r, B), :] + jnp.dot(h, whh1,
                                                preferred_element_type=jnp.float32)
        h, c, _ = cell(g, h, c, step_mask(i))
        return h, c

    h, _ = lax.fori_loop(0, T, step1, (zeros, zeros), unroll=True)

    # ---- fc + sigmoid on [h_fwd_final | h_bwd_final] of the top layer ------------------
    logits = jnp.dot(h, fcw_ref[...], preferred_element_type=jnp.float32) + fcb_ref[...]
    out_ref[...] = _sig(logits)


# ----------------------------- wrapper ------------------------------------------
def lstm_net_forward(packed, text, text_lengths):
    """Pallas equivalent of LSTMNet.forward(text, text_lengths)."""
    B_real, T = text.shape
    B = BATCH_PAD
    assert B_real <= B
    E, H = EMBEDDING_DIM, HIDDEN_DIM

    ids = text.astype(jnp.int32)                                   # (B_real, T) -> SMEM
    lens = jnp.concatenate(
        [text_lengths.astype(jnp.int32),
         jnp.zeros((B - B_real,), jnp.int32)]).reshape(B, 1)       # padded rows: length 0

    kernel = functools.partial(_lstm_net_kernel, T=T, B=B, B_real=B_real, H=H, E=E)
    vmem = pltpu.MemorySpace.VMEM
    out = pl.pallas_call(
        kernel,
        out_shape=jax.ShapeDtypeStruct((B, OUTPUT_DIM), jnp.float32),
        in_specs=[
            pl.BlockSpec(memory_space=pltpu.MemorySpace.SMEM),     # token ids
            pl.BlockSpec(memory_space=vmem),                       # lengths (B,1)
            pl.BlockSpec(memory_space=pl.ANY),                     # embedding table in HBM
            pl.BlockSpec(memory_space=vmem),                       # w0
            pl.BlockSpec(memory_space=vmem),                       # b0
            pl.BlockSpec(memory_space=vmem),                       # whh0
            pl.BlockSpec(memory_space=vmem),                       # w1
            pl.BlockSpec(memory_space=vmem),                       # b1
            pl.BlockSpec(memory_space=vmem),                       # whh1
            pl.BlockSpec(memory_space=vmem),                       # fc_w
            pl.BlockSpec(memory_space=vmem),                       # fc_b
        ],
        out_specs=pl.BlockSpec(memory_space=vmem),
        scratch_shapes=[
            pltpu.VMEM((T * B, E), jnp.float32),        # gathered embeddings      (32 KB)
            pltpu.VMEM((T * B, 2 * E), jnp.float32),    # [x(t) | x(T-1-t)] pairs  (64 KB)
            pltpu.VMEM((T * B, 4 * H), jnp.float32),    # staged layer-0 outputs   (64 KB)
            pltpu.VMEM((T * B, 8 * H), jnp.float32),    # hoisted gate projections (128 KB)
            pltpu.SemaphoreType.DMA((T * B_real,)),     # one DMA sem per gathered row
        ],
        # ~2 MB used (weights ~1.6 MB + scratch ~0.3 MB); explicit budget is safe on
        # v5e/v6e (128 MiB physical) and v7x (64 MiB physical).
        compiler_params=pltpu.CompilerParams(vmem_limit_bytes=32 * 1024 * 1024),
    )(ids, lens, packed["embedding"],
      packed["w0"], packed["b0"], packed["whh0"],
      packed["w1"], packed["b1"], packed["whh1"],
      packed["fc_w"], packed["fc_b"])
    return out[:B_real]


# ----------------------------- weight packing ------------------------------------
def _interleave_gate_cols(a_f, a_b, h):
    """(R,4h) fwd + (R,4h) bwd (gate order i,f,g,o) -> (R,8h) [i_f i_b f_f f_b g_f g_b o_f o_b]."""
    r = a_f.shape[0]
    return jnp.concatenate(
        [a_f.reshape(r, 4, h), a_b.reshape(r, 4, h)], axis=-1).reshape(r, 8 * h)


def pack_params(raw):
    """Build the fused/interleaved weight matrices consumed by the kernel."""
    H, E = HIDDEN_DIM, EMBEDDING_DIM
    z_e = jnp.zeros((E, 4 * H), jnp.float32)
    z_h = jnp.zeros((H, 4 * H), jnp.float32)

    w_ih0_f, w_hh0_f, b0_f = raw["l0_d0"]
    w_ih0_b, w_hh0_b, b0_b = raw["l0_d1"]
    w_ih1_f, w_hh1_f, b1_f = raw["l1_d0"]
    w_ih1_b, w_hh1_b, b1_b = raw["l1_d1"]

    packed = {
        "embedding": raw["embedding"],
        # layer-0 input weights: rows 0:E act on x(t) -> fwd cols; rows E:2E on x(T-1-t) -> bwd cols
        "w0": jnp.concatenate([_interleave_gate_cols(w_ih0_f, z_e, H),
                               _interleave_gate_cols(z_e, w_ih0_b, H)], axis=0),
        "b0": _interleave_gate_cols(b0_f, b0_b, H),
        "whh0": jnp.concatenate([_interleave_gate_cols(w_hh0_f, z_h, H),
                                 _interleave_gate_cols(z_h, w_hh0_b, H)], axis=0),
        # layer-1 input weights matched to the x1 staging layout
        # x1 row-block j lanes: [out_f(j) | out_b(T-1-j) | out_f(T-1-j) | out_b(j)]
        "w1": jnp.concatenate([_interleave_gate_cols(w_ih1_f[0:H], z_h, H),      # out_f(j)    -> fwd
                               _interleave_gate_cols(z_h, w_ih1_b[H:2 * H], H),  # out_b(T-1-j)-> bwd
                               _interleave_gate_cols(z_h, w_ih1_b[0:H], H),      # out_f(T-1-j)-> bwd
                               _interleave_gate_cols(w_ih1_f[H:2 * H], z_h, H)], # out_b(j)    -> fwd
                              axis=0),
        "b1": _interleave_gate_cols(b1_f, b1_b, H),
        "whh1": jnp.concatenate([_interleave_gate_cols(w_hh1_f, z_h, H),
                                 _interleave_gate_cols(z_h, w_hh1_b, H)], axis=0),
        "fc_w": raw["fc_w"],
        "fc_b": raw["fc_b"],
    }
    return packed


# ----------------------------- deterministic parameter init ----------------------
def init_raw_params(key):
    """PyTorch-style per-direction weights: w_ih (Din,4H), w_hh (H,4H), combined bias (1,4H)."""
    H = HIDDEN_DIM
    k = 1.0 / jnp.sqrt(jnp.float32(H))
    params = {}
    key, ek = jax.random.split(key)
    params["embedding"] = jax.random.normal(ek, (VOCAB_SIZE, EMBEDDING_DIM), jnp.float32)

    for layer in range(N_LAYERS):
        din = EMBEDDING_DIM if layer == 0 else 2 * H
        for d in range(2):
            key, k1, k2, k3, k4 = jax.random.split(key, 5)
            w_ih = jax.random.uniform(k1, (din, 4 * H), jnp.float32, -k, k)
            w_hh = jax.random.uniform(k2, (H, 4 * H), jnp.float32, -k, k)
            b_ih = jax.random.uniform(k3, (1, 4 * H), jnp.float32, -k, k)
            b_hh = jax.random.uniform(k4, (1, 4 * H), jnp.float32, -k, k)
            params[f"l{layer}_d{d}"] = (w_ih, w_hh, b_ih + b_hh)

    key, fk1, fk2 = jax.random.split(key, 3)
    kf = 1.0 / jnp.sqrt(jnp.float32(2 * H))
    params["fc_w"] = jax.random.uniform(fk1, (2 * H, OUTPUT_DIM), jnp.float32, -kf, kf)
    params["fc_b"] = jax.random.uniform(fk2, (1, OUTPUT_DIM), jnp.float32, -kf, kf)
    return params


# ----------------------------- pure-JAX reference (correctness check) ------------
def lstm_net_reference(raw, text, text_lengths):
    B, T = text.shape
    H = HIDDEN_DIM
    emb = jnp.take(raw["embedding"], text, axis=0)
    x = jnp.transpose(emb, (1, 0, 2)).astype(jnp.float32)       # (T, B, E)
    lengths = text_lengths.astype(jnp.int32)

    def run_dir(inp, w_ih, w_hh, b, reverse):
        h = jnp.zeros((B, H), jnp.float32)
        c = jnp.zeros((B, H), jnp.float32)
        outs = [None] * T
        steps = range(T - 1, -1, -1) if reverse else range(T)
        for t in steps:
            gates = inp[t] @ w_ih + h @ w_hh + b
            i_g = jax.nn.sigmoid(gates[:, 0:H])
            f_g = jax.nn.sigmoid(gates[:, H:2 * H])
            g_g = jnp.tanh(gates[:, 2 * H:3 * H])
            o_g = jax.nn.sigmoid(gates[:, 3 * H:4 * H])
            c_new = f_g * c + i_g * g_g
            h_new = o_g * jnp.tanh(c_new)
            valid = (t < lengths)[:, None].astype(jnp.float32)
            h = valid * h_new + (1.0 - valid) * h
            c = valid * c_new + (1.0 - valid) * c
            outs[t] = valid * h_new
        return jnp.stack(outs, axis=0), h

    layer_in = x
    finals = {}
    for layer in range(N_LAYERS):
        dir_outs = []
        for d, rev in ((0, False), (1, True)):
            w_ih, w_hh, b = raw[f"l{layer}_d{d}"]
            o, hf = run_dir(layer_in, w_ih, w_hh, b, rev)
            dir_outs.append(o)
            finals[(layer, d)] = hf
        layer_in = jnp.concatenate(dir_outs, axis=-1)

    hidden = jnp.concatenate([finals[(N_LAYERS - 1, 0)], finals[(N_LAYERS - 1, 1)]], axis=1)
    return jax.nn.sigmoid(hidden @ raw["fc_w"] + raw["fc_b"])


# ----------------------------- main ----------------------------------------------
if __name__ == "__main__":
    key = jax.random.PRNGKey(0)
    key, pkey, tkey = jax.random.split(key, 3)

    raw = init_raw_params(pkey)
    packed = pack_params(raw)

    text = jax.random.randint(tkey, (BATCH, SEQ_LEN), 0, VOCAB_SIZE, dtype=jnp.int32)
    # pack_padded_sequence(enforce_sorted=True) requires lengths sorted descending.
    text_lengths = jnp.array([SEQ_LEN, 5], dtype=jnp.int32)

    out = jax.jit(lstm_net_forward)(packed, text, text_lengths)
    out = jax.block_until_ready(out)

    ref = jax.jit(lstm_net_reference)(raw, text, text_lengths)
    ref = jax.block_until_ready(ref)

    assert out.shape == (BATCH, OUTPUT_DIM)
    assert bool(jnp.all(jnp.isfinite(out)))
    assert bool(jnp.all((out >= 0.0) & (out <= 1.0)))
    max_err = float(jnp.max(jnp.abs(out - ref)))
    assert max_err < 2e-3, f"Pallas kernel mismatch vs pure-JAX reference: {max_err}"
    print("KERNEL_OK")
</pallas_src>

<mosaic_0001>
module attributes {stable_mosaic.version = 11 : i64} {
  func.func @_lstm_net_kernel(%arg0: memref<2x8xi32, #tpu.memory_space<smem>>, %arg1: memref<8x1xi32, #tpu.memory_space<vmem>>, %arg2: memref<1000x128xf32, #tpu.memory_space<any>>, %arg3: memref<256x512xf32, #tpu.memory_space<vmem>>, %arg4: memref<1x512xf32, #tpu.memory_space<vmem>>, %arg5: memref<128x512xf32, #tpu.memory_space<vmem>>, %arg6: memref<256x512xf32, #tpu.memory_space<vmem>>, %arg7: memref<1x512xf32, #tpu.memory_space<vmem>>, %arg8: memref<128x512xf32, #tpu.memory_space<vmem>>, %arg9: memref<128x1xf32, #tpu.memory_space<vmem>>, %arg10: memref<1x1xf32, #tpu.memory_space<vmem>>, %arg11: memref<8x1xf32, #tpu.memory_space<vmem>>, %arg12: memref<64x128xf32, #tpu.memory_space<vmem>>, %arg13: memref<64x256xf32, #tpu.memory_space<vmem>>, %arg14: memref<64x256xf32, #tpu.memory_space<vmem>>, %arg15: memref<64x512xf32, #tpu.memory_space<vmem>>, %arg16: memref<16x!tpu.dma_semaphore, #tpu.memory_space<semaphore_mem>>) attributes {dimension_semantics = [], scalar_prefetch = 0 : i64, scratch_operands = 5 : i64, tpu.core_type = #tpu.core_type<tc>} {
    %c0 = arith.constant 0 : index
    %c0_0 = arith.constant 0 : index
    %0 = memref.load %arg0[%c0, %c0_0] : memref<2x8xi32, #tpu.memory_space<smem>>
    %c0_i32 = arith.constant 0 : i32
    %c0_i32_1 = arith.constant 0 : i32
    %c0_i32_2 = arith.constant 0 : i32
    %1 = tpu.memref_slice %arg2[%0, %c0_i32_2] : memref<1000x128xf32, #tpu.memory_space<any>> -> memref<1x128xf32, #tpu.memory_space<any>>
    %2 = tpu.memref_squeeze %1 : memref<1x128xf32, #tpu.memory_space<any>> -> memref<128xf32, #tpu.memory_space<any>>
    %c0_i32_3 = arith.constant 0 : i32
    %3 = tpu.memref_slice %arg12[%c0_i32, %c0_i32_3] : memref<64x128xf32, #tpu.memory_space<vmem>> -> memref<1x128xf32, #tpu.memory_space<vmem>>
    %4 = tpu.memref_squeeze %3 : memref<1x128xf32, #tpu.memory_space<vmem>> -> memref<128xf32, #tpu.memory_space<vmem>>
    %5 = tpu.memref_slice %arg16[%c0_i32_1] : memref<16x!tpu.dma_semaphore, #tpu.memory_space<semaphore_mem>> -> memref<1x!tpu.dma_semaphore, #tpu.memory_space<semaphore_mem>>
    %6 = tpu.memref_squeeze %5 : memref<1x!tpu.dma_semaphore, #tpu.memory_space<semaphore_mem>> -> memref<!tpu.dma_semaphore, #tpu.memory_space<semaphore_mem>>
    tpu.enqueue_dma source(%2 : memref<128xf32, #tpu.memory_space<any>>) target(%4 : memref<128xf32, #tpu.memory_space<vmem>>) target_semaphore(%6 : memref<!tpu.dma_semaphore, #tpu.memory_space<semaphore_mem>>)
    %c1 = arith.constant 1 : index
    %c0_4 = arith.constant 0 : index
    %7 = memref.load %arg0[%c1, %c0_4] : memref<2x8xi32, #tpu.memory_space<smem>>
    %c1_i32 = arith.constant 1 : i32
    %c1_i32_5 = arith.constant 1 : i32
    %c0_i32_6 = arith.constant 0 : i32
    %8 = tpu.memref_slice %arg2[%7, %c0_i32_6] : memref<1000x128xf32, #tpu.memory_space<any>> -> memref<1x128xf32, #tpu.memory_space<any>>
    %9 = tpu.memref_squeeze %8 : memref<1x128xf32, #tpu.memory_space<any>> -> memref<128xf32, #tpu.memory_space<any>>
    %c0_i32_7 = arith.constant 0 : i32
    %10 = tpu.memref_slice %arg12[%c1_i32, %c0_i32_7] : memref<64x128xf32, #tpu.memory_space<vmem>> -> memref<1x128xf32, #tpu.memory_space<vmem>>
    %11 = tpu.memref_squeeze %10 : memref<1x128xf32, #tpu.memory_space<vmem>> -> memref<128xf32, #tpu.memory_space<vmem>>
    %12 = tpu.memref_slice %arg16[%c1_i32_5] : memref<16x!tpu.dma_semaphore, #tpu.memory_space<semaphore_mem>> -> memref<1x!tpu.dma_semaphore, #tpu.memory_space<semaphore_mem>>
    %13 = tpu.memref_squeeze %12 : memref<1x!tpu.dma_semaphore, #tpu.memory_space<semaphore_mem>> -> memref<!tpu.dma_semaphore, #tpu.memory_space<semaphore_mem>>
    tpu.enqueue_dma source(%9 : memref<128xf32, #tpu.memory_space<any>>) target(%11 : memref<128xf32, #tpu.memory_space<vmem>>) target_semaphore(%13 : memref<!tpu.dma_semaphore, #tpu.memory_space<semaphore_mem>>)
    %c0_8 = arith.constant 0 : index
    %c1_9 = arith.constant 1 : index
    %14 = memref.load %arg0[%c0_8, %c1_9] : memref<2x8xi32, #tpu.memory_space<smem>>
    %c8_i32 = arith.constant 8 : i32
    %c2_i32 = arith.constant 2 : i32
    %c0_i32_10 = arith.constant 0 : i32
    %15 = tpu.memref_slice %arg2[%14, %c0_i32_10] : memref<1000x128xf32, #tpu.memory_space<any>> -> memref<1x128xf32, #tpu.memory_space<any>>
    %16 = tpu.memref_squeeze %15 : memref<1x128xf32, #tpu.memory_space<any>> -> memref<128xf32, #tpu.memory_space<any>>
    %c0_i32_11 = arith.constant 0 : i32
    %17 = tpu.memref_slice %arg12[%c8_i32, %c0_i32_11] : memref<64x128xf32, #tpu.memory_space<vmem>> -> memref<1x128xf32, #tpu.memory_space<vmem>>
    %18 = tpu.memref_squeeze %17 : memref<1x128xf32, #tpu.memory_space<vmem>> -> memref<128xf32, #tpu.memory_space<vmem>>
    %19 = tpu.memref_slice %arg16[%c2_i32] : memref<16x!tpu.dma_semaphore, #tpu.memory_space<semaphore_mem>> -> memref<1x!tpu.dma_semaphore, #tpu.memory_space<semaphore_mem>>
    %20 = tpu.memref_squeeze %19 : memref<1x!tpu.dma_semaphore, #tpu.memory_space<semaphore_mem>> -> memref<!tpu.dma_semaphore, #tpu.memory_space<semaphore_mem>>
    tpu.enqueue_dma source(%16 : memref<128xf32, #tpu.memory_space<any>>) target(%18 : memref<128xf32, #tpu.memory_space<vmem>>) target_semaphore(%20 : memref<!tpu.dma_semaphore, #tpu.memory_space<semaphore_mem>>)
    %c1_12 = arith.constant 1 : index
    %c1_13 = arith.constant 1 : index
    %21 = memref.load %arg0[%c1_12, %c1_13] : memref<2x8xi32, #tpu.memory_space<smem>>
    %c9_i32 = arith.constant 9 : i32
    %c3_i32 = arith.constant 3 : i32
    %c0_i32_14 = arith.constant 0 : i32
    %22 = tpu.memref_slice %arg2[%21, %c0_i32_14] : memref<1000x128xf32, #tpu.memory_space<any>> -> memref<1x128xf32, #tpu.memory_space<any>>
    %23 = tpu.memref_squeeze %22 : memref<1x128xf32, #tpu.memory_space<any>> -> memref<128xf32, #tpu.memory_space<any>>
    %c0_i32_15 = arith.constant 0 : i32
    %24 = tpu.memref_slice %arg12[%c9_i32, %c0_i32_15] : memref<64x128xf32, #tpu.memory_space<vmem>> -> memref<1x128xf32, #tpu.memory_space<vmem>>
    %25 = tpu.memref_squeeze %24 : memref<1x128xf32, #tpu.memory_space<vmem>> -> memref<128xf32, #tpu.memory_space<vmem>>
    %26 = tpu.memref_slice %arg16[%c3_i32] : memref<16x!tpu.dma_semaphore, #tpu.memory_space<semaphore_mem>> -> memref<1x!tpu.dma_semaphore, #tpu.memory_space<semaphore_mem>>
    %27 = tpu.memref_squeeze %26 : memref<1x!tpu.dma_semaphore, #tpu.memory_space<semaphore_mem>> -> memref<!tpu.dma_semaphore, #tpu.memory_space<semaphore_mem>>
    tpu.enqueue_dma source(%23 : memref<128xf32, #tpu.memory_space<any>>) target(%25 : memref<128xf32, #tpu.memory_space<vmem>>) target_semaphore(%27 : memref<!tpu.dma_semaphore, #tpu.memory_space<semaphore_mem>>)
    %c0_16 = arith.constant 0 : index
    %c2 = arith.constant 2 : index
    %28 = memref.load %arg0[%c0_16, %c2] : memref<2x8xi32, #tpu.memory_space<smem>>
    %c16_i32 = arith.constant 16 : i32
    %c4_i32 = arith.constant 4 : i32
    %c0_i32_17 = arith.constant 0 : i32
    %29 = tpu.memref_slice %arg2[%28, %c0_i32_17] : memref<1000x128xf32, #tpu.memory_space<any>> -> memref<1x128xf32, #tpu.memory_space<any>>
    %30 = tpu.memref_squeeze %29 : memref<1x128xf32, #tpu.memory_space<any>> -> memref<128xf32, #tpu.memory_space<any>>
    %c0_i32_18 = arith.constant 0 : i32
    %31 = tpu.memref_slice %arg12[%c16_i32, %c0_i32_18] : memref<64x128xf32, #tpu.memory_space<vmem>> -> memref<1x128xf32, #tpu.memory_space<vmem>>
    %32 = tpu.memref_squeeze %31 : memref<1x128xf32, #tpu.memory_space<vmem>> -> memref<128xf32, #tpu.memory_space<vmem>>
    %33 = tpu.memref_slice %arg16[%c4_i32] : memref<16x!tpu.dma_semaphore, #tpu.memory_space<semaphore_mem>> -> memref<1x!tpu.dma_semaphore, #tpu.memory_space<semaphore_mem>>
    %34 = tpu.memref_squeeze %33 : memref<1x!tpu.dma_semaphore, #tpu.memory_space<semaphore_mem>> -> memref<!tpu.dma_semaphore, #tpu.memory_space<semaphore_mem>>
    tpu.enqueue_dma source(%30 : memref<128xf32, #tpu.memory_space<any>>) target(%32 : memref<128xf32, #tpu.memory_space<vmem>>) target_semaphore(%34 : memref<!tpu.dma_semaphore, #tpu.memory_space<semaphore_mem>>)
    %c1_19 = arith.constant 1 : index
    %c2_20 = arith.constant 2 : index
    %35 = memref.load %arg0[%c1_19, %c2_20] : memref<2x8xi32, #tpu.memory_space<smem>>
    %c17_i32 = arith.constant 17 : i32
    %c5_i32 = arith.constant 5 : i32
    %c0_i32_21 = arith.constant 0 : i32
    %36 = tpu.memref_slice %arg2[%35, %c0_i32_21] : memref<1000x128xf32, #tpu.memory_space<any>> -> memref<1x128xf32, #tpu.memory_space<any>>
    %37 = tpu.memref_squeeze %36 : memref<1x128xf32, #tpu.memory_space<any>> -> memref<128xf32, #tpu.memory_space<any>>
    %c0_i32_22 = arith.constant 0 : i32
    %38 = tpu.memref_slice %arg12[%c17_i32, %c0_i32_22] : memref<64x128xf32, #tpu.memory_space<vmem>> -> memref<1x128xf32, #tpu.memory_space<vmem>>
    %39 = tpu.memref_squeeze %38 : memref<1x128xf32, #tpu.memory_space<vmem>> -> memref<128xf32, #tpu.memory_space<vmem>>
    %40 = tpu.memref_slice %arg16[%c5_i32] : memref<16x!tpu.dma_semaphore, #tpu.memory_space<semaphore_mem>> -> memref<1x!tpu.dma_semaphore, #tpu.memory_space<semaphore_mem>>
    %41 = tpu.memref_squeeze %40 : memref<1x!tpu.dma_semaphore, #tpu.memory_space<semaphore_mem>> -> memref<!tpu.dma_semaphore, #tpu.memory_space<semaphore_mem>>
    tpu.enqueue_dma source(%37 : memref<128xf32, #tpu.memory_space<any>>) target(%39 : memref<128xf32, #tpu.memory_space<vmem>>) target_semaphore(%41 : memref<!tpu.dma_semaphore, #tpu.memory_space<semaphore_mem>>)
    %c0_23 = arith.constant 0 : index
    %c3 = arith.constant 3 : index
    %42 = memref.load %arg0[%c0_23, %c3] : memref<2x8xi32, #tpu.memory_space<smem>>
    %c24_i32 = arith.constant 24 : i32
    %c6_i32 = arith.constant 6 : i32
    %c0_i32_24 = arith.constant 0 : i32
    %43 = tpu.memref_slice %arg2[%42, %c0_i32_24] : memref<1000x128xf32, #tpu.memory_space<any>> -> memref<1x128xf32, #tpu.memory_space<any>>
    %44 = tpu.memref_squeeze %43 : memref<1x128xf32, #tpu.memory_space<any>> -> memref<128xf32, #tpu.memory_space<any>>
    %c0_i32_25 = arith.constant 0 : i32
    %45 = tpu.memref_slice %arg12[%c24_i32, %c0_i32_25] : memref<64x128xf32, #tpu.memory_space<vmem>> -> memref<1x128xf32, #tpu.memory_space<vmem>>
    %46 = tpu.memref_squeeze %45 : memref<1x128xf32, #tpu.memory_space<vmem>> -> memref<128xf32, #tpu.memory_space<vmem>>
    %47 = tpu.memref_slice %arg16[%c6_i32] : memref<16x!tpu.dma_semaphore, #tpu.memory_space<semaphore_mem>> -> memref<1x!tpu.dma_semaphore, #tpu.memory_space<semaphore_mem>>
    %48 = tpu.memref_squeeze %47 : memref<1x!tpu.dma_semaphore, #tpu.memory_space<semaphore_mem>> -> memref<!tpu.dma_semaphore, #tpu.memory_space<semaphore_mem>>
    tpu.enqueue_dma source(%44 : memref<128xf32, #tpu.memory_space<any>>) target(%46 : memref<128xf32, #tpu.memory_space<vmem>>) target_semaphore(%48 : memref<!tpu.dma_semaphore, #tpu.memory_space<semaphore_mem>>)
    %c1_26 = arith.constant 1 : index
    %c3_27 = arith.constant 3 : index
    %49 = memref.load %arg0[%c1_26, %c3_27] : memref<2x8xi32, #tpu.memory_space<smem>>
    %c25_i32 = arith.constant 25 : i32
    %c7_i32 = arith.constant 7 : i32
    %c0_i32_28 = arith.constant 0 : i32
    %50 = tpu.memref_slice %arg2[%49, %c0_i32_28] : memref<1000x128xf32, #tpu.memory_space<any>> -> memref<1x128xf32, #tpu.memory_space<any>>
    %51 = tpu.memref_squeeze %50 : memref<1x128xf32, #tpu.memory_space<any>> -> memref<128xf32, #tpu.memory_space<any>>
    %c0_i32_29 = arith.constant 0 : i32
    %52 = tpu.memref_slice %arg12[%c25_i32, %c0_i32_29] : memref<64x128xf32, #tpu.memory_space<vmem>> -> memref<1x128xf32, #tpu.memory_space<vmem>>
    %53 = tpu.memref_squeeze %52 : memref<1x128xf32, #tpu.memory_space<vmem>> -> memref<128xf32, #tpu.memory_space<vmem>>
    %54 = tpu.memref_slice %arg16[%c7_i32] : memref<16x!tpu.dma_semaphore, #tpu.memory_space<semaphore_mem>> -> memref<1x!tpu.dma_semaphore, #tpu.memory_space<semaphore_mem>>
    %55 = tpu.memref_squeeze %54 : memref<1x!tpu.dma_semaphore, #tpu.memory_space<semaphore_mem>> -> memref<!tpu.dma_semaphore, #tpu.memory_space<semaphore_mem>>
    tpu.enqueue_dma source(%51 : memref<128xf32, #tpu.memory_space<any>>) target(%53 : memref<128xf32, #tpu.memory_space<vmem>>) target_semaphore(%55 : memref<!tpu.dma_semaphore, #tpu.memory_space<semaphore_mem>>)
    %c0_30 = arith.constant 0 : index
    %c4 = arith.constant 4 : index
    %56 = memref.load %arg0[%c0_30, %c4] : memref<2x8xi32, #tpu.memory_space<smem>>
    %c32_i32 = arith.constant 32 : i32
    %c8_i32_31 = arith.constant 8 : i32
    %c0_i32_32 = arith.constant 0 : i32
    %57 = tpu.memref_slice %arg2[%56, %c0_i32_32] : memref<1000x128xf32, #tpu.memory_space<any>> -> memref<1x128xf32, #tpu.memory_space<any>>
    %58 = tpu.memref_squeeze %57 : memref<1x128xf32, #tpu.memory_space<any>> -> memref<128xf32, #tpu.memory_space<any>>
    %c0_i32_33 = arith.constant 0 : i32
    %59 = tpu.memref_slice %arg12[%c32_i32, %c0_i32_33] : memref<64x128xf32, #tpu.memory_space<vmem>> -> memref<1x128xf32, #tpu.memory_space<vmem>>
    %60 = tpu.memref_squeeze %59 : memref<1x128xf32, #tpu.memory_space<vmem>> -> memref<128xf32, #tpu.memory_space<vmem>>
    %61 = tpu.memref_slice %arg16[%c8_i32_31] : memref<16x!tpu.dma_semaphore, #tpu.memory_space<semaphore_mem>> -> memref<1x!tpu.dma_semaphore, #tpu.memory_space<semaphore_mem>>
    %62 = tpu.memref_squeeze %61 : memref<1x!tpu.dma_semaphore, #tpu.memory_space<semaphore_mem>> -> memref<!tpu.dma_semaphore, #tpu.memory_space<semaphore_mem>>
    tpu.enqueue_dma source(%58 : memref<128xf32, #tpu.memory_space<any>>) target(%60 : memref<128xf32, #tpu.memory_space<vmem>>) target_semaphore(%62 : memref<!tpu.dma_semaphore, #tpu.memory_space<semaphore_mem>>)
    %c1_34 = arith.constant 1 : index
    %c4_35 = arith.constant 4 : index
    %63 = memref.load %arg0[%c1_34, %c4_35] : memref<2x8xi32, #tpu.memory_space<smem>>
    %c33_i32 = arith.constant 33 : i32
    %c9_i32_36 = arith.constant 9 : i32
    %c0_i32_37 = arith.constant 0 : i32
    %64 = tpu.memref_slice %arg2[%63, %c0_i32_37] : memref<1000x128xf32, #tpu.memory_space<any>> -> memref<1x128xf32, #tpu.memory_space<any>>
    %65 = tpu.memref_squeeze %64 : memref<1x128xf32, #tpu.memory_space<any>> -> memref<128xf32, #tpu.memory_space<any>>
    %c0_i32_38 = arith.constant 0 : i32
    %66 = tpu.memref_slice %arg12[%c33_i32, %c0_i32_38] : memref<64x128xf32, #tpu.memory_space<vmem>> -> memref<1x128xf32, #tpu.memory_space<vmem>>
    %67 = tpu.memref_squeeze %66 : memref<1x128xf32, #tpu.memory_space<vmem>> -> memref<128xf32, #tpu.memory_space<vmem>>
    %68 = tpu.memref_slice %arg16[%c9_i32_36] : memref<16x!tpu.dma_semaphore, #tpu.memory_space<semaphore_mem>> -> memref<1x!tpu.dma_semaphore, #tpu.memory_space<semaphore_mem>>
    %69 = tpu.memref_squeeze %68 : memref<1x!tpu.dma_semaphore, #tpu.memory_space<semaphore_mem>> -> memref<!tpu.dma_semaphore, #tpu.memory_space<semaphore_mem>>
    tpu.enqueue_dma source(%65 : memref<128xf32, #tpu.memory_space<any>>) target(%67 : memref<128xf32, #tpu.memory_space<vmem>>) target_semaphore(%69 : memref<!tpu.dma_semaphore, #tpu.memory_space<semaphore_mem>>)
    %c0_39 = arith.constant 0 : index
    %c5 = arith.constant 5 : index
    %70 = memref.load %arg0[%c0_39, %c5] : memref<2x8xi32, #tpu.memory_space<smem>>
    %c40_i32 = arith.constant 40 : i32
    %c10_i32 = arith.constant 10 : i32
    %c0_i32_40 = arith.constant 0 : i32
    %71 = tpu.memref_slice %arg2[%70, %c0_i32_40] : memref<1000x128xf32, #tpu.memory_space<any>> -> memref<1x128xf32, #tpu.memory_space<any>>
    %72 = tpu.memref_squeeze %71 : memref<1x128xf32, #tpu.memory_space<any>> -> memref<128xf32, #tpu.memory_space<any>>
    %c0_i32_41 = arith.constant 0 : i32
    %73 = tpu.memref_slice %arg12[%c40_i32, %c0_i32_41] : memref<64x128xf32, #tpu.memory_space<vmem>> -> memref<1x128xf32, #tpu.memory_space<vmem>>
    %74 = tpu.memref_squeeze %73 : memref<1x128xf32, #tpu.memory_space<vmem>> -> memref<128xf32, #tpu.memory_space<vmem>>
    %75 = tpu.memref_slice %arg16[%c10_i32] : memref<16x!tpu.dma_semaphore, #tpu.memory_space<semaphore_mem>> -> memref<1x!tpu.dma_semaphore, #tpu.memory_space<semaphore_mem>>
    %76 = tpu.memref_squeeze %75 : memref<1x!tpu.dma_semaphore, #tpu.memory_space<semaphore_mem>> -> memref<!tpu.dma_semaphore, #tpu.memory_space<semaphore_mem>>
    tpu.enqueue_dma source(%72 : memref<128xf32, #tpu.memory_space<any>>) target(%74 : memref<128xf32, #tpu.memory_space<vmem>>) target_semaphore(%76 : memref<!tpu.dma_semaphore, #tpu.memory_space<semaphore_mem>>)
    %c1_42 = arith.constant 1 : index
    %c5_43 = arith.constant 5 : index
    %77 = memref.load %arg0[%c1_42, %c5_43] : memref<2x8xi32, #tpu.memory_space<smem>>
    %c41_i32 = arith.constant 41 : i32
    %c11_i32 = arith.constant 11 : i32
    %c0_i32_44 = arith.constant 0 : i32
    %78 = tpu.memref_slice %arg2[%77, %c0_i32_44] : memref<1000x128xf32, #tpu.memory_space<any>> -> memref<1x128xf32, #tpu.memory_space<any>>
    %79 = tpu.memref_squeeze %78 : memref<1x128xf32, #tpu.memory_space<any>> -> memref<128xf32, #tpu.memory_space<any>>
    %c0_i32_45 = arith.constant 0 : i32
    %80 = tpu.memref_slice %arg12[%c41_i32, %c0_i32_45] : memref<64x128xf32, #tpu.memory_space<vmem>> -> memref<1x128xf32, #tpu.memory_space<vmem>>
    %81 = tpu.memref_squeeze %80 : memref<1x128xf32, #tpu.memory_space<vmem>> -> memref<128xf32, #tpu.memory_space<vmem>>
    %82 = tpu.memref_slice %arg16[%c11_i32] : memref<16x!tpu.dma_semaphore, #tpu.memory_space<semaphore_mem>> -> memref<1x!tpu.dma_semaphore, #tpu.memory_space<semaphore_mem>>
    %83 = tpu.memref_squeeze %82 : memref<1x!tpu.dma_semaphore, #tpu.memory_space<semaphore_mem>> -> memref<!tpu.dma_semaphore, #tpu.memory_space<semaphore_mem>>
    tpu.enqueue_dma source(%79 : memref<128xf32, #tpu.memory_space<any>>) target(%81 : memref<128xf32, #tpu.memory_space<vmem>>) target_semaphore(%83 : memref<!tpu.dma_semaphore, #tpu.memory_space<semaphore_mem>>)
    %c0_46 = arith.constant 0 : index
    %c6 = arith.constant 6 : index
    %84 = memref.load %arg0[%c0_46, %c6] : memref<2x8xi32, #tpu.memory_space<smem>>
    %c48_i32 = arith.constant 48 : i32
    %c12_i32 = arith.constant 12 : i32
    %c0_i32_47 = arith.constant 0 : i32
    %85 = tpu.memref_slice %arg2[%84, %c0_i32_47] : memref<1000x128xf32, #tpu.memory_space<any>> -> memref<1x128xf32, #tpu.memory_space<any>>
    %86 = tpu.memref_squeeze %85 : memref<1x128xf32, #tpu.memory_space<any>> -> memref<128xf32, #tpu.memory_space<any>>
    %c0_i32_48 = arith.constant 0 : i32
    %87 = tpu.memref_slice %arg12[%c48_i32, %c0_i32_48] : memref<64x128xf32, #tpu.memory_space<vmem>> -> memref<1x128xf32, #tpu.memory_space<vmem>>
    %88 = tpu.memref_squeeze %87 : memref<1x128xf32, #tpu.memory_space<vmem>> -> memref<128xf32, #tpu.memory_space<vmem>>
    %89 = tpu.memref_slice %arg16[%c12_i32] : memref<16x!tpu.dma_semaphore, #tpu.memory_space<semaphore_mem>> -> memref<1x!tpu.dma_semaphore, #tpu.memory_space<semaphore_mem>>
    %90 = tpu.memref_squeeze %89 : memref<1x!tpu.dma_semaphore, #tpu.memory_space<semaphore_mem>> -> memref<!tpu.dma_semaphore, #tpu.memory_space<semaphore_mem>>
    tpu.enqueue_dma source(%86 : memref<128xf32, #tpu.memory_space<any>>) target(%88 : memref<128xf32, #tpu.memory_space<vmem>>) target_semaphore(%90 : memref<!tpu.dma_semaphore, #tpu.memory_space<semaphore_mem>>)
    %c1_49 = arith.constant 1 : index
    %c6_50 = arith.constant 6 : index
    %91 = memref.load %arg0[%c1_49, %c6_50] : memref<2x8xi32, #tpu.memory_space<smem>>
    %c49_i32 = arith.constant 49 : i32
    %c13_i32 = arith.constant 13 : i32
    %c0_i32_51 = arith.constant 0 : i32
    %92 = tpu.memref_slice %arg2[%91, %c0_i32_51] : memref<1000x128xf32, #tpu.memory_space<any>> -> memref<1x128xf32, #tpu.memory_space<any>>
    %93 = tpu.memref_squeeze %92 : memref<1x128xf32, #tpu.memory_space<any>> -> memref<128xf32, #tpu.memory_space<any>>
    %c0_i32_52 = arith.constant 0 : i32
    %94 = tpu.memref_slice %arg12[%c49_i32, %c0_i32_52] : memref<64x128xf32, #tpu.memory_space<vmem>> -> memref<1x128xf32, #tpu.memory_space<vmem>>
    %95 = tpu.memref_squeeze %94 : memref<1x128xf32, #tpu.memory_space<vmem>> -> memref<128xf32, #tpu.memory_space<vmem>>
    %96 = tpu.memref_slice %arg16[%c13_i32] : memref<16x!tpu.dma_semaphore, #tpu.memory_space<semaphore_mem>> -> memref<1x!tpu.dma_semaphore, #tpu.memory_space<semaphore_mem>>
    %97 = tpu.memref_squeeze %96 : memref<1x!tpu.dma_semaphore, #tpu.memory_space<semaphore_mem>> -> memref<!tpu.dma_semaphore, #tpu.memory_space<semaphore_mem>>
    tpu.enqueue_dma source(%93 : memref<128xf32, #tpu.memory_space<any>>) target(%95 : memref<128xf32, #tpu.memory_space<vmem>>) target_semaphore(%97 : memref<!tpu.dma_semaphore, #tpu.memory_space<semaphore_mem>>)
    %c0_53 = arith.constant 0 : index
    %c7 = arith.constant 7 : index
    %98 = memref.load %arg0[%c0_53, %c7] : memref<2x8xi32, #tpu.memory_space<smem>>
    %c56_i32 = arith.constant 56 : i32
    %c14_i32 = arith.constant 14 : i32
    %c0_i32_54 = arith.constant 0 : i32
    %99 = tpu.memref_slice %arg2[%98, %c0_i32_54] : memref<1000x128xf32, #tpu.memory_space<any>> -> memref<1x128xf32, #tpu.memory_space<any>>
    %100 = tpu.memref_squeeze %99 : memref<1x128xf32, #tpu.memory_space<any>> -> memref<128xf32, #tpu.memory_space<any>>
    %c0_i32_55 = arith.constant 0 : i32
    %101 = tpu.memref_slice %arg12[%c56_i32, %c0_i32_55] : memref<64x128xf32, #tpu.memory_space<vmem>> -> memref<1x128xf32, #tpu.memory_space<vmem>>
    %102 = tpu.memref_squeeze %101 : memref<1x128xf32, #tpu.memory_space<vmem>> -> memref<128xf32, #tpu.memory_space<vmem>>
    %103 = tpu.memref_slice %arg16[%c14_i32] : memref<16x!tpu.dma_semaphore, #tpu.memory_space<semaphore_mem>> -> memref<1x!tpu.dma_semaphore, #tpu.memory_space<semaphore_mem>>
    %104 = tpu.memref_squeeze %103 : memref<1x!tpu.dma_semaphore, #tpu.memory_space<semaphore_mem>> -> memref<!tpu.dma_semaphore, #tpu.memory_space<semaphore_mem>>
    tpu.enqueue_dma source(%100 : memref<128xf32, #tpu.memory_space<any>>) target(%102 : memref<128xf32, #tpu.memory_space<vmem>>) target_semaphore(%104 : memref<!tpu.dma_semaphore, #tpu.memory_space<semaphore_mem>>)
    %c1_56 = arith.constant 1 : index
    %c7_57 = arith.constant 7 : index
    %105 = memref.load %arg0[%c1_56, %c7_57] : memref<2x8xi32, #tpu.memory_space<smem>>
    %c57_i32 = arith.constant 57 : i32
    %c15_i32 = arith.constant 15 : i32
    %c0_i32_58 = arith.constant 0 : i32
    %106 = tpu.memref_slice %arg2[%105, %c0_i32_58] : memref<1000x128xf32, #tpu.memory_space<any>> -> memref<1x128xf32, #tpu.memory_space<any>>
    %107 = tpu.memref_squeeze %106 : memref<1x128xf32, #tpu.memory_space<any>> -> memref<128xf32, #tpu.memory_space<any>>
    %c0_i32_59 = arith.constant 0 : i32
    %108 = tpu.memref_slice %arg12[%c57_i32, %c0_i32_59] : memref<64x128xf32, #tpu.memory_space<vmem>> -> memref<1x128xf32, #tpu.memory_space<vmem>>
    %109 = tpu.memref_squeeze %108 : memref<1x128xf32, #tpu.memory_space<vmem>> -> memref<128xf32, #tpu.memory_space<vmem>>
    %110 = tpu.memref_slice %arg16[%c15_i32] : memref<16x!tpu.dma_semaphore, #tpu.memory_space<semaphore_mem>> -> memref<1x!tpu.dma_semaphore, #tpu.memory_space<semaphore_mem>>
    %111 = tpu.memref_squeeze %110 : memref<1x!tpu.dma_semaphore, #tpu.memory_space<semaphore_mem>> -> memref<!tpu.dma_semaphore, #tpu.memory_space<semaphore_mem>>
    tpu.enqueue_dma source(%107 : memref<128xf32, #tpu.memory_space<any>>) target(%109 : memref<128xf32, #tpu.memory_space<vmem>>) target_semaphore(%111 : memref<!tpu.dma_semaphore, #tpu.memory_space<semaphore_mem>>)
    %c0_i32_60 = arith.constant 0 : i32
    %c0_i32_61 = arith.constant 0 : i32
    %c0_i32_62 = arith.constant 0 : i32
    %112 = tpu.memref_slice %arg2[%0, %c0_i32_62] : memref<1000x128xf32, #tpu.memory_space<any>> -> memref<1x128xf32, #tpu.memory_space<any>>
    %113 = tpu.memref_squeeze %112 : memref<1x128xf32, #tpu.memory_space<any>> -> memref<128xf32, #tpu.memory_space<any>>
    %c0_i32_63 = arith.constant 0 : i32
    %114 = tpu.memref_slice %arg12[%c0_i32_60, %c0_i32_63] : memref<64x128xf32, #tpu.memory_space<vmem>> -> memref<1x128xf32, #tpu.memory_space<vmem>>
    %115 = tpu.memref_squeeze %114 : memref<1x128xf32, #tpu.memory_space<vmem>> -> memref<128xf32, #tpu.memory_space<vmem>>
    %116 = tpu.memref_slice %arg16[%c0_i32_61] : memref<16x!tpu.dma_semaphore, #tpu.memory_space<semaphore_mem>> -> memref<1x!tpu.dma_semaphore, #tpu.memory_space<semaphore_mem>>
    %117 = tpu.memref_squeeze %116 : memref<1x!tpu.dma_semaphore, #tpu.memory_space<semaphore_mem>> -> memref<!tpu.dma_semaphore, #tpu.memory_space<semaphore_mem>>
    tpu.wait_dma2 semaphore(%117 : memref<!tpu.dma_semaphore, #tpu.memory_space<semaphore_mem>>) src(%113 : memref<128xf32, #tpu.memory_space<any>>) dst(%115 : memref<128xf32, #tpu.memory_space<vmem>>)
    %c1_i32_64 = arith.constant 1 : i32
    %c1_i32_65 = arith.constant 1 : i32
    %c0_i32_66 = arith.constant 0 : i32
    %118 = tpu.memref_slice %arg2[%7, %c0_i32_66] : memref<1000x128xf32, #tpu.memory_space<any>> -> memref<1x128xf32, #tpu.memory_space<any>>
    %119 = tpu.memref_squeeze %118 : memref<1x128xf32, #tpu.memory_space<any>> -> memref<128xf32, #tpu.memory_space<any>>
    %c0_i32_67 = arith.constant 0 : i32
    %120 = tpu.memref_slice %arg12[%c1_i32_64, %c0_i32_67] : memref<64x128xf32, #tpu.memory_space<vmem>> -> memref<1x128xf32, #tpu.memory_space<vmem>>
    %121 = tpu.memref_squeeze %120 : memref<1x128xf32, #tpu.memory_space<vmem>> -> memref<128xf32, #tpu.memory_space<vmem>>
    %122 = tpu.memref_slice %arg16[%c1_i32_65] : memref<16x!tpu.dma_semaphore, #tpu.memory_space<semaphore_mem>> -> memref<1x!tpu.dma_semaphore, #tpu.memory_space<semaphore_mem>>
    %123 = tpu.memref_squeeze %122 : memref<1x!tpu.dma_semaphore, #tpu.memory_space<semaphore_mem>> -> memref<!tpu.dma_semaphore, #tpu.memory_space<semaphore_mem>>
    tpu.wait_dma2 semaphore(%123 : memref<!tpu.dma_semaphore, #tpu.memory_space<semaphore_mem>>) src(%119 : memref<128xf32, #tpu.memory_space<any>>) dst(%121 : memref<128xf32, #tpu.memory_space<vmem>>)
    %c8_i32_68 = arith.constant 8 : i32
    %c2_i32_69 = arith.constant 2 : i32
    %c0_i32_70 = arith.constant 0 : i32
    %124 = tpu.memref_slice %arg2[%14, %c0_i32_70] : memref<1000x128xf32, #tpu.memory_space<any>> -> memref<1x128xf32, #tpu.memory_space<any>>
    %125 = tpu.memref_squeeze %124 : memref<1x128xf32, #tpu.memory_space<any>> -> memref<128xf32, #tpu.memory_space<any>>
    %c0_i32_71 = arith.constant 0 : i32
    %126 = tpu.memref_slice %arg12[%c8_i32_68, %c0_i32_71] : memref<64x128xf32, #tpu.memory_space<vmem>> -> memref<1x128xf32, #tpu.memory_space<vmem>>
    %127 = tpu.memref_squeeze %126 : memref<1x128xf32, #tpu.memory_space<vmem>> -> memref<128xf32, #tpu.memory_space<vmem>>
    %128 = tpu.memref_slice %arg16[%c2_i32_69] : memref<16x!tpu.dma_semaphore, #tpu.memory_space<semaphore_mem>> -> memref<1x!tpu.dma_semaphore, #tpu.memory_space<semaphore_mem>>
    %129 = tpu.memref_squeeze %128 : memref<1x!tpu.dma_semaphore, #tpu.memory_space<semaphore_mem>> -> memref<!tpu.dma_semaphore, #tpu.memory_space<semaphore_mem>>
    tpu.wait_dma2 semaphore(%129 : memref<!tpu.dma_semaphore, #tpu.memory_space<semaphore_mem>>) src(%125 : memref<128xf32, #tpu.memory_space<any>>) dst(%127 : memref<128xf32, #tpu.memory_space<vmem>>)
    %c9_i32_72 = arith.constant 9 : i32
    %c3_i32_73 = arith.constant 3 : i32
    %c0_i32_74 = arith.constant 0 : i32
    %130 = tpu.memref_slice %arg2[%21, %c0_i32_74] : memref<1000x128xf32, #tpu.memory_space<any>> -> memref<1x128xf32, #tpu.memory_space<any>>
    %131 = tpu.memref_squeeze %130 : memref<1x128xf32, #tpu.memory_space<any>> -> memref<128xf32, #tpu.memory_space<any>>
    %c0_i32_75 = arith.constant 0 : i32
    %132 = tpu.memref_slice %arg12[%c9_i32_72, %c0_i32_75] : memref<64x128xf32, #tpu.memory_space<vmem>> -> memref<1x128xf32, #tpu.memory_space<vmem>>
    %133 = tpu.memref_squeeze %132 : memref<1x128xf32, #tpu.memory_space<vmem>> -> memref<128xf32, #tpu.memory_space<vmem>>
    %134 = tpu.memref_slice %arg16[%c3_i32_73] : memref<16x!tpu.dma_semaphore, #tpu.memory_space<semaphore_mem>> -> memref<1x!tpu.dma_semaphore, #tpu.memory_space<semaphore_mem>>
    %135 = tpu.memref_squeeze %134 : memref<1x!tpu.dma_semaphore, #tpu.memory_space<semaphore_mem>> -> memref<!tpu.dma_semaphore, #tpu.memory_space<semaphore_mem>>
    tpu.wait_dma2 semaphore(%135 : memref<!tpu.dma_semaphore, #tpu.memory_space<semaphore_mem>>) src(%131 : memref<128xf32, #tpu.memory_space<any>>) dst(%133 : memref<128xf32, #tpu.memory_space<vmem>>)
    %c16_i32_76 = arith.constant 16 : i32
    %c4_i32_77 = arith.constant 4 : i32
    %c0_i32_78 = arith.constant 0 : i32
    %136 = tpu.memref_slice %arg2[%28, %c0_i32_78] : memref<1000x128xf32, #tpu.memory_space<any>> -> memref<1x128xf32, #tpu.memory_space<any>>
    %137 = tpu.memref_squeeze %136 : memref<1x128xf32, #tpu.memory_space<any>> -> memref<128xf32, #tpu.memory_space<any>>
    %c0_i32_79 = arith.constant 0 : i32
    %138 = tpu.memref_slice %arg12[%c16_i32_76, %c0_i32_79] : memref<64x128xf32, #tpu.memory_space<vmem>> -> memref<1x128xf32, #tpu.memory_space<vmem>>
    %139 = tpu.memref_squeeze %138 : memref<1x128xf32, #tpu.memory_space<vmem>> -> memref<128xf32, #tpu.memory_space<vmem>>
    %140 = tpu.memref_slice %arg16[%c4_i32_77] : memref<16x!tpu.dma_semaphore, #tpu.memory_space<semaphore_mem>> -> memref<1x!tpu.dma_semaphore, #tpu.memory_space<semaphore_mem>>
    %141 = tpu.memref_squeeze %140 : memref<1x!tpu.dma_semaphore, #tpu.memory_space<semaphore_mem>> -> memref<!tpu.dma_semaphore, #tpu.memory_space<semaphore_mem>>
    tpu.wait_dma2 semaphore(%141 : memref<!tpu.dma_semaphore, #tpu.memory_space<semaphore_mem>>) src(%137 : memref<128xf32, #tpu.memory_space<any>>) dst(%139 : memref<128xf32, #tpu.memory_space<vmem>>)
    %c17_i32_80 = arith.constant 17 : i32
    %c5_i32_81 = arith.constant 5 : i32
    %c0_i32_82 = arith.constant 0 : i32
    %142 = tpu.memref_slice %arg2[%35, %c0_i32_82] : memref<1000x128xf32, #tpu.memory_space<any>> -> memref<1x128xf32, #tpu.memory_space<any>>
    %143 = tpu.memref_squeeze %142 : memref<1x128xf32, #tpu.memory_space<any>> -> memref<128xf32, #tpu.memory_space<any>>
    %c0_i32_83 = arith.constant 0 : i32
    %144 = tpu.memref_slice %arg12[%c17_i32_80, %c0_i32_83] : memref<64x128xf32, #tpu.memory_space<vmem>> -> memref<1x128xf32, #tpu.memory_space<vmem>>
    %145 = tpu.memref_squeeze %144 : memref<1x128xf32, #tpu.memory_space<vmem>> -> memref<128xf32, #tpu.memory_space<vmem>>
    %146 = tpu.memref_slice %arg16[%c5_i32_81] : memref<16x!tpu.dma_semaphore, #tpu.memory_space<semaphore_mem>> -> memref<1x!tpu.dma_semaphore, #tpu.memory_space<semaphore_mem>>
    %147 = tpu.memref_squeeze %146 : memref<1x!tpu.dma_semaphore, #tpu.memory_space<semaphore_mem>> -> memref<!tpu.dma_semaphore, #tpu.memory_space<semaphore_mem>>
    tpu.wait_dma2 semaphore(%147 : memref<!tpu.dma_semaphore, #tpu.memory_space<semaphore_mem>>) src(%143 : memref<128xf32, #tpu.memory_space<any>>) dst(%145 : memref<128xf32, #tpu.memory_space<vmem>>)
    %c24_i32_84 = arith.constant 24 : i32
    %c6_i32_85 = arith.constant 6 : i32
    %c0_i32_86 = arith.constant 0 : i32
    %148 = tpu.memref_slice %arg2[%42, %c0_i32_86] : memref<1000x128xf32, #tpu.memory_space<any>> -> memref<1x128xf32, #tpu.memory_space<any>>
    %149 = tpu.memref_squeeze %148 : memref<1x128xf32, #tpu.memory_space<any>> -> memref<128xf32, #tpu.memory_space<any>>
    %c0_i32_87 = arith.constant 0 : i32
    %150 = tpu.memref_slice %arg12[%c24_i32_84, %c0_i32_87] : memref<64x128xf32, #tpu.memory_space<vmem>> -> memref<1x128xf32, #tpu.memory_space<vmem>>
    %151 = tpu.memref_squeeze %150 : memref<1x128xf32, #tpu.memory_space<vmem>> -> memref<128xf32, #tpu.memory_space<vmem>>
    %152 = tpu.memref_slice %arg16[%c6_i32_85] : memref<16x!tpu.dma_semaphore, #tpu.memory_space<semaphore_mem>> -> memref<1x!tpu.dma_semaphore, #tpu.memory_space<semaphore_mem>>
    %153 = tpu.memref_squeeze %152 : memref<1x!tpu.dma_semaphore, #tpu.memory_space<semaphore_mem>> -> memref<!tpu.dma_semaphore, #tpu.memory_space<semaphore_mem>>
    tpu.wait_dma2 semaphore(%153 : memref<!tpu.dma_semaphore, #tpu.memory_space<semaphore_mem>>) src(%149 : memref<128xf32, #tpu.memory_space<any>>) dst(%151 : memref<128xf32, #tpu.memory_space<vmem>>)
    %c25_i32_88 = arith.constant 25 : i32
    %c7_i32_89 = arith.constant 7 : i32
    %c0_i32_90 = arith.constant 0 : i32
    %154 = tpu.memref_slice %arg2[%49, %c0_i32_90] : memref<1000x128xf32, #tpu.memory_space<any>> -> memref<1x128xf32, #tpu.memory_space<any>>
    %155 = tpu.memref_squeeze %154 : memref<1x128xf32, #tpu.memory_space<any>> -> memref<128xf32, #tpu.memory_space<any>>
    %c0_i32_91 = arith.constant 0 : i32
    %156 = tpu.memref_slice %arg12[%c25_i32_88, %c0_i32_91] : memref<64x128xf32, #tpu.memory_space<vmem>> -> memref<1x128xf32, #tpu.memory_space<vmem>>
    %157 = tpu.memref_squeeze %156 : memref<1x128xf32, #tpu.memory_space<vmem>> -> memref<128xf32, #tpu.memory_space<vmem>>
    %158 = tpu.memref_slice %arg16[%c7_i32_89] : memref<16x!tpu.dma_semaphore, #tpu.memory_space<semaphore_mem>> -> memref<1x!tpu.dma_semaphore, #tpu.memory_space<semaphore_mem>>
    %159 = tpu.memref_squeeze %158 : memref<1x!tpu.dma_semaphore, #tpu.memory_space<semaphore_mem>> -> memref<!tpu.dma_semaphore, #tpu.memory_space<semaphore_mem>>
    tpu.wait_dma2 semaphore(%159 : memref<!tpu.dma_semaphore, #tpu.memory_space<semaphore_mem>>) src(%155 : memref<128xf32, #tpu.memory_space<any>>) dst(%157 : memref<128xf32, #tpu.memory_space<vmem>>)
    %c32_i32_92 = arith.constant 32 : i32
    %c8_i32_93 = arith.constant 8 : i32
    %c0_i32_94 = arith.constant 0 : i32
    %160 = tpu.memref_slice %arg2[%56, %c0_i32_94] : memref<1000x128xf32, #tpu.memory_space<any>> -> memref<1x128xf32, #tpu.memory_space<any>>
    %161 = tpu.memref_squeeze %160 : memref<1x128xf32, #tpu.memory_space<any>> -> memref<128xf32, #tpu.memory_space<any>>
    %c0_i32_95 = arith.constant 0 : i32
    %162 = tpu.memref_slice %arg12[%c32_i32_92, %c0_i32_95] : memref<64x128xf32, #tpu.memory_space<vmem>> -> memref<1x128xf32, #tpu.memory_space<vmem>>
    %163 = tpu.memref_squeeze %162 : memref<1x128xf32, #tpu.memory_space<vmem>> -> memref<128xf32, #tpu.memory_space<vmem>>
    %164 = tpu.memref_slice %arg16[%c8_i32_93] : memref<16x!tpu.dma_semaphore, #tpu.memory_space<semaphore_mem>> -> memref<1x!tpu.dma_semaphore, #tpu.memory_space<semaphore_mem>>
    %165 = tpu.memref_squeeze %164 : memref<1x!tpu.dma_semaphore, #tpu.memory_space<semaphore_mem>> -> memref<!tpu.dma_semaphore, #tpu.memory_space<semaphore_mem>>
    tpu.wait_dma2 semaphore(%165 : memref<!tpu.dma_semaphore, #tpu.memory_space<semaphore_mem>>) src(%161 : memref<128xf32, #tpu.memory_space<any>>) dst(%163 : memref<128xf32, #tpu.memory_space<vmem>>)
    %c33_i32_96 = arith.constant 33 : i32
    %c9_i32_97 = arith.constant 9 : i32
    %c0_i32_98 = arith.constant 0 : i32
    %166 = tpu.memref_slice %arg2[%63, %c0_i32_98] : memref<1000x128xf32, #tpu.memory_space<any>> -> memref<1x128xf32, #tpu.memory_space<any>>
    %167 = tpu.memref_squeeze %166 : memref<1x128xf32, #tpu.memory_space<any>> -> memref<128xf32, #tpu.memory_space<any>>
    %c0_i32_99 = arith.constant 0 : i32
    %168 = tpu.memref_slice %arg12[%c33_i32_96, %c0_i32_99] : memref<64x128xf32, #tpu.memory_space<vmem>> -> memref<1x128xf32, #tpu.memory_space<vmem>>
    %169 = tpu.memref_squeeze %168 : memref<1x128xf32, #tpu.memory_space<vmem>> -> memref<128xf32, #tpu.memory_space<vmem>>
    %170 = tpu.memref_slice %arg16[%c9_i32_97] : memref<16x!tpu.dma_semaphore, #tpu.memory_space<semaphore_mem>> -> memref<1x!tpu.dma_semaphore, #tpu.memory_space<semaphore_mem>>
    %171 = tpu.memref_squeeze %170 : memref<1x!tpu.dma_semaphore, #tpu.memory_space<semaphore_mem>> -> memref<!tpu.dma_semaphore, #tpu.memory_space<semaphore_mem>>
    tpu.wait_dma2 semaphore(%171 : memref<!tpu.dma_semaphore, #tpu.memory_space<semaphore_mem>>) src(%167 : memref<128xf32, #tpu.memory_space<any>>) dst(%169 : memref<128xf32, #tpu.memory_space<vmem>>)
    %c40_i32_100 = arith.constant 40 : i32
    %c10_i32_101 = arith.constant 10 : i32
    %c0_i32_102 = arith.constant 0 : i32
    %172 = tpu.memref_slice %arg2[%70, %c0_i32_102] : memref<1000x128xf32, #tpu.memory_space<any>> -> memref<1x128xf32, #tpu.memory_space<any>>
    %173 = tpu.memref_squeeze %172 : memref<1x128xf32, #tpu.memory_space<any>> -> memref<128xf32, #tpu.memory_space<any>>
    %c0_i32_103 = arith.constant 0 : i32
    %174 = tpu.memref_slice %arg12[%c40_i32_100, %c0_i32_103] : memref<64x128xf32, #tpu.memory_space<vmem>> -> memref<1x128xf32, #tpu.memory_space<vmem>>
    %175 = tpu.memref_squeeze %174 : memref<1x128xf32, #tpu.memory_space<vmem>> -> memref<128xf32, #tpu.memory_space<vmem>>
    %176 = tpu.memref_slice %arg16[%c10_i32_101] : memref<16x!tpu.dma_semaphore, #tpu.memory_space<semaphore_mem>> -> memref<1x!tpu.dma_semaphore, #tpu.memory_space<semaphore_mem>>
    %177 = tpu.memref_squeeze %176 : memref<1x!tpu.dma_semaphore, #tpu.memory_space<semaphore_mem>> -> memref<!tpu.dma_semaphore, #tpu.memory_space<semaphore_mem>>
    tpu.wait_dma2 semaphore(%177 : memref<!tpu.dma_semaphore, #tpu.memory_space<semaphore_mem>>) src(%173 : memref<128xf32, #tpu.memory_space<any>>) dst(%175 : memref<128xf32, #tpu.memory_space<vmem>>)
    %c41_i32_104 = arith.constant 41 : i32
    %c11_i32_105 = arith.constant 11 : i32
    %c0_i32_106 = arith.constant 0 : i32
    %178 = tpu.memref_slice %arg2[%77, %c0_i32_106] : memref<1000x128xf32, #tpu.memory_space<any>> -> memref<1x128xf32, #tpu.memory_space<any>>
    %179 = tpu.memref_squeeze %178 : memref<1x128xf32, #tpu.memory_space<any>> -> memref<128xf32, #tpu.memory_space<any>>
    %c0_i32_107 = arith.constant 0 : i32
    %180 = tpu.memref_slice %arg12[%c41_i32_104, %c0_i32_107] : memref<64x128xf32, #tpu.memory_space<vmem>> -> memref<1x128xf32, #tpu.memory_space<vmem>>
    %181 = tpu.memref_squeeze %180 : memref<1x128xf32, #tpu.memory_space<vmem>> -> memref<128xf32, #tpu.memory_space<vmem>>
    %182 = tpu.memref_slice %arg16[%c11_i32_105] : memref<16x!tpu.dma_semaphore, #tpu.memory_space<semaphore_mem>> -> memref<1x!tpu.dma_semaphore, #tpu.memory_space<semaphore_mem>>
    %183 = tpu.memref_squeeze %182 : memref<1x!tpu.dma_semaphore, #tpu.memory_space<semaphore_mem>> -> memref<!tpu.dma_semaphore, #tpu.memory_space<semaphore_mem>>
    tpu.wait_dma2 semaphore(%183 : memref<!tpu.dma_semaphore, #tpu.memory_space<semaphore_mem>>) src(%179 : memref<128xf32, #tpu.memory_space<any>>) dst(%181 : memref<128xf32, #tpu.memory_space<vmem>>)
    %c48_i32_108 = arith.constant 48 : i32
    %c12_i32_109 = arith.constant 12 : i32
    %c0_i32_110 = arith.constant 0 : i32
    %184 = tpu.memref_slice %arg2[%84, %c0_i32_110] : memref<1000x128xf32, #tpu.memory_space<any>> -> memref<1x128xf32, #tpu.memory_space<any>>
    %185 = tpu.memref_squeeze %184 : memref<1x128xf32, #tpu.memory_space<any>> -> memref<128xf32, #tpu.memory_space<any>>
    %c0_i32_111 = arith.constant 0 : i32
    %186 = tpu.memref_slice %arg12[%c48_i32_108, %c0_i32_111] : memref<64x128xf32, #tpu.memory_space<vmem>> -> memref<1x128xf32, #tpu.memory_space<vmem>>
    %187 = tpu.memref_squeeze %186 : memref<1x128xf32, #tpu.memory_space<vmem>> -> memref<128xf32, #tpu.memory_space<vmem>>
    %188 = tpu.memref_slice %arg16[%c12_i32_109] : memref<16x!tpu.dma_semaphore, #tpu.memory_space<semaphore_mem>> -> memref<1x!tpu.dma_semaphore, #tpu.memory_space<semaphore_mem>>
    %189 = tpu.memref_squeeze %188 : memref<1x!tpu.dma_semaphore, #tpu.memory_space<semaphore_mem>> -> memref<!tpu.dma_semaphore, #tpu.memory_space<semaphore_mem>>
    tpu.wait_dma2 semaphore(%189 : memref<!tpu.dma_semaphore, #tpu.memory_space<semaphore_mem>>) src(%185 : memref<128xf32, #tpu.memory_space<any>>) dst(%187 : memref<128xf32, #tpu.memory_space<vmem>>)
    %c49_i32_112 = arith.constant 49 : i32
    %c13_i32_113 = arith.constant 13 : i32
    %c0_i32_114 = arith.constant 0 : i32
    %190 = tpu.memref_slice %arg2[%91, %c0_i32_114] : memref<1000x128xf32, #tpu.memory_space<any>> -> memref<1x128xf32, #tpu.memory_space<any>>
    %191 = tpu.memref_squeeze %190 : memref<1x128xf32, #tpu.memory_space<any>> -> memref<128xf32, #tpu.memory_space<any>>
    %c0_i32_115 = arith.constant 0 : i32
    %192 = tpu.memref_slice %arg12[%c49_i32_112, %c0_i32_115] : memref<64x128xf32, #tpu.memory_space<vmem>> -> memref<1x128xf32, #tpu.memory_space<vmem>>
    %193 = tpu.memref_squeeze %192 : memref<1x128xf32, #tpu.memory_space<vmem>> -> memref<128xf32, #tpu.memory_space<vmem>>
    %194 = tpu.memref_slice %arg16[%c13_i32_113] : memref<16x!tpu.dma_semaphore, #tpu.memory_space<semaphore_mem>> -> memref<1x!tpu.dma_semaphore, #tpu.memory_space<semaphore_mem>>
    %195 = tpu.memref_squeeze %194 : memref<1x!tpu.dma_semaphore, #tpu.memory_space<semaphore_mem>> -> memref<!tpu.dma_semaphore, #tpu.memory_space<semaphore_mem>>
    tpu.wait_dma2 semaphore(%195 : memref<!tpu.dma_semaphore, #tpu.memory_space<semaphore_mem>>) src(%191 : memref<128xf32, #tpu.memory_space<any>>) dst(%193 : memref<128xf32, #tpu.memory_space<vmem>>)
    %c56_i32_116 = arith.constant 56 : i32
    %c14_i32_117 = arith.constant 14 : i32
    %c0_i32_118 = arith.constant 0 : i32
    %196 = tpu.memref_slice %arg2[%98, %c0_i32_118] : memref<1000x128xf32, #tpu.memory_space<any>> -> memref<1x128xf32, #tpu.memory_space<any>>
    %197 = tpu.memref_squeeze %196 : memref<1x128xf32, #tpu.memory_space<any>> -> memref<128xf32, #tpu.memory_space<any>>
    %c0_i32_119 = arith.constant 0 : i32
    %198 = tpu.memref_slice %arg12[%c56_i32_116, %c0_i32_119] : memref<64x128xf32, #tpu.memory_space<vmem>> -> memref<1x128xf32, #tpu.memory_space<vmem>>
    %199 = tpu.memref_squeeze %198 : memref<1x128xf32, #tpu.memory_space<vmem>> -> memref<128xf32, #tpu.memory_space<vmem>>
    %200 = tpu.memref_slice %arg16[%c14_i32_117] : memref<16x!tpu.dma_semaphore, #tpu.memory_space<semaphore_mem>> -> memref<1x!tpu.dma_semaphore, #tpu.memory_space<semaphore_mem>>
    %201 = tpu.memref_squeeze %200 : memref<1x!tpu.dma_semaphore, #tpu.memory_space<semaphore_mem>> -> memref<!tpu.dma_semaphore, #tpu.memory_space<semaphore_mem>>
    tpu.wait_dma2 semaphore(%201 : memref<!tpu.dma_semaphore, #tpu.memory_space<semaphore_mem>>) src(%197 : memref<128xf32, #tpu.memory_space<any>>) dst(%199 : memref<128xf32, #tpu.memory_space<vmem>>)
    %c57_i32_120 = arith.constant 57 : i32
    %c15_i32_121 = arith.constant 15 : i32
    %c0_i32_122 = arith.constant 0 : i32
    %202 = tpu.memref_slice %arg2[%105, %c0_i32_122] : memref<1000x128xf32, #tpu.memory_space<any>> -> memref<1x128xf32, #tpu.memory_space<any>>
    %203 = tpu.memref_squeeze %202 : memref<1x128xf32, #tpu.memory_space<any>> -> memref<128xf32, #tpu.memory_space<any>>
    %c0_i32_123 = arith.constant 0 : i32
    %204 = tpu.memref_slice %arg12[%c57_i32_120, %c0_i32_123] : memref<64x128xf32, #tpu.memory_space<vmem>> -> memref<1x128xf32, #tpu.memory_space<vmem>>
    %205 = tpu.memref_squeeze %204 : memref<1x128xf32, #tpu.memory_space<vmem>> -> memref<128xf32, #tpu.memory_space<vmem>>
    %206 = tpu.memref_slice %arg16[%c15_i32_121] : memref<16x!tpu.dma_semaphore, #tpu.memory_space<semaphore_mem>> -> memref<1x!tpu.dma_semaphore, #tpu.memory_space<semaphore_mem>>
    %207 = tpu.memref_squeeze %206 : memref<1x!tpu.dma_semaphore, #tpu.memory_space<semaphore_mem>> -> memref<!tpu.dma_semaphore, #tpu.memory_space<semaphore_mem>>
    tpu.wait_dma2 semaphore(%207 : memref<!tpu.dma_semaphore, #tpu.memory_space<semaphore_mem>>) src(%203 : memref<128xf32, #tpu.memory_space<any>>) dst(%205 : memref<128xf32, #tpu.memory_space<vmem>>)
    %c0_124 = arith.constant 0 : index
    %c0_125 = arith.constant 0 : index
    %208 = vector.load %arg12[%c0_124, %c0_125] : memref<64x128xf32, #tpu.memory_space<vmem>>, vector<64x128xf32>
    %c0_126 = arith.constant 0 : index
    %c0_127 = arith.constant 0 : index
    %209 = vector.load %arg13[%c0_126, %c0_127] : memref<64x256xf32, #tpu.memory_space<vmem>>, vector<64x128xf32>
    tpu.vector_store %arg13[%c0_126, %c0_127], %208 {strides = array<i32>} : memref<64x256xf32, #tpu.memory_space<vmem>>, vector<64x128xf32>,
    %c56 = arith.constant 56 : index
    %c0_128 = arith.constant 0 : index
    %210 = vector.load %arg12[%c56, %c0_128] : memref<64x128xf32, #tpu.memory_space<vmem>>, vector<8x128xf32>
    %c0_129 = arith.constant 0 : index
    %c128 = arith.constant 128 : index
    %211 = vector.load %arg13[%c0_129, %c128] : memref<64x256xf32, #tpu.memory_space<vmem>>, vector<8x128xf32>
    tpu.vector_store %arg13[%c0_129, %c128], %210 {strides = array<i32>} : memref<64x256xf32, #tpu.memory_space<vmem>>, vector<8x128xf32>,
    %c48 = arith.constant 48 : index
    %c0_130 = arith.constant 0 : index
    %212 = vector.load %arg12[%c48, %c0_130] : memref<64x128xf32, #tpu.memory_space<vmem>>, vector<8x128xf32>
    %c8 = arith.constant 8 : index
    %c128_131 = arith.constant 128 : index
    %213 = vector.load %arg13[%c8, %c128_131] : memref<64x256xf32, #tpu.memory_space<vmem>>, vector<8x128xf32>
    tpu.vector_store %arg13[%c8, %c128_131], %212 {strides = array<i32>} : memref<64x256xf32, #tpu.memory_space<vmem>>, vector<8x128xf32>,
    %c40 = arith.constant 40 : index
    %c0_132 = arith.constant 0 : index
    %214 = vector.load %arg12[%c40, %c0_132] : memref<64x128xf32, #tpu.memory_space<vmem>>, vector<8x128xf32>
    %c16 = arith.constant 16 : index
    %c128_133 = arith.constant 128 : index
    %215 = vector.load %arg13[%c16, %c128_133] : memref<64x256xf32, #tpu.memory_space<vmem>>, vector<8x128xf32>
    tpu.vector_store %arg13[%c16, %c128_133], %214 {strides = array<i32>} : memref<64x256xf32, #tpu.memory_space<vmem>>, vector<8x128xf32>,
    %c32 = arith.constant 32 : index
    %c0_134 = arith.constant 0 : index
    %216 = vector.load %arg12[%c32, %c0_134] : memref<64x128xf32, #tpu.memory_space<vmem>>, vector<8x128xf32>
    %c24 = arith.constant 24 : index
    %c128_135 = arith.constant 128 : index
    %217 = vector.load %arg13[%c24, %c128_135] : memref<64x256xf32, #tpu.memory_space<vmem>>, vector<8x128xf32>
    tpu.vector_store %arg13[%c24, %c128_135], %216 {strides = array<i32>} : memref<64x256xf32, #tpu.memory_space<vmem>>, vector<8x128xf32>,
    %c24_136 = arith.constant 24 : index
    %c0_137 = arith.constant 0 : index
    %218 = vector.load %arg12[%c24_136, %c0_137] : memref<64x128xf32, #tpu.memory_space<vmem>>, vector<8x128xf32>
    %c32_138 = arith.constant 32 : index
    %c128_139 = arith.constant 128 : index
    %219 = vector.load %arg13[%c32_138, %c128_139] : memref<64x256xf32, #tpu.memory_space<vmem>>, vector<8x128xf32>
    tpu.vector_store %arg13[%c32_138, %c128_139], %218 {strides = array<i32>} : memref<64x256xf32, #tpu.memory_space<vmem>>, vector<8x128xf32>,
    %c16_140 = arith.constant 16 : index
    %c0_141 = arith.constant 0 : index
    %220 = vector.load %arg12[%c16_140, %c0_141] : memref<64x128xf32, #tpu.memory_space<vmem>>, vector<8x128xf32>
    %c40_142 = arith.constant 40 : index
    %c128_143 = arith.constant 128 : index
    %221 = vector.load %arg13[%c40_142, %c128_143] : memref<64x256xf32, #tpu.memory_space<vmem>>, vector<8x128xf32>
    tpu.vector_store %arg13[%c40_142, %c128_143], %220 {strides = array<i32>} : memref<64x256xf32, #tpu.memory_space<vmem>>, vector<8x128xf32>,
    %c8_144 = arith.constant 8 : index
    %c0_145 = arith.constant 0 : index
    %222 = vector.load %arg12[%c8_144, %c0_145] : memref<64x128xf32, #tpu.memory_space<vmem>>, vector<8x128xf32>
    %c48_146 = arith.constant 48 : index
    %c128_147 = arith.constant 128 : index
    %223 = vector.load %arg13[%c48_146, %c128_147] : memref<64x256xf32, #tpu.memory_space<vmem>>, vector<8x128xf32>
    tpu.vector_store %arg13[%c48_146, %c128_147], %222 {strides = array<i32>} : memref<64x256xf32, #tpu.memory_space<vmem>>, vector<8x128xf32>,
    %c0_148 = arith.constant 0 : index
    %c0_149 = arith.constant 0 : index
    %224 = vector.load %arg12[%c0_148, %c0_149] : memref<64x128xf32, #tpu.memory_space<vmem>>, vector<8x128xf32>
    %c56_150 = arith.constant 56 : index
    %c128_151 = arith.constant 128 : index
    %225 = vector.load %arg13[%c56_150, %c128_151] : memref<64x256xf32, #tpu.memory_space<vmem>>, vector<8x128xf32>
    tpu.vector_store %arg13[%c56_150, %c128_151], %224 {strides = array<i32>} : memref<64x256xf32, #tpu.memory_space<vmem>>, vector<8x128xf32>,
    %226 = tpu.iota {dimensions = array<i32: 1>} : vector<8x128xi32>
    %c64_i32 = arith.constant 64 : i32
    %227 = vector.broadcast %c64_i32 : i32 to vector<8x128xi32>
    %228 = arith.cmpi slt, %226, %227 : vector<8x128xi32>
    %c0_152 = arith.constant 0 : index
    %c0_153 = arith.constant 0 : index
    %229 = vector.load %arg1[%c0_152, %c0_153] : memref<8x1xi32, #tpu.memory_space<vmem>>, vector<8x1xi32>
    %cst = arith.constant 0.000000e+00 : f32
    %230 = vector.broadcast %cst : f32 to vector<8x128xf32>
    %c0_154 = arith.constant 0 : index
    %c0_155 = arith.constant 0 : index
    %231 = vector.load %arg13[%c0_154, %c0_155] : memref<64x256xf32, #tpu.memory_space<vmem>>, vector<64x256xf32>
    %c0_156 = arith.constant 0 : index
    %c0_157 = arith.constant 0 : index
    %232 = vector.load %arg3[%c0_156, %c0_157] : memref<256x512xf32, #tpu.memory_space<vmem>>, vector<256x512xf32>
    %cst_158 = arith.constant dense<0.000000e+00> : vector<64x512xf32>
    %233 = tpu.matmul %231, %232, %cst_158 {dimension_numbers = #tpu.dot_dimension_numbers<[1], [0], [0], [1], [0, 0, 1, 1], [], []>} : vector<64x256xf32>, vector<256x512xf32>, vector<64x512xf32> -> vector<64x512xf32>
    %c0_159 = arith.constant 0 : index
    %c0_160 = arith.constant 0 : index
    %234 = vector.load %arg4[%c0_159, %c0_160] : memref<1x512xf32, #tpu.memory_space<vmem>>, vector<1x512xf32>
    %235 = vector.broadcast %234 : vector<1x512xf32> to vector<64x512xf32>
    %236 = arith.addf %233, %235 : vector<64x512xf32>
    %c0_161 = arith.constant 0 : index
    %c0_162 = arith.constant 0 : index
    %237 = vector.load %arg15[%c0_161, %c0_162] : memref<64x512xf32, #tpu.memory_space<vmem>>, vector<64x512xf32>
    tpu.vector_store %arg15[%c0_161, %c0_162], %236 {strides = array<i32>} : memref<64x512xf32, #tpu.memory_space<vmem>>, vector<64x512xf32>,
    %c0_163 = arith.constant 0 : index
    %c0_164 = arith.constant 0 : index
    %238 = vector.load %arg5[%c0_163, %c0_164] : memref<128x512xf32, #tpu.memory_space<vmem>>, vector<128x512xf32>
    %c0_i32_165 = arith.constant 0 : i32
    %c8_i32_166 = arith.constant 8 : i32
    %239 = arith.muli %c0_i32_165, %c8_i32_166 : i32
    %240 = tpu.assume_multiple %239, 8 : i32
    %c7_i32_167 = arith.constant 7 : i32
    %241 = arith.subi %c7_i32_167, %c0_i32_165 : i32
    %c8_i32_168 = arith.constant 8 : i32
    %242 = arith.muli %241, %c8_i32_168 : i32
    %243 = tpu.assume_multiple %242, 8 : i32
    %244 = arith.index_cast %240 : i32 to index
    %c0_169 = arith.constant 0 : index
    %245 = vector.load %arg15[%244, %c0_169] : memref<64x512xf32, #tpu.memory_space<vmem>>, vector<8x512xf32>
    %cst_170 = arith.constant dense<0.000000e+00> : vector<8x512xf32>
    %246 = tpu.matmul %230, %238, %cst_170 {dimension_numbers = #tpu.dot_dimension_numbers<[1], [0], [0], [1], [0, 0, 1, 1], [], []>} : vector<8x128xf32>, vector<128x512xf32>, vector<8x512xf32> -> vector<8x512xf32>
    %247 = arith.addf %245, %246 : vector<8x512xf32>
    %c7_i32_171 = arith.constant 7 : i32
    %248 = arith.subi %c7_i32_171, %c0_i32_165 : i32
    %249 = vector.broadcast %c0_i32_165 : i32 to vector<8x128xi32>
    %250 = vector.broadcast %248 : i32 to vector<8x128xi32>
    %251 = arith.select %228, %249, %250 : vector<8x128xi1>, vector<8x128xi32>
    %252 = vector.broadcast %229 : vector<8x1xi32> to vector<8x128xi32>
    %253 = arith.cmpi slt, %251, %252 : vector<8x128xi32>
    %254 = vector.extract_strided_slice %247 {offsets = [0, 0], sizes = [8, 128], strides = [1, 1]} : vector<8x512xf32> to vector<8x128xf32>
    %cst_172 = arith.constant 5.000000e-01 : f32
    %255 = vector.broadcast %cst_172 : f32 to vector<8x128xf32>
    %256 = arith.mulf %255, %254 : vector<8x128xf32>
    %257 = math.tanh %256 : vector<8x128xf32>
    %cst_173 = arith.constant 5.000000e-01 : f32
    %258 = vector.broadcast %cst_173 : f32 to vector<8x128xf32>
    %259 = arith.mulf %258, %257 : vector<8x128xf32>
    %cst_174 = arith.constant 5.000000e-01 : f32
    %260 = vector.broadcast %cst_174 : f32 to vector<8x128xf32>
    %261 = arith.addf %259, %260 : vector<8x128xf32>
    %262 = vector.extract_strided_slice %247 {offsets = [0, 128], sizes = [8, 128], strides = [1, 1]} : vector<8x512xf32> to vector<8x128xf32>
    %cst_175 = arith.constant 5.000000e-01 : f32
    %263 = vector.broadcast %cst_175 : f32 to vector<8x128xf32>
    %264 = arith.mulf %263, %262 : vector<8x128xf32>
    %265 = math.tanh %264 : vector<8x128xf32>
    %cst_176 = arith.constant 5.000000e-01 : f32
    %266 = vector.broadcast %cst_176 : f32 to vector<8x128xf32>
    %267 = arith.mulf %266, %265 : vector<8x128xf32>
    %cst_177 = arith.constant 5.000000e-01 : f32
    %268 = vector.broadcast %cst_177 : f32 to vector<8x128xf32>
    %269 = arith.addf %267, %268 : vector<8x128xf32>
    %270 = vector.extract_strided_slice %247 {offsets = [0, 256], sizes = [8, 128], strides = [1, 1]} : vector<8x512xf32> to vector<8x128xf32>
    %271 = math.tanh %270 : vector<8x128xf32>
    %272 = vector.extract_strided_slice %247 {offsets = [0, 384], sizes = [8, 128], strides = [1, 1]} : vector<8x512xf32> to vector<8x128xf32>
    %cst_178 = arith.constant 5.000000e-01 : f32
    %273 = vector.broadcast %cst_178 : f32 to vector<8x128xf32>
    %274 = arith.mulf %273, %272 : vector<8x128xf32>
    %275 = math.tanh %274 : vector<8x128xf32>
    %cst_179 = arith.constant 5.000000e-01 : f32
    %276 = vector.broadcast %cst_179 : f32 to vector<8x128xf32>
    %277 = arith.mulf %276, %275 : vector<8x128xf32>
    %cst_180 = arith.constant 5.000000e-01 : f32
    %278 = vector.broadcast %cst_180 : f32 to vector<8x128xf32>
    %279 = arith.addf %277, %278 : vector<8x128xf32>
    %280 = arith.mulf %269, %230 : vector<8x128xf32>
    %281 = arith.mulf %261, %271 : vector<8x128xf32>
    %282 = arith.addf %280, %281 : vector<8x128xf32>
    %283 = math.tanh %282 : vector<8x128xf32>
    %284 = arith.mulf %279, %283 : vector<8x128xf32>
    %285 = arith.select %253, %284, %230 : vector<8x128xi1>, vector<8x128xf32>
    %286 = arith.select %253, %282, %230 : vector<8x128xi1>, vector<8x128xf32>
    %cst_181 = arith.constant 0.000000e+00 : f32
    %287 = vector.broadcast %cst_181 : f32 to vector<8x128xf32>
    %288 = arith.select %253, %284, %287 : vector<8x128xi1>, vector<8x128xf32>
    %289 = arith.index_cast %240 : i32 to index
    %c0_182 = arith.constant 0 : index
    %290 = vector.load %arg14[%289, %c0_182] : memref<64x256xf32, #tpu.memory_space<vmem>>, vector<8x128xf32>
    tpu.vector_store %arg14[%289, %c0_182], %288 {strides = array<i32>} : memref<64x256xf32, #tpu.memory_space<vmem>>, vector<8x128xf32>,
    %291 = arith.index_cast %243 : i32 to index
    %c128_183 = arith.constant 128 : index
    %292 = vector.load %arg14[%291, %c128_183] : memref<64x256xf32, #tpu.memory_space<vmem>>, vector<8x128xf32>
    tpu.vector_store %arg14[%291, %c128_183], %288 {strides = array<i32>} : memref<64x256xf32, #tpu.memory_space<vmem>>, vector<8x128xf32>,
    %c1_i32_184 = arith.constant 1 : i32
    %c8_i32_185 = arith.constant 8 : i32
    %293 = arith.muli %c1_i32_184, %c8_i32_185 : i32
    %294 = tpu.assume_multiple %293, 8 : i32
    %c7_i32_186 = arith.constant 7 : i32
    %295 = arith.subi %c7_i32_186, %c1_i32_184 : i32
    %c8_i32_187 = arith.constant 8 : i32
    %296 = arith.muli %295, %c8_i32_187 : i32
    %297 = tpu.assume_multiple %296, 8 : i32
    %298 = arith.index_cast %294 : i32 to index
    %c0_188 = arith.constant 0 : index
    %299 = vector.load %arg15[%298, %c0_188] : memref<64x512xf32, #tpu.memory_space<vmem>>, vector<8x512xf32>
    %cst_189 = arith.constant dense<0.000000e+00> : vector<8x512xf32>
    %300 = tpu.matmul %285, %238, %cst_189 {dimension_numbers = #tpu.dot_dimension_numbers<[1], [0], [0], [1], [0, 0, 1, 1], [], []>} : vector<8x128xf32>, vector<128x512xf32>, vector<8x512xf32> -> vector<8x512xf32>
    %301 = arith.addf %299, %300 : vector<8x512xf32>
    %c7_i32_190 = arith.constant 7 : i32
    %302 = arith.subi %c7_i32_190, %c1_i32_184 : i32
    %303 = vector.broadcast %c1_i32_184 : i32 to vector<8x128xi32>
    %304 = vector.broadcast %302 : i32 to vector<8x128xi32>
    %305 = arith.select %228, %303, %304 : vector<8x128xi1>, vector<8x128xi32>
    %306 = vector.broadcast %229 : vector<8x1xi32> to vector<8x128xi32>
    %307 = arith.cmpi slt, %305, %306 : vector<8x128xi32>
    %308 = vector.extract_strided_slice %301 {offsets = [0, 0], sizes = [8, 128], strides = [1, 1]} : vector<8x512xf32> to vector<8x128xf32>
    %cst_191 = arith.constant 5.000000e-01 : f32
    %309 = vector.broadcast %cst_191 : f32 to vector<8x128xf32>
    %310 = arith.mulf %309, %308 : vector<8x128xf32>
    %311 = math.tanh %310 : vector<8x128xf32>
    %cst_192 = arith.constant 5.000000e-01 : f32
    %312 = vector.broadcast %cst_192 : f32 to vector<8x128xf32>
    %313 = arith.mulf %312, %311 : vector<8x128xf32>
    %cst_193 = arith.constant 5.000000e-01 : f32
    %314 = vector.broadcast %cst_193 : f32 to vector<8x128xf32>
    %315 = arith.addf %313, %314 : vector<8x128xf32>
    %316 = vector.extract_strided_slice %301 {offsets = [0, 128], sizes = [8, 128], strides = [1, 1]} : vector<8x512xf32> to vector<8x128xf32>
    %cst_194 = arith.constant 5.000000e-01 : f32
    %317 = vector.broadcast %cst_194 : f32 to vector<8x128xf32>
    %318 = arith.mulf %317, %316 : vector<8x128xf32>
    %319 = math.tanh %318 : vector<8x128xf32>
    %cst_195 = arith.constant 5.000000e-01 : f32
    %320 = vector.broadcast %cst_195 : f32 to vector<8x128xf32>
    %321 = arith.mulf %320, %319 : vector<8x128xf32>
    %cst_196 = arith.constant 5.000000e-01 : f32
    %322 = vector.broadcast %cst_196 : f32 to vector<8x128xf32>
    %323 = arith.addf %321, %322 : vector<8x128xf32>
    %324 = vector.extract_strided_slice %301 {offsets = [0, 256], sizes = [8, 128], strides = [1, 1]} : vector<8x512xf32> to vector<8x128xf32>
    %325 = math.tanh %324 : vector<8x128xf32>
    %326 = vector.extract_strided_slice %301 {offsets = [0, 384], sizes = [8, 128], strides = [1, 1]} : vector<8x512xf32> to vector<8x128xf32>
    %cst_197 = arith.constant 5.000000e-01 : f32
    %327 = vector.broadcast %cst_197 : f32 to vector<8x128xf32>
    %328 = arith.mulf %327, %326 : vector<8x128xf32>
    %329 = math.tanh %328 : vector<8x128xf32>
    %cst_198 = arith.constant 5.000000e-01 : f32
    %330 = vector.broadcast %cst_198 : f32 to vector<8x128xf32>
    %331 = arith.mulf %330, %329 : vector<8x128xf32>
    %cst_199 = arith.constant 5.000000e-01 : f32
    %332 = vector.broadcast %cst_199 : f32 to vector<8x128xf32>
    %333 = arith.addf %331, %332 : vector<8x128xf32>
    %334 = arith.mulf %323, %286 : vector<8x128xf32>
    %335 = arith.mulf %315, %325 : vector<8x128xf32>
    %336 = arith.addf %334, %335 : vector<8x128xf32>
    %337 = math.tanh %336 : vector<8x128xf32>
    %338 = arith.mulf %333, %337 : vector<8x128xf32>
    %339 = arith.select %307, %338, %285 : vector<8x128xi1>, vector<8x128xf32>
    %340 = arith.select %307, %336, %286 : vector<8x128xi1>, vector<8x128xf32>
    %cst_200 = arith.constant 0.000000e+00 : f32
    %341 = vector.broadcast %cst_200 : f32 to vector<8x128xf32>
    %342 = arith.select %307, %338, %341 : vector<8x128xi1>, vector<8x128xf32>
    %343 = arith.index_cast %294 : i32 to index
    %c0_201 = arith.constant 0 : index
    %344 = vector.load %arg14[%343, %c0_201] : memref<64x256xf32, #tpu.memory_space<vmem>>, vector<8x128xf32>
    tpu.vector_store %arg14[%343, %c0_201], %342 {strides = array<i32>} : memref<64x256xf32, #tpu.memory_space<vmem>>, vector<8x128xf32>,
    %345 = arith.index_cast %297 : i32 to index
    %c128_202 = arith.constant 128 : index
    %346 = vector.load %arg14[%345, %c128_202] : memref<64x256xf32, #tpu.memory_space<vmem>>, vector<8x128xf32>
    tpu.vector_store %arg14[%345, %c128_202], %342 {strides = array<i32>} : memref<64x256xf32, #tpu.memory_space<vmem>>, vector<8x128xf32>,
    %c2_i32_203 = arith.constant 2 : i32
    %c8_i32_204 = arith.constant 8 : i32
    %347 = arith.muli %c2_i32_203, %c8_i32_204 : i32
    %348 = tpu.assume_multiple %347, 8 : i32
    %c7_i32_205 = arith.constant 7 : i32
    %349 = arith.subi %c7_i32_205, %c2_i32_203 : i32
    %c8_i32_206 = arith.constant 8 : i32
    %350 = arith.muli %349, %c8_i32_206 : i32
    %351 = tpu.assume_multiple %350, 8 : i32
    %352 = arith.index_cast %348 : i32 to index
    %c0_207 = arith.constant 0 : index
    %353 = vector.load %arg15[%352, %c0_207] : memref<64x512xf32, #tpu.memory_space<vmem>>, vector<8x512xf32>
    %cst_208 = arith.constant dense<0.000000e+00> : vector<8x512xf32>
    %354 = tpu.matmul %339, %238, %cst_208 {dimension_numbers = #tpu.dot_dimension_numbers<[1], [0], [0], [1], [0, 0, 1, 1], [], []>} : vector<8x128xf32>, vector<128x512xf32>, vector<8x512xf32> -> vector<8x512xf32>
    %355 = arith.addf %353, %354 : vector<8x512xf32>
    %c7_i32_209 = arith.constant 7 : i32
    %356 = arith.subi %c7_i32_209, %c2_i32_203 : i32
    %357 = vector.broadcast %c2_i32_203 : i32 to vector<8x128xi32>
    %358 = vector.broadcast %356 : i32 to vector<8x128xi32>
    %359 = arith.select %228, %357, %358 : vector<8x128xi1>, vector<8x128xi32>
    %360 = vector.broadcast %229 : vector<8x1xi32> to vector<8x128xi32>
    %361 = arith.cmpi slt, %359, %360 : vector<8x128xi32>
    %362 = vector.extract_strided_slice %355 {offsets = [0, 0], sizes = [8, 128], strides = [1, 1]} : vector<8x512xf32> to vector<8x128xf32>
    %cst_210 = arith.constant 5.000000e-01 : f32
    %363 = vector.broadcast %cst_210 : f32 to vector<8x128xf32>
    %364 = arith.mulf %363, %362 : vector<8x128xf32>
    %365 = math.tanh %364 : vector<8x128xf32>
    %cst_211 = arith.constant 5.000000e-01 : f32
    %366 = vector.broadcast %cst_211 : f32 to vector<8x128xf32>
    %367 = arith.mulf %366, %365 : vector<8x128xf32>
    %cst_212 = arith.constant 5.000000e-01 : f32
    %368 = vector.broadcast %cst_212 : f32 to vector<8x128xf32>
    %369 = arith.addf %367, %368 : vector<8x128xf32>
    %370 = vector.extract_strided_slice %355 {offsets = [0, 128], sizes = [8, 128], strides = [1, 1]} : vector<8x512xf32> to vector<8x128xf32>
    %cst_213 = arith.constant 5.000000e-01 : f32
    %371 = vector.broadcast %cst_213 : f32 to vector<8x128xf32>
    %372 = arith.mulf %371, %370 : vector<8x128xf32>
    %373 = math.tanh %372 : vector<8x128xf32>
    %cst_214 = arith.constant 5.000000e-01 : f32
    %374 = vector.broadcast %cst_214 : f32 to vector<8x128xf32>
    %375 = arith.mulf %374, %373 : vector<8x128xf32>
    %cst_215 = arith.constant 5.000000e-01 : f32
    %376 = vector.broadcast %cst_215 : f32 to vector<8x128xf32>
    %377 = arith.addf %375, %376 : vector<8x128xf32>
    %378 = vector.extract_strided_slice %355 {offsets = [0, 256], sizes = [8, 128], strides = [1, 1]} : vector<8x512xf32> to vector<8x128xf32>
    %379 = math.tanh %378 : vector<8x128xf32>
    %380 = vector.extract_strided_slice %355 {offsets = [0, 384], sizes = [8, 128], strides = [1, 1]} : vector<8x512xf32> to vector<8x128xf32>
    %cst_216 = arith.constant 5.000000e-01 : f32
    %381 = vector.broadcast %cst_216 : f32 to vector<8x128xf32>
    %382 = arith.mulf %381, %380 : vector<8x128xf32>
    %383 = math.tanh %382 : vector<8x128xf32>
    %cst_217 = arith.constant 5.000000e-01 : f32
    %384 = vector.broadcast %cst_217 : f32 to vector<8x128xf32>
    %385 = arith.mulf %384, %383 : vector<8x128xf32>
    %cst_218 = arith.constant 5.000000e-01 : f32
    %386 = vector.broadcast %cst_218 : f32 to vector<8x128xf32>
    %387 = arith.addf %385, %386 : vector<8x128xf32>
    %388 = arith.mulf %377, %340 : vector<8x128xf32>
    %389 = arith.mulf %369, %379 : vector<8x128xf32>
    %390 = arith.addf %388, %389 : vector<8x128xf32>
    %391 = math.tanh %390 : vector<8x128xf32>
    %392 = arith.mulf %387, %391 : vector<8x128xf32>
    %393 = arith.select %361, %392, %339 : vector<8x128xi1>, vector<8x128xf32>
    %394 = arith.select %361, %390, %340 : vector<8x128xi1>, vector<8x128xf32>
    %cst_219 = arith.constant 0.000000e+00 : f32
    %395 = vector.broadcast %cst_219 : f32 to vector<8x128xf32>
    %396 = arith.select %361, %392, %395 : vector<8x128xi1>, vector<8x128xf32>
    %397 = arith.index_cast %348 : i32 to index
    %c0_220 = arith.constant 0 : index
    %398 = vector.load %arg14[%397, %c0_220] : memref<64x256xf32, #tpu.memory_space<vmem>>, vector<8x128xf32>
    tpu.vector_store %arg14[%397, %c0_220], %396 {strides = array<i32>} : memref<64x256xf32, #tpu.memory_space<vmem>>, vector<8x128xf32>,
    %399 = arith.index_cast %351 : i32 to index
    %c128_221 = arith.constant 128 : index
    %400 = vector.load %arg14[%399, %c128_221] : memref<64x256xf32, #tpu.memory_space<vmem>>, vector<8x128xf32>
    tpu.vector_store %arg14[%399, %c128_221], %396 {strides = array<i32>} : memref<64x256xf32, #tpu.memory_space<vmem>>, vector<8x128xf32>,
    %c3_i32_222 = arith.constant 3 : i32
    %c8_i32_223 = arith.constant 8 : i32
    %401 = arith.muli %c3_i32_222, %c8_i32_223 : i32
    %402 = tpu.assume_multiple %401, 8 : i32
    %c7_i32_224 = arith.constant 7 : i32
    %403 = arith.subi %c7_i32_224, %c3_i32_222 : i32
    %c8_i32_225 = arith.constant 8 : i32
    %404 = arith.muli %403, %c8_i32_225 : i32
    %405 = tpu.assume_multiple %404, 8 : i32
    %406 = arith.index_cast %402 : i32 to index
    %c0_226 = arith.constant 0 : index
    %407 = vector.load %arg15[%406, %c0_226] : memref<64x512xf32, #tpu.memory_space<vmem>>, vector<8x512xf32>
    %cst_227 = arith.constant dense<0.000000e+00> : vector<8x512xf32>
    %408 = tpu.matmul %393, %238, %cst_227 {dimension_numbers = #tpu.dot_dimension_numbers<[1], [0], [0], [1], [0, 0, 1, 1], [], []>} : vector<8x128xf32>, vector<128x512xf32>, vector<8x512xf32> -> vector<8x512xf32>
    %409 = arith.addf %407, %408 : vector<8x512xf32>
    %c7_i32_228 = arith.constant 7 : i32
    %410 = arith.subi %c7_i32_228, %c3_i32_222 : i32
    %411 = vector.broadcast %c3_i32_222 : i32 to vector<8x128xi32>
    %412 = vector.broadcast %410 : i32 to vector<8x128xi32>
    %413 = arith.select %228, %411, %412 : vector<8x128xi1>, vector<8x128xi32>
    %414 = vector.broadcast %229 : vector<8x1xi32> to vector<8x128xi32>
    %415 = arith.cmpi slt, %413, %414 : vector<8x128xi32>
    %416 = vector.extract_strided_slice %409 {offsets = [0, 0], sizes = [8, 128], strides = [1, 1]} : vector<8x512xf32> to vector<8x128xf32>
    %cst_229 = arith.constant 5.000000e-01 : f32
    %417 = vector.broadcast %cst_229 : f32 to vector<8x128xf32>
    %418 = arith.mulf %417, %416 : vector<8x128xf32>
    %419 = math.tanh %418 : vector<8x128xf32>
    %cst_230 = arith.constant 5.000000e-01 : f32
    %420 = vector.broadcast %cst_230 : f32 to vector<8x128xf32>
    %421 = arith.mulf %420, %419 : vector<8x128xf32>
    %cst_231 = arith.constant 5.000000e-01 : f32
    %422 = vector.broadcast %cst_231 : f32 to vector<8x128xf32>
    %423 = arith.addf %421, %422 : vector<8x128xf32>
    %424 = vector.extract_strided_slice %409 {offsets = [0, 128], sizes = [8, 128], strides = [1, 1]} : vector<8x512xf32> to vector<8x128xf32>
    %cst_232 = arith.constant 5.000000e-01 : f32
    %425 = vector.broadcast %cst_232 : f32 to vector<8x128xf32>
    %426 = arith.mulf %425, %424 : vector<8x128xf32>
    %427 = math.tanh %426 : vector<8x128xf32>
    %cst_233 = arith.constant 5.000000e-01 : f32
    %428 = vector.broadcast %cst_233 : f32 to vector<8x128xf32>
    %429 = arith.mulf %428, %427 : vector<8x128xf32>
    %cst_234 = arith.constant 5.000000e-01 : f32
    %430 = vector.broadcast %cst_234 : f32 to vector<8x128xf32>
    %431 = arith.addf %429, %430 : vector<8x128xf32>
    %432 = vector.extract_strided_slice %409 {offsets = [0, 256], sizes = [8, 128], strides = [1, 1]} : vector<8x512xf32> to vector<8x128xf32>
    %433 = math.tanh %432 : vector<8x128xf32>
    %434 = vector.extract_strided_slice %409 {offsets = [0, 384], sizes = [8, 128], strides = [1, 1]} : vector<8x512xf32> to vector<8x128xf32>
    %cst_235 = arith.constant 5.000000e-01 : f32
    %435 = vector.broadcast %cst_235 : f32 to vector<8x128xf32>
    %436 = arith.mulf %435, %434 : vector<8x128xf32>
    %437 = math.tanh %436 : vector<8x128xf32>
    %cst_236 = arith.constant 5.000000e-01 : f32
    %438 = vector.broadcast %cst_236 : f32 to vector<8x128xf32>
    %439 = arith.mulf %438, %437 : vector<8x128xf32>
    %cst_237 = arith.constant 5.000000e-01 : f32
    %440 = vector.broadcast %cst_237 : f32 to vector<8x128xf32>
    %441 = arith.addf %439, %440 : vector<8x128xf32>
    %442 = arith.mulf %431, %394 : vector<8x128xf32>
    %443 = arith.mulf %423, %433 : vector<8x128xf32>
    %444 = arith.addf %442, %443 : vector<8x128xf32>
    %445 = math.tanh %444 : vector<8x128xf32>
    %446 = arith.mulf %441, %445 : vector<8x128xf32>
    %447 = arith.select %415, %446, %393 : vector<8x128xi1>, vector<8x128xf32>
    %448 = arith.select %415, %444, %394 : vector<8x128xi1>, vector<8x128xf32>
    %cst_238 = arith.constant 0.000000e+00 : f32
    %449 = vector.broadcast %cst_238 : f32 to vector<8x128xf32>
    %450 = arith.select %415, %446, %449 : vector<8x128xi1>, vector<8x128xf32>
    %451 = arith.index_cast %402 : i32 to index
    %c0_239 = arith.constant 0 : index
    %452 = vector.load %arg14[%451, %c0_239] : memref<64x256xf32, #tpu.memory_space<vmem>>, vector<8x128xf32>
    tpu.vector_store %arg14[%451, %c0_239], %450 {strides = array<i32>} : memref<64x256xf32, #tpu.memory_space<vmem>>, vector<8x128xf32>,
    %453 = arith.index_cast %405 : i32 to index
    %c128_240 = arith.constant 128 : index
    %454 = vector.load %arg14[%453, %c128_240] : memref<64x256xf32, #tpu.memory_space<vmem>>, vector<8x128xf32>
    tpu.vector_store %arg14[%453, %c128_240], %450 {strides = array<i32>} : memref<64x256xf32, #tpu.memory_space<vmem>>, vector<8x128xf32>,
    %c4_i32_241 = arith.constant 4 : i32
    %c8_i32_242 = arith.constant 8 : i32
    %455 = arith.muli %c4_i32_241, %c8_i32_242 : i32
    %456 = tpu.assume_multiple %455, 8 : i32
    %c7_i32_243 = arith.constant 7 : i32
    %457 = arith.subi %c7_i32_243, %c4_i32_241 : i32
    %c8_i32_244 = arith.constant 8 : i32
    %458 = arith.muli %457, %c8_i32_244 : i32
    %459 = tpu.assume_multiple %458, 8 : i32
    %460 = arith.index_cast %456 : i32 to index
    %c0_245 = arith.constant 0 : index
    %461 = vector.load %arg15[%460, %c0_245] : memref<64x512xf32, #tpu.memory_space<vmem>>, vector<8x512xf32>
    %cst_246 = arith.constant dense<0.000000e+00> : vector<8x512xf32>
    %462 = tpu.matmul %447, %238, %cst_246 {dimension_numbers = #tpu.dot_dimension_numbers<[1], [0], [0], [1], [0, 0, 1, 1], [], []>} : vector<8x128xf32>, vector<128x512xf32>, vector<8x512xf32> -> vector<8x512xf32>
    %463 = arith.addf %461, %462 : vector<8x512xf32>
    %c7_i32_247 = arith.constant 7 : i32
    %464 = arith.subi %c7_i32_247, %c4_i32_241 : i32
    %465 = vector.broadcast %c4_i32_241 : i32 to vector<8x128xi32>
    %466 = vector.broadcast %464 : i32 to vector<8x128xi32>
    %467 = arith.select %228, %465, %466 : vector<8x128xi1>, vector<8x128xi32>
    %468 = vector.broadcast %229 : vector<8x1xi32> to vector<8x128xi32>
    %469 = arith.cmpi slt, %467, %468 : vector<8x128xi32>
    %470 = vector.extract_strided_slice %463 {offsets = [0, 0], sizes = [8, 128], strides = [1, 1]} : vector<8x512xf32> to vector<8x128xf32>
    %cst_248 = arith.constant 5.000000e-01 : f32
    %471 = vector.broadcast %cst_248 : f32 to vector<8x128xf32>
    %472 = arith.mulf %471, %470 : vector<8x128xf32>
    %473 = math.tanh %472 : vector<8x128xf32>
    %cst_249 = arith.constant 5.000000e-01 : f32
    %474 = vector.broadcast %cst_249 : f32 to vector<8x128xf32>
    %475 = arith.mulf %474, %473 : vector<8x128xf32>
    %cst_250 = arith.constant 5.000000e-01 : f32
    %476 = vector.broadcast %cst_250 : f32 to vector<8x128xf32>
    %477 = arith.addf %475, %476 : vector<8x128xf32>
    %478 = vector.extract_strided_slice %463 {offsets = [0, 128], sizes = [8, 128], strides = [1, 1]} : vector<8x512xf32> to vector<8x128xf32>
    %cst_251 = arith.constant 5.000000e-01 : f32
    %479 = vector.broadcast %cst_251 : f32 to vector<8x128xf32>
    %480 = arith.mulf %479, %478 : vector<8x128xf32>
    %481 = math.tanh %480 : vector<8x128xf32>
    %cst_252 = arith.constant 5.000000e-01 : f32
    %482 = vector.broadcast %cst_252 : f32 to vector<8x128xf32>
    %483 = arith.mulf %482, %481 : vector<8x128xf32>
    %cst_253 = arith.constant 5.000000e-01 : f32
    %484 = vector.broadcast %cst_253 : f32 to vector<8x128xf32>
    %485 = arith.addf %483, %484 : vector<8x128xf32>
    %486 = vector.extract_strided_slice %463 {offsets = [0, 256], sizes = [8, 128], strides = [1, 1]} : vector<8x512xf32> to vector<8x128xf32>
    %487 = math.tanh %486 : vector<8x128xf32>
    %488 = vector.extract_strided_slice %463 {offsets = [0, 384], sizes = [8, 128], strides = [1, 1]} : vector<8x512xf32> to vector<8x128xf32>
    %cst_254 = arith.constant 5.000000e-01 : f32
    %489 = vector.broadcast %cst_254 : f32 to vector<8x128xf32>
    %490 = arith.mulf %489, %488 : vector<8x128xf32>
    %491 = math.tanh %490 : vector<8x128xf32>
    %cst_255 = arith.constant 5.000000e-01 : f32
    %492 = vector.broadcast %cst_255 : f32 to vector<8x128xf32>
    %493 = arith.mulf %492, %491 : vector<8x128xf32>
    %cst_256 = arith.constant 5.000000e-01 : f32
    %494 = vector.broadcast %cst_256 : f32 to vector<8x128xf32>
    %495 = arith.addf %493, %494 : vector<8x128xf32>
    %496 = arith.mulf %485, %448 : vector<8x128xf32>
    %497 = arith.mulf %477, %487 : vector<8x128xf32>
    %498 = arith.addf %496, %497 : vector<8x128xf32>
    %499 = math.tanh %498 : vector<8x128xf32>
    %500 = arith.mulf %495, %499 : vector<8x128xf32>
    %501 = arith.select %469, %500, %447 : vector<8x128xi1>, vector<8x128xf32>
    %502 = arith.select %469, %498, %448 : vector<8x128xi1>, vector<8x128xf32>
    %cst_257 = arith.constant 0.000000e+00 : f32
    %503 = vector.broadcast %cst_257 : f32 to vector<8x128xf32>
    %504 = arith.select %469, %500, %503 : vector<8x128xi1>, vector<8x128xf32>
    %505 = arith.index_cast %456 : i32 to index
    %c0_258 = arith.constant 0 : index
    %506 = vector.load %arg14[%505, %c0_258] : memref<64x256xf32, #tpu.memory_space<vmem>>, vector<8x128xf32>
    tpu.vector_store %arg14[%505, %c0_258], %504 {strides = array<i32>} : memref<64x256xf32, #tpu.memory_space<vmem>>, vector<8x128xf32>,
    %507 = arith.index_cast %459 : i32 to index
    %c128_259 = arith.constant 128 : index
    %508 = vector.load %arg14[%507, %c128_259] : memref<64x256xf32, #tpu.memory_space<vmem>>, vector<8x128xf32>
    tpu.vector_store %arg14[%507, %c128_259], %504 {strides = array<i32>} : memref<64x256xf32, #tpu.memory_space<vmem>>, vector<8x128xf32>,
    %c5_i32_260 = arith.constant 5 : i32
    %c8_i32_261 = arith.constant 8 : i32
    %509 = arith.muli %c5_i32_260, %c8_i32_261 : i32
    %510 = tpu.assume_multiple %509, 8 : i32
    %c7_i32_262 = arith.constant 7 : i32
    %511 = arith.subi %c7_i32_262, %c5_i32_260 : i32
    %c8_i32_263 = arith.constant 8 : i32
    %512 = arith.muli %511, %c8_i32_263 : i32
    %513 = tpu.assume_multiple %512, 8 : i32
    %514 = arith.index_cast %510 : i32 to index
    %c0_264 = arith.constant 0 : index
    %515 = vector.load %arg15[%514, %c0_264] : memref<64x512xf32, #tpu.memory_space<vmem>>, vector<8x512xf32>
    %cst_265 = arith.constant dense<0.000000e+00> : vector<8x512xf32>
    %516 = tpu.matmul %501, %238, %cst_265 {dimension_numbers = #tpu.dot_dimension_numbers<[1], [0], [0], [1], [0, 0, 1, 1], [], []>} : vector<8x128xf32>, vector<128x512xf32>, vector<8x512xf32> -> vector<8x512xf32>
    %517 = arith.addf %515, %516 : vector<8x512xf32>
    %c7_i32_266 = arith.constant 7 : i32
    %518 = arith.subi %c7_i32_266, %c5_i32_260 : i32
    %519 = vector.broadcast %c5_i32_260 : i32 to vector<8x128xi32>
    %520 = vector.broadcast %518 : i32 to vector<8x128xi32>
    %521 = arith.select %228, %519, %520 : vector<8x128xi1>, vector<8x128xi32>
    %522 = vector.broadcast %229 : vector<8x1xi32> to vector<8x128xi32>
    %523 = arith.cmpi slt, %521, %522 : vector<8x128xi32>
    %524 = vector.extract_strided_slice %517 {offsets = [0, 0], sizes = [8, 128], strides = [1, 1]} : vector<8x512xf32> to vector<8x128xf32>
    %cst_267 = arith.constant 5.000000e-01 : f32
    %525 = vector.broadcast %cst_267 : f32 to vector<8x128xf32>
    %526 = arith.mulf %525, %524 : vector<8x128xf32>
    %527 = math.tanh %526 : vector<8x128xf32>
    %cst_268 = arith.constant 5.000000e-01 : f32
    %528 = vector.broadcast %cst_268 : f32 to vector<8x128xf32>
    %529 = arith.mulf %528, %527 : vector<8x128xf32>
    %cst_269 = arith.constant 5.000000e-01 : f32
    %530 = vector.broadcast %cst_269 : f32 to vector<8x128xf32>
    %531 = arith.addf %529, %530 : vector<8x128xf32>
    %532 = vector.extract_strided_slice %517 {offsets = [0, 128], sizes = [8, 128], strides = [1, 1]} : vector<8x512xf32> to vector<8x128xf32>
    %cst_270 = arith.constant 5.000000e-01 : f32
    %533 = vector.broadcast %cst_270 : f32 to vector<8x128xf32>
    %534 = arith.mulf %533, %532 : vector<8x128xf32>
    %535 = math.tanh %534 : vector<8x128xf32>
    %cst_271 = arith.constant 5.000000e-01 : f32
    %536 = vector.broadcast %cst_271 : f32 to vector<8x128xf32>
    %537 = arith.mulf %536, %535 : vector<8x128xf32>
    %cst_272 = arith.constant 5.000000e-01 : f32
    %538 = vector.broadcast %cst_272 : f32 to vector<8x128xf32>
    %539 = arith.addf %537, %538 : vector<8x128xf32>
    %540 = vector.extract_strided_slice %517 {offsets = [0, 256], sizes = [8, 128], strides = [1, 1]} : vector<8x512xf32> to vector<8x128xf32>
    %541 = math.tanh %540 : vector<8x128xf32>
    %542 = vector.extract_strided_slice %517 {offsets = [0, 384], sizes = [8, 128], strides = [1, 1]} : vector<8x512xf32> to vector<8x128xf32>
    %cst_273 = arith.constant 5.000000e-01 : f32
    %543 = vector.broadcast %cst_273 : f32 to vector<8x128xf32>
    %544 = arith.mulf %543, %542 : vector<8x128xf32>
    %545 = math.tanh %544 : vector<8x128xf32>
    %cst_274 = arith.constant 5.000000e-01 : f32
    %546 = vector.broadcast %cst_274 : f32 to vector<8x128xf32>
    %547 = arith.mulf %546, %545 : vector<8x128xf32>
    %cst_275 = arith.constant 5.000000e-01 : f32
    %548 = vector.broadcast %cst_275 : f32 to vector<8x128xf32>
    %549 = arith.addf %547, %548 : vector<8x128xf32>
    %550 = arith.mulf %539, %502 : vector<8x128xf32>
    %551 = arith.mulf %531, %541 : vector<8x128xf32>
    %552 = arith.addf %550, %551 : vector<8x128xf32>
    %553 = math.tanh %552 : vector<8x128xf32>
    %554 = arith.mulf %549, %553 : vector<8x128xf32>
    %555 = arith.select %523, %554, %501 : vector<8x128xi1>, vector<8x128xf32>
    %556 = arith.select %523, %552, %502 : vector<8x128xi1>, vector<8x128xf32>
    %cst_276 = arith.constant 0.000000e+00 : f32
    %557 = vector.broadcast %cst_276 : f32 to vector<8x128xf32>
    %558 = arith.select %523, %554, %557 : vector<8x128xi1>, vector<8x128xf32>
    %559 = arith.index_cast %510 : i32 to index
    %c0_277 = arith.constant 0 : index
    %560 = vector.load %arg14[%559, %c0_277] : memref<64x256xf32, #tpu.memory_space<vmem>>, vector<8x128xf32>
    tpu.vector_store %arg14[%559, %c0_277], %558 {strides = array<i32>} : memref<64x256xf32, #tpu.memory_space<vmem>>, vector<8x128xf32>,
    %561 = arith.index_cast %513 : i32 to index
    %c128_278 = arith.constant 128 : index
    %562 = vector.load %arg14[%561, %c128_278] : memref<64x256xf32, #tpu.memory_space<vmem>>, vector<8x128xf32>
    tpu.vector_store %arg14[%561, %c128_278], %558 {strides = array<i32>} : memref<64x256xf32, #tpu.memory_space<vmem>>, vector<8x128xf32>,
    %c6_i32_279 = arith.constant 6 : i32
    %c8_i32_280 = arith.constant 8 : i32
    %563 = arith.muli %c6_i32_279, %c8_i32_280 : i32
    %564 = tpu.assume_multiple %563, 8 : i32
    %c7_i32_281 = arith.constant 7 : i32
    %565 = arith.subi %c7_i32_281, %c6_i32_279 : i32
    %c8_i32_282 = arith.constant 8 : i32
    %566 = arith.muli %565, %c8_i32_282 : i32
    %567 = tpu.assume_multiple %566, 8 : i32
    %568 = arith.index_cast %564 : i32 to index
    %c0_283 = arith.constant 0 : index
    %569 = vector.load %arg15[%568, %c0_283] : memref<64x512xf32, #tpu.memory_space<vmem>>, vector<8x512xf32>
    %cst_284 = arith.constant dense<0.000000e+00> : vector<8x512xf32>
    %570 = tpu.matmul %555, %238, %cst_284 {dimension_numbers = #tpu.dot_dimension_numbers<[1], [0], [0], [1], [0, 0, 1, 1], [], []>} : vector<8x128xf32>, vector<128x512xf32>, vector<8x512xf32> -> vector<8x512xf32>
    %571 = arith.addf %569, %570 : vector<8x512xf32>
    %c7_i32_285 = arith.constant 7 : i32
    %572 = arith.subi %c7_i32_285, %c6_i32_279 : i32
    %573 = vector.broadcast %c6_i32_279 : i32 to vector<8x128xi32>
    %574 = vector.broadcast %572 : i32 to vector<8x128xi32>
    %575 = arith.select %228, %573, %574 : vector<8x128xi1>, vector<8x128xi32>
    %576 = vector.broadcast %229 : vector<8x1xi32> to vector<8x128xi32>
    %577 = arith.cmpi slt, %575, %576 : vector<8x128xi32>
    %578 = vector.extract_strided_slice %571 {offsets = [0, 0], sizes = [8, 128], strides = [1, 1]} : vector<8x512xf32> to vector<8x128xf32>
    %cst_286 = arith.constant 5.000000e-01 : f32
    %579 = vector.broadcast %cst_286 : f32 to vector<8x128xf32>
    %580 = arith.mulf %579, %578 : vector<8x128xf32>
    %581 = math.tanh %580 : vector<8x128xf32>
    %cst_287 = arith.constant 5.000000e-01 : f32
    %582 = vector.broadcast %cst_287 : f32 to vector<8x128xf32>
    %583 = arith.mulf %582, %581 : vector<8x128xf32>
    %cst_288 = arith.constant 5.000000e-01 : f32
    %584 = vector.broadcast %cst_288 : f32 to vector<8x128xf32>
    %585 = arith.addf %583, %584 : vector<8x128xf32>
    %586 = vector.extract_strided_slice %571 {offsets = [0, 128], sizes = [8, 128], strides = [1, 1]} : vector<8x512xf32> to vector<8x128xf32>
    %cst_289 = arith.constant 5.000000e-01 : f32
    %587 = vector.broadcast %cst_289 : f32 to vector<8x128xf32>
    %588 = arith.mulf %587, %586 : vector<8x128xf32>
    %589 = math.tanh %588 : vector<8x128xf32>
    %cst_290 = arith.constant 5.000000e-01 : f32
    %590 = vector.broadcast %cst_290 : f32 to vector<8x128xf32>
    %591 = arith.mulf %590, %589 : vector<8x128xf32>
    %cst_291 = arith.constant 5.000000e-01 : f32
    %592 = vector.broadcast %cst_291 : f32 to vector<8x128xf32>
    %593 = arith.addf %591, %592 : vector<8x128xf32>
    %594 = vector.extract_strided_slice %571 {offsets = [0, 256], sizes = [8, 128], strides = [1, 1]} : vector<8x512xf32> to vector<8x128xf32>
    %595 = math.tanh %594 : vector<8x128xf32>
    %596 = vector.extract_strided_slice %571 {offsets = [0, 384], sizes = [8, 128], strides = [1, 1]} : vector<8x512xf32> to vector<8x128xf32>
    %cst_292 = arith.constant 5.000000e-01 : f32
    %597 = vector.broadcast %cst_292 : f32 to vector<8x128xf32>
    %598 = arith.mulf %597, %596 : vector<8x128xf32>
    %599 = math.tanh %598 : vector<8x128xf32>
    %cst_293 = arith.constant 5.000000e-01 : f32
    %600 = vector.broadcast %cst_293 : f32 to vector<8x128xf32>
    %601 = arith.mulf %600, %599 : vector<8x128xf32>
    %cst_294 = arith.constant 5.000000e-01 : f32
    %602 = vector.broadcast %cst_294 : f32 to vector<8x128xf32>
    %603 = arith.addf %601, %602 : vector<8x128xf32>
    %604 = arith.mulf %593, %556 : vector<8x128xf32>
    %605 = arith.mulf %585, %595 : vector<8x128xf32>
    %606 = arith.addf %604, %605 : vector<8x128xf32>
    %607 = math.tanh %606 : vector<8x128xf32>
    %608 = arith.mulf %603, %607 : vector<8x128xf32>
    %609 = arith.select %577, %608, %555 : vector<8x128xi1>, vector<8x128xf32>
    %610 = arith.select %577, %606, %556 : vector<8x128xi1>, vector<8x128xf32>
    %cst_295 = arith.constant 0.000000e+00 : f32
    %611 = vector.broadcast %cst_295 : f32 to vector<8x128xf32>
    %612 = arith.select %577, %608, %611 : vector<8x128xi1>, vector<8x128xf32>
    %613 = arith.index_cast %564 : i32 to index
    %c0_296 = arith.constant 0 : index
    %614 = vector.load %arg14[%613, %c0_296] : memref<64x256xf32, #tpu.memory_space<vmem>>, vector<8x128xf32>
    tpu.vector_store %arg14[%613, %c0_296], %612 {strides = array<i32>} : memref<64x256xf32, #tpu.memory_space<vmem>>, vector<8x128xf32>,
    %615 = arith.index_cast %567 : i32 to index
    %c128_297 = arith.constant 128 : index
    %616 = vector.load %arg14[%615, %c128_297] : memref<64x256xf32, #tpu.memory_space<vmem>>, vector<8x128xf32>
    tpu.vector_store %arg14[%615, %c128_297], %612 {strides = array<i32>} : memref<64x256xf32, #tpu.memory_space<vmem>>, vector<8x128xf32>,
    %c7_i32_298 = arith.constant 7 : i32
    %c8_i32_299 = arith.constant 8 : i32
    %617 = arith.muli %c7_i32_298, %c8_i32_299 : i32
    %618 = tpu.assume_multiple %617, 8 : i32
    %c7_i32_300 = arith.constant 7 : i32
    %619 = arith.subi %c7_i32_300, %c7_i32_298 : i32
    %c8_i32_301 = arith.constant 8 : i32
    %620 = arith.muli %619, %c8_i32_301 : i32
    %621 = tpu.assume_multiple %620, 8 : i32
    %622 = arith.index_cast %618 : i32 to index
    %c0_302 = arith.constant 0 : index
    %623 = vector.load %arg15[%622, %c0_302] : memref<64x512xf32, #tpu.memory_space<vmem>>, vector<8x512xf32>
    %cst_303 = arith.constant dense<0.000000e+00> : vector<8x512xf32>
    %624 = tpu.matmul %609, %238, %cst_303 {dimension_numbers = #tpu.dot_dimension_numbers<[1], [0], [0], [1], [0, 0, 1, 1], [], []>} : vector<8x128xf32>, vector<128x512xf32>, vector<8x512xf32> -> vector<8x512xf32>
    %625 = arith.addf %623, %624 : vector<8x512xf32>
    %c7_i32_304 = arith.constant 7 : i32
    %626 = arith.subi %c7_i32_304, %c7_i32_298 : i32
    %627 = vector.broadcast %c7_i32_298 : i32 to vector<8x128xi32>
    %628 = vector.broadcast %626 : i32 to vector<8x128xi32>
    %629 = arith.select %228, %627, %628 : vector<8x128xi1>, vector<8x128xi32>
    %630 = vector.broadcast %229 : vector<8x1xi32> to vector<8x128xi32>
    %631 = arith.cmpi slt, %629, %630 : vector<8x128xi32>
    %632 = vector.extract_strided_slice %625 {offsets = [0, 0], sizes = [8, 128], strides = [1, 1]} : vector<8x512xf32> to vector<8x128xf32>
    %cst_305 = arith.constant 5.000000e-01 : f32
    %633 = vector.broadcast %cst_305 : f32 to vector<8x128xf32>
    %634 = arith.mulf %633, %632 : vector<8x128xf32>
    %635 = math.tanh %634 : vector<8x128xf32>
    %cst_306 = arith.constant 5.000000e-01 : f32
    %636 = vector.broadcast %cst_306 : f32 to vector<8x128xf32>
    %637 = arith.mulf %636, %635 : vector<8x128xf32>
    %cst_307 = arith.constant 5.000000e-01 : f32
    %638 = vector.broadcast %cst_307 : f32 to vector<8x128xf32>
    %639 = arith.addf %637, %638 : vector<8x128xf32>
    %640 = vector.extract_strided_slice %625 {offsets = [0, 128], sizes = [8, 128], strides = [1, 1]} : vector<8x512xf32> to vector<8x128xf32>
    %cst_308 = arith.constant 5.000000e-01 : f32
    %641 = vector.broadcast %cst_308 : f32 to vector<8x128xf32>
    %642 = arith.mulf %641, %640 : vector<8x128xf32>
    %643 = math.tanh %642 : vector<8x128xf32>
    %cst_309 = arith.constant 5.000000e-01 : f32
    %644 = vector.broadcast %cst_309 : f32 to vector<8x128xf32>
    %645 = arith.mulf %644, %643 : vector<8x128xf32>
    %cst_310 = arith.constant 5.000000e-01 : f32
    %646 = vector.broadcast %cst_310 : f32 to vector<8x128xf32>
    %647 = arith.addf %645, %646 : vector<8x128xf32>
    %648 = vector.extract_strided_slice %625 {offsets = [0, 256], sizes = [8, 128], strides = [1, 1]} : vector<8x512xf32> to vector<8x128xf32>
    %649 = math.tanh %648 : vector<8x128xf32>
    %650 = vector.extract_strided_slice %625 {offsets = [0, 384], sizes = [8, 128], strides = [1, 1]} : vector<8x512xf32> to vector<8x128xf32>
    %cst_311 = arith.constant 5.000000e-01 : f32
    %651 = vector.broadcast %cst_311 : f32 to vector<8x128xf32>
    %652 = arith.mulf %651, %650 : vector<8x128xf32>
    %653 = math.tanh %652 : vector<8x128xf32>
    %cst_312 = arith.constant 5.000000e-01 : f32
    %654 = vector.broadcast %cst_312 : f32 to vector<8x128xf32>
    %655 = arith.mulf %654, %653 : vector<8x128xf32>
    %cst_313 = arith.constant 5.000000e-01 : f32
    %656 = vector.broadcast %cst_313 : f32 to vector<8x128xf32>
    %657 = arith.addf %655, %656 : vector<8x128xf32>
    %658 = arith.mulf %647, %610 : vector<8x128xf32>
    %659 = arith.mulf %639, %649 : vector<8x128xf32>
    %660 = arith.addf %658, %659 : vector<8x128xf32>
    %661 = math.tanh %660 : vector<8x128xf32>
    %662 = arith.mulf %657, %661 : vector<8x128xf32>
    %663 = arith.select %631, %662, %609 : vector<8x128xi1>, vector<8x128xf32>
    %664 = arith.select %631, %660, %610 : vector<8x128xi1>, vector<8x128xf32>
    %cst_314 = arith.constant 0.000000e+00 : f32
    %665 = vector.broadcast %cst_314 : f32 to vector<8x128xf32>
    %666 = arith.select %631, %662, %665 : vector<8x128xi1>, vector<8x128xf32>
    %667 = arith.index_cast %618 : i32 to index
    %c0_315 = arith.constant 0 : index
    %668 = vector.load %arg14[%667, %c0_315] : memref<64x256xf32, #tpu.memory_space<vmem>>, vector<8x128xf32>
    tpu.vector_store %arg14[%667, %c0_315], %666 {strides = array<i32>} : memref<64x256xf32, #tpu.memory_space<vmem>>, vector<8x128xf32>,
    %669 = arith.index_cast %621 : i32 to index
    %c128_316 = arith.constant 128 : index
    %670 = vector.load %arg14[%669, %c128_316] : memref<64x256xf32, #tpu.memory_space<vmem>>, vector<8x128xf32>
    tpu.vector_store %arg14[%669, %c128_316], %666 {strides = array<i32>} : memref<64x256xf32, #tpu.memory_space<vmem>>, vector<8x128xf32>,
    %c8_i32_317 = arith.constant 8 : i32
    %c0_318 = arith.constant 0 : index
    %c0_319 = arith.constant 0 : index
    %671 = vector.load %arg14[%c0_318, %c0_319] : memref<64x256xf32, #tpu.memory_space<vmem>>, vector<64x256xf32>
    %c0_320 = arith.constant 0 : index
    %c0_321 = arith.constant 0 : index
    %672 = vector.load %arg6[%c0_320, %c0_321] : memref<256x512xf32, #tpu.memory_space<vmem>>, vector<256x512xf32>
    %cst_322 = arith.constant dense<0.000000e+00> : vector<64x512xf32>
    %673 = tpu.matmul %671, %672, %cst_322 {dimension_numbers = #tpu.dot_dimension_numbers<[1], [0], [0], [1], [0, 0, 1, 1], [], []>} : vector<64x256xf32>, vector<256x512xf32>, vector<64x512xf32> -> vector<64x512xf32>
    %c0_323 = arith.constant 0 : index
    %c0_324 = arith.constant 0 : index
    %674 = vector.load %arg7[%c0_323, %c0_324] : memref<1x512xf32, #tpu.memory_space<vmem>>, vector<1x512xf32>
    %675 = vector.broadcast %674 : vector<1x512xf32> to vector<64x512xf32>
    %676 = arith.addf %673, %675 : vector<64x512xf32>
    %c0_325 = arith.constant 0 : index
    %c0_326 = arith.constant 0 : index
    %677 = vector.load %arg15[%c0_325, %c0_326] : memref<64x512xf32, #tpu.memory_space<vmem>>, vector<64x512xf32>
    tpu.vector_store %arg15[%c0_325, %c0_326], %676 {strides = array<i32>} : memref<64x512xf32, #tpu.memory_space<vmem>>, vector<64x512xf32>,
    %c0_327 = arith.constant 0 : index
    %c0_328 = arith.constant 0 : index
    %678 = vector.load %arg8[%c0_327, %c0_328] : memref<128x512xf32, #tpu.memory_space<vmem>>, vector<128x512xf32>
    %c0_i32_329 = arith.constant 0 : i32
    %c8_i32_330 = arith.constant 8 : i32
    %679 = arith.muli %c0_i32_329, %c8_i32_330 : i32
    %680 = tpu.assume_multiple %679, 8 : i32
    %681 = arith.index_cast %680 : i32 to index
    %c0_331 = arith.constant 0 : index
    %682 = vector.load %arg15[%681, %c0_331] : memref<64x512xf32, #tpu.memory_space<vmem>>, vector<8x512xf32>
    %cst_332 = arith.constant dense<0.000000e+00> : vector<8x512xf32>
    %683 = tpu.matmul %230, %678, %cst_332 {dimension_numbers = #tpu.dot_dimension_numbers<[1], [0], [0], [1], [0, 0, 1, 1], [], []>} : vector<8x128xf32>, vector<128x512xf32>, vector<8x512xf32> -> vector<8x512xf32>
    %684 = arith.addf %682, %683 : vector<8x512xf32>
    %c7_i32_333 = arith.constant 7 : i32
    %685 = arith.subi %c7_i32_333, %c0_i32_329 : i32
    %686 = vector.broadcast %c0_i32_329 : i32 to vector<8x128xi32>
    %687 = vector.broadcast %685 : i32 to vector<8x128xi32>
    %688 = arith.select %228, %686, %687 : vector<8x128xi1>, vector<8x128xi32>
    %689 = vector.broadcast %229 : vector<8x1xi32> to vector<8x128xi32>
    %690 = arith.cmpi slt, %688, %689 : vector<8x128xi32>
    %691 = vector.extract_strided_slice %684 {offsets = [0, 0], sizes = [8, 128], strides = [1, 1]} : vector<8x512xf32> to vector<8x128xf32>
    %cst_334 = arith.constant 5.000000e-01 : f32
    %692 = vector.broadcast %cst_334 : f32 to vector<8x128xf32>
    %693 = arith.mulf %692, %691 : vector<8x128xf32>
    %694 = math.tanh %693 : vector<8x128xf32>
    %cst_335 = arith.constant 5.000000e-01 : f32
    %695 = vector.broadcast %cst_335 : f32 to vector<8x128xf32>
    %696 = arith.mulf %695, %694 : vector<8x128xf32>
    %cst_336 = arith.constant 5.000000e-01 : f32
    %697 = vector.broadcast %cst_336 : f32 to vector<8x128xf32>
    %698 = arith.addf %696, %697 : vector<8x128xf32>
    %699 = vector.extract_strided_slice %684 {offsets = [0, 128], sizes = [8, 128], strides = [1, 1]} : vector<8x512xf32> to vector<8x128xf32>
    %cst_337 = arith.constant 5.000000e-01 : f32
    %700 = vector.broadcast %cst_337 : f32 to vector<8x128xf32>
    %701 = arith.mulf %700, %699 : vector<8x128xf32>
    %702 = math.tanh %701 : vector<8x128xf32>
    %cst_338 = arith.constant 5.000000e-01 : f32
    %703 = vector.broadcast %cst_338 : f32 to vector<8x128xf32>
    %704 = arith.mulf %703, %702 : vector<8x128xf32>
    %cst_339 = arith.constant 5.000000e-01 : f32
    %705 = vector.broadcast %cst_339 : f32 to vector<8x128xf32>
    %706 = arith.addf %704, %705 : vector<8x128xf32>
    %707 = vector.extract_strided_slice %684 {offsets = [0, 256], sizes = [8, 128], strides = [1, 1]} : vector<8x512xf32> to vector<8x128xf32>
    %708 = math.tanh %707 : vector<8x128xf32>
    %709 = vector.extract_strided_slice %684 {offsets = [0, 384], sizes = [8, 128], strides = [1, 1]} : vector<8x512xf32> to vector<8x128xf32>
    %cst_340 = arith.constant 5.000000e-01 : f32
    %710 = vector.broadcast %cst_340 : f32 to vector<8x128xf32>
    %711 = arith.mulf %710, %709 : vector<8x128xf32>
    %712 = math.tanh %711 : vector<8x128xf32>
    %cst_341 = arith.constant 5.000000e-01 : f32
    %713 = vector.broadcast %cst_341 : f32 to vector<8x128xf32>
    %714 = arith.mulf %713, %712 : vector<8x128xf32>
    %cst_342 = arith.constant 5.000000e-01 : f32
    %715 = vector.broadcast %cst_342 : f32 to vector<8x128xf32>
    %716 = arith.addf %714, %715 : vector<8x128xf32>
    %717 = arith.mulf %706, %230 : vector<8x128xf32>
    %718 = arith.mulf %698, %708 : vector<8x128xf32>
    %719 = arith.addf %717, %718 : vector<8x128xf32>
    %720 = math.tanh %719 : vector<8x128xf32>
    %721 = arith.mulf %716, %720 : vector<8x128xf32>
    %722 = arith.select %690, %721, %230 : vector<8x128xi1>, vector<8x128xf32>
    %723 = arith.select %690, %719, %230 : vector<8x128xi1>, vector<8x128xf32>
    %c1_i32_343 = arith.constant 1 : i32
    %c8_i32_344 = arith.constant 8 : i32
    %724 = arith.muli %c1_i32_343, %c8_i32_344 : i32
    %725 = tpu.assume_multiple %724, 8 : i32
    %726 = arith.index_cast %725 : i32 to index
    %c0_345 = arith.constant 0 : index
    %727 = vector.load %arg15[%726, %c0_345] : memref<64x512xf32, #tpu.memory_space<vmem>>, vector<8x512xf32>
    %cst_346 = arith.constant dense<0.000000e+00> : vector<8x512xf32>
    %728 = tpu.matmul %722, %678, %cst_346 {dimension_numbers = #tpu.dot_dimension_numbers<[1], [0], [0], [1], [0, 0, 1, 1], [], []>} : vector<8x128xf32>, vector<128x512xf32>, vector<8x512xf32> -> vector<8x512xf32>
    %729 = arith.addf %727, %728 : vector<8x512xf32>
    %c7_i32_347 = arith.constant 7 : i32
    %730 = arith.subi %c7_i32_347, %c1_i32_343 : i32
    %731 = vector.broadcast %c1_i32_343 : i32 to vector<8x128xi32>
    %732 = vector.broadcast %730 : i32 to vector<8x128xi32>
    %733 = arith.select %228, %731, %732 : vector<8x128xi1>, vector<8x128xi32>
    %734 = vector.broadcast %229 : vector<8x1xi32> to vector<8x128xi32>
    %735 = arith.cmpi slt, %733, %734 : vector<8x128xi32>
    %736 = vector.extract_strided_slice %729 {offsets = [0, 0], sizes = [8, 128], strides = [1, 1]} : vector<8x512xf32> to vector<8x128xf32>
    %cst_348 = arith.constant 5.000000e-01 : f32
    %737 = vector.broadcast %cst_348 : f32 to vector<8x128xf32>
    %738 = arith.mulf %737, %736 : vector<8x128xf32>
    %739 = math.tanh %738 : vector<8x128xf32>
    %cst_349 = arith.constant 5.000000e-01 : f32
    %740 = vector.broadcast %cst_349 : f32 to vector<8x128xf32>
    %741 = arith.mulf %740, %739 : vector<8x128xf32>
    %cst_350 = arith.constant 5.000000e-01 : f32
    %742 = vector.broadcast %cst_350 : f32 to vector<8x128xf32>
    %743 = arith.addf %741, %742 : vector<8x128xf32>
    %744 = vector.extract_strided_slice %729 {offsets = [0, 128], sizes = [8, 128], strides = [1, 1]} : vector<8x512xf32> to vector<8x128xf32>
    %cst_351 = arith.constant 5.000000e-01 : f32
    %745 = vector.broadcast %cst_351 : f32 to vector<8x128xf32>
    %746 = arith.mulf %745, %744 : vector<8x128xf32>
    %747 = math.tanh %746 : vector<8x128xf32>
    %cst_352 = arith.constant 5.000000e-01 : f32
    %748 = vector.broadcast %cst_352 : f32 to vector<8x128xf32>
    %749 = arith.mulf %748, %747 : vector<8x128xf32>
    %cst_353 = arith.constant 5.000000e-01 : f32
    %750 = vector.broadcast %cst_353 : f32 to vector<8x128xf32>
    %751 = arith.addf %749, %750 : vector<8x128xf32>
    %752 = vector.extract_strided_slice %729 {offsets = [0, 256], sizes = [8, 128], strides = [1, 1]} : vector<8x512xf32> to vector<8x128xf32>
    %753 = math.tanh %752 : vector<8x128xf32>
    %754 = vector.extract_strided_slice %729 {offsets = [0, 384], sizes = [8, 128], strides = [1, 1]} : vector<8x512xf32> to vector<8x128xf32>
    %cst_354 = arith.constant 5.000000e-01 : f32
    %755 = vector.broadcast %cst_354 : f32 to vector<8x128xf32>
    %756 = arith.mulf %755, %754 : vector<8x128xf32>
    %757 = math.tanh %756 : vector<8x128xf32>
    %cst_355 = arith.constant 5.000000e-01 : f32
    %758 = vector.broadcast %cst_355 : f32 to vector<8x128xf32>
    %759 = arith.mulf %758, %757 : vector<8x128xf32>
    %cst_356 = arith.constant 5.000000e-01 : f32
    %760 = vector.broadcast %cst_356 : f32 to vector<8x128xf32>
    %761 = arith.addf %759, %760 : vector<8x128xf32>
    %762 = arith.mulf %751, %723 : vector<8x128xf32>
    %763 = arith.mulf %743, %753 : vector<8x128xf32>
    %764 = arith.addf %762, %763 : vector<8x128xf32>
    %765 = math.tanh %764 : vector<8x128xf32>
    %766 = arith.mulf %761, %765 : vector<8x128xf32>
    %767 = arith.select %735, %766, %722 : vector<8x128xi1>, vector<8x128xf32>
    %768 = arith.select %735, %764, %723 : vector<8x128xi1>, vector<8x128xf32>
    %c2_i32_357 = arith.constant 2 : i32
    %c8_i32_358 = arith.constant 8 : i32
    %769 = arith.muli %c2_i32_357, %c8_i32_358 : i32
    %770 = tpu.assume_multiple %769, 8 : i32
    %771 = arith.index_cast %770 : i32 to index
    %c0_359 = arith.constant 0 : index
    %772 = vector.load %arg15[%771, %c0_359] : memref<64x512xf32, #tpu.memory_space<vmem>>, vector<8x512xf32>
    %cst_360 = arith.constant dense<0.000000e+00> : vector<8x512xf32>
    %773 = tpu.matmul %767, %678, %cst_360 {dimension_numbers = #tpu.dot_dimension_numbers<[1], [0], [0], [1], [0, 0, 1, 1], [], []>} : vector<8x128xf32>, vector<128x512xf32>, vector<8x512xf32> -> vector<8x512xf32>
    %774 = arith.addf %772, %773 : vector<8x512xf32>
    %c7_i32_361 = arith.constant 7 : i32
    %775 = arith.subi %c7_i32_361, %c2_i32_357 : i32
    %776 = vector.broadcast %c2_i32_357 : i32 to vector<8x128xi32>
    %777 = vector.broadcast %775 : i32 to vector<8x128xi32>
    %778 = arith.select %228, %776, %777 : vector<8x128xi1>, vector<8x128xi32>
    %779 = vector.broadcast %229 : vector<8x1xi32> to vector<8x128xi32>
    %780 = arith.cmpi slt, %778, %779 : vector<8x128xi32>
    %781 = vector.extract_strided_slice %774 {offsets = [0, 0], sizes = [8, 128], strides = [1, 1]} : vector<8x512xf32> to vector<8x128xf32>
    %cst_362 = arith.constant 5.000000e-01 : f32
    %782 = vector.broadcast %cst_362 : f32 to vector<8x128xf32>
    %783 = arith.mulf %782, %781 : vector<8x128xf32>
    %784 = math.tanh %783 : vector<8x128xf32>
    %cst_363 = arith.constant 5.000000e-01 : f32
    %785 = vector.broadcast %cst_363 : f32 to vector<8x128xf32>
    %786 = arith.mulf %785, %784 : vector<8x128xf32>
    %cst_364 = arith.constant 5.000000e-01 : f32
    %787 = vector.broadcast %cst_364 : f32 to vector<8x128xf32>
    %788 = arith.addf %786, %787 : vector<8x128xf32>
    %789 = vector.extract_strided_slice %774 {offsets = [0, 128], sizes = [8, 128], strides = [1, 1]} : vector<8x512xf32> to vector<8x128xf32>
    %cst_365 = arith.constant 5.000000e-01 : f32
    %790 = vector.broadcast %cst_365 : f32 to vector<8x128xf32>
    %791 = arith.mulf %790, %789 : vector<8x128xf32>
    %792 = math.tanh %791 : vector<8x128xf32>
    %cst_366 = arith.constant 5.000000e-01 : f32
    %793 = vector.broadcast %cst_366 : f32 to vector<8x128xf32>
    %794 = arith.mulf %793, %792 : vector<8x128xf32>
    %cst_367 = arith.constant 5.000000e-01 : f32
    %795 = vector.broadcast %cst_367 : f32 to vector<8x128xf32>
    %796 = arith.addf %794, %795 : vector<8x128xf32>
    %797 = vector.extract_strided_slice %774 {offsets = [0, 256], sizes = [8, 128], strides = [1, 1]} : vector<8x512xf32> to vector<8x128xf32>
    %798 = math.tanh %797 : vector<8x128xf32>
    %799 = vector.extract_strided_slice %774 {offsets = [0, 384], sizes = [8, 128], strides = [1, 1]} : vector<8x512xf32> to vector<8x128xf32>
    %cst_368 = arith.constant 5.000000e-01 : f32
    %800 = vector.broadcast %cst_368 : f32 to vector<8x128xf32>
    %801 = arith.mulf %800, %799 : vector<8x128xf32>
    %802 = math.tanh %801 : vector<8x128xf32>
    %cst_369 = arith.constant 5.000000e-01 : f32
    %803 = vector.broadcast %cst_369 : f32 to vector<8x128xf32>
    %804 = arith.mulf %803, %802 : vector<8x128xf32>
    %cst_370 = arith.constant 5.000000e-01 : f32
    %805 = vector.broadcast %cst_370 : f32 to vector<8x128xf32>
    %806 = arith.addf %804, %805 : vector<8x128xf32>
    %807 = arith.mulf %796, %768 : vector<8x128xf32>
    %808 = arith.mulf %788, %798 : vector<8x128xf32>
    %809 = arith.addf %807, %808 : vector<8x128xf32>
    %810 = math.tanh %809 : vector<8x128xf32>
    %811 = arith.mulf %806, %810 : vector<8x128xf32>
    %812 = arith.select %780, %811, %767 : vector<8x128xi1>, vector<8x128xf32>
    %813 = arith.select %780, %809, %768 : vector<8x128xi1>, vector<8x128xf32>
    %c3_i32_371 = arith.constant 3 : i32
    %c8_i32_372 = arith.constant 8 : i32
    %814 = arith.muli %c3_i32_371, %c8_i32_372 : i32
    %815 = tpu.assume_multiple %814, 8 : i32
    %816 = arith.index_cast %815 : i32 to index
    %c0_373 = arith.constant 0 : index
    %817 = vector.load %arg15[%816, %c0_373] : memref<64x512xf32, #tpu.memory_space<vmem>>, vector<8x512xf32>
    %cst_374 = arith.constant dense<0.000000e+00> : vector<8x512xf32>
    %818 = tpu.matmul %812, %678, %cst_374 {dimension_numbers = #tpu.dot_dimension_numbers<[1], [0], [0], [1], [0, 0, 1, 1], [], []>} : vector<8x128xf32>, vector<128x512xf32>, vector<8x512xf32> -> vector<8x512xf32>
    %819 = arith.addf %817, %818 : vector<8x512xf32>
    %c7_i32_375 = arith.constant 7 : i32
    %820 = arith.subi %c7_i32_375, %c3_i32_371 : i32
    %821 = vector.broadcast %c3_i32_371 : i32 to vector<8x128xi32>
    %822 = vector.broadcast %820 : i32 to vector<8x128xi32>
    %823 = arith.select %228, %821, %822 : vector<8x128xi1>, vector<8x128xi32>
    %824 = vector.broadcast %229 : vector<8x1xi32> to vector<8x128xi32>
    %825 = arith.cmpi slt, %823, %824 : vector<8x128xi32>
    %826 = vector.extract_strided_slice %819 {offsets = [0, 0], sizes = [8, 128], strides = [1, 1]} : vector<8x512xf32> to vector<8x128xf32>
    %cst_376 = arith.constant 5.000000e-01 : f32
    %827 = vector.broadcast %cst_376 : f32 to vector<8x128xf32>
    %828 = arith.mulf %827, %826 : vector<8x128xf32>
    %829 = math.tanh %828 : vector<8x128xf32>
    %cst_377 = arith.constant 5.000000e-01 : f32
    %830 = vector.broadcast %cst_377 : f32 to vector<8x128xf32>
    %831 = arith.mulf %830, %829 : vector<8x128xf32>
    %cst_378 = arith.constant 5.000000e-01 : f32
    %832 = vector.broadcast %cst_378 : f32 to vector<8x128xf32>
    %833 = arith.addf %831, %832 : vector<8x128xf32>
    %834 = vector.extract_strided_slice %819 {offsets = [0, 128], sizes = [8, 128], strides = [1, 1]} : vector<8x512xf32> to vector<8x128xf32>
    %cst_379 = arith.constant 5.000000e-01 : f32
    %835 = vector.broadcast %cst_379 : f32 to vector<8x128xf32>
    %836 = arith.mulf %835, %834 : vector<8x128xf32>
    %837 = math.tanh %836 : vector<8x128xf32>
    %cst_380 = arith.constant 5.000000e-01 : f32
    %838 = vector.broadcast %cst_380 : f32 to vector<8x128xf32>
    %839 = arith.mulf %838, %837 : vector<8x128xf32>
    %cst_381 = arith.constant 5.000000e-01 : f32
    %840 = vector.broadcast %cst_381 : f32 to vector<8x128xf32>
    %841 = arith.addf %839, %840 : vector<8x128xf32>
    %842 = vector.extract_strided_slice %819 {offsets = [0, 256], sizes = [8, 128], strides = [1, 1]} : vector<8x512xf32> to vector<8x128xf32>
    %843 = math.tanh %842 : vector<8x128xf32>
    %844 = vector.extract_strided_slice %819 {offsets = [0, 384], sizes = [8, 128], strides = [1, 1]} : vector<8x512xf32> to vector<8x128xf32>
    %cst_382 = arith.constant 5.000000e-01 : f32
    %845 = vector.broadcast %cst_382 : f32 to vector<8x128xf32>
    %846 = arith.mulf %845, %844 : vector<8x128xf32>
    %847 = math.tanh %846 : vector<8x128xf32>
    %cst_383 = arith.constant 5.000000e-01 : f32
    %848 = vector.broadcast %cst_383 : f32 to vector<8x128xf32>
    %849 = arith.mulf %848, %847 : vector<8x128xf32>
    %cst_384 = arith.constant 5.000000e-01 : f32
    %850 = vector.broadcast %cst_384 : f32 to vector<8x128xf32>
    %851 = arith.addf %849, %850 : vector<8x128xf32>
    %852 = arith.mulf %841, %813 : vector<8x128xf32>
    %853 = arith.mulf %833, %843 : vector<8x128xf32>
    %854 = arith.addf %852, %853 : vector<8x128xf32>
    %855 = math.tanh %854 : vector<8x128xf32>
    %856 = arith.mulf %851, %855 : vector<8x128xf32>
    %857 = arith.select %825, %856, %812 : vector<8x128xi1>, vector<8x128xf32>
    %858 = arith.select %825, %854, %813 : vector<8x128xi1>, vector<8x128xf32>
    %c4_i32_385 = arith.constant 4 : i32
    %c8_i32_386 = arith.constant 8 : i32
    %859 = arith.muli %c4_i32_385, %c8_i32_386 : i32
    %860 = tpu.assume_multiple %859, 8 : i32
    %861 = arith.index_cast %860 : i32 to index
    %c0_387 = arith.constant 0 : index
    %862 = vector.load %arg15[%861, %c0_387] : memref<64x512xf32, #tpu.memory_space<vmem>>, vector<8x512xf32>
    %cst_388 = arith.constant dense<0.000000e+00> : vector<8x512xf32>
    %863 = tpu.matmul %857, %678, %cst_388 {dimension_numbers = #tpu.dot_dimension_numbers<[1], [0], [0], [1], [0, 0, 1, 1], [], []>} : vector<8x128xf32>, vector<128x512xf32>, vector<8x512xf32> -> vector<8x512xf32>
    %864 = arith.addf %862, %863 : vector<8x512xf32>
    %c7_i32_389 = arith.constant 7 : i32
    %865 = arith.subi %c7_i32_389, %c4_i32_385 : i32
    %866 = vector.broadcast %c4_i32_385 : i32 to vector<8x128xi32>
    %867 = vector.broadcast %865 : i32 to vector<8x128xi32>
    %868 = arith.select %228, %866, %867 : vector<8x128xi1>, vector<8x128xi32>
    %869 = vector.broadcast %229 : vector<8x1xi32> to vector<8x128xi32>
    %870 = arith.cmpi slt, %868, %869 : vector<8x128xi32>
    %871 = vector.extract_strided_slice %864 {offsets = [0, 0], sizes = [8, 128], strides = [1, 1]} : vector<8x512xf32> to vector<8x128xf32>
    %cst_390 = arith.constant 5.000000e-01 : f32
    %872 = vector.broadcast %cst_390 : f32 to vector<8x128xf32>
    %873 = arith.mulf %872, %871 : vector<8x128xf32>
    %874 = math.tanh %873 : vector<8x128xf32>
    %cst_391 = arith.constant 5.000000e-01 : f32
    %875 = vector.broadcast %cst_391 : f32 to vector<8x128xf32>
    %876 = arith.mulf %875, %874 : vector<8x128xf32>
    %cst_392 = arith.constant 5.000000e-01 : f32
    %877 = vector.broadcast %cst_392 : f32 to vector<8x128xf32>
    %878 = arith.addf %876, %877 : vector<8x128xf32>
    %879 = vector.extract_strided_slice %864 {offsets = [0, 128], sizes = [8, 128], strides = [1, 1]} : vector<8x512xf32> to vector<8x128xf32>
    %cst_393 = arith.constant 5.000000e-01 : f32
    %880 = vector.broadcast %cst_393 : f32 to vector<8x128xf32>
    %881 = arith.mulf %880, %879 : vector<8x128xf32>
    %882 = math.tanh %881 : vector<8x128xf32>
    %cst_394 = arith.constant 5.000000e-01 : f32
    %883 = vector.broadcast %cst_394 : f32 to vector<8x128xf32>
    %884 = arith.mulf %883, %882 : vector<8x128xf32>
    %cst_395 = arith.constant 5.000000e-01 : f32
    %885 = vector.broadcast %cst_395 : f32 to vector<8x128xf32>
    %886 = arith.addf %884, %885 : vector<8x128xf32>
    %887 = vector.extract_strided_slice %864 {offsets = [0, 256], sizes = [8, 128], strides = [1, 1]} : vector<8x512xf32> to vector<8x128xf32>
    %888 = math.tanh %887 : vector<8x128xf32>
    %889 = vector.extract_strided_slice %864 {offsets = [0, 384], sizes = [8, 128], strides = [1, 1]} : vector<8x512xf32> to vector<8x128xf32>
    %cst_396 = arith.constant 5.000000e-01 : f32
    %890 = vector.broadcast %cst_396 : f32 to vector<8x128xf32>
    %891 = arith.mulf %890, %889 : vector<8x128xf32>
    %892 = math.tanh %891 : vector<8x128xf32>
    %cst_397 = arith.constant 5.000000e-01 : f32
    %893 = vector.broadcast %cst_397 : f32 to vector<8x128xf32>
    %894 = arith.mulf %893, %892 : vector<8x128xf32>
    %cst_398 = arith.constant 5.000000e-01 : f32
    %895 = vector.broadcast %cst_398 : f32 to vector<8x128xf32>
    %896 = arith.addf %894, %895 : vector<8x128xf32>
    %897 = arith.mulf %886, %858 : vector<8x128xf32>
    %898 = arith.mulf %878, %888 : vector<8x128xf32>
    %899 = arith.addf %897, %898 : vector<8x128xf32>
    %900 = math.tanh %899 : vector<8x128xf32>
    %901 = arith.mulf %896, %900 : vector<8x128xf32>
    %902 = arith.select %870, %901, %857 : vector<8x128xi1>, vector<8x128xf32>
    %903 = arith.select %870, %899, %858 : vector<8x128xi1>, vector<8x128xf32>
    %c5_i32_399 = arith.constant 5 : i32
    %c8_i32_400 = arith.constant 8 : i32
    %904 = arith.muli %c5_i32_399, %c8_i32_400 : i32
    %905 = tpu.assume_multiple %904, 8 : i32
    %906 = arith.index_cast %905 : i32 to index
    %c0_401 = arith.constant 0 : index
    %907 = vector.load %arg15[%906, %c0_401] : memref<64x512xf32, #tpu.memory_space<vmem>>, vector<8x512xf32>
    %cst_402 = arith.constant dense<0.000000e+00> : vector<8x512xf32>
    %908 = tpu.matmul %902, %678, %cst_402 {dimension_numbers = #tpu.dot_dimension_numbers<[1], [0], [0], [1], [0, 0, 1, 1], [], []>} : vector<8x128xf32>, vector<128x512xf32>, vector<8x512xf32> -> vector<8x512xf32>
    %909 = arith.addf %907, %908 : vector<8x512xf32>
    %c7_i32_403 = arith.constant 7 : i32
    %910 = arith.subi %c7_i32_403, %c5_i32_399 : i32
    %911 = vector.broadcast %c5_i32_399 : i32 to vector<8x128xi32>
    %912 = vector.broadcast %910 : i32 to vector<8x128xi32>
    %913 = arith.select %228, %911, %912 : vector<8x128xi1>, vector<8x128xi32>
    %914 = vector.broadcast %229 : vector<8x1xi32> to vector<8x128xi32>
    %915 = arith.cmpi slt, %913, %914 : vector<8x128xi32>
    %916 = vector.extract_strided_slice %909 {offsets = [0, 0], sizes = [8, 128], strides = [1, 1]} : vector<8x512xf32> to vector<8x128xf32>
    %cst_404 = arith.constant 5.000000e-01 : f32
    %917 = vector.broadcast %cst_404 : f32 to vector<8x128xf32>
    %918 = arith.mulf %917, %916 : vector<8x128xf32>
    %919 = math.tanh %918 : vector<8x128xf32>
    %cst_405 = arith.constant 5.000000e-01 : f32
    %920 = vector.broadcast %cst_405 : f32 to vector<8x128xf32>
    %921 = arith.mulf %920, %919 : vector<8x128xf32>
    %cst_406 = arith.constant 5.000000e-01 : f32
    %922 = vector.broadcast %cst_406 : f32 to vector<8x128xf32>
    %923 = arith.addf %921, %922 : vector<8x128xf32>
    %924 = vector.extract_strided_slice %909 {offsets = [0, 128], sizes = [8, 128], strides = [1, 1]} : vector<8x512xf32> to vector<8x128xf32>
    %cst_407 = arith.constant 5.000000e-01 : f32
    %925 = vector.broadcast %cst_407 : f32 to vector<8x128xf32>
    %926 = arith.mulf %925, %924 : vector<8x128xf32>
    %927 = math.tanh %926 : vector<8x128xf32>
    %cst_408 = arith.constant 5.000000e-01 : f32
    %928 = vector.broadcast %cst_408 : f32 to vector<8x128xf32>
    %929 = arith.mulf %928, %927 : vector<8x128xf32>
    %cst_409 = arith.constant 5.000000e-01 : f32
    %930 = vector.broadcast %cst_409 : f32 to vector<8x128xf32>
    %931 = arith.addf %929, %930 : vector<8x128xf32>
    %932 = vector.extract_strided_slice %909 {offsets = [0, 256], sizes = [8, 128], strides = [1, 1]} : vector<8x512xf32> to vector<8x128xf32>
    %933 = math.tanh %932 : vector<8x128xf32>
    %934 = vector.extract_strided_slice %909 {offsets = [0, 384], sizes = [8, 128], strides = [1, 1]} : vector<8x512xf32> to vector<8x128xf32>
    %cst_410 = arith.constant 5.000000e-01 : f32
    %935 = vector.broadcast %cst_410 : f32 to vector<8x128xf32>
    %936 = arith.mulf %935, %934 : vector<8x128xf32>
    %937 = math.tanh %936 : vector<8x128xf32>
    %cst_411 = arith.constant 5.000000e-01 : f32
    %938 = vector.broadcast %cst_411 : f32 to vector<8x128xf32>
    %939 = arith.mulf %938, %937 : vector<8x128xf32>
    %cst_412 = arith.constant 5.000000e-01 : f32
    %940 = vector.broadcast %cst_412 : f32 to vector<8x128xf32>
    %941 = arith.addf %939, %940 : vector<8x128xf32>
    %942 = arith.mulf %931, %903 : vector<8x128xf32>
    %943 = arith.mulf %923, %933 : vector<8x128xf32>
    %944 = arith.addf %942, %943 : vector<8x128xf32>
    %945 = math.tanh %944 : vector<8x128xf32>
    %946 = arith.mulf %941, %945 : vector<8x128xf32>
    %947 = arith.select %915, %946, %902 : vector<8x128xi1>, vector<8x128xf32>
    %948 = arith.select %915, %944, %903 : vector<8x128xi1>, vector<8x128xf32>
    %c6_i32_413 = arith.constant 6 : i32
    %c8_i32_414 = arith.constant 8 : i32
    %949 = arith.muli %c6_i32_413, %c8_i32_414 : i32
    %950 = tpu.assume_multiple %949, 8 : i32
    %951 = arith.index_cast %950 : i32 to index
    %c0_415 = arith.constant 0 : index
    %952 = vector.load %arg15[%951, %c0_415] : memref<64x512xf32, #tpu.memory_space<vmem>>, vector<8x512xf32>
    %cst_416 = arith.constant dense<0.000000e+00> : vector<8x512xf32>
    %953 = tpu.matmul %947, %678, %cst_416 {dimension_numbers = #tpu.dot_dimension_numbers<[1], [0], [0], [1], [0, 0, 1, 1], [], []>} : vector<8x128xf32>, vector<128x512xf32>, vector<8x512xf32> -> vector<8x512xf32>
    %954 = arith.addf %952, %953 : vector<8x512xf32>
    %c7_i32_417 = arith.constant 7 : i32
    %955 = arith.subi %c7_i32_417, %c6_i32_413 : i32
    %956 = vector.broadcast %c6_i32_413 : i32 to vector<8x128xi32>
    %957 = vector.broadcast %955 : i32 to vector<8x128xi32>
    %958 = arith.select %228, %956, %957 : vector<8x128xi1>, vector<8x128xi32>
    %959 = vector.broadcast %229 : vector<8x1xi32> to vector<8x128xi32>
    %960 = arith.cmpi slt, %958, %959 : vector<8x128xi32>
    %961 = vector.extract_strided_slice %954 {offsets = [0, 0], sizes = [8, 128], strides = [1, 1]} : vector<8x512xf32> to vector<8x128xf32>
    %cst_418 = arith.constant 5.000000e-01 : f32
    %962 = vector.broadcast %cst_418 : f32 to vector<8x128xf32>
    %963 = arith.mulf %962, %961 : vector<8x128xf32>
    %964 = math.tanh %963 : vector<8x128xf32>
    %cst_419 = arith.constant 5.000000e-01 : f32
    %965 = vector.broadcast %cst_419 : f32 to vector<8x128xf32>
    %966 = arith.mulf %965, %964 : vector<8x128xf32>
    %cst_420 = arith.constant 5.000000e-01 : f32
    %967 = vector.broadcast %cst_420 : f32 to vector<8x128xf32>
    %968 = arith.addf %966, %967 : vector<8x128xf32>
    %969 = vector.extract_strided_slice %954 {offsets = [0, 128], sizes = [8, 128], strides = [1, 1]} : vector<8x512xf32> to vector<8x128xf32>
    %cst_421 = arith.constant 5.000000e-01 : f32
    %970 = vector.broadcast %cst_421 : f32 to vector<8x128xf32>
    %971 = arith.mulf %970, %969 : vector<8x128xf32>
    %972 = math.tanh %971 : vector<8x128xf32>
    %cst_422 = arith.constant 5.000000e-01 : f32
    %973 = vector.broadcast %cst_422 : f32 to vector<8x128xf32>
    %974 = arith.mulf %973, %972 : vector<8x128xf32>
    %cst_423 = arith.constant 5.000000e-01 : f32
    %975 = vector.broadcast %cst_423 : f32 to vector<8x128xf32>
    %976 = arith.addf %974, %975 : vector<8x128xf32>
    %977 = vector.extract_strided_slice %954 {offsets = [0, 256], sizes = [8, 128], strides = [1, 1]} : vector<8x512xf32> to vector<8x128xf32>
    %978 = math.tanh %977 : vector<8x128xf32>
    %979 = vector.extract_strided_slice %954 {offsets = [0, 384], sizes = [8, 128], strides = [1, 1]} : vector<8x512xf32> to vector<8x128xf32>
    %cst_424 = arith.constant 5.000000e-01 : f32
    %980 = vector.broadcast %cst_424 : f32 to vector<8x128xf32>
    %981 = arith.mulf %980, %979 : vector<8x128xf32>
    %982 = math.tanh %981 : vector<8x128xf32>
    %cst_425 = arith.constant 5.000000e-01 : f32
    %983 = vector.broadcast %cst_425 : f32 to vector<8x128xf32>
    %984 = arith.mulf %983, %982 : vector<8x128xf32>
    %cst_426 = arith.constant 5.000000e-01 : f32
    %985 = vector.broadcast %cst_426 : f32 to vector<8x128xf32>
    %986 = arith.addf %984, %985 : vector<8x128xf32>
    %987 = arith.mulf %976, %948 : vector<8x128xf32>
    %988 = arith.mulf %968, %978 : vector<8x128xf32>
    %989 = arith.addf %987, %988 : vector<8x128xf32>
    %990 = math.tanh %989 : vector<8x128xf32>
    %991 = arith.mulf %986, %990 : vector<8x128xf32>
    %992 = arith.select %960, %991, %947 : vector<8x128xi1>, vector<8x128xf32>
    %993 = arith.select %960, %989, %948 : vector<8x128xi1>, vector<8x128xf32>
    %c7_i32_427 = arith.constant 7 : i32
    %c8_i32_428 = arith.constant 8 : i32
    %994 = arith.muli %c7_i32_427, %c8_i32_428 : i32
    %995 = tpu.assume_multiple %994, 8 : i32
    %996 = arith.index_cast %995 : i32 to index
    %c0_429 = arith.constant 0 : index
    %997 = vector.load %arg15[%996, %c0_429] : memref<64x512xf32, #tpu.memory_space<vmem>>, vector<8x512xf32>
    %cst_430 = arith.constant dense<0.000000e+00> : vector<8x512xf32>
    %998 = tpu.matmul %992, %678, %cst_430 {dimension_numbers = #tpu.dot_dimension_numbers<[1], [0], [0], [1], [0, 0, 1, 1], [], []>} : vector<8x128xf32>, vector<128x512xf32>, vector<8x512xf32> -> vector<8x512xf32>
    %999 = arith.addf %997, %998 : vector<8x512xf32>
    %c7_i32_431 = arith.constant 7 : i32
    %1000 = arith.subi %c7_i32_431, %c7_i32_427 : i32
    %1001 = vector.broadcast %c7_i32_427 : i32 to vector<8x128xi32>
    %1002 = vector.broadcast %1000 : i32 to vector<8x128xi32>
    %1003 = arith.select %228, %1001, %1002 : vector<8x128xi1>, vector<8x128xi32>
    %1004 = vector.broadcast %229 : vector<8x1xi32> to vector<8x128xi32>
    %1005 = arith.cmpi slt, %1003, %1004 : vector<8x128xi32>
    %1006 = vector.extract_strided_slice %999 {offsets = [0, 0], sizes = [8, 128], strides = [1, 1]} : vector<8x512xf32> to vector<8x128xf32>
    %cst_432 = arith.constant 5.000000e-01 : f32
    %1007 = vector.broadcast %cst_432 : f32 to vector<8x128xf32>
    %1008 = arith.mulf %1007, %1006 : vector<8x128xf32>
    %1009 = math.tanh %1008 : vector<8x128xf32>
    %cst_433 = arith.constant 5.000000e-01 : f32
    %1010 = vector.broadcast %cst_433 : f32 to vector<8x128xf32>
    %1011 = arith.mulf %1010, %1009 : vector<8x128xf32>
    %cst_434 = arith.constant 5.000000e-01 : f32
    %1012 = vector.broadcast %cst_434 : f32 to vector<8x128xf32>
    %1013 = arith.addf %1011, %1012 : vector<8x128xf32>
    %1014 = vector.extract_strided_slice %999 {offsets = [0, 128], sizes = [8, 128], strides = [1, 1]} : vector<8x512xf32> to vector<8x128xf32>
    %cst_435 = arith.constant 5.000000e-01 : f32
    %1015 = vector.broadcast %cst_435 : f32 to vector<8x128xf32>
    %1016 = arith.mulf %1015, %1014 : vector<8x128xf32>
    %1017 = math.tanh %1016 : vector<8x128xf32>
    %cst_436 = arith.constant 5.000000e-01 : f32
    %1018 = vector.broadcast %cst_436 : f32 to vector<8x128xf32>
    %1019 = arith.mulf %1018, %1017 : vector<8x128xf32>
    %cst_437 = arith.constant 5.000000e-01 : f32
    %1020 = vector.broadcast %cst_437 : f32 to vector<8x128xf32>
    %1021 = arith.addf %1019, %1020 : vector<8x128xf32>
    %1022 = vector.extract_strided_slice %999 {offsets = [0, 256], sizes = [8, 128], strides = [1, 1]} : vector<8x512xf32> to vector<8x128xf32>
    %1023 = math.tanh %1022 : vector<8x128xf32>
    %1024 = vector.extract_strided_slice %999 {offsets = [0, 384], sizes = [8, 128], strides = [1, 1]} : vector<8x512xf32> to vector<8x128xf32>
    %cst_438 = arith.constant 5.000000e-01 : f32
    %1025 = vector.broadcast %cst_438 : f32 to vector<8x128xf32>
    %1026 = arith.mulf %1025, %1024 : vector<8x128xf32>
    %1027 = math.tanh %1026 : vector<8x128xf32>
    %cst_439 = arith.constant 5.000000e-01 : f32
    %1028 = vector.broadcast %cst_439 : f32 to vector<8x128xf32>
    %1029 = arith.mulf %1028, %1027 : vector<8x128xf32>
    %cst_440 = arith.constant 5.000000e-01 : f32
    %1030 = vector.broadcast %cst_440 : f32 to vector<8x128xf32>
    %1031 = arith.addf %1029, %1030 : vector<8x128xf32>
    %1032 = arith.mulf %1021, %993 : vector<8x128xf32>
    %1033 = arith.mulf %1013, %1023 : vector<8x128xf32>
    %1034 = arith.addf %1032, %1033 : vector<8x128xf32>
    %1035 = math.tanh %1034 : vector<8x128xf32>
    %1036 = arith.mulf %1031, %1035 : vector<8x128xf32>
    %1037 = arith.select %1005, %1036, %992 : vector<8x128xi1>, vector<8x128xf32>
    %1038 = arith.select %1005, %1034, %993 : vector<8x128xi1>, vector<8x128xf32>
    %c8_i32_441 = arith.constant 8 : i32
    %c0_442 = arith.constant 0 : index
    %c0_443 = arith.constant 0 : index
    %1039 = vector.load %arg9[%c0_442, %c0_443] : memref<128x1xf32, #tpu.memory_space<vmem>>, vector<128x1xf32>
    %cst_444 = arith.constant dense<0.000000e+00> : vector<8x1xf32>
    %1040 = tpu.matmul %1037, %1039, %cst_444 {dimension_numbers = #tpu.dot_dimension_numbers<[1], [0], [0], [1], [0, 0, 1, 1], [], []>} : vector<8x128xf32>, vector<128x1xf32>, vector<8x1xf32> -> vector<8x1xf32>
    %c0_445 = arith.constant 0 : index
    %c0_446 = arith.constant 0 : index
    %1041 = vector.load %arg10[%c0_445, %c0_446] : memref<1x1xf32, #tpu.memory_space<vmem>>, vector<1x1xf32>
    %1042 = vector.broadcast %1041 : vector<1x1xf32> to vector<8x1xf32>
    %1043 = arith.addf %1040, %1042 : vector<8x1xf32>
    %cst_447 = arith.constant 5.000000e-01 : f32
    %1044 = vector.broadcast %cst_447 : f32 to vector<8x1xf32>
    %1045 = arith.mulf %1044, %1043 : vector<8x1xf32>
    %1046 = math.tanh %1045 : vector<8x1xf32>
    %cst_448 = arith.constant 5.000000e-01 : f32
    %1047 = vector.broadcast %cst_448 : f32 to vector<8x1xf32>
    %1048 = arith.mulf %1047, %1046 : vector<8x1xf32>
    %cst_449 = arith.constant 5.000000e-01 : f32
    %1049 = vector.broadcast %cst_449 : f32 to vector<8x1xf32>
    %1050 = arith.addf %1048, %1049 : vector<8x1xf32>
    %c0_450 = arith.constant 0 : index
    %c0_451 = arith.constant 0 : index
    %1051 = vector.load %arg11[%c0_450, %c0_451] : memref<8x1xf32, #tpu.memory_space<vmem>>, vector<8x1xf32>
    tpu.vector_store %arg11[%c0_450, %c0_451], %1050 {strides = array<i32>} : memref<8x1xf32, #tpu.memory_space<vmem>>, vector<8x1xf32>,
    return
  }
}

</mosaic_0001>

<bundles_post_ra>
// kernel: lstm_net_forward.1
= control target key start
LH: loop header
LB: loop body
LE: loop exit
PB: predicated region body
PF: predicated region fallthrough
CT: control target
= control target key end

     0   :  { %s8445_s0 = inlined_call_operand.vmem [shape: s32[2,8], index: 0, kind: input, shape index: {}]   ;;  %s8446_s1 = inlined_call_operand.vmem [shape: s32[8,1], index: 1, kind: input, shape index: {}]   ;;  %s8447_s2 = inlined_call_operand.hbm [shape: f32[1000,128], index: 2, kind: input, shape index: {}]   ;;  %s8448_s3 = inlined_call_operand.hbm [shape: f32[256,512], index: 3, kind: input, shape index: {}]   ;;  %s8449_s4 = inlined_call_operand.vmem [shape: f32[1,512], index: 4, kind: input, shape index: {}]   ;;  %s8450_s5 = inlined_call_operand.hbm [shape: f32[128,512], index: 5, kind: input, shape index: {}]   ;;  %s8451_s6 = inlined_call_operand.hbm [shape: f32[256,512], index: 6, kind: input, shape index: {}]   ;;  %s8452_s7 = inlined_call_operand.vmem [shape: f32[1,512], index: 7, kind: input, shape index: {}]   ;;  %s8453_s8 = inlined_call_operand.hbm [shape: f32[128,512], index: 8, kind: input, shape index: {}]   ;;  %s8454_s9 = inlined_call_operand.vmem [shape: f32[128,1], index: 9, kind: input, shape index: {}]   ;;  %s8455_s10 = inlined_call_operand.<no memory space> [shape: f32[1,1], index: 10, kind: input, shape index: {}]   ;;  %s8456_s11 = inlined_call_operand.vmem [shape: f32[8,1], index: 11, kind: output, shape index: {}]  }
   0x1   :  { %v16_v0 = vstv %s8455_s10 }
   0x2   :  { %17 = vst [vmem:[#allocation7] sm:$0x1] %v16_v0 }
   0x3   :  { %18 = vsyncpa [#allocation10], 0 }
   0x4   :  { %19 = vsyncpa [#allocation9], 0 }
   0x5   :  { %20 = vsyncpa [#allocation13], 0 }
   0x6   :  { %21 = vsyncpa [#allocation16], 0  ;;  %s28_s21 = sshll.u32 %s8445_s0, 4  ;;  %s6764_s22 = smov [#allocation12]   ;;  %s29_s21 = int_to_ptr.vmem [resolvable:$true] %s28_s21 }
   0x7   :  { %s53_s23 = sshll.u32 %s6764_s22, 4  ;;  %s6240_s26 = scalar_lea.hbm %s8450_s5, 8192  ;;  %s54_s23 = int_to_ptr.vmem [resolvable:$true] %s53_s23 }
   0x8   :  { %p6241_p0 = scmp.ne.s32.totalorder %s8450_s5, %s6240_s26  ;;  %p6244_p1 = scmp.lt.u32.totalorder %s6240_s26, %s8450_s5 }
   0xa   :  { %p6246_p2 = pnand %p6244_p1, %p6241_p0 }
   0xc   :  { %6249 = shalt.err (!%p6246_p2)
}
   0xd   :  { %s6250_s30 = scalar_lea.vmem %s54_s23, 8192  ;;  %p6255_p4 = scmp.lt.s32.totalorder %s54_s23, %s54_s23 }
   0xe   :  { %p6251_p3 = scmp.ne.s32.totalorder %s54_s23, %s6250_s30  ;;  %p6256_p5 = scmp.lt.s32.totalorder %s6250_s30, %s6250_s30 }
  0x10   :  { %p6257_p6 = por %p6256_p5, %p6255_p4 }
  0x12   :  { %p6258_p7 = pnand %p6257_p6, %p6251_p3 }
  0x14   :  { %6261 = shalt.err (!%p6258_p7)
}
  0x15   :  { %s6765_s0 = smov 512   ;;  %s6766_s12 = smov 32  }
  0x16   :  { %59 = dma.hbm_to_vmem [thread:$0]  %s8450_s5, 8192, %s54_s23, [#allocation13], %s6765_s0, %s6765_s0, %s6766_s12  }
  0x17   :  { %s6262_s15 = scalar_lea.vmem %s29_s21, 32  ;;  %p6267_p9 = scmp.lt.s32.totalorder %s29_s21, %s29_s21 }
  0x18   :  { %p6263_p8 = scmp.ne.s32.totalorder %s29_s21, %s6262_s15  ;;  %p6268_p10 = scmp.lt.s32.totalorder %s6262_s15, %s6262_s15 }
  0x1a   :  { %p6269_p11 = por %p6268_p10, %p6267_p9 }
  0x1c   :  { %p6270_p12 = pnand %p6269_p11, %p6263_p8 }
  0x1e   :  { %6273 = shalt.err (!%p6270_p12)
}
  0x1f   :  { %s6767_s16 = smov [#allocation8]   ;;  %s6768_s17 = smov [#allocation11]  }
  0x20   :  { %31 = dma.vmem_to_smem %s29_s21, 32, %s6767_s16, [#allocation10]  }
  0x21   :  { %s39_s18 = sshll.u32 %s6768_s17, 4  ;;  %s6769_s19 = smov [#allocation14]   ;;  %s40_s18 = int_to_ptr.vmem [resolvable:$true] %s39_s18 }
  0x22   :  { %s65_s20 = sshll.u32 %s6769_s19, 4  ;;  %s6274_s5 = scalar_lea.hbm %s8448_s3, 16384  ;;  %s6879_s20 = int_to_ptr.vmem [resolvable:$true] %s65_s20 }
  0x23   :  { %p6275_p13 = scmp.ne.s32.totalorder %s8448_s3, %s6274_s5  ;;  %p6278_p0 = scmp.lt.u32.totalorder %s6274_s5, %s8448_s3 }
  0x25   :  { %p6280_p1 = pnand %p6278_p0, %p6275_p13 }
  0x27   :  { %6283 = shalt.err (!%p6280_p1)
}
  0x28   :  { %s6284_s21 = scalar_lea.vmem %s40_s18, 16384  ;;  %p6289_p3 = scmp.lt.s32.totalorder %s40_s18, %s40_s18 }
  0x29   :  { %p6285_p2 = scmp.ne.s32.totalorder %s40_s18, %s6284_s21  ;;  %p6290_p4 = scmp.lt.s32.totalorder %s6284_s21, %s6284_s21 }
  0x2b   :  { %p6291_p5 = por %p6290_p4, %p6289_p3 }
  0x2d   :  { %p6292_p6 = pnand %p6291_p5, %p6285_p2 }
  0x2f   :  { %6295 = shalt.err (!%p6292_p6)
}
  0x30   :  { %45 = dma.hbm_to_vmem [thread:$0]  %s8448_s3, 16384, %s40_s18, [#allocation9], %s6765_s0, %s6765_s0, %s6766_s12  }
  0x31   :  { %s6296_s13 = scalar_lea.hbm %s8451_s6, 16384 }
  0x32   :  { %p6297_p7 = scmp.ne.s32.totalorder %s8451_s6, %s6296_s13  ;;  %p6300_p8 = scmp.lt.u32.totalorder %s6296_s13, %s8451_s6 }
  0x34   :  { %p6302_p9 = pnand %p6300_p8, %p6297_p7 }
  0x36   :  { %6305 = shalt.err (!%p6302_p9)
}
  0x37   :  { %s6306_s19 = scalar_lea.vmem %s6879_s20, 16384  ;;  %p6311_p11 = scmp.lt.s32.totalorder %s6879_s20, %s6879_s20 }
  0x38   :  { %p6307_p10 = scmp.ne.s32.totalorder %s6879_s20, %s6306_s19  ;;  %p6312_p12 = scmp.lt.s32.totalorder %s6306_s19, %s6306_s19 }
  0x3a   :  { %p6313_p13 = por %p6312_p12, %p6311_p11 }
  0x3c   :  { %p6314_p0 = pnand %p6313_p13, %p6307_p10 }
  0x3e   :  { %6317 = shalt.err (!%p6314_p0)
}
  0x3f   :  { %71 = dma.hbm_to_vmem [thread:$0]  %s8451_s6, 16384, %s6879_s20, [#allocation13], %s6765_s0, %s6765_s0, %s6766_s12  }
  0x40   :  { %s6770_s22 = smov [#allocation15]   ;;  %s6318_s25 = scalar_lea.hbm %s8453_s8, 8192 }
  0x41   :  { %s79_s24 = sshll.u32 %s6770_s22, 4  ;;  %p6319_p1 = scmp.ne.s32.totalorder %s8453_s8, %s6318_s25  ;;  %s80_s24 = int_to_ptr.vmem [resolvable:$true] %s79_s24 }
  0x42   :  { %p6322_p2 = scmp.lt.u32.totalorder %s6318_s25, %s8453_s8 }
  0x44   :  { %p6324_p3 = pnand %p6322_p2, %p6319_p1 }
  0x46   :  { %6327 = shalt.err (!%p6324_p3)
}
  0x47   :  { %s6328_s10 = scalar_lea.vmem %s80_s24, 8192  ;;  %p6333_p5 = scmp.lt.s32.totalorder %s80_s24, %s80_s24 }
  0x48   :  { %p6329_p4 = scmp.ne.s32.totalorder %s80_s24, %s6328_s10  ;;  %p6334_p6 = scmp.lt.s32.totalorder %s6328_s10, %s6328_s10 }
  0x4a   :  { %p6335_p7 = por %p6334_p6, %p6333_p5 }
  0x4c   :  { %p6336_p8 = pnand %p6335_p7, %p6329_p4 }
  0x4e   :  { %6339 = shalt.err (!%p6336_p8)
}
  0x4f   :  { %85 = dma.hbm_to_vmem [thread:$0]  %s8453_s8, 8192, %s80_s24, [#allocation16], %s6765_s0, %s6765_s0, %s6766_s12  }
  0x50   :  { %6724 = dma.done.wait [#allocation10], 32  }
  0x51   :  { %6725 = vsyncadd [#allocation10], 4294967264 }
  0x52   :  { %6726 = dma.done.wait [#allocation9], 16384  }
  0x53   :  { %6727 = vsyncadd [#allocation9], 4294950912 }
  0x54   :  { %6728 = dma.done.wait [#allocation13], 24576  }
  0x55   :  { %6729 = vsyncadd [#allocation13], 4294942720 }
  0x56   :  { %6730 = dma.done.wait [#allocation16], 8192  }
  0x57   :  { %6731 = vsyncadd [#allocation16], 4294959104 }
  0x58   :  { %105 = sfence }
  0x59   :  { %s106_s29 = sld [smem:[#allocation8]]  ;;  %s6771_s30 = smov [#allocation2]  }
  0x5a   :  { %s116_s13 = sshll.u32 %s6771_s30, 4  ;;  %s6931_s14 = sld [smem:[#allocation8 + $0x80]]  ;;  %s6933_s13 = int_to_ptr.vmem [resolvable:$true] %s116_s13 }
  0x5b   :  { %s6772_s15 = smov [#allocation2 + $0x1]   ;;  %s6935_s8 = sld [smem:[#allocation8 + $0x1]] }
  0x5c   :  { %s132_s16 = sshll.u32 %s6772_s15, 4  ;;  %s6773_s0 = smov [#allocation2 + $0x8]   ;;  %s6937_s16 = int_to_ptr.vmem [resolvable:$true] %s132_s16 }
  0x5d   :  { %s148_s12 = sshll.u32 %s6773_s0, 4  ;;  %s6939_s17 = sld [smem:[#allocation8 + $0x81]]  ;;  %s6941_s12 = int_to_ptr.vmem [resolvable:$true] %s148_s12 }
  0x5e   :  { %s6950_s26 = scalar_lea.hbm %s8447_s2, 16000 }
  0x5f   :  { %s4475_s19 = sshll.u32 %s106_s29, 4 }
  0x60   :  { %s108_s22 = scalar_lea.hbm %s8447_s2, %s4475_s19  ;;  %s4477_s24 = sshll.u32 %s6931_s14, 4 }
  0x61   :  { %s6340_s5 = scalar_lea.hbm %s108_s22, 16  ;;  %p6343_p10 = scmp.lt.u32.totalorder %s108_s22, %s8447_s2 }
  0x62   :  { %p6341_p9 = scmp.ne.s32.totalorder %s108_s22, %s6340_s5  ;;  %p6344_p11 = scmp.lt.u32.totalorder %s6950_s26, %s6340_s5 }
  0x63   :  { %p6346_p13 = scmp.lt.u32.totalorder %s6340_s5, %s108_s22 }
  0x64   :  { %p6345_p12 = por %p6344_p11, %p6343_p10 }
  0x66   :  { %p6347_p0 = por %p6346_p13, %p6345_p12 }
  0x68   :  { %p6348_p1 = pnand %p6347_p0, %p6341_p9 }
  0x6a   :  { %6351 = shalt.err (!%p6348_p1)  }
  0x6b   :  { %s6352_s28 = scalar_lea.vmem %s6933_s13, 16  ;;  %s6959_s10 = scalar_lea.vmem %s6933_s13, 1024 }
  0x6c   :  { %p6353_p2 = scmp.ne.s32.totalorder %s6933_s13, %s6352_s28  ;;  %p6357_p3 = scmp.lt.s32.totalorder %s6933_s13, %s6933_s13 }
  0x6d   :  { %p6358_p4 = scmp.lt.s32.totalorder %s6959_s10, %s6352_s28 }
  0x6f   :  { %p6359_p5 = por %p6358_p4, %p6357_p3 }
  0x71   :  { %p6360_p6 = pnand %p6359_p5, %p6353_p2 }
  0x73   :  { %6363 = shalt.err (!%p6360_p6)  }
  0x74   :  { %119 = dma.hbm_to_vmem [thread:$0]  %s108_s22, 16, %s6933_s13, [#allocation6] }
  0x75   :  { %s122_s29 = scalar_lea.hbm %s8447_s2, %s4477_s24  ;;  %s4479_s30 = sshll.u32 %s6935_s8, 4 }
  0x76   :  { %s6364_s14 = scalar_lea.hbm %s122_s29, 16  ;;  %p6367_p8 = scmp.lt.u32.totalorder %s122_s29, %s8447_s2 }
  0x77   :  { %p6365_p7 = scmp.ne.s32.totalorder %s122_s29, %s6364_s14  ;;  %p6368_p9 = scmp.lt.u32.totalorder %s6950_s26, %s6364_s14 }
  0x78   :  { %p6370_p11 = scmp.lt.u32.totalorder %s6364_s14, %s122_s29 }
  0x79   :  { %p6369_p10 = por %p6368_p9, %p6367_p8 }
  0x7b   :  { %p6371_p12 = por %p6370_p11, %p6369_p10 }
  0x7d   :  { %p6372_p13 = pnand %p6371_p12, %p6365_p7 }
  0x7f   :  { %6375 = shalt.err (!%p6372_p13)  }
  0x80   :  { %s6376_s19 = scalar_lea.vmem %s6937_s16, 16  ;;  %p6381_p1 = scmp.lt.s32.totalorder %s6937_s16, %s6933_s13 }
  0x81   :  { %p6377_p0 = scmp.ne.s32.totalorder %s6937_s16, %s6376_s19  ;;  %p6382_p2 = scmp.lt.s32.totalorder %s6959_s10, %s6376_s19 }
  0x83   :  { %p6383_p3 = por %p6382_p2, %p6381_p1 }
  0x85   :  { %p6384_p4 = pnand %p6383_p3, %p6377_p0 }
  0x87   :  { %6387 = shalt.err (!%p6384_p4)  }
  0x88   :  { %135 = dma.hbm_to_vmem [thread:$0]  %s122_s29, 16, %s6937_s16, [#allocation6 + $0x1] }
  0x89   :  { %s138_s18 = scalar_lea.hbm %s8447_s2, %s4479_s30  ;;  %s4481_s22 = sshll.u32 %s6939_s17, 4 }
  0x8a   :  { %s6388_s24 = scalar_lea.hbm %s138_s18, 16  ;;  %p6391_p6 = scmp.lt.u32.totalorder %s138_s18, %s8447_s2 }
  0x8b   :  { %p6389_p5 = scmp.ne.s32.totalorder %s138_s18, %s6388_s24  ;;  %p6392_p7 = scmp.lt.u32.totalorder %s6950_s26, %s6388_s24 }
  0x8c   :  { %p6394_p9 = scmp.lt.u32.totalorder %s6388_s24, %s138_s18 }
  0x8d   :  { %p6393_p8 = por %p6392_p7, %p6391_p6 }
  0x8f   :  { %p6395_p10 = por %p6394_p9, %p6393_p8 }
  0x91   :  { %p6396_p11 = pnand %p6395_p10, %p6389_p5 }
  0x93   :  { %6399 = shalt.err (!%p6396_p11)  }
  0x94   :  { %s6400_s16 = scalar_lea.vmem %s6941_s12, 16  ;;  %p6405_p13 = scmp.lt.s32.totalorder %s6941_s12, %s6933_s13 }
  0x95   :  { %p6401_p12 = scmp.ne.s32.totalorder %s6941_s12, %s6400_s16  ;;  %p6406_p0 = scmp.lt.s32.totalorder %s6959_s10, %s6400_s16 }
  0x97   :  { %p6407_p1 = por %p6406_p0, %p6405_p13 }
  0x99   :  { %p6408_p2 = pnand %p6407_p1, %p6401_p12 }
  0x9b   :  { %6411 = shalt.err (!%p6408_p2)  }
  0x9c   :  { %151 = dma.hbm_to_vmem [thread:$0]  %s138_s18, 16, %s6941_s12, [#allocation6 + $0x2] }
  0x9d   :  { %s154_s27 = scalar_lea.hbm %s8447_s2, %s4481_s22  ;;  %s6774_s21 = smov [#allocation2 + $0x9]  }
  0x9e   :  { %s164_s28 = sshll.u32 %s6774_s21, 4  ;;  %s6996_s6 = sld [smem:[#allocation8 + $0x2]]  ;;  %s165_s28 = int_to_ptr.vmem [resolvable:$true] %s164_s28 }
  0x9f   :  { %s6412_s20 = scalar_lea.hbm %s154_s27, 16  ;;  %p6415_p4 = scmp.lt.u32.totalorder %s154_s27, %s8447_s2 }
  0xa0   :  { %p6413_p3 = scmp.ne.s32.totalorder %s154_s27, %s6412_s20  ;;  %p6416_p5 = scmp.lt.u32.totalorder %s6950_s26, %s6412_s20 }
  0xa1   :  { %p6418_p7 = scmp.lt.u32.totalorder %s6412_s20, %s154_s27 }
  0xa2   :  { %p6417_p6 = por %p6416_p5, %p6415_p4 }
  0xa4   :  { %p6419_p8 = por %p6418_p7, %p6417_p6 }
  0xa6   :  { %p6420_p9 = pnand %p6419_p8, %p6413_p3 }
  0xa8   :  { %6423 = shalt.err (!%p6420_p9)  }
  0xa9   :  { %s6424_s12 = scalar_lea.vmem %s165_s28, 16  ;;  %p6429_p11 = scmp.lt.s32.totalorder %s165_s28, %s6933_s13 }
  0xaa   :  { %p6425_p10 = scmp.ne.s32.totalorder %s165_s28, %s6424_s12  ;;  %p6430_p12 = scmp.lt.s32.totalorder %s6959_s10, %s6424_s12 }
  0xac   :  { %p6431_p13 = por %p6430_p12, %p6429_p11 }
  0xae   :  { %p6432_p0 = pnand %p6431_p13, %p6425_p10 }
  0xb0   :  { %6435 = shalt.err (!%p6432_p0)  }
  0xb1   :  { %167 = dma.hbm_to_vmem [thread:$0]  %s154_s27, 16, %s165_s28, [#allocation6 + $0x3] }
  0xb2   :  { %s6775_s14 = smov [#allocation2 + $0x10]   ;;  %s7004_s0 = sld [smem:[#allocation8 + $0x82]] }
  0xb3   :  { %s180_s15 = sshll.u32 %s6775_s14, 4  ;;  %s6776_s19 = smov [#allocation2 + $0x11]   ;;  %s181_s15 = int_to_ptr.vmem [resolvable:$true] %s180_s15 }
  0xb4   :  { %s196_s8 = sshll.u32 %s6776_s19, 4  ;;  %s7006_s3 = sld [smem:[#allocation8 + $0x3]]  ;;  %s7009_s8 = int_to_ptr.vmem [resolvable:$true] %s196_s8 }
  0xb5   :  { %s4483_s18 = sshll.u32 %s6996_s6, 4 }
  0xb6   :  { %s170_s5 = scalar_lea.hbm %s8447_s2, %s4483_s18 }
  0xb7   :  { %s6436_s23 = scalar_lea.hbm %s170_s5, 16  ;;  %p6439_p2 = scmp.lt.u32.totalorder %s170_s5, %s8447_s2 }
  0xb8   :  { %p6437_p1 = scmp.ne.s32.totalorder %s170_s5, %s6436_s23  ;;  %p6440_p3 = scmp.lt.u32.totalorder %s6950_s26, %s6436_s23 }
  0xb9   :  { %p6442_p5 = scmp.lt.u32.totalorder %s6436_s23, %s170_s5 }
  0xba   :  { %p6441_p4 = por %p6440_p3, %p6439_p2 }
  0xbc   :  { %p6443_p6 = por %p6442_p5, %p6441_p4 }
  0xbe   :  { %p6444_p7 = pnand %p6443_p6, %p6437_p1 }
  0xc0   :  { %6447 = shalt.err (!%p6444_p7)  }
  0xc1   :  { %s6448_s25 = scalar_lea.vmem %s181_s15, 16  ;;  %p6453_p9 = scmp.lt.s32.totalorder %s181_s15, %s6933_s13 }
  0xc2   :  { %p6449_p8 = scmp.ne.s32.totalorder %s181_s15, %s6448_s25  ;;  %p6454_p10 = scmp.lt.s32.totalorder %s6959_s10, %s6448_s25 }
  0xc4   :  { %p6455_p11 = por %p6454_p10, %p6453_p9 }
  0xc6   :  { %p6456_p12 = pnand %p6455_p11, %p6449_p8 }
  0xc8   :  { %6459 = shalt.err (!%p6456_p12)  }
  0xc9   :  { %183 = dma.hbm_to_vmem [thread:$0]  %s170_s5, 16, %s181_s15, [#allocation6 + $0x4] }
  0xca   :  { %s4485_s27 = sshll.u32 %s7004_s0, 4  ;;  %s6777_s21 = smov [#allocation2 + $0x18]  }
  0xcb   :  { %s212_s28 = sshll.u32 %s6777_s21, 4  ;;  %s186_s29 = scalar_lea.hbm %s8447_s2, %s4485_s27  ;;  %s7024_s28 = int_to_ptr.vmem [resolvable:$true] %s212_s28 }
  0xcc   :  { %s6460_s30 = scalar_lea.hbm %s186_s29, 16  ;;  %p6463_p0 = scmp.lt.u32.totalorder %s186_s29, %s8447_s2 }
  0xcd   :  { %p6461_p13 = scmp.ne.s32.totalorder %s186_s29, %s6460_s30  ;;  %p6464_p1 = scmp.lt.u32.totalorder %s6950_s26, %s6460_s30 }
  0xce   :  { %p6466_p3 = scmp.lt.u32.totalorder %s6460_s30, %s186_s29 }
  0xcf   :  { %p6465_p2 = por %p6464_p1, %p6463_p0 }
  0xd1   :  { %p6467_p4 = por %p6466_p3, %p6465_p2 }
  0xd3   :  { %p6468_p5 = pnand %p6467_p4, %p6461_p13 }
  0xd5   :  { %6471 = shalt.err (!%p6468_p5)  }
  0xd6   :  { %s6472_s15 = scalar_lea.vmem %s7009_s8, 16  ;;  %p6477_p7 = scmp.lt.s32.totalorder %s7009_s8, %s6933_s13 }
  0xd7   :  { %p6473_p6 = scmp.ne.s32.totalorder %s7009_s8, %s6472_s15  ;;  %p6478_p8 = scmp.lt.s32.totalorder %s6959_s10, %s6472_s15 }
  0xd9   :  { %p6479_p9 = por %p6478_p8, %p6477_p7 }
  0xdb   :  { %p6480_p10 = pnand %p6479_p9, %p6473_p6 }
  0xdd   :  { %6483 = shalt.err (!%p6480_p10)  }
  0xde   :  { %199 = dma.hbm_to_vmem [thread:$0]  %s186_s29, 16, %s7009_s8, [#allocation6 + $0x5] }
  0xdf   :  { %s4487_s0 = sshll.u32 %s7006_s3, 4  ;;  %s7037_s19 = sld [smem:[#allocation8 + $0x83]] }
  0xe0   :  { %s202_s24 = scalar_lea.hbm %s8447_s2, %s4487_s0 }
  0xe1   :  { %s6484_s5 = scalar_lea.hbm %s202_s24, 16  ;;  %p6487_p12 = scmp.lt.u32.totalorder %s202_s24, %s8447_s2 }
  0xe2   :  { %p6485_p11 = scmp.ne.s32.totalorder %s202_s24, %s6484_s5  ;;  %p6488_p13 = scmp.lt.u32.totalorder %s6950_s26, %s6484_s5 }
  0xe3   :  { %p6490_p1 = scmp.lt.u32.totalorder %s6484_s5, %s202_s24 }
  0xe4   :  { %p6489_p0 = por %p6488_p13, %p6487_p12 }
  0xe6   :  { %p6491_p2 = por %p6490_p1, %p6489_p0 }
  0xe8   :  { %p6492_p3 = pnand %p6491_p2, %p6485_p11 }
  0xea   :  { %6495 = shalt.err (!%p6492_p3)  }
  0xeb   :  { %s6496_s8 = scalar_lea.vmem %s7024_s28, 16  ;;  %p6501_p5 = scmp.lt.s32.totalorder %s7024_s28, %s6933_s13 }
  0xec   :  { %p6497_p4 = scmp.ne.s32.totalorder %s7024_s28, %s6496_s8  ;;  %p6502_p6 = scmp.lt.s32.totalorder %s6959_s10, %s6496_s8 }
  0xee   :  { %p6503_p7 = por %p6502_p6, %p6501_p5 }
  0xf0   :  { %p6504_p8 = pnand %p6503_p7, %p6497_p4 }
  0xf2   :  { %6507 = shalt.err (!%p6504_p8)  }
  0xf3   :  { %215 = dma.hbm_to_vmem [thread:$0]  %s202_s24, 16, %s7024_s28, [#allocation6 + $0x6] }
  0xf4   :  { %s6778_s3 = smov [#allocation2 + $0x19]   ;;  %s7052_s25 = sld [smem:[#allocation8 + $0x4]] }
  0xf5   :  { %s228_s17 = sshll.u32 %s6778_s3, 4  ;;  %s6779_s27 = smov [#allocation2 + $0x20]   ;;  %s229_s17 = int_to_ptr.vmem [resolvable:$true] %s228_s17 }
  0xf6   :  { %s244_s21 = sshll.u32 %s6779_s27, 4  ;;  %s7054_s6 = sld [smem:[#allocation8 + $0x84]]  ;;  %s7057_s21 = int_to_ptr.vmem [resolvable:$true] %s244_s21 }
  0xf7   :  { %s4489_s20 = sshll.u32 %s7037_s19, 4 }
  0xf8   :  { %s218_s12 = scalar_lea.hbm %s8447_s2, %s4489_s20 }
  0xf9   :  { %s6508_s14 = scalar_lea.hbm %s218_s12, 16  ;;  %p6511_p10 = scmp.lt.u32.totalorder %s218_s12, %s8447_s2 }
  0xfa   :  { %p6509_p9 = scmp.ne.s32.totalorder %s218_s12, %s6508_s14  ;;  %p6512_p11 = scmp.lt.u32.totalorder %s6950_s26, %s6508_s14 }
  0xfb   :  { %p6514_p13 = scmp.lt.u32.totalorder %s6508_s14, %s218_s12 }
  0xfc   :  { %p6513_p12 = por %p6512_p11, %p6511_p10 }
  0xfe   :  { %p6515_p0 = por %p6514_p13, %p6513_p12 }
 0x100   :  { %p6516_p1 = pnand %p6515_p0, %p6509_p9 }
 0x102   :  { %6519 = shalt.err (!%p6516_p1)  }
 0x103   :  { %s6520_s0 = scalar_lea.vmem %s229_s17, 16  ;;  %p6525_p3 = scmp.lt.s32.totalorder %s229_s17, %s6933_s13 }
 0x104   :  { %p6521_p2 = scmp.ne.s32.totalorder %s229_s17, %s6520_s0  ;;  %p6526_p4 = scmp.lt.s32.totalorder %s6959_s10, %s6520_s0 }
 0x106   :  { %p6527_p5 = por %p6526_p4, %p6525_p3 }
 0x108   :  { %p6528_p6 = pnand %p6527_p5, %p6521_p2 }
 0x10a   :  { %6531 = shalt.err (!%p6528_p6)  }
 0x10b   :  { %231 = dma.hbm_to_vmem [thread:$0]  %s218_s12, 16, %s229_s17, [#allocation6 + $0x7] }
 0x10c   :  { %s4491_s19 = sshll.u32 %s7052_s25, 4  ;;  %s6780_s18 = smov [#allocation2 + $0x21]  }
 0x10d   :  { %s260_s22 = sshll.u32 %s6780_s18, 4  ;;  %s234_s23 = scalar_lea.hbm %s8447_s2, %s4491_s19  ;;  %s7072_s22 = int_to_ptr.vmem [resolvable:$true] %s260_s22 }
 0x10e   :  { %s6532_s16 = scalar_lea.hbm %s234_s23, 16  ;;  %p6535_p8 = scmp.lt.u32.totalorder %s234_s23, %s8447_s2 }
 0x10f   :  { %p6533_p7 = scmp.ne.s32.totalorder %s234_s23, %s6532_s16  ;;  %p6536_p9 = scmp.lt.u32.totalorder %s6950_s26, %s6532_s16 }
 0x110   :  { %p6538_p11 = scmp.lt.u32.totalorder %s6532_s16, %s234_s23 }
 0x111   :  { %p6537_p10 = por %p6536_p9, %p6535_p8 }
 0x113   :  { %p6539_p12 = por %p6538_p11, %p6537_p10 }
 0x115   :  { %p6540_p13 = pnand %p6539_p12, %p6533_p7 }
 0x117   :  { %6543 = shalt.err (!%p6540_p13)  }
 0x118   :  { %s6544_s17 = scalar_lea.vmem %s7057_s21, 16  ;;  %p6549_p1 = scmp.lt.s32.totalorder %s7057_s21, %s6933_s13 }
 0x119   :  { %p6545_p0 = scmp.ne.s32.totalorder %s7057_s21, %s6544_s17  ;;  %p6550_p2 = scmp.lt.s32.totalorder %s6959_s10, %s6544_s17 }
 0x11b   :  { %p6551_p3 = por %p6550_p2, %p6549_p1 }
 0x11d   :  { %p6552_p4 = pnand %p6551_p3, %p6545_p0 }
 0x11f   :  { %6555 = shalt.err (!%p6552_p4)  }
 0x120   :  { %247 = dma.hbm_to_vmem [thread:$0]  %s234_s23, 16, %s7057_s21, [#allocation6 + $0x8] }
 0x121   :  { %s4493_s25 = sshll.u32 %s7054_s6, 4  ;;  %s7085_s27 = sld [smem:[#allocation8 + $0x5]] }
 0x122   :  { %s250_s30 = scalar_lea.hbm %s8447_s2, %s4493_s25 }
 0x123   :  { %s6556_s12 = scalar_lea.hbm %s250_s30, 16  ;;  %p6559_p6 = scmp.lt.u32.totalorder %s250_s30, %s8447_s2 }
 0x124   :  { %p6557_p5 = scmp.ne.s32.totalorder %s250_s30, %s6556_s12  ;;  %p6560_p7 = scmp.lt.u32.totalorder %s6950_s26, %s6556_s12 }
 0x125   :  { %p6562_p9 = scmp.lt.u32.totalorder %s6556_s12, %s250_s30 }
 0x126   :  { %p6561_p8 = por %p6560_p7, %p6559_p6 }
 0x128   :  { %p6563_p10 = por %p6562_p9, %p6561_p8 }
 0x12a   :  { %p6564_p11 = pnand %p6563_p10, %p6557_p5 }
 0x12c   :  { %6567 = shalt.err (!%p6564_p11)  }
 0x12d   :  { %s6568_s21 = scalar_lea.vmem %s7072_s22, 16  ;;  %p6573_p13 = scmp.lt.s32.totalorder %s7072_s22, %s6933_s13 }
 0x12e   :  { %p6569_p12 = scmp.ne.s32.totalorder %s7072_s22, %s6568_s21  ;;  %p6574_p0 = scmp.lt.s32.totalorder %s6959_s10, %s6568_s21 }
 0x130   :  { %p6575_p1 = por %p6574_p0, %p6573_p13 }
 0x132   :  { %p6576_p2 = pnand %p6575_p1, %p6569_p12 }
 0x134   :  { %6579 = shalt.err (!%p6576_p2)  }
 0x135   :  { %263 = dma.hbm_to_vmem [thread:$0]  %s250_s30, 16, %s7072_s22, [#allocation6 + $0x9] }
 0x136   :  { %s6781_s6 = smov [#allocation2 + $0x28]   ;;  %s7100_s0 = sld [smem:[#allocation8 + $0x85]] }
 0x137   :  { %s276_s28 = sshll.u32 %s6781_s6, 4  ;;  %s6782_s19 = smov [#allocation2 + $0x29]   ;;  %s277_s28 = int_to_ptr.vmem [resolvable:$true] %s276_s28 }
 0x138   :  { %s292_s18 = sshll.u32 %s6782_s19, 4  ;;  %s7102_s24 = sld [smem:[#allocation8 + $0x6]]  ;;  %s7105_s18 = int_to_ptr.vmem [resolvable:$true] %s292_s18 }
 0x139   :  { %s4495_s5 = sshll.u32 %s7085_s27, 4 }
 0x13a   :  { %s266_s8 = scalar_lea.hbm %s8447_s2, %s4495_s5 }
 0x13b   :  { %s6580_s3 = scalar_lea.hbm %s266_s8, 16  ;;  %p6583_p4 = scmp.lt.u32.totalorder %s266_s8, %s8447_s2 }
 0x13c   :  { %p6581_p3 = scmp.ne.s32.totalorder %s266_s8, %s6580_s3  ;;  %p6584_p5 = scmp.lt.u32.totalorder %s6950_s26, %s6580_s3 }
 0x13d   :  { %p6586_p7 = scmp.lt.u32.totalorder %s6580_s3, %s266_s8 }
 0x13e   :  { %p6585_p6 = por %p6584_p5, %p6583_p4 }
 0x140   :  { %p6587_p8 = por %p6586_p7, %p6585_p6 }
 0x142   :  { %p6588_p9 = pnand %p6587_p8, %p6581_p3 }
 0x144   :  { %6591 = shalt.err (!%p6588_p9)  }
 0x145   :  { %s6592_s25 = scalar_lea.vmem %s277_s28, 16  ;;  %p6597_p11 = scmp.lt.s32.totalorder %s277_s28, %s6933_s13 }
 0x146   :  { %p6593_p10 = scmp.ne.s32.totalorder %s277_s28, %s6592_s25  ;;  %p6598_p12 = scmp.lt.s32.totalorder %s6959_s10, %s6592_s25 }
 0x148   :  { %p6599_p13 = por %p6598_p12, %p6597_p11 }
 0x14a   :  { %p6600_p0 = pnand %p6599_p13, %p6593_p10 }
 0x14c   :  { %6603 = shalt.err (!%p6600_p0)  }
 0x14d   :  { %279 = dma.hbm_to_vmem [thread:$0]  %s266_s8, 16, %s277_s28, [#allocation6 + $0xa] }
 0x14e   :  { %s4497_s27 = sshll.u32 %s7100_s0, 4  ;;  %s6783_s20 = smov [#allocation2 + $0x30]  }
 0x14f   :  { %s308_s29 = sshll.u32 %s6783_s20, 4  ;;  %s282_s14 = scalar_lea.hbm %s8447_s2, %s4497_s27  ;;  %s7120_s29 = int_to_ptr.vmem [resolvable:$true] %s308_s29 }
 0x150   :  { %s6604_s15 = scalar_lea.hbm %s282_s14, 16  ;;  %p6607_p2 = scmp.lt.u32.totalorder %s282_s14, %s8447_s2 }
 0x151   :  { %p6605_p1 = scmp.ne.s32.totalorder %s282_s14, %s6604_s15  ;;  %p6608_p3 = scmp.lt.u32.totalorder %s6950_s26, %s6604_s15 }
 0x152   :  { %p6610_p5 = scmp.lt.u32.totalorder %s6604_s15, %s282_s14 }
 0x153   :  { %p6609_p4 = por %p6608_p3, %p6607_p2 }
 0x155   :  { %p6611_p6 = por %p6610_p5, %p6609_p4 }
 0x157   :  { %p6612_p7 = pnand %p6611_p6, %p6605_p1 }
 0x159   :  { %6615 = shalt.err (!%p6612_p7)  }
 0x15a   :  { %s6616_s28 = scalar_lea.vmem %s7105_s18, 16  ;;  %p6621_p9 = scmp.lt.s32.totalorder %s7105_s18, %s6933_s13 }
 0x15b   :  { %p6617_p8 = scmp.ne.s32.totalorder %s7105_s18, %s6616_s28  ;;  %p6622_p10 = scmp.lt.s32.totalorder %s6959_s10, %s6616_s28 }
 0x15d   :  { %p6623_p11 = por %p6622_p10, %p6621_p9 }
 0x15f   :  { %p6624_p12 = pnand %p6623_p11, %p6617_p8 }
 0x161   :  { %6627 = shalt.err (!%p6624_p12)  }
 0x162   :  { %295 = dma.hbm_to_vmem [thread:$0]  %s282_s14, 16, %s7105_s18, [#allocation6 + $0xb] }
 0x163   :  { %s4499_s0 = sshll.u32 %s7102_s24, 4  ;;  %s7133_s19 = sld [smem:[#allocation8 + $0x86]] }
 0x164   :  { %s298_s16 = scalar_lea.hbm %s8447_s2, %s4499_s0 }
 0x165   :  { %s6628_s8 = scalar_lea.hbm %s298_s16, 16  ;;  %p6631_p0 = scmp.lt.u32.totalorder %s298_s16, %s8447_s2 }
 0x166   :  { %p6629_p13 = scmp.ne.s32.totalorder %s298_s16, %s6628_s8  ;;  %p6632_p1 = scmp.lt.u32.totalorder %s6950_s26, %s6628_s8 }
 0x167   :  { %p6634_p3 = scmp.lt.u32.totalorder %s6628_s8, %s298_s16 }
 0x168   :  { %p6633_p2 = por %p6632_p1, %p6631_p0 }
 0x16a   :  { %p6635_p4 = por %p6634_p3, %p6633_p2 }
 0x16c   :  { %p6636_p5 = pnand %p6635_p4, %p6629_p13 }
 0x16e   :  { %6639 = shalt.err (!%p6636_p5)  }
 0x16f   :  { %s6640_s18 = scalar_lea.vmem %s7120_s29, 16  ;;  %p6645_p7 = scmp.lt.s32.totalorder %s7120_s29, %s6933_s13 }
 0x170   :  { %p6641_p6 = scmp.ne.s32.totalorder %s7120_s29, %s6640_s18  ;;  %p6646_p8 = scmp.lt.s32.totalorder %s6959_s10, %s6640_s18 }
 0x172   :  { %p6647_p9 = por %p6646_p8, %p6645_p7 }
 0x174   :  { %p6648_p10 = pnand %p6647_p9, %p6641_p6 }
 0x176   :  { %6651 = shalt.err (!%p6648_p10)  }
 0x177   :  { %311 = dma.hbm_to_vmem [thread:$0]  %s298_s16, 16, %s7120_s29, [#allocation6 + $0xc] }
 0x178   :  { %s6784_s24 = smov [#allocation2 + $0x31]   ;;  %s7148_s25 = sld [smem:[#allocation8 + $0x7]] }
 0x179   :  { %s324_s22 = sshll.u32 %s6784_s24, 4  ;;  %s6785_s27 = smov [#allocation2 + $0x38]   ;;  %s325_s22 = int_to_ptr.vmem [resolvable:$true] %s324_s22 }
 0x17a   :  { %s340_s20 = sshll.u32 %s6785_s27, 4  ;;  %s7150_s30 = sld [smem:[#allocation8 + $0x87]]  ;;  %s7153_s20 = int_to_ptr.vmem [resolvable:$true] %s340_s20 }
 0x17b   :  { %s4501_s12 = sshll.u32 %s7133_s19, 4 }
 0x17c   :  { %s314_s21 = scalar_lea.hbm %s8447_s2, %s4501_s12 }
 0x17d   :  { %s6652_s6 = scalar_lea.hbm %s314_s21, 16  ;;  %p6655_p12 = scmp.lt.u32.totalorder %s314_s21, %s8447_s2 }
 0x17e   :  { %p6653_p11 = scmp.ne.s32.totalorder %s314_s21, %s6652_s6  ;;  %p6656_p13 = scmp.lt.u32.totalorder %s6950_s26, %s6652_s6 }
 0x17f   :  { %p6658_p1 = scmp.lt.u32.totalorder %s6652_s6, %s314_s21 }
 0x180   :  { %p6657_p0 = por %p6656_p13, %p6655_p12 }
 0x182   :  { %p6659_p2 = por %p6658_p1, %p6657_p0 }
 0x184   :  { %p6660_p3 = pnand %p6659_p2, %p6653_p11 }
 0x186   :  { %6663 = shalt.err (!%p6660_p3)  }
 0x187   :  { %s6664_s0 = scalar_lea.vmem %s325_s22, 16  ;;  %p6669_p5 = scmp.lt.s32.totalorder %s325_s22, %s6933_s13 }
 0x188   :  { %p6665_p4 = scmp.ne.s32.totalorder %s325_s22, %s6664_s0  ;;  %p6670_p6 = scmp.lt.s32.totalorder %s6959_s10, %s6664_s0 }
 0x18a   :  { %p6671_p7 = por %p6670_p6, %p6669_p5 }
 0x18c   :  { %p6672_p8 = pnand %p6671_p7, %p6665_p4 }
 0x18e   :  { %6675 = shalt.err (!%p6672_p8)  }
 0x18f   :  { %327 = dma.hbm_to_vmem [thread:$0]  %s314_s21, 16, %s325_s22, [#allocation6 + $0xd] }
 0x190   :  { %s4503_s19 = sshll.u32 %s7148_s25, 4  ;;  %s6786_s5 = smov [#allocation2 + $0x39]  }
 0x191   :  { %s356_s23 = sshll.u32 %s6786_s5, 4  ;;  %s330_s3 = scalar_lea.hbm %s8447_s2, %s4503_s19  ;;  %s7168_s23 = int_to_ptr.vmem [resolvable:$true] %s356_s23 }
 0x192   :  { %s6676_s17 = scalar_lea.hbm %s330_s3, 16  ;;  %p6679_p10 = scmp.lt.u32.totalorder %s330_s3, %s8447_s2 }
 0x193   :  { %p6677_p9 = scmp.ne.s32.totalorder %s330_s3, %s6676_s17  ;;  %p6680_p11 = scmp.lt.u32.totalorder %s6950_s26, %s6676_s17 }
 0x194   :  { %p6682_p13 = scmp.lt.u32.totalorder %s6676_s17, %s330_s3 }
 0x195   :  { %p6681_p12 = por %p6680_p11, %p6679_p10 }
 0x197   :  { %p6683_p0 = por %p6682_p13, %p6681_p12 }
 0x199   :  { %p6684_p1 = pnand %p6683_p0, %p6677_p9 }
 0x19b   :  { %6687 = shalt.err (!%p6684_p1)  }
 0x19c   :  { %s6688_s22 = scalar_lea.vmem %s7153_s20, 16  ;;  %p6693_p3 = scmp.lt.s32.totalorder %s7153_s20, %s6933_s13 }
 0x19d   :  { %p6689_p2 = scmp.ne.s32.totalorder %s7153_s20, %s6688_s22  ;;  %p6694_p4 = scmp.lt.s32.totalorder %s6959_s10, %s6688_s22 }
 0x19f   :  { %p6695_p5 = por %p6694_p4, %p6693_p3 }
 0x1a1   :  { %p6696_p6 = pnand %p6695_p5, %p6689_p2 }
 0x1a3   :  { %6699 = shalt.err (!%p6696_p6)  }
 0x1a4   :  { %343 = dma.hbm_to_vmem [thread:$0]  %s330_s3, 16, %s7153_s20, [#allocation6 + $0xe] }
 0x1a5   :  { %s4505_s25 = sshll.u32 %s7150_s30, 4 }
 0x1a6   :  { %s346_s14 = scalar_lea.hbm %s8447_s2, %s4505_s25 }
 0x1a7   :  { %s6700_s15 = scalar_lea.hbm %s346_s14, 16  ;;  %p6703_p8 = scmp.lt.u32.totalorder %s346_s14, %s8447_s2 }
 0x1a8   :  { %p6701_p7 = scmp.ne.s32.totalorder %s346_s14, %s6700_s15  ;;  %p6704_p9 = scmp.lt.u32.totalorder %s6950_s26, %s6700_s15 }
 0x1a9   :  { %p6706_p11 = scmp.lt.u32.totalorder %s6700_s15, %s346_s14 }
 0x1aa   :  { %p6705_p10 = por %p6704_p9, %p6703_p8 }
 0x1ac   :  { %p6707_p12 = por %p6706_p11, %p6705_p10 }
 0x1ae   :  { %p6708_p13 = pnand %p6707_p12, %p6701_p7 }
 0x1b0   :  { %6711 = shalt.err (!%p6708_p13)  }
 0x1b1   :  { %s6712_s20 = scalar_lea.vmem %s7168_s23, 16  ;;  %p6717_p1 = scmp.lt.s32.totalorder %s7168_s23, %s6933_s13 }
 0x1b2   :  { %p6713_p0 = scmp.ne.s32.totalorder %s7168_s23, %s6712_s20  ;;  %p6718_p2 = scmp.lt.s32.totalorder %s6959_s10, %s6712_s20 }
 0x1b4   :  { %p6719_p3 = por %p6718_p2, %p6717_p1 }
 0x1b6   :  { %p6720_p4 = pnand %p6719_p3, %p6713_p0 }
 0x1b8   :  { %6723 = shalt.err (!%p6720_p4)  }
 0x1b9   :  { %359 = dma.hbm_to_vmem [thread:$0]  %s346_s14, 16, %s7168_s23, [#allocation6 + $0xf] }
 0x1ba   :  { %6732 = dma.done.wait [#allocation6], 16 }
 0x1bb   :  { %6733 = vsyncadd [#allocation6], 4294967280 }
 0x1bc   :  { %6734 = dma.done.wait [#allocation6 + $0x1], 16 }
 0x1bd   :  { %6735 = vsyncadd [#allocation6 + $0x1], 4294967280 }
 0x1be   :  { %6736 = dma.done.wait [#allocation6 + $0x2], 16 }
 0x1bf   :  { %6737 = vsyncadd [#allocation6 + $0x2], 4294967280 }
 0x1c0   :  { %6738 = dma.done.wait [#allocation6 + $0x3], 16 }
 0x1c1   :  { %6739 = vsyncadd [#allocation6 + $0x3], 4294967280 }
 0x1c2   :  { %6740 = dma.done.wait [#allocation6 + $0x4], 16 }
 0x1c3   :  { %6741 = vsyncadd [#allocation6 + $0x4], 4294967280 }
 0x1c4   :  { %6742 = dma.done.wait [#allocation6 + $0x5], 16 }
 0x1c5   :  { %6743 = vsyncadd [#allocation6 + $0x5], 4294967280 }
 0x1c6   :  { %6744 = dma.done.wait [#allocation6 + $0x6], 16 }
 0x1c7   :  { %6745 = vsyncadd [#allocation6 + $0x6], 4294967280 }
 0x1c8   :  { %6746 = dma.done.wait [#allocation6 + $0x7], 16 }
 0x1c9   :  { %6747 = vsyncadd [#allocation6 + $0x7], 4294967280 }
 0x1ca   :  { %6748 = dma.done.wait [#allocation6 + $0x8], 16 }
 0x1cb   :  { %6749 = vsyncadd [#allocation6 + $0x8], 4294967280 }
 0x1cc   :  { %6750 = dma.done.wait [#allocation6 + $0x9], 16 }
 0x1cd   :  { %6751 = vsyncadd [#allocation6 + $0x9], 4294967280 }
 0x1ce   :  { %6752 = dma.done.wait [#allocation6 + $0xa], 16 }
 0x1cf   :  { %6753 = vsyncadd [#allocation6 + $0xa], 4294967280 }
 0x1d0   :  { %6754 = dma.done.wait [#allocation6 + $0xb], 16 }
 0x1d1   :  { %6755 = vsyncadd [#allocation6 + $0xb], 4294967280 }
 0x1d2   :  { %6756 = dma.done.wait [#allocation6 + $0xc], 16 }
 0x1d3   :  { %6757 = vsyncadd [#allocation6 + $0xc], 4294967280 }
 0x1d4   :  { %6758 = dma.done.wait [#allocation6 + $0xd], 16 }
 0x1d5   :  { %6759 = vsyncadd [#allocation6 + $0xd], 4294967280 }
 0x1d6   :  { %6760 = dma.done.wait [#allocation6 + $0xe], 16 }
 0x1d7   :  { %6761 = vsyncadd [#allocation6 + $0xe], 4294967280 }
 0x1d8   :  { %6762 = dma.done.wait [#allocation6 + $0xf], 16 }
 0x1d9   :  { %6763 = vsyncadd [#allocation6 + $0xf], 4294967280  ;;  %v6787_v1 = vmov 0   ;;  %v445_v2 = vld [vmem:[#allocation11 + $0x8] sm:$0xff]  ;;  %v447_v4 = vld [vmem:[#allocation11 + $0x18] sm:$0xff]  ;;  %vm6797_vm9 = vmmov 0  }
 0x1da   :  { %6077 = vset.pattern.permute.xlu0 %v6787_v1  ;;  %v449_v3 = vld [vmem:[#allocation11 + $0x28] sm:$0xff]  ;;  %v451_v6 = vld [vmem:[#allocation11 + $0x38] sm:$0xff]  ;;  %v444_v7 = vld [vmem:[#allocation11] sm:$0xff]  ;;  %vm4308_vm10 = vcmask 7168  }
 0x1db   :  { %v4611_v5 = vpack.c.bf16 %v449_v3, %v445_v2  ;;  %v448_v8 = vld [vmem:[#allocation11 + $0x20] sm:$0xff]  ;;  %v4675_v9 = vpack.c.bf16 %v451_v6, %v447_v4  ;;  %v446_v11 = vld [vmem:[#allocation11 + $0x10] sm:$0xff]  ;;  %v453_v13 = vld [vmem:[#allocation11 + $0x48] sm:$0xff] }
 0x1dc   :  { %v4613_v10 = vpack.c.bf16 %v448_v8, %v444_v7  ;;  %v450_v12 = vld [vmem:[#allocation11 + $0x30] sm:$0xff]  ;;  %v457_v15 = vld [vmem:[#allocation11 + $0x68] sm:$0xff]  ;;  %v455_v16 = vld [vmem:[#allocation11 + $0x58] sm:$0xff] }
 0x1dd   :  { %4612 = vmatprep.subr.bf16.mxu0 %v4611_v5  ;;  %v4677_v14 = vpack.c.bf16 %v450_v12, %v446_v11  ;;  %v459_v17 = vld [vmem:[#allocation11 + $0x78] sm:$0xff]  ;;  %4676 = vmatprep.subr.bf16.mxu1 %v4675_v9  ;;  %v4615_v18 = vpack.c.bf16 %v457_v15, %v453_v13  ;;  %v452_v20 = vld [vmem:[#allocation11 + $0x40] sm:$0xff]  ;;  %v454_v22 = vld [vmem:[#allocation11 + $0x50] sm:$0xff] }
 0x1de   :  { %4614 = vmatpush1.bf16.msra.mxu0 %v4613_v10  ;;  %v4679_v19 = vpack.c.bf16 %v459_v17, %v455_v16  ;;  %v456_v21 = vld [vmem:[#allocation11 + $0x60] sm:$0xff]  ;;  %v458_v24 = vld [vmem:[#allocation11 + $0x70] sm:$0xff]  ;;  %v461_v25 = vld [vmem:[#allocation11 + $0x88] sm:$0xff] }
 0x1df   :  { %4678 = vmatpush1.bf16.msra.mxu1 %v4677_v14  ;;  %v4617_v23 = vpack.c.bf16 %v456_v21, %v452_v20  ;;  %v465_v26 = vld [vmem:[#allocation11 + $0xa8] sm:$0xff]  ;;  %4616 = vmatprep.subr.bf16.mxu0 %v4615_v18  ;;  %v4681_v27 = vpack.c.bf16 %v458_v24, %v454_v22  ;;  %v463_v29 = vld [vmem:[#allocation11 + $0x98] sm:$0xff]  ;;  %v460_v31 = vld [vmem:[#allocation11 + $0x80] sm:$0xff] }
 0x1e0   :  { %4680 = vmatprep.subr.bf16.mxu1 %v4679_v19  ;;  %v4619_v28 = vpack.c.bf16 %v465_v26, %v461_v25  ;;  %v467_v30 = vld [vmem:[#allocation11 + $0xb8] sm:$0xff]  ;;  %v464_v33 = vld [vmem:[#allocation11 + $0xa0] sm:$0xff]  ;;  %v462_v34 = vld [vmem:[#allocation11 + $0x90] sm:$0xff] }
 0x1e1   :  { %v4683_v32 = vpack.c.bf16 %v467_v30, %v463_v29  ;;  %v466_v35 = vld [vmem:[#allocation11 + $0xb0] sm:$0xff]  ;;  %v4621_v36 = vpack.c.bf16 %v464_v33, %v460_v31  ;;  %v469_v37 = vld [vmem:[#allocation11 + $0xc8] sm:$0xff]  ;;  %v471_v39 = vld [vmem:[#allocation11 + $0xd8] sm:$0xff] }
 0x1e2   :  { %4618 = vmatpush1.bf16.msra.mxu0 %v4617_v23  ;;  %v473_v38 = vld [vmem:[#allocation11 + $0xe8] sm:$0xff]  ;;  %v4685_v40 = vpack.c.bf16 %v466_v35, %v462_v34  ;;  %v475_v42 = vld [vmem:[#allocation11 + $0xf8] sm:$0xff]  ;;  %v468_v43 = vld [vmem:[#allocation11 + $0xc0] sm:$0xff] }
 0x1e3   :  { %4682 = vmatpush1.bf16.msra.mxu1 %v4681_v27  ;;  %4620 = vmatprep.subr.bf16.mxu0 %v4619_v28  ;;  %v4623_v41 = vpack.c.bf16 %v473_v38, %v469_v37  ;;  %v472_v44 = vld [vmem:[#allocation11 + $0xe0] sm:$0xff]  ;;  %v4687_v45 = vpack.c.bf16 %v475_v42, %v471_v39  ;;  %v470_v46 = vld [vmem:[#allocation11 + $0xd0] sm:$0xff]  ;;  %v477_v48 = vld [vmem:[#allocation11 + $0x108] sm:$0xff] }
 0x1e4   :  { %4684 = vmatprep.subr.bf16.mxu1 %v4683_v32  ;;  %v474_v47 = vld [vmem:[#allocation11 + $0xf0] sm:$0xff]  ;;  %v481_v49 = vld [vmem:[#allocation11 + $0x128] sm:$0xff]  ;;  %v479_v50 = vld [vmem:[#allocation11 + $0x118] sm:$0xff]  ;;  %v4625_v52 = vpack.c.bf16 %v472_v44, %v468_v43 }
 0x1e5   :  { %v483_v51 = vld [vmem:[#allocation11 + $0x138] sm:$0xff]  ;;  %v4689_v53 = vpack.c.bf16 %v474_v47, %v470_v46  ;;  %v4627_v54 = vpack.c.bf16 %v481_v49, %v477_v48  ;;  %v476_v55 = vld [vmem:[#allocation11 + $0x100] sm:$0xff]  ;;  %v478_v57 = vld [vmem:[#allocation11 + $0x110] sm:$0xff] }
 0x1e6   :  { %4622 = vmatpush1.bf16.msra.mxu0 %v4621_v36  ;;  %v480_v56 = vld [vmem:[#allocation11 + $0x120] sm:$0xff]  ;;  %v4691_v58 = vpack.c.bf16 %v483_v51, %v479_v50  ;;  %v482_v59 = vld [vmem:[#allocation11 + $0x130] sm:$0xff]  ;;  %v485_v60 = vld [vmem:[#allocation11 + $0x148] sm:$0xff] }
 0x1e7   :  { %4686 = vmatpush1.bf16.msra.mxu1 %v4685_v40  ;;  %4624 = vmatprep.subr.bf16.mxu0 %v4623_v41  ;;  %v489_v61 = vld [vmem:[#allocation11 + $0x168] sm:$0xff]  ;;  %v487_v62 = vld [vmem:[#allocation11 + $0x158] sm:$0xff]  ;;  %v4629_v0 = vpack.c.bf16 %v480_v56, %v476_v55  ;;  %v4693_v2 = vpack.c.bf16 %v482_v59, %v478_v57  ;;  %v484_v4 = vld [vmem:[#allocation11 + $0x140] sm:$0xff] }
 0x1e8   :  { %4688 = vmatprep.subr.bf16.mxu1 %v4687_v45  ;;  %v491_v63 = vld [vmem:[#allocation11 + $0x178] sm:$0xff]  ;;  %v4631_v3 = vpack.c.bf16 %v489_v61, %v485_v60  ;;  %v488_v5 = vld [vmem:[#allocation11 + $0x160] sm:$0xff]  ;;  %v486_v6 = vld [vmem:[#allocation11 + $0x150] sm:$0xff] }
 0x1e9   :  { %v4695_v7 = vpack.c.bf16 %v491_v63, %v487_v62  ;;  %v490_v8 = vld [vmem:[#allocation11 + $0x170] sm:$0xff]  ;;  %v493_v9 = vld [vmem:[#allocation11 + $0x188] sm:$0xff]  ;;  %v495_v11 = vld [vmem:[#allocation11 + $0x198] sm:$0xff]  ;;  %v4633_v13 = vpack.c.bf16 %v488_v5, %v484_v4 }
 0x1ea   :  { %4626 = vmatpush1.bf16.msra.mxu0 %v4625_v52  ;;  %v497_v10 = vld [vmem:[#allocation11 + $0x1a8] sm:$0xff]  ;;  %v499_v12 = vld [vmem:[#allocation11 + $0x1b8] sm:$0xff]  ;;  %v4697_v14 = vpack.c.bf16 %v490_v8, %v486_v6  ;;  %v492_v16 = vld [vmem:[#allocation11 + $0x180] sm:$0xff] }
 0x1eb   :  { %4690 = vmatpush1.bf16.msra.mxu1 %v4689_v53  ;;  %4628 = vmatprep.subr.bf16.mxu0 %v4627_v54  ;;  %v4635_v15 = vpack.c.bf16 %v497_v10, %v493_v9  ;;  %v496_v17 = vld [vmem:[#allocation11 + $0x1a0] sm:$0xff]  ;;  %v494_v18 = vld [vmem:[#allocation11 + $0x190] sm:$0xff]  ;;  %v4699_v19 = vpack.c.bf16 %v499_v12, %v495_v11  ;;  %v501_v21 = vld [vmem:[#allocation11 + $0x1c8] sm:$0xff] }
 0x1ec   :  { %4692 = vmatprep.subr.bf16.mxu1 %v4691_v58  ;;  %v498_v20 = vld [vmem:[#allocation11 + $0x1b0] sm:$0xff]  ;;  %v505_v22 = vld [vmem:[#allocation11 + $0x1e8] sm:$0xff]  ;;  %v503_v23 = vld [vmem:[#allocation11 + $0x1d8] sm:$0xff]  ;;  %v4637_v25 = vpack.c.bf16 %v496_v17, %v492_v16 }
 0x1ed   :  { %v507_v24 = vld [vmem:[#allocation11 + $0x1f8] sm:$0xff]  ;;  %v4701_v26 = vpack.c.bf16 %v498_v20, %v494_v18  ;;  %v4639_v27 = vpack.c.bf16 %v505_v22, %v501_v21  ;;  %v500_v28 = vld [vmem:[#allocation11 + $0x1c0] sm:$0xff]  ;;  %v502_v30 = vld [vmem:[#allocation11 + $0x1d0] sm:$0xff] }
 0x1ee   :  { %4630 = vmatpush1.bf16.msra.mxu0 %v4629_v0  ;;  %v504_v29 = vld [vmem:[#allocation11 + $0x1e0] sm:$0xff]  ;;  %v4703_v31 = vpack.c.bf16 %v507_v24, %v503_v23  ;;  %v506_v32 = vld [vmem:[#allocation11 + $0x1f0] sm:$0xff]  ;;  %v509_v33 = vld [vmem:[#allocation11 + $0x208] sm:$0xff] }
 0x1ef   :  { %4694 = vmatpush1.bf16.msra.mxu1 %v4693_v2  ;;  %4632 = vmatprep.subr.bf16.mxu0 %v4631_v3  ;;  %v513_v34 = vld [vmem:[#allocation11 + $0x228] sm:$0xff]  ;;  %v511_v35 = vld [vmem:[#allocation11 + $0x218] sm:$0xff]  ;;  %v4641_v37 = vpack.c.bf16 %v504_v29, %v500_v28  ;;  %v4705_v38 = vpack.c.bf16 %v506_v32, %v502_v30  ;;  %v508_v40 = vld [vmem:[#allocation11 + $0x200] sm:$0xff] }
 0x1f0   :  { %4696 = vmatprep.subr.bf16.mxu1 %v4695_v7  ;;  %v515_v36 = vld [vmem:[#allocation11 + $0x238] sm:$0xff]  ;;  %v4643_v39 = vpack.c.bf16 %v513_v34, %v509_v33  ;;  %v512_v41 = vld [vmem:[#allocation11 + $0x220] sm:$0xff]  ;;  %v510_v42 = vld [vmem:[#allocation11 + $0x210] sm:$0xff] }
 0x1f1   :  { %v4707_v43 = vpack.c.bf16 %v515_v36, %v511_v35  ;;  %v514_v44 = vld [vmem:[#allocation11 + $0x230] sm:$0xff]  ;;  %v517_v45 = vld [vmem:[#allocation11 + $0x248] sm:$0xff]  ;;  %v519_v47 = vld [vmem:[#allocation11 + $0x258] sm:$0xff]  ;;  %v4645_v49 = vpack.c.bf16 %v512_v41, %v508_v40 }
 0x1f2   :  { %4634 = vmatpush1.bf16.msra.mxu0 %v4633_v13  ;;  %v521_v46 = vld [vmem:[#allocation11 + $0x268] sm:$0xff]  ;;  %v523_v48 = vld [vmem:[#allocation11 + $0x278] sm:$0xff]  ;;  %v4709_v50 = vpack.c.bf16 %v514_v44, %v510_v42  ;;  %v516_v52 = vld [vmem:[#allocation11 + $0x240] sm:$0xff] }
 0x1f3   :  { %4698 = vmatpush1.bf16.msra.mxu1 %v4697_v14  ;;  %4636 = vmatprep.subr.bf16.mxu0 %v4635_v15  ;;  %v4647_v51 = vpack.c.bf16 %v521_v46, %v517_v45  ;;  %v520_v53 = vld [vmem:[#allocation11 + $0x260] sm:$0xff]  ;;  %v518_v54 = vld [vmem:[#allocation11 + $0x250] sm:$0xff]  ;;  %v4711_v55 = vpack.c.bf16 %v523_v48, %v519_v47  ;;  %v525_v57 = vld [vmem:[#allocation11 + $0x288] sm:$0xff] }
 0x1f4   :  { %4700 = vmatprep.subr.bf16.mxu1 %v4699_v19  ;;  %v522_v56 = vld [vmem:[#allocation11 + $0x270] sm:$0xff]  ;;  %v529_v58 = vld [vmem:[#allocation11 + $0x2a8] sm:$0xff]  ;;  %v527_v59 = vld [vmem:[#allocation11 + $0x298] sm:$0xff]  ;;  %v4649_v61 = vpack.c.bf16 %v520_v53, %v516_v52 }
 0x1f5   :  { %v531_v60 = vld [vmem:[#allocation11 + $0x2b8] sm:$0xff]  ;;  %v4713_v62 = vpack.c.bf16 %v522_v56, %v518_v54  ;;  %v4651_v63 = vpack.c.bf16 %v529_v58, %v525_v57  ;;  %v524_v0 = vld [vmem:[#allocation11 + $0x280] sm:$0xff]  ;;  %v526_v3 = vld [vmem:[#allocation11 + $0x290] sm:$0xff] }
 0x1f6   :  { %4638 = vmatpush1.bf16.msra.mxu0 %v4637_v25  ;;  %v528_v2 = vld [vmem:[#allocation11 + $0x2a0] sm:$0xff]  ;;  %v4715_v4 = vpack.c.bf16 %v531_v60, %v527_v59  ;;  %v530_v5 = vld [vmem:[#allocation11 + $0x2b0] sm:$0xff]  ;;  %v533_v6 = vld [vmem:[#allocation11 + $0x2c8] sm:$0xff] }
 0x1f7   :  { %4702 = vmatpush1.bf16.msra.mxu1 %v4701_v26  ;;  %4640 = vmatprep.subr.bf16.mxu0 %v4639_v27  ;;  %v537_v7 = vld [vmem:[#allocation11 + $0x2e8] sm:$0xff]  ;;  %v535_v8 = vld [vmem:[#allocation11 + $0x2d8] sm:$0xff]  ;;  %v4653_v10 = vpack.c.bf16 %v528_v2, %v524_v0  ;;  %v532_v11 = vld [vmem:[#allocation11 + $0x2c0] sm:$0xff]  ;;  %v4717_v12 = vpack.c.bf16 %v530_v5, %v526_v3 }
 0x1f8   :  { %4704 = vmatprep.subr.bf16.mxu1 %v4703_v31  ;;  %v539_v9 = vld [vmem:[#allocation11 + $0x2f8] sm:$0xff]  ;;  %v4655_v13 = vpack.c.bf16 %v537_v7, %v533_v6  ;;  %v536_v14 = vld [vmem:[#allocation11 + $0x2e0] sm:$0xff]  ;;  %v534_v15 = vld [vmem:[#allocation11 + $0x2d0] sm:$0xff] }
 0x1f9   :  { %v538_v16 = vld [vmem:[#allocation11 + $0x2f0] sm:$0xff]  ;;  %v4719_v17 = vpack.c.bf16 %v539_v9, %v535_v8  ;;  %v541_v18 = vld [vmem:[#allocation11 + $0x308] sm:$0xff]  ;;  %v543_v21 = vld [vmem:[#allocation11 + $0x318] sm:$0xff]  ;;  %v4657_v23 = vpack.c.bf16 %v536_v14, %v532_v11 }
 0x1fa   :  { %4642 = vmatpush1.bf16.msra.mxu0 %v4641_v37  ;;  %v545_v19 = vld [vmem:[#allocation11 + $0x328] sm:$0xff]  ;;  %v7195_v20 = vld [vmem:[#allocation2 + $0x38] sm:$0xff]  ;;  %v4721_v24 = vpack.c.bf16 %v538_v16, %v534_v15  ;;  %v540_v26 = vld [vmem:[#allocation11 + $0x300] sm:$0xff] }
 0x1fb   :  { %4706 = vmatpush1.bf16.msra.mxu1 %v4705_v38  ;;  %4644 = vmatprep.subr.bf16.mxu0 %v4643_v39  ;;  %v547_v22 = vld [vmem:[#allocation11 + $0x338] sm:$0xff]  ;;  %v4659_v25 = vpack.c.bf16 %v545_v19, %v541_v18  ;;  %v544_v27 = vld [vmem:[#allocation11 + $0x320] sm:$0xff]  ;;  %v542_v28 = vld [vmem:[#allocation11 + $0x310] sm:$0xff] }
 0x1fc   :  { %4708 = vmatprep.subr.bf16.mxu1 %v4707_v43  ;;  %658 = vmatprep.mubr.f32.mxu0 %v7195_v20  ;;  %v4723_v29 = vpack.c.bf16 %v547_v22, %v543_v21  ;;  %v546_v30 = vld [vmem:[#allocation11 + $0x330] sm:$0xff]  ;;  %v549_v31 = vld [vmem:[#allocation11 + $0x348] sm:$0xff]  ;;  %v551_v33 = vld [vmem:[#allocation11 + $0x358] sm:$0xff]  ;;  %v4661_v35 = vpack.c.bf16 %v544_v27, %v540_v26 }
 0x1fd   :  { %771 = vmatprep.mubr.f32.mxu1 %v7195_v20  ;;  %v553_v32 = vld [vmem:[#allocation11 + $0x368] sm:$0xff]  ;;  %v555_v34 = vld [vmem:[#allocation11 + $0x378] sm:$0xff]  ;;  %v4725_v36 = vpack.c.bf16 %v546_v30, %v542_v28  ;;  %v548_v38 = vld [vmem:[#allocation11 + $0x340] sm:$0xff] }
 0x1fe   :  { %4646 = vmatpush1.bf16.msra.mxu0 %v4645_v49  ;;  %v4663_v37 = vpack.c.bf16 %v553_v32, %v549_v31  ;;  %v552_v39 = vld [vmem:[#allocation11 + $0x360] sm:$0xff]  ;;  %v550_v40 = vld [vmem:[#allocation11 + $0x350] sm:$0xff]  ;;  %v4727_v41 = vpack.c.bf16 %v555_v34, %v551_v33  ;;  %v557_v43 = vld [vmem:[#allocation11 + $0x388] sm:$0xff] }
 0x1ff   :  { %4710 = vmatpush1.bf16.msra.mxu1 %v4709_v50  ;;  %4648 = vmatprep.subr.bf16.mxu0 %v4647_v51  ;;  %v554_v42 = vld [vmem:[#allocation11 + $0x370] sm:$0xff]  ;;  %v561_v44 = vld [vmem:[#allocation11 + $0x3a8] sm:$0xff]  ;;  %v559_v45 = vld [vmem:[#allocation11 + $0x398] sm:$0xff]  ;;  %v4665_v47 = vpack.c.bf16 %v552_v39, %v548_v38 }
 0x200   :  { %4712 = vmatprep.subr.bf16.mxu1 %v4711_v55  ;;  %v563_v46 = vld [vmem:[#allocation11 + $0x3b8] sm:$0xff]  ;;  %v4729_v48 = vpack.c.bf16 %v554_v42, %v550_v40  ;;  %v4667_v49 = vpack.c.bf16 %v561_v44, %v557_v43  ;;  %v556_v50 = vld [vmem:[#allocation11 + $0x380] sm:$0xff]  ;;  %v558_v52 = vld [vmem:[#allocation11 + $0x390] sm:$0xff] }
 0x201   :  { %v560_v51 = vld [vmem:[#allocation11 + $0x3a0] sm:$0xff]  ;;  %v4731_v53 = vpack.c.bf16 %v563_v46, %v559_v45  ;;  %v562_v54 = vld [vmem:[#allocation11 + $0x3b0] sm:$0xff]  ;;  %v565_v55 = vld [vmem:[#allocation11 + $0x3c8] sm:$0xff] }
 0x202   :  { %4650 = vmatpush1.bf16.msra.mxu0 %v4649_v61  ;;  %v569_v56 = vld [vmem:[#allocation11 + $0x3e8] sm:$0xff]  ;;  %v567_v57 = vld [vmem:[#allocation11 + $0x3d8] sm:$0xff]  ;;  %v4669_v59 = vpack.c.bf16 %v560_v51, %v556_v50  ;;  %v4733_v60 = vpack.c.bf16 %v562_v54, %v558_v52  ;;  %v566_v0 = vld [vmem:[#allocation11 + $0x3d0] sm:$0xff] }
 0x203   :  { %4714 = vmatpush1.bf16.msra.mxu1 %v4713_v62  ;;  %4652 = vmatprep.subr.bf16.mxu0 %v4651_v63  ;;  %v571_v58 = vld [vmem:[#allocation11 + $0x3f8] sm:$0xff]  ;;  %v4671_v61 = vpack.c.bf16 %v569_v56, %v565_v55  ;;  %v564_v62 = vld [vmem:[#allocation11 + $0x3c0] sm:$0xff]  ;;  %v570_v3 = vld [vmem:[#allocation11 + $0x3f0] sm:$0xff] }
 0x204   :  { %4716 = vmatprep.subr.bf16.mxu1 %v4715_v4  ;;  %v568_v63 = vld [vmem:[#allocation11 + $0x3e0] sm:$0xff]  ;;  %v4735_v2 = vpack.c.bf16 %v571_v58, %v567_v57  ;;  %v853_v4 = vld [vmem:[#allocation12 + $0x8] sm:$0xff]  ;;  %v855_v6 = vld [vmem:[#allocation12 + $0x18] sm:$0xff]  ;;  %v4737_v9 = vpack.c.bf16 %v570_v3, %v566_v0 }
 0x205   :  { %v857_v5 = vld [vmem:[#allocation12 + $0x28] sm:$0xff]  ;;  %v859_v7 = vld [vmem:[#allocation12 + $0x38] sm:$0xff]  ;;  %v4673_v8 = vpack.c.bf16 %v568_v63, %v564_v62  ;;  %v852_v11 = vld [vmem:[#allocation12] sm:$0xff] }
 0x206   :  { %4654 = vmatpush1.bf16.msra.mxu0 %v4653_v10  ;;  %v7199_v10 = vpack.c.bf16 %v857_v5, %v853_v4  ;;  %v854_v14 = vld [vmem:[#allocation12 + $0x10] sm:$0xff]  ;;  %v861_v16 = vld [vmem:[#allocation12 + $0x48] sm:$0xff]  ;;  %v7203_v18 = vld [vmem:[#allocation2] sm:$0xff] }
 0x207   :  { %4718 = vmatpush1.bf16.msra.mxu1 %v4717_v12  ;;  %4656 = vmatprep.subr.bf16.mxu0 %v4655_v13  ;;  %v856_v12 = vld [vmem:[#allocation12 + $0x20] sm:$0xff]  ;;  %v7201_v13 = vpack.c.bf16 %v859_v7, %v855_v6  ;;  %v858_v15 = vld [vmem:[#allocation12 + $0x30] sm:$0xff]  ;;  %v863_v21 = vld [vmem:[#allocation12 + $0x58] sm:$0xff] }
 0x208   :  { %4720 = vmatprep.subr.bf16.mxu1 %v4719_v17  ;;  %v865_v17 = vld [vmem:[#allocation12 + $0x68] sm:$0xff]  ;;  %v7205_v19 = vpack.c.bf16 %v856_v12, %v852_v11  ;;  %v867_v22 = vld [vmem:[#allocation12 + $0x78] sm:$0xff]  ;;  %v862_v28 = vld [vmem:[#allocation12 + $0x50] sm:$0xff] }
 0x209   :  { %v7211_v26 = vld [vmem:[#allocation2 + $0x30] sm:$0xff]  ;;  %v7213_v27 = vpack.c.bf16 %v865_v17, %v861_v16  ;;  %v7216_v30 = vpack.c.bf16 %v867_v22, %v863_v21  ;;  %v7220_v33 = vld [vmem:[#allocation2 + $0x8] sm:$0xff]  ;;  %v883_v50 = vld [vmem:[#allocation12 + $0xf8] sm:$0xff] }
 0x20a   :  { %4658 = vmatpush1.bf16.msra.mxu0 %v4657_v23  ;;  %v7208_v23 = vpack.c.bf16 %v858_v15, %v854_v14  ;;  %v869_v31 = vld [vmem:[#allocation12 + $0x88] sm:$0xff]  ;;  %v868_v38 = vld [vmem:[#allocation12 + $0x80] sm:$0xff]  ;;  %v870_v42 = vld [vmem:[#allocation12 + $0x90] sm:$0xff] }
 0x20b   :  { %4722 = vmatpush1.bf16.msra.mxu1 %v4721_v24  ;;  %4660 = vmatprep.subr.bf16.mxu0 %v4659_v25  ;;  %v860_v24 = vld [vmem:[#allocation12 + $0x40] sm:$0xff]  ;;  %v873_v32 = vld [vmem:[#allocation12 + $0xa8] sm:$0xff]  ;;  %v874_v43 = vld [vmem:[#allocation12 + $0xb0] sm:$0xff] }
 0x20c   :  { %4724 = vmatprep.subr.bf16.mxu1 %v4723_v29  ;;  %v864_v25 = vld [vmem:[#allocation12 + $0x60] sm:$0xff]  ;;  %v866_v29 = vld [vmem:[#allocation12 + $0x70] sm:$0xff]  ;;  %v877_v45 = vld [vmem:[#allocation12 + $0xc8] sm:$0xff]  ;;  %v7246_v51 = vpack.c.bf16 %v874_v43, %v870_v42 }
 0x20d   :  { %v7222_v34 = vpack.c.bf16 %v864_v25, %v860_v24  ;;  %v872_v39 = vld [vmem:[#allocation12 + $0xa0] sm:$0xff]  ;;  %v881_v46 = vld [vmem:[#allocation12 + $0xe8] sm:$0xff]  ;;  %v878_v56 = vld [vmem:[#allocation12 + $0xd0] sm:$0xff] }
 0x20e   :  { %4662 = vmatpush1.bf16.msra.mxu0 %v4661_v35  ;;  %v871_v35 = vld [vmem:[#allocation12 + $0x98] sm:$0xff]  ;;  %v7230_v40 = vld [vmem:[#allocation2 + $0x28] sm:$0xff]  ;;  %v7250_v55 = vpack.c.bf16 %v881_v46, %v877_v45  ;;  %v882_v57 = vld [vmem:[#allocation12 + $0xf0] sm:$0xff] }
 0x20f   :  { %4726 = vmatpush1.bf16.msra.mxu1 %v4725_v36  ;;  %4664 = vmatprep.subr.bf16.mxu0 %v4663_v37  ;;  %v875_v36 = vld [vmem:[#allocation12 + $0xb8] sm:$0xff]  ;;  %v7226_v37 = vpack.c.bf16 %v866_v29, %v862_v28  ;;  %v876_v52 = vld [vmem:[#allocation12 + $0xc0] sm:$0xff]  ;;  %v886_v6 = vld [vmem:[#allocation12 + $0x110] sm:$0xff] }
 0x210   :  { %4728 = vmatprep.subr.bf16.mxu1 %v4727_v41  ;;  %v7232_v41 = vpack.c.bf16 %v873_v32, %v869_v31  ;;  %v7236_v44 = vpack.c.bf16 %v875_v36, %v871_v35  ;;  %v414_v54 = vld [vmem:[#allocation2 + $0x20] sm:$0xff]  ;;  %v890_v7 = vld [vmem:[#allocation12 + $0x130] sm:$0xff]  ;;  %v897_v11 = vld [vmem:[#allocation12 + $0x168] sm:$0xff] }
 0x211   :  { %v887_v63 = vld [vmem:[#allocation12 + $0x118] sm:$0xff]  ;;  %v884_v3 = vld [vmem:[#allocation12 + $0x100] sm:$0xff]  ;;  %v7273_v16 = vpack.c.bf16 %v890_v7, %v886_v6  ;;  %v894_v24 = vld [vmem:[#allocation12 + $0x150] sm:$0xff] }
 0x212   :  { %4666 = vmatpush1.bf16.msra.mxu0 %v4665_v47  ;;  %v7240_v47 = vld [vmem:[#allocation2 + $0x10] sm:$0xff]  ;;  %v891_v0 = vld [vmem:[#allocation12 + $0x138] sm:$0xff]  ;;  %v888_v4 = vld [vmem:[#allocation12 + $0x120] sm:$0xff] }
 0x213   :  { %4730 = vmatpush1.bf16.msra.mxu1 %v4729_v48  ;;  %4668 = vmatprep.subr.bf16.mxu0 %v4667_v49  ;;  %v7242_v48 = vpack.c.bf16 %v872_v39, %v868_v38  ;;  %v879_v49 = vld [vmem:[#allocation12 + $0xd8] sm:$0xff]  ;;  %v7270_v12 = vpack.c.bf16 %v888_v4, %v884_v3  ;;  %v892_v17 = vld [vmem:[#allocation12 + $0x140] sm:$0xff]  ;;  %v898_v25 = vld [vmem:[#allocation12 + $0x170] sm:$0xff]  ;;  %v8461_v3 = vmov 0.0  }
 0x214   :  { %4732 = vmatprep.subr.bf16.mxu1 %v4731_v53  ;;  %v880_v53 = vld [vmem:[#allocation12 + $0xe0] sm:$0xff]  ;;  %v7254_v58 = vpack.c.bf16 %v883_v50, %v879_v49  ;;  %v895_v14 = vld [vmem:[#allocation12 + $0x158] sm:$0xff]  ;;  %v901_v29 = vld [vmem:[#allocation12 + $0x188] sm:$0xff]  ;;  %v7286_v38 = vpack.c.bf16 %v898_v25, %v894_v24 }
 0x215   :  { %v7258_v62 = vpack.c.bf16 %v880_v53, %v876_v52  ;;  %v899_v15 = vld [vmem:[#allocation12 + $0x178] sm:$0xff]  ;;  %v896_v21 = vld [vmem:[#allocation12 + $0x160] sm:$0xff]  ;;  %v905_v31 = vld [vmem:[#allocation12 + $0x1a8] sm:$0xff] }
 0x216   :  { %4670 = vmatpush1.bf16.msra.mxu0 %v4669_v59  ;;  %v885_v59 = vld [vmem:[#allocation12 + $0x108] sm:$0xff]  ;;  %v7279_v28 = vpack.c.bf16 %v899_v15, %v895_v14  ;;  %v7282_v32 = vpack.c.bf16 %v896_v21, %v892_v17  ;;  %v903_v35 = vld [vmem:[#allocation12 + $0x198] sm:$0xff]  ;;  %v900_v39 = vld [vmem:[#allocation12 + $0x180] sm:$0xff]  ;;  %v7290_v43 = vpack.c.bf16 %v905_v31, %v901_v29 }
 0x217   :  { %4734 = vmatpush1.bf16.msra.mxu1 %v4733_v60  ;;  %4672 = vmatprep.subr.bf16.mxu0 %v4671_v61  ;;  %v889_v60 = vld [vmem:[#allocation12 + $0x128] sm:$0xff]  ;;  %v395_v61 = vld [vmem:[#allocation2 + $0x18] sm:$0xff]  ;;  %v904_v42 = vld [vmem:[#allocation12 + $0x1a0] sm:$0xff] }
 0x218   :  { %4736 = vmatprep.subr.bf16.mxu1 %v4735_v2  ;;  %v7261_v2 = vpack.c.bf16 %v882_v57, %v878_v56  ;;  %v7264_v5 = vpack.c.bf16 %v889_v60, %v885_v59  ;;  %v907_v36 = vld [vmem:[#allocation12 + $0x1b8] sm:$0xff]  ;;  %v902_v45 = vld [vmem:[#allocation12 + $0x190] sm:$0xff]  ;;  %v909_v50 = vld [vmem:[#allocation12 + $0x1c8] sm:$0xff]  ;;  %v7298_v53 = vpack.c.bf16 %v904_v42, %v900_v39 }
 0x219   :  { %v906_v46 = vld [vmem:[#allocation12 + $0x1b0] sm:$0xff]  ;;  %v7294_v49 = vpack.c.bf16 %v907_v36, %v903_v35  ;;  %v913_v52 = vld [vmem:[#allocation12 + $0x1e8] sm:$0xff]  ;;  %v908_v57 = vld [vmem:[#allocation12 + $0x1c0] sm:$0xff] }
 0x21a   :  { %4674 = vmatpush1.bf16.msra.mxu0 %v4673_v8  ;;  %v7267_v8 = vpack.c.bf16 %v891_v0, %v887_v63  ;;  %v7302_v56 = vpack.c.bf16 %v906_v46, %v902_v45  ;;  %v912_v59 = vld [vmem:[#allocation12 + $0x1e0] sm:$0xff]  ;;  %v7306_v60 = vpack.c.bf16 %v913_v52, %v909_v50 }
 0x21b   :  { %4738 = vmatpush1.bf16.msra.mxu1 %v4737_v9  ;;  %4740 = vmatprep.subr.bf16.mxu0 %v7199_v10  ;;  %v893_v9 = vld [vmem:[#allocation12 + $0x148] sm:$0xff]  ;;  %v7314_v0 = vpack.c.bf16 %v912_v59, %v908_v57  ;;  %v572_v14 = vld [vmem:[%s8449_s4] sm:$0xf] }
 0x21c   :  { %4772 = vmatprep.subr.bf16.mxu1 %v7201_v13  ;;  %v7276_v22 = vpack.c.bf16 %v897_v11, %v893_v9 }
 0x21d   :  { %659 = vmatmul.mubr.f32.vlgmr.msra.gmra.mrb[0].mxu0 %v7203_v18 }
 0x21e   :  { %772 = vmatmul.mubr.f32.vlgmr.msra.gmra.mrb[0].mxu1 %v7203_v18  ;;  %4742 = vmatpush1.bf16.msra.mxu0 %v7205_v19 }
 0x21f   :  { %4774 = vmatpush1.bf16.msra.mxu1 %v7208_v23  ;;  %664 = vmatprep.mubr.f32.mxu0 %v7211_v26 }
 0x220   :  { %777 = vmatprep.mubr.f32.mxu1 %v7211_v26  ;;  %4744 = vmatprep.subr.bf16.mxu0 %v7213_v27 }
 0x221   :  { %665 = vmatmul.mubr.f32.gmra.mrb[2].mxu0 %v7220_v33  ;;  %4776 = vmatprep.subr.bf16.mxu1 %v7216_v30 }
 0x222   :  { %778 = vmatmul.mubr.f32.gmra.mrb[2].mxu1 %v7220_v33  ;;  %4746 = vmatpush1.bf16.msra.mxu0 %v7222_v34 }
 0x223   :  { %4778 = vmatpush1.bf16.msra.mxu1 %v7226_v37  ;;  %670 = vmatprep.mubr.f32.mxu0 %v7230_v40 }
 0x224   :  { %783 = vmatprep.mubr.f32.mxu1 %v7230_v40  ;;  %4748 = vmatprep.subr.bf16.mxu0 %v7232_v41 }
 0x225   :  { %671 = vmatmul.mubr.f32.gmra.mrb[4].mxu0 %v7240_v47  ;;  %4780 = vmatprep.subr.bf16.mxu1 %v7236_v44 }
 0x226   :  { %784 = vmatmul.mubr.f32.gmra.mrb[4].mxu1 %v7240_v47  ;;  %4750 = vmatpush1.bf16.msra.mxu0 %v7242_v48 }
 0x227   :  { %4782 = vmatpush1.bf16.msra.mxu1 %v7246_v51  ;;  %676 = vmatprep.mubr.f32.mxu0 %v414_v54 }
 0x228   :  { %789 = vmatprep.mubr.f32.mxu1 %v414_v54  ;;  %4752 = vmatprep.subr.bf16.mxu0 %v7250_v55 }
 0x229   :  { %677 = vmatmul.mubr.f32.gmra.mrb[6].mxu0 %v395_v61  ;;  %4784 = vmatprep.subr.bf16.mxu1 %v7254_v58 }
 0x22a   :  { %790 = vmatmul.mubr.f32.gmra.mrb[6].mxu1 %v395_v61  ;;  %4754 = vmatpush1.bf16.msra.mxu0 %v7258_v62 }
 0x22b   :  { %4786 = vmatpush1.bf16.msra.mxu1 %v7261_v2  ;;  %682 = vmatprep.mubr.f32.mxu0 %v395_v61 }
 0x22c   :  { %795 = vmatprep.mubr.f32.mxu1 %v395_v61  ;;  %4756 = vmatprep.subr.bf16.mxu0 %v7264_v5  ;;  %v914_v61 = vld [vmem:[#allocation12 + $0x1f0] sm:$0xff] }
 0x22d   :  { %683 = vmatmul.mubr.f32.gmra.mrb[8].mxu0 %v414_v54  ;;  %4788 = vmatprep.subr.bf16.mxu1 %v7267_v8 }
 0x22e   :  { %796 = vmatmul.mubr.f32.gmra.mrb[8].mxu1 %v414_v54  ;;  %4758 = vmatpush1.bf16.msra.mxu0 %v7270_v12  ;;  %v915_v54 = vld [vmem:[#allocation12 + $0x1f8] sm:$0xff] }
 0x22f   :  { %4790 = vmatpush1.bf16.msra.mxu1 %v7273_v16  ;;  %688 = vmatprep.mubr.f32.mxu0 %v7240_v47 }
 0x230   :  { %801 = vmatprep.mubr.f32.mxu1 %v7240_v47  ;;  %4760 = vmatprep.subr.bf16.mxu0 %v7276_v22  ;;  %v911_v47 = vld [vmem:[#allocation12 + $0x1d8] sm:$0xff] }
 0x231   :  { %689 = vmatmul.mubr.f32.gmra.mrb[10].mxu0 %v7230_v40  ;;  %4792 = vmatprep.subr.bf16.mxu1 %v7279_v28  ;;  %v7310_v63 = vpack.c.bf16 %v915_v54, %v911_v47 }
 0x232   :  { %802 = vmatmul.mubr.f32.gmra.mrb[10].mxu1 %v7230_v40  ;;  %4762 = vmatpush1.bf16.msra.mxu0 %v7282_v32  ;;  %v910_v40 = vld [vmem:[#allocation12 + $0x1d0] sm:$0xff] }
 0x233   :  { %4794 = vmatpush1.bf16.msra.mxu1 %v7286_v38  ;;  %694 = vmatprep.mubr.f32.mxu0 %v7220_v33 }
 0x234   :  { %807 = vmatprep.mubr.f32.mxu1 %v7220_v33  ;;  %4764 = vmatprep.subr.bf16.mxu0 %v7290_v43  ;;  %v7318_v33 = vpack.c.bf16 %v914_v61, %v910_v40 }
 0x235   :  { %695 = vmatmul.mubr.f32.gmra.mrb[12].mxu0 %v7211_v26  ;;  %4796 = vmatprep.subr.bf16.mxu1 %v7294_v49 }
 0x236   :  { %808 = vmatmul.mubr.f32.gmra.mrb[12].mxu1 %v7211_v26  ;;  %4766 = vmatpush1.bf16.msra.mxu0 %v7298_v53  ;;  %v427_v26 = vld [vmem:[%s8446_s1] sm:$0xff] }
 0x237   :  { %4798 = vmatpush1.bf16.msra.mxu1 %v7302_v56  ;;  %700 = vmatprep.mubr.f32.mxu0 %v7203_v18 }
 0x238   :  { %813 = vmatprep.mubr.f32.mxu1 %v7203_v18  ;;  %4768 = vmatprep.subr.bf16.mxu0 %v7306_v60 }
 0x239   :  { %701 = vmatmul.mubr.f32.gmra.mrb[14].mxu0 %v7195_v20  ;;  %4800 = vmatprep.subr.bf16.mxu1 %v7310_v63 }
 0x23a   :  { %814 = vmatmul.mubr.f32.gmra.mrb[14].mxu1 %v7195_v20  ;;  %4770 = vmatpush1.bf16.msra.mxu0 %v7314_v0  ;;  %v424_v20 = vlaneseq }
 0x23b   :  { %4802 = vmatpush1.bf16.msra.mxu1 %v7318_v33  ;;  %987 = vmatprep.mubr.f32.mxu0 %v8461_v3 }
 0x23c   :  { %1058 = vmatprep.mubr.f32.mxu1 %v8461_v3  ;;  %1071 = vperm.xlu0 %6077, %v427_v26   ;;  %v7370_v18 = vand.u32 127, %v424_v20  ;;  %v7383_v9 = vshrl.u32 %v424_v20, 7 }
 0x23d   :  { %988 = vmatmul.mubr.f32.vlgmr.msra.gmra.mrb[0].mxu0 %v8461_v3  ;;  %4804 = vmatprep.subr.bf16.mxu0 %v7199_v10 }
 0x23e   :  { %1059 = vmatmul.mubr.f32.vlgmr.msra.gmra.mrb[0].mxu1 %v8461_v3  ;;  %4836 = vmatprep.subr.bf16.mxu1 %v7201_v13  ;;  %vm426_vm0 = vcmp.lt.s32.totalorder %v7370_v18, 64  ;;  %8475 = vst [vmem:[#allocation71_spill] sm:$0xff] %v7383_v9  ;;  %v8460_v11 = vsub.s32 0, %v7383_v9  ;;  %v8459_v15 = vsub.s32 1, %v7383_v9  ;;  %v8458_v17 = vsub.s32 2, %v7383_v9  ;;  %v2380_v18 = vld [vmem:[#allocation14] sm:$0xff] }
 0x23f   :  { %4806 = vmatpush1.bf16.msra.mxu0 %v7205_v19  ;;  %4838 = vmatpush1.bf16.msra.mxu1 %v7208_v23  ;;  %v2341_v4 = vsel %vm426_vm0, 7, %v6787_v1  ;;  %v8457_v29 = vsub.s32 3, %v7383_v9 }
 0x240   :  { %4808 = vmatprep.subr.bf16.mxu0 %v7213_v27  ;;  %4840 = vmatprep.subr.bf16.mxu1 %v7216_v30  ;;  %v7392_v1 = vrot.slane %v572_v14, %v8460_v11  ;;  %v7397_v21 = vrot.slane %v572_v14, %v8459_v15  ;;  %v7401_v25 = vrot.slane %v572_v14, %v8458_v17 }
 0x241   :  { %1173 = vmatprep.mubr.f32.mxu0 %v8461_v3  ;;  %1244 = vmatprep.mubr.f32.mxu1 %v8461_v3  ;;  %v7408_v50 = vrot.slane %v572_v14, %v8457_v29 }
 0x243   :  { %4810 = vmatpush1.bf16.msra.mxu0 %v7222_v34  ;;  %4842 = vmatpush1.bf16.msra.mxu1 %v7226_v37 }
 0x244   :  { %4812 = vmatprep.subr.bf16.mxu0 %v7232_v41  ;;  %4844 = vmatprep.subr.bf16.mxu1 %v7236_v44 }
 0x247   :  { %4814 = vmatpush1.bf16.msra.mxu0 %v7242_v48  ;;  %4846 = vmatpush1.bf16.msra.mxu1 %v7246_v51 }
 0x248   :  { %4816 = vmatprep.subr.bf16.mxu0 %v7250_v55  ;;  %4848 = vmatprep.subr.bf16.mxu1 %v7254_v58 }
 0x24b   :  { %4818 = vmatpush1.bf16.msra.mxu0 %v7258_v62  ;;  %4850 = vmatpush1.bf16.msra.mxu1 %v7261_v2 }
 0x24c   :  { %4820 = vmatprep.subr.bf16.mxu0 %v7264_v5  ;;  %4852 = vmatprep.subr.bf16.mxu1 %v7267_v8 }
 0x24f   :  { %4822 = vmatpush1.bf16.msra.mxu0 %v7270_v12  ;;  %4854 = vmatpush1.bf16.msra.mxu1 %v7273_v16 }
 0x250   :  { %4824 = vmatprep.subr.bf16.mxu0 %v7276_v22  ;;  %4856 = vmatprep.subr.bf16.mxu1 %v7279_v28 }
 0x253   :  { %4826 = vmatpush1.bf16.msra.mxu0 %v7282_v32  ;;  %4858 = vmatpush1.bf16.msra.mxu1 %v7286_v38 }
 0x254   :  { %4828 = vmatprep.subr.bf16.mxu0 %v7290_v43  ;;  %4860 = vmatprep.subr.bf16.mxu1 %v7294_v49 }
 0x257   :  { %4830 = vmatpush1.bf16.msra.mxu0 %v7298_v53  ;;  %4862 = vmatpush1.bf16.msra.mxu1 %v7302_v56 }
 0x258   :  { %4832 = vmatprep.subr.bf16.mxu0 %v7306_v60  ;;  %4864 = vmatprep.subr.bf16.mxu1 %v7310_v63 }
 0x25b   :  { %4834 = vmatpush1.bf16.msra.mxu0 %v7314_v0  ;;  %4866 = vmatpush1.bf16.msra.mxu1 %v7318_v33 }
 0x25c   :  { %4868 = vmatprep.subr.bf16.mxu0 %v7199_v10  ;;  %4900 = vmatprep.subr.bf16.mxu1 %v7201_v13 }
 0x2bb   :  { %v7376_v6 = vpop.permute.xlu0 %1071 }
 0x2bc   :  { %vm7379_vm1 = vcmp.lt.s32.totalorder %v2341_v4, %v7376_v6 }
 0x310   :  { %v989_v24 = vpop.f32.mrb[0].mxu0 }
 0x311   :  { %v5915_v31 = vadd.f32 %v989_v24, %v7392_v1  ;;  %v1060_v35 = vpop.f32.mrb[0].mxu1  ;;  %v991_v36 = vpop.f32.mrb[1].mxu0 }
 0x312   :  { %v5916_v39 = vadd.f32 %v991_v36, %v7397_v21  ;;  %v1062_v42 = vpop.f32.mrb[1].mxu1  ;;  %v5931_v52 = vadd.f32 %v1060_v35, %v7401_v25 }
 0x313   :  { %v1074_v45 = vmul.f32 0.5, %v5915_v31  ;;  %v5932_v47 = vadd.f32 %v1062_v42, %v7408_v50 }
 0x314   :  { %v1078_v46 = vmul.f32 0.5, %v5916_v39 }
 0x315   :  { %6078 = vtanh.f32 %v1074_v45  ;;  %v1083_v54 = vmul.f32 0.5, %v5932_v47  ;;  %v6789_v45 = vmov 7  }
 0x316   :  { %6080 = vtanh.f32 %v1078_v46  ;;  %v1069_v42 = vsel %vm426_vm0, 0, %v6789_v45 }
 0x317   :  { %6082 = vtanh.f32 %v5931_v52  ;;  %vm7420_vm2 = vcmp.lt.s32.totalorder %v1069_v42, %v7376_v6 }
 0x318   :  { %6084 = vtanh.f32 %v1083_v54 }
 0x31f   :  { %v6079_v57 = vpop.eup %6078 }
 0x320   :  { %v6081_v59 = vpop.eup %6080  ;;  %v1076_v40 = vmul.f32 0.5, %v6079_v57 }
 0x321   :  { %v1080_v61 = vmul.f32 0.5, %v6081_v59  ;;  %v6083_v20 = vpop.eup %6082 }
 0x322   :  { %v1077_v26 = vadd.f32 0.5, %v1076_v40  ;;  %v6085_v35 = vpop.eup %6084 }
 0x323   :  { %v1081_v4 = vadd.f32 0.5, %v1080_v61  ;;  %v1085_v36 = vmul.f32 0.5, %v6085_v35 }
 0x324   :  { %v1088_v24 = vmul.f32 %v6083_v20, %v1077_v26 }
 0x325   :  { %v1087_v31 = vmul.f32 0.0, %v1081_v4  ;;  %v1086_v39 = vadd.f32 0.5, %v1085_v36 }
 0x327   :  { %v7412_v14 = vadd.f32 %v1088_v24, %v1087_v31 }
 0x329   :  { %6086 = vtanh.f32 %v7412_v14 }
 0x333   :  { %v6087_v46 = vpop.eup %6086 }
 0x334   :  { %v7417_v52 = vmul.f32 %v6087_v46, %v1086_v39 }
 0x336   :  { %4506 = vmatmul.mubr.msk.f32.vlgmr.msra.gmra.mrb[2].mxu0 %vm7420_vm2, %v7417_v52  ;;  %4507 = vmatmul.mubr.msk.f32.vlgmr.msra.gmra.mrb[2].mxu1 %vm7420_vm2, %v7417_v52 }
 0x337   :  { %4870 = vmatpush1.bf16.msra.mxu0 %v7205_v19  ;;  %4902 = vmatpush1.bf16.msra.mxu1 %v7208_v23 }
 0x338   :  { %4872 = vmatprep.subr.bf16.mxu0 %v7213_v27  ;;  %4904 = vmatprep.subr.bf16.mxu1 %v7216_v30 }
 0x339   :  { %1357 = vmatprep.mubr.f32.mxu0 %v8461_v3  ;;  %1428 = vmatprep.mubr.f32.mxu1 %v8461_v3 }
 0x33b   :  { %4874 = vmatpush1.bf16.msra.mxu0 %v7222_v34  ;;  %4906 = vmatpush1.bf16.msra.mxu1 %v7226_v37 }
 0x33c   :  { %4876 = vmatprep.subr.bf16.mxu0 %v7232_v41  ;;  %4908 = vmatprep.subr.bf16.mxu1 %v7236_v44 }
 0x33f   :  { %4878 = vmatpush1.bf16.msra.mxu0 %v7242_v48  ;;  %4910 = vmatpush1.bf16.msra.mxu1 %v7246_v51 }
 0x340   :  { %4880 = vmatprep.subr.bf16.mxu0 %v7250_v55  ;;  %4912 = vmatprep.subr.bf16.mxu1 %v7254_v58 }
 0x343   :  { %4882 = vmatpush1.bf16.msra.mxu0 %v7258_v62  ;;  %4914 = vmatpush1.bf16.msra.mxu1 %v7261_v2 }
 0x344   :  { %4884 = vmatprep.subr.bf16.mxu0 %v7264_v5  ;;  %4916 = vmatprep.subr.bf16.mxu1 %v7267_v8 }
 0x347   :  { %4886 = vmatpush1.bf16.msra.mxu0 %v7270_v12  ;;  %4918 = vmatpush1.bf16.msra.mxu1 %v7273_v16 }
 0x348   :  { %4888 = vmatprep.subr.bf16.mxu0 %v7276_v22  ;;  %4920 = vmatprep.subr.bf16.mxu1 %v7279_v28 }
 0x34b   :  { %4890 = vmatpush1.bf16.msra.mxu0 %v7282_v32  ;;  %4922 = vmatpush1.bf16.msra.mxu1 %v7286_v38 }
 0x34c   :  { %4892 = vmatprep.subr.bf16.mxu0 %v7290_v43  ;;  %4924 = vmatprep.subr.bf16.mxu1 %v7294_v49 }
 0x34f   :  { %4894 = vmatpush1.bf16.msra.mxu0 %v7298_v53  ;;  %4926 = vmatpush1.bf16.msra.mxu1 %v7302_v56 }
 0x350   :  { %4896 = vmatprep.subr.bf16.mxu0 %v7306_v60  ;;  %4928 = vmatprep.subr.bf16.mxu1 %v7310_v63 }
 0x353   :  { %4898 = vmatpush1.bf16.msra.mxu0 %v7314_v0  ;;  %4930 = vmatpush1.bf16.msra.mxu1 %v7318_v33 }
 0x354   :  { %4932 = vmatprep.subr.bf16.mxu0 %v7199_v10  ;;  %4964 = vmatprep.subr.bf16.mxu1 %v7201_v13 }
 0x409   :  { %v1175_v54 = vpop.f32.mrb[2].mxu0  ;;  %v1246_v57 = vpop.f32.mrb[2].mxu1 }
 0x40a   :  { %v5917_v59 = vadd.f32 %v1175_v54, %v7392_v1  ;;  %v1177_v40 = vpop.f32.mrb[3].mxu0  ;;  %v1248_v61 = vpop.f32.mrb[3].mxu1  ;;  %v5933_v24 = vadd.f32 %v1246_v57, %v7401_v25 }
 0x40b   :  { %v5918_v26 = vadd.f32 %v1177_v40, %v7397_v21  ;;  %v5934_v31 = vadd.f32 %v1248_v61, %v7408_v50 }
 0x40c   :  { %v1257_v20 = vmul.f32 0.5, %v5917_v59  ;;  %v1093_v59 = vsel %vm7420_vm2, %v7412_v14, 0.0 }
 0x40d   :  { %v1261_v4 = vmul.f32 0.5, %v5918_v26  ;;  %v1266_v35 = vmul.f32 0.5, %v5934_v31  ;;  %v6790_v26 = vmov 6  }
 0x40e   :  { %6088 = vtanh.f32 %v1257_v20  ;;  %v1255_v57 = vsel %vm426_vm0, 1, %v6790_v26 }
 0x40f   :  { %6090 = vtanh.f32 %v1261_v4  ;;  %vm7474_vm3 = vcmp.lt.s32.totalorder %v1255_v57, %v7376_v6 }
 0x410   :  { %6092 = vtanh.f32 %v5933_v24 }
 0x411   :  { %6094 = vtanh.f32 %v1266_v35 }
 0x418   :  { %v6089_v36 = vpop.eup %6088 }
 0x419   :  { %v6091_v39 = vpop.eup %6090  ;;  %v1259_v45 = vmul.f32 0.5, %v6089_v36 }
 0x41a   :  { %v1263_v42 = vmul.f32 0.5, %v6091_v39  ;;  %v6093_v54 = vpop.eup %6092 }
 0x41b   :  { %v1260_v46 = vadd.f32 0.5, %v1259_v45  ;;  %v6095_v31 = vpop.eup %6094 }
 0x41c   :  { %v1264_v29 = vadd.f32 0.5, %v1263_v42  ;;  %v1268_v35 = vmul.f32 0.5, %v6095_v31 }
 0x41d   :  { %v1271_v40 = vmul.f32 %v6093_v54, %v1260_v46 }
 0x41e   :  { %v1270_v20 = vmul.f32 %v1264_v29, %v1093_v59  ;;  %v1269_v14 = vadd.f32 0.5, %v1268_v35  ;;  %v1092_v29 = vsel %vm7420_vm2, %v7417_v52, 0.0 }
 0x420   :  { %v1272_v61 = vadd.f32 %v1271_v40, %v1270_v20 }
 0x422   :  { %6096 = vtanh.f32 %v1272_v61  ;;  %v7480_v24 = vsel %vm7474_vm3, %v1272_v61, %v1093_v59 }
 0x42c   :  { %v6097_v36 = vpop.eup %6096 }
 0x42d   :  { %v7482_v39 = vmul.f32 %v6097_v36, %v1269_v14 }
 0x42f   :  { %v7490_v45 = vsel %vm7474_vm3, %v7482_v39, %v1092_v29 }
 0x430   :  { %1358 = vmatmul.mubr.f32.vlgmr.msra.gmra.mrb[4].mxu0 %v7490_v45  ;;  %1429 = vmatmul.mubr.f32.vlgmr.msra.gmra.mrb[4].mxu1 %v7490_v45 }
 0x431   :  { %4934 = vmatpush1.bf16.msra.mxu0 %v7205_v19  ;;  %4966 = vmatpush1.bf16.msra.mxu1 %v7208_v23 }
 0x432   :  { %4936 = vmatprep.subr.bf16.mxu0 %v7213_v27  ;;  %4968 = vmatprep.subr.bf16.mxu1 %v7216_v30 }
 0x433   :  { %1541 = vmatprep.mubr.f32.mxu0 %v8461_v3  ;;  %1612 = vmatprep.mubr.f32.mxu1 %v8461_v3 }
 0x435   :  { %4938 = vmatpush1.bf16.msra.mxu0 %v7222_v34  ;;  %4970 = vmatpush1.bf16.msra.mxu1 %v7226_v37 }
 0x436   :  { %4940 = vmatprep.subr.bf16.mxu0 %v7232_v41  ;;  %4972 = vmatprep.subr.bf16.mxu1 %v7236_v44 }
 0x439   :  { %4942 = vmatpush1.bf16.msra.mxu0 %v7242_v48  ;;  %4974 = vmatpush1.bf16.msra.mxu1 %v7246_v51 }
 0x43a   :  { %4944 = vmatprep.subr.bf16.mxu0 %v7250_v55  ;;  %4976 = vmatprep.subr.bf16.mxu1 %v7254_v58 }
 0x43d   :  { %4946 = vmatpush1.bf16.msra.mxu0 %v7258_v62  ;;  %4978 = vmatpush1.bf16.msra.mxu1 %v7261_v2 }
 0x43e   :  { %4948 = vmatprep.subr.bf16.mxu0 %v7264_v5  ;;  %4980 = vmatprep.subr.bf16.mxu1 %v7267_v8 }
 0x441   :  { %4950 = vmatpush1.bf16.msra.mxu0 %v7270_v12  ;;  %4982 = vmatpush1.bf16.msra.mxu1 %v7273_v16 }
 0x442   :  { %4952 = vmatprep.subr.bf16.mxu0 %v7276_v22  ;;  %4984 = vmatprep.subr.bf16.mxu1 %v7279_v28 }
 0x445   :  { %4954 = vmatpush1.bf16.msra.mxu0 %v7282_v32  ;;  %4986 = vmatpush1.bf16.msra.mxu1 %v7286_v38 }
 0x446   :  { %4956 = vmatprep.subr.bf16.mxu0 %v7290_v43  ;;  %4988 = vmatprep.subr.bf16.mxu1 %v7294_v49 }
 0x449   :  { %4958 = vmatpush1.bf16.msra.mxu0 %v7298_v53  ;;  %4990 = vmatpush1.bf16.msra.mxu1 %v7302_v56 }
 0x44a   :  { %4960 = vmatprep.subr.bf16.mxu0 %v7306_v60  ;;  %4992 = vmatprep.subr.bf16.mxu1 %v7310_v63 }
 0x44d   :  { %4962 = vmatpush1.bf16.msra.mxu0 %v7314_v0  ;;  %4994 = vmatpush1.bf16.msra.mxu1 %v7318_v33 }
 0x44e   :  { %4996 = vmatprep.subr.bf16.mxu0 %v7199_v10  ;;  %5028 = vmatprep.subr.bf16.mxu1 %v7201_v13 }
 0x503   :  { %v1359_v42 = vpop.f32.mrb[4].mxu0  ;;  %v1430_v46 = vpop.f32.mrb[4].mxu1 }
 0x504   :  { %v5919_v54 = vadd.f32 %v1359_v42, %v7392_v1  ;;  %v1361_v59 = vpop.f32.mrb[5].mxu0  ;;  %v1432_v40 = vpop.f32.mrb[5].mxu1  ;;  %v5935_v61 = vadd.f32 %v1430_v46, %v7401_v25 }
 0x505   :  { %v5920_v26 = vadd.f32 %v1361_v59, %v7397_v21  ;;  %v5936_v31 = vadd.f32 %v1432_v40, %v7408_v50  ;;  %v6791_v59 = vmov 5   ;;  %v8480_v40 = vmov 0 }
 0x506   :  { %v1441_v57 = vmul.f32 0.5, %v5919_v54  ;;  %v1439_v54 = vsel %vm426_vm0, 2, %v6791_v59 }
 0x507   :  { %v1445_v20 = vmul.f32 0.5, %v5920_v26  ;;  %v1450_v35 = vmul.f32 0.5, %v5936_v31  ;;  %vm7536_vm4 = vcmp.lt.s32.totalorder %v1439_v54, %v7376_v6 }
 0x508   :  { %6098 = vtanh.f32 %v1441_v57  ;;  %v8481_v40 = vsel %vm7536_vm4, 4294967295, %v8480_v40 }
 0x509   :  { %6100 = vtanh.f32 %v1445_v20  ;;  %8482 = vst [vmem:[#allocation72_spill] sm:$0xff] %v8481_v40 }
 0x50a   :  { %6102 = vtanh.f32 %v5935_v61 }
 0x50b   :  { %6104 = vtanh.f32 %v1450_v35 }
 0x512   :  { %v6099_v14 = vpop.eup %6098 }
 0x513   :  { %v6101_v36 = vpop.eup %6100  ;;  %v1443_v29 = vmul.f32 0.5, %v6099_v14 }
 0x514   :  { %v1447_v17 = vmul.f32 0.5, %v6101_v36  ;;  %v6103_v15 = vpop.eup %6102 }
 0x515   :  { %v1444_v42 = vadd.f32 0.5, %v1443_v29 }
 0x516   :  { %v1448_v11 = vadd.f32 0.5, %v1447_v17  ;;  %v6105_v17 = vpop.eup %6104 }
 0x517   :  { %v1455_v3 = vmul.f32 %v6103_v15, %v1444_v42  ;;  %v1452_v15 = vmul.f32 0.5, %v6105_v17 }
 0x518   :  { %v1454_v46 = vmul.f32 %v1448_v11, %v7480_v24  ;;  %v8484_v11 = vmov 0.0  }
 0x519   :  { %v1453_v20 = vadd.f32 0.5, %v1452_v15 }
 0x51a   :  { %v1456_v26 = vadd.f32 %v1455_v3, %v1454_v46 }
 0x51c   :  { %6106 = vtanh.f32 %v1456_v26  ;;  %v7543_v57 = vsel %vm7536_vm4, %v1456_v26, %v7480_v24 }
 0x526   :  { %v6107_v61 = vpop.eup %6106 }
 0x527   :  { %v7545_v31 = vmul.f32 %v6107_v61, %v1453_v20 }
 0x529   :  { %8483 = vst [vmem:[#allocation73_spill] sm:$0xff] %v7545_v31  ;;  %v7551_v3 = vsel %vm7536_vm4, %v7545_v31, %v7490_v45 }
 0x52a   :  { %1542 = vmatmul.mubr.f32.vlgmr.msra.gmra.mrb[6].mxu0 %v7551_v3  ;;  %1613 = vmatmul.mubr.f32.vlgmr.msra.gmra.mrb[6].mxu1 %v7551_v3 }
 0x52b   :  { %4998 = vmatpush1.bf16.msra.mxu0 %v7205_v19  ;;  %5030 = vmatpush1.bf16.msra.mxu1 %v7208_v23 }
 0x52c   :  { %5000 = vmatprep.subr.bf16.mxu0 %v7213_v27  ;;  %5032 = vmatprep.subr.bf16.mxu1 %v7216_v30 }
 0x52d   :  { %1725 = vmatprep.mubr.f32.mxu0 %v8484_v11  ;;  %1796 = vmatprep.mubr.f32.mxu1 %v8484_v11 }
 0x52f   :  { %5002 = vmatpush1.bf16.msra.mxu0 %v7222_v34  ;;  %5034 = vmatpush1.bf16.msra.mxu1 %v7226_v37 }
 0x530   :  { %5004 = vmatprep.subr.bf16.mxu0 %v7232_v41  ;;  %5036 = vmatprep.subr.bf16.mxu1 %v7236_v44 }
 0x533   :  { %5006 = vmatpush1.bf16.msra.mxu0 %v7242_v48  ;;  %5038 = vmatpush1.bf16.msra.mxu1 %v7246_v51 }
 0x534   :  { %5008 = vmatprep.subr.bf16.mxu0 %v7250_v55  ;;  %5040 = vmatprep.subr.bf16.mxu1 %v7254_v58 }
 0x537   :  { %5010 = vmatpush1.bf16.msra.mxu0 %v7258_v62  ;;  %5042 = vmatpush1.bf16.msra.mxu1 %v7261_v2 }
 0x538   :  { %5012 = vmatprep.subr.bf16.mxu0 %v7264_v5  ;;  %5044 = vmatprep.subr.bf16.mxu1 %v7267_v8 }
 0x53b   :  { %5014 = vmatpush1.bf16.msra.mxu0 %v7270_v12  ;;  %5046 = vmatpush1.bf16.msra.mxu1 %v7273_v16 }
 0x53c   :  { %5016 = vmatprep.subr.bf16.mxu0 %v7276_v22  ;;  %5048 = vmatprep.subr.bf16.mxu1 %v7279_v28 }
 0x53f   :  { %5018 = vmatpush1.bf16.msra.mxu0 %v7282_v32  ;;  %5050 = vmatpush1.bf16.msra.mxu1 %v7286_v38 }
 0x540   :  { %5020 = vmatprep.subr.bf16.mxu0 %v7290_v43  ;;  %5052 = vmatprep.subr.bf16.mxu1 %v7294_v49 }
 0x543   :  { %5022 = vmatpush1.bf16.msra.mxu0 %v7298_v53  ;;  %5054 = vmatpush1.bf16.msra.mxu1 %v7302_v56 }
 0x544   :  { %5024 = vmatprep.subr.bf16.mxu0 %v7306_v60  ;;  %5056 = vmatprep.subr.bf16.mxu1 %v7310_v63 }
 0x547   :  { %5026 = vmatpush1.bf16.msra.mxu0 %v7314_v0  ;;  %5058 = vmatpush1.bf16.msra.mxu1 %v7318_v33 }
 0x548   :  { %5060 = vmatprep.subr.bf16.mxu0 %v7199_v10  ;;  %5092 = vmatprep.subr.bf16.mxu1 %v7201_v13 }
 0x5fd   :  { %v1543_v24 = vpop.f32.mrb[6].mxu0  ;;  %v1614_v45 = vpop.f32.mrb[6].mxu1 }
 0x5fe   :  { %v5921_v35 = vadd.f32 %v1543_v24, %v7392_v1  ;;  %v1545_v14 = vpop.f32.mrb[7].mxu0  ;;  %v1616_v36 = vpop.f32.mrb[7].mxu1  ;;  %v5937_v54 = vadd.f32 %v1614_v45, %v7401_v25 }
 0x5ff   :  { %v5922_v29 = vadd.f32 %v1545_v14, %v7397_v21  ;;  %v5938_v46 = vadd.f32 %v1616_v36, %v7408_v50  ;;  %v6792_v14 = vmov 4   ;;  %v8485_v36 = vmov 0 }
 0x600   :  { %v1625_v42 = vmul.f32 0.5, %v5921_v35  ;;  %v1623_v35 = vsel %vm426_vm0, 3, %v6792_v14 }
 0x601   :  { %v1629_v59 = vmul.f32 0.5, %v5922_v29  ;;  %v1634_v26 = vmul.f32 0.5, %v5938_v46  ;;  %vm7597_vm5 = vcmp.lt.s32.totalorder %v1623_v35, %v7376_v6 }
 0x602   :  { %6108 = vtanh.f32 %v1625_v42  ;;  %v8486_v36 = vsel %vm7597_vm5, 4294967295, %v8485_v36 }
 0x603   :  { %6110 = vtanh.f32 %v1629_v59  ;;  %8487 = vst [vmem:[#allocation74_spill] sm:$0xff] %v8486_v36 }
 0x604   :  { %6112 = vtanh.f32 %v5937_v54 }
 0x605   :  { %6114 = vtanh.f32 %v1634_v26 }
 0x60c   :  { %v6109_v17 = vpop.eup %6108 }
 0x60d   :  { %v6111_v15 = vpop.eup %6110  ;;  %v1627_v20 = vmul.f32 0.5, %v6109_v17 }
 0x60e   :  { %v1631_v61 = vmul.f32 0.5, %v6111_v15  ;;  %v6113_v9 = vpop.eup %6112 }
 0x60f   :  { %v1628_v24 = vadd.f32 0.5, %v1627_v20  ;;  %v6115_v59 = vpop.eup %6114 }
 0x610   :  { %v1632_v40 = vadd.f32 0.5, %v1631_v61 }
 0x611   :  { %v1639_v31 = vmul.f32 %v6113_v9, %v1628_v24  ;;  %v1636_v9 = vmul.f32 0.5, %v6115_v59 }
 0x612   :  { %v1638_v45 = vmul.f32 %v1632_v40, %v7543_v57 }
 0x613   :  { %v1637_v54 = vadd.f32 0.5, %v1636_v9 }
 0x614   :  { %v1640_v29 = vadd.f32 %v1639_v31, %v1638_v45 }
 0x616   :  { %6116 = vtanh.f32 %v1640_v29  ;;  %v7604_v42 = vsel %vm7597_vm5, %v1640_v29, %v7543_v57 }
 0x620   :  { %v6117_v46 = vpop.eup %6116 }
 0x621   :  { %v7606_v26 = vmul.f32 %v6117_v46, %v1637_v54 }
 0x623   :  { %8488 = vst [vmem:[#allocation75_spill] sm:$0xff] %v7606_v26  ;;  %v7612_v40 = vsel %vm7597_vm5, %v7606_v26, %v7551_v3 }
 0x624   :  { %1726 = vmatmul.mubr.f32.vlgmr.msra.gmra.mrb[8].mxu0 %v7612_v40  ;;  %1797 = vmatmul.mubr.f32.vlgmr.msra.gmra.mrb[8].mxu1 %v7612_v40 }
 0x625   :  { %5062 = vmatpush1.bf16.msra.mxu0 %v7205_v19  ;;  %5094 = vmatpush1.bf16.msra.mxu1 %v7208_v23 }
 0x626   :  { %5064 = vmatprep.subr.bf16.mxu0 %v7213_v27  ;;  %5096 = vmatprep.subr.bf16.mxu1 %v7216_v30 }
 0x627   :  { %1903 = vmatprep.mubr.f32.mxu0 %v8484_v11  ;;  %1974 = vmatprep.mubr.f32.mxu1 %v8484_v11 }
 0x629   :  { %5066 = vmatpush1.bf16.msra.mxu0 %v7222_v34  ;;  %5098 = vmatpush1.bf16.msra.mxu1 %v7226_v37 }
 0x62a   :  { %5068 = vmatprep.subr.bf16.mxu0 %v7232_v41  ;;  %5100 = vmatprep.subr.bf16.mxu1 %v7236_v44 }
 0x62d   :  { %5070 = vmatpush1.bf16.msra.mxu0 %v7242_v48  ;;  %5102 = vmatpush1.bf16.msra.mxu1 %v7246_v51 }
 0x62e   :  { %5072 = vmatprep.subr.bf16.mxu0 %v7250_v55  ;;  %5104 = vmatprep.subr.bf16.mxu1 %v7254_v58 }
 0x631   :  { %5074 = vmatpush1.bf16.msra.mxu0 %v7258_v62  ;;  %5106 = vmatpush1.bf16.msra.mxu1 %v7261_v2 }
 0x632   :  { %5076 = vmatprep.subr.bf16.mxu0 %v7264_v5  ;;  %5108 = vmatprep.subr.bf16.mxu1 %v7267_v8 }
 0x635   :  { %5078 = vmatpush1.bf16.msra.mxu0 %v7270_v12  ;;  %5110 = vmatpush1.bf16.msra.mxu1 %v7273_v16 }
 0x636   :  { %5080 = vmatprep.subr.bf16.mxu0 %v7276_v22  ;;  %5112 = vmatprep.subr.bf16.mxu1 %v7279_v28 }
 0x639   :  { %5082 = vmatpush1.bf16.msra.mxu0 %v7282_v32  ;;  %5114 = vmatpush1.bf16.msra.mxu1 %v7286_v38 }
 0x63a   :  { %5084 = vmatprep.subr.bf16.mxu0 %v7290_v43  ;;  %5116 = vmatprep.subr.bf16.mxu1 %v7294_v49 }
 0x63d   :  { %5086 = vmatpush1.bf16.msra.mxu0 %v7298_v53  ;;  %5118 = vmatpush1.bf16.msra.mxu1 %v7302_v56 }
 0x63e   :  { %5088 = vmatprep.subr.bf16.mxu0 %v7306_v60  ;;  %5120 = vmatprep.subr.bf16.mxu1 %v7310_v63 }
 0x641   :  { %5090 = vmatpush1.bf16.msra.mxu0 %v7314_v0  ;;  %5122 = vmatpush1.bf16.msra.mxu1 %v7318_v33 }
 0x642   :  { %5124 = vmatprep.subr.bf16.mxu0 %v7199_v10  ;;  %5156 = vmatprep.subr.bf16.mxu1 %v7201_v13 }
 0x6f7   :  { %v1727_v57 = vpop.f32.mrb[8].mxu0  ;;  %v1798_v31 = vpop.f32.mrb[8].mxu1 }
 0x6f8   :  { %v5923_v3 = vadd.f32 %v1727_v57, %v7392_v1  ;;  %v1729_v17 = vpop.f32.mrb[9].mxu0  ;;  %v1800_v15 = vpop.f32.mrb[9].mxu1  ;;  %v5939_v14 = vadd.f32 %v1798_v31, %v7401_v25 }
 0x6f9   :  { %v5924_v20 = vadd.f32 %v1729_v17, %v7397_v21  ;;  %v5940_v35 = vadd.f32 %v1800_v15, %v7408_v50  ;;  %v6793_v17 = vmov 3  }
 0x6fa   :  { %v1809_v61 = vmul.f32 0.5, %v5923_v3  ;;  %v1807_v3 = vsel %vm426_vm0, 4, %v6793_v17 }
 0x6fb   :  { %v1813_v24 = vmul.f32 0.5, %v5924_v20  ;;  %v1818_v45 = vmul.f32 0.5, %v5940_v35  ;;  %vm7658_vm6 = vcmp.lt.s32.totalorder %v1807_v3, %v7376_v6 }
 0x6fc   :  { %6118 = vtanh.f32 %v1809_v61 }
 0x6fd   :  { %6120 = vtanh.f32 %v1813_v24 }
 0x6fe   :  { %6122 = vtanh.f32 %v5939_v14 }
 0x6ff   :  { %6124 = vtanh.f32 %v1818_v45 }
 0x706   :  { %v6119_v29 = vpop.eup %6118 }
 0x707   :  { %v6121_v59 = vpop.eup %6120  ;;  %v1811_v9 = vmul.f32 0.5, %v6119_v29 }
 0x708   :  { %v1815_v54 = vmul.f32 0.5, %v6121_v59  ;;  %v6123_v57 = vpop.eup %6122 }
 0x709   :  { %v1812_v46 = vadd.f32 0.5, %v1811_v9  ;;  %v6125_v24 = vpop.eup %6124 }
 0x70a   :  { %v1816_v36 = vadd.f32 0.5, %v1815_v54  ;;  %v1820_v14 = vmul.f32 0.5, %v6125_v24 }
 0x70b   :  { %v1823_v26 = vmul.f32 %v6123_v57, %v1812_v46 }
 0x70c   :  { %v1822_v31 = vmul.f32 %v1816_v36, %v7604_v42  ;;  %v1821_v35 = vadd.f32 0.5, %v1820_v14 }
 0x70e   :  { %v1824_v20 = vadd.f32 %v1823_v26, %v1822_v31 }
 0x710   :  { %6126 = vtanh.f32 %v1824_v20  ;;  %v7665_v61 = vsel %vm7658_vm6, %v1824_v20, %v7604_v42 }
 0x71a   :  { %v6127_v45 = vpop.eup %6126 }
 0x71b   :  { %v7667_v29 = vmul.f32 %v6127_v45, %v1821_v35 }
 0x71d   :  { %v7673_v36 = vsel %vm7658_vm6, %v7667_v29, %v7612_v40 }
 0x71e   :  { %1904 = vmatmul.mubr.f32.vlgmr.msra.gmra.mrb[10].mxu0 %v7673_v36  ;;  %1975 = vmatmul.mubr.f32.vlgmr.msra.gmra.mrb[10].mxu1 %v7673_v36 }
 0x71f   :  { %5126 = vmatpush1.bf16.msra.mxu0 %v7205_v19  ;;  %5158 = vmatpush1.bf16.msra.mxu1 %v7208_v23 }
 0x720   :  { %5128 = vmatprep.subr.bf16.mxu0 %v7213_v27  ;;  %5160 = vmatprep.subr.bf16.mxu1 %v7216_v30 }
 0x721   :  { %2081 = vmatprep.mubr.f32.mxu0 %v8484_v11  ;;  %2152 = vmatprep.mubr.f32.mxu1 %v8484_v11 }
 0x723   :  { %5130 = vmatpush1.bf16.msra.mxu0 %v7222_v34  ;;  %5162 = vmatpush1.bf16.msra.mxu1 %v7226_v37 }
 0x724   :  { %5132 = vmatprep.subr.bf16.mxu0 %v7232_v41  ;;  %5164 = vmatprep.subr.bf16.mxu1 %v7236_v44 }
 0x727   :  { %5134 = vmatpush1.bf16.msra.mxu0 %v7242_v48  ;;  %5166 = vmatpush1.bf16.msra.mxu1 %v7246_v51 }
 0x728   :  { %5136 = vmatprep.subr.bf16.mxu0 %v7250_v55  ;;  %5168 = vmatprep.subr.bf16.mxu1 %v7254_v58 }
 0x72b   :  { %5138 = vmatpush1.bf16.msra.mxu0 %v7258_v62  ;;  %5170 = vmatpush1.bf16.msra.mxu1 %v7261_v2 }
 0x72c   :  { %5140 = vmatprep.subr.bf16.mxu0 %v7264_v5  ;;  %5172 = vmatprep.subr.bf16.mxu1 %v7267_v8 }
 0x72f   :  { %5142 = vmatpush1.bf16.msra.mxu0 %v7270_v12  ;;  %5174 = vmatpush1.bf16.msra.mxu1 %v7273_v16 }
 0x730   :  { %5144 = vmatprep.subr.bf16.mxu0 %v7276_v22  ;;  %5176 = vmatprep.subr.bf16.mxu1 %v7279_v28 }
 0x733   :  { %5146 = vmatpush1.bf16.msra.mxu0 %v7282_v32  ;;  %5178 = vmatpush1.bf16.msra.mxu1 %v7286_v38 }
 0x734   :  { %5148 = vmatprep.subr.bf16.mxu0 %v7290_v43  ;;  %5180 = vmatprep.subr.bf16.mxu1 %v7294_v49 }
 0x737   :  { %5150 = vmatpush1.bf16.msra.mxu0 %v7298_v53  ;;  %5182 = vmatpush1.bf16.msra.mxu1 %v7302_v56 }
 0x738   :  { %5152 = vmatprep.subr.bf16.mxu0 %v7306_v60  ;;  %5184 = vmatprep.subr.bf16.mxu1 %v7310_v63 }
 0x73b   :  { %5154 = vmatpush1.bf16.msra.mxu0 %v7314_v0  ;;  %5186 = vmatpush1.bf16.msra.mxu1 %v7318_v33 }
 0x73c   :  { %5188 = vmatprep.subr.bf16.mxu0 %v7199_v10  ;;  %5220 = vmatprep.subr.bf16.mxu1 %v7201_v13 }
 0x7f1   :  { %v1905_v42 = vpop.f32.mrb[10].mxu0  ;;  %v1976_v26 = vpop.f32.mrb[10].mxu1 }
 0x7f2   :  { %v5925_v40 = vadd.f32 %v1905_v42, %v7392_v1  ;;  %v1907_v59 = vpop.f32.mrb[11].mxu0  ;;  %v1978_v9 = vpop.f32.mrb[11].mxu1  ;;  %v5941_v17 = vadd.f32 %v1976_v26, %v7401_v25 }
 0x7f3   :  { %v5926_v54 = vadd.f32 %v1907_v59, %v7397_v21  ;;  %v5942_v3 = vadd.f32 %v1978_v9, %v7408_v50  ;;  %v6794_v59 = vmov 2  }
 0x7f4   :  { %v1987_v46 = vmul.f32 0.5, %v5925_v40  ;;  %v1985_v40 = vsel %vm426_vm0, 5, %v6794_v59  ;;  %v2393_v59 = vld [vmem:[#allocation14 + $0x68] sm:$0xff] }
 0x7f5   :  { %v1991_v57 = vmul.f32 0.5, %v5926_v54  ;;  %v1996_v10 = vmul.f32 0.5, %v5942_v3  ;;  %vm7719_vm7 = vcmp.lt.s32.totalorder %v1985_v40, %v7376_v6  ;;  %v2395_v40 = vld [vmem:[#allocation14 + $0x78] sm:$0xff] }
 0x7f6   :  { %6128 = vtanh.f32 %v1987_v46 }
 0x7f7   :  { %6130 = vtanh.f32 %v1991_v57 }
 0x7f8   :  { %6132 = vtanh.f32 %v5941_v17 }
 0x7f9   :  { %6134 = vtanh.f32 %v1996_v10 }
 0x800   :  { %v6129_v31 = vpop.eup %6128 }
 0x801   :  { %v6131_v13 = vpop.eup %6130  ;;  %v1989_v20 = vmul.f32 0.5, %v6129_v31 }
 0x802   :  { %v1993_v24 = vmul.f32 0.5, %v6131_v13  ;;  %v6133_v35 = vpop.eup %6132 }
 0x803   :  { %v1990_v14 = vadd.f32 0.5, %v1989_v20  ;;  %v6135_v57 = vpop.eup %6134 }
 0x804   :  { %v1994_v45 = vadd.f32 0.5, %v1993_v24  ;;  %v1998_v17 = vmul.f32 0.5, %v6135_v57  ;;  %v2384_v24 = vld [vmem:[#allocation14 + $0x20] sm:$0xff] }
 0x805   :  { %v2001_v42 = vmul.f32 %v6133_v35, %v1990_v14  ;;  %v2382_v14 = vld [vmem:[#allocation14 + $0x10] sm:$0xff]  ;;  %v5253_v57 = vpack.c.bf16 %v2384_v24, %v2380_v18  ;;  %v2415_v18 = vld [vmem:[#allocation14 + $0x118] sm:$0xff] }
 0x806   :  { %v2000_v26 = vmul.f32 %v1994_v45, %v7665_v61  ;;  %v1999_v3 = vadd.f32 0.5, %v1998_v17  ;;  %v2386_v35 = vld [vmem:[#allocation14 + $0x30] sm:$0xff]  ;;  %v2389_v45 = vld [vmem:[#allocation14 + $0x48] sm:$0xff]  ;;  %v2419_v24 = vld [vmem:[#allocation14 + $0x138] sm:$0xff] }
 0x807   :  { %v5317_v17 = vpack.c.bf16 %v2386_v35, %v2382_v14 }
 0x808   :  { %v2002_v54 = vadd.f32 %v2001_v42, %v2000_v26 }
 0x80a   :  { %6136 = vtanh.f32 %v2002_v54  ;;  %v7726_v46 = vsel %vm7719_vm7, %v2002_v54, %v7665_v61 }
 0x814   :  { %v6137_v10 = vpop.eup %6136 }
 0x815   :  { %v7728_v31 = vmul.f32 %v6137_v10, %v1999_v3  ;;  %v2388_v3 = vld [vmem:[#allocation14 + $0x40] sm:$0xff] }
 0x816   :  { %v2392_v10 = vld [vmem:[#allocation14 + $0x60] sm:$0xff] }
 0x817   :  { %v7734_v13 = vsel %vm7719_vm7, %v7728_v31, %v7673_v36 }
 0x818   :  { %2082 = vmatmul.mubr.f32.vlgmr.msra.gmra.mrb[12].mxu0 %v7734_v13  ;;  %2153 = vmatmul.mubr.f32.vlgmr.msra.gmra.mrb[12].mxu1 %v7734_v13 }
 0x819   :  { %5190 = vmatpush1.bf16.msra.mxu0 %v7205_v19  ;;  %5222 = vmatpush1.bf16.msra.mxu1 %v7208_v23  ;;  %v2381_v19 = vld [vmem:[#allocation14 + $0x8] sm:$0xff] }
 0x81a   :  { %5192 = vmatprep.subr.bf16.mxu0 %v7213_v27  ;;  %5224 = vmatprep.subr.bf16.mxu1 %v7216_v30  ;;  %v2385_v23 = vld [vmem:[#allocation14 + $0x28] sm:$0xff]  ;;  %v2383_v27 = vld [vmem:[#allocation14 + $0x18] sm:$0xff] }
 0x81b   :  { %2259 = vmatprep.mubr.f32.mxu0 %v8484_v11  ;;  %2330 = vmatprep.mubr.f32.mxu1 %v8484_v11  ;;  %v5251_v30 = vpack.c.bf16 %v2385_v23, %v2381_v19  ;;  %v5255_v19 = vpack.c.bf16 %v2393_v59, %v2389_v45  ;;  %v2412_v45 = vld [vmem:[#allocation14 + $0x100] sm:$0xff] }
 0x81d   :  { %5194 = vmatpush1.bf16.msra.mxu0 %v7222_v34  ;;  %5226 = vmatpush1.bf16.msra.mxu1 %v7226_v37  ;;  %v2387_v34 = vld [vmem:[#allocation14 + $0x38] sm:$0xff] }
 0x81e   :  { %5196 = vmatprep.subr.bf16.mxu0 %v7232_v41  ;;  %5228 = vmatprep.subr.bf16.mxu1 %v7236_v44  ;;  %v5315_v37 = vpack.c.bf16 %v2387_v34, %v2383_v27  ;;  %v2390_v27 = vld [vmem:[#allocation14 + $0x50] sm:$0xff]  ;;  %v2397_v34 = vld [vmem:[#allocation14 + $0x88] sm:$0xff] }
 0x821   :  { %5198 = vmatpush1.bf16.msra.mxu0 %v7242_v48  ;;  %5230 = vmatpush1.bf16.msra.mxu1 %v7246_v51 }
 0x822   :  { %5200 = vmatprep.subr.bf16.mxu0 %v7250_v55  ;;  %5232 = vmatprep.subr.bf16.mxu1 %v7254_v58 }
 0x825   :  { %5202 = vmatpush1.bf16.msra.mxu0 %v7258_v62  ;;  %5234 = vmatpush1.bf16.msra.mxu1 %v7261_v2 }
 0x826   :  { %5204 = vmatprep.subr.bf16.mxu0 %v7264_v5  ;;  %5236 = vmatprep.subr.bf16.mxu1 %v7267_v8 }
 0x829   :  { %5206 = vmatpush1.bf16.msra.mxu0 %v7270_v12  ;;  %5238 = vmatpush1.bf16.msra.mxu1 %v7273_v16 }
 0x82a   :  { %5208 = vmatprep.subr.bf16.mxu0 %v7276_v22  ;;  %5240 = vmatprep.subr.bf16.mxu1 %v7279_v28 }
 0x82d   :  { %5210 = vmatpush1.bf16.msra.mxu0 %v7282_v32  ;;  %5242 = vmatpush1.bf16.msra.mxu1 %v7286_v38 }
 0x82e   :  { %5212 = vmatprep.subr.bf16.mxu0 %v7290_v43  ;;  %5244 = vmatprep.subr.bf16.mxu1 %v7294_v49 }
 0x831   :  { %5214 = vmatpush1.bf16.msra.mxu0 %v7298_v53  ;;  %5246 = vmatpush1.bf16.msra.mxu1 %v7302_v56  ;;  %v6795_v56 = vmov 1  }
 0x832   :  { %5216 = vmatprep.subr.bf16.mxu0 %v7306_v60  ;;  %5248 = vmatprep.subr.bf16.mxu1 %v7310_v63  ;;  %v2163_v60 = vsel %vm426_vm0, 6, %v6795_v56 }
 0x833   :  { %vm7780_vm8 = vcmp.lt.s32.totalorder %v2163_v60, %v7376_v6  ;;  %v2391_v6 = vld [vmem:[#allocation14 + $0x58] sm:$0xff]  ;;  %v2406_v60 = vld [vmem:[#allocation14 + $0xd0] sm:$0xff] }
 0x834   :  { %v5319_v23 = vpack.c.bf16 %v2395_v40, %v2391_v6  ;;  %v5331_v6 = vpack.c.bf16 %v2419_v24, %v2415_v18  ;;  %v2414_v40 = vld [vmem:[#allocation14 + $0x110] sm:$0xff] }
 0x835   :  { %5218 = vmatpush1.bf16.msra.mxu0 %v7314_v0  ;;  %5250 = vmatpush1.bf16.msra.mxu1 %v7318_v33  ;;  %v2438_v18 = vld [vmem:[#allocation14 + $0x1d0] sm:$0xff] }
 0x836   :  { %5252 = vmatprep.subr.bf16.mxu0 %v5251_v30  ;;  %5316 = vmatprep.subr.bf16.mxu1 %v5315_v37  ;;  %v2394_v30 = vld [vmem:[#allocation14 + $0x70] sm:$0xff] }
 0x837   :  { %v2442_v24 = vld [vmem:[#allocation14 + $0x1f0] sm:$0xff] }
 0x8eb   :  { %v2083_v41 = vpop.f32.mrb[12].mxu0  ;;  %v2154_v44 = vpop.f32.mrb[12].mxu1 }
 0x8ec   :  { %v5927_v48 = vadd.f32 %v2083_v41, %v7392_v1  ;;  %v2085_v51 = vpop.f32.mrb[13].mxu0  ;;  %v2156_v55 = vpop.f32.mrb[13].mxu1  ;;  %v5943_v5 = vadd.f32 %v2154_v44, %v7401_v25  ;;  %v2401_v41 = vld [vmem:[#allocation14 + $0xa8] sm:$0xff]  ;;  %v2399_v44 = vld [vmem:[#allocation14 + $0x98] sm:$0xff] }
 0x8ed   :  { %v5928_v58 = vadd.f32 %v2085_v51, %v7397_v21  ;;  %v5944_v8 = vadd.f32 %v2156_v55, %v7408_v50  ;;  %v5257_v51 = vpack.c.bf16 %v2392_v10, %v2388_v3  ;;  %v5321_v55 = vpack.c.bf16 %v2394_v30, %v2390_v27  ;;  %v2423_v3 = vld [vmem:[#allocation14 + $0x158] sm:$0xff]  ;;  %v2420_v27 = vld [vmem:[#allocation14 + $0x140] sm:$0xff] }
 0x8ee   :  { %v2165_v62 = vmul.f32 0.5, %v5927_v48  ;;  %v2403_v48 = vld [vmem:[#allocation14 + $0xb8] sm:$0xff]  ;;  %v2424_v30 = vld [vmem:[#allocation14 + $0x160] sm:$0xff] }
 0x8ef   :  { %v2169_v2 = vmul.f32 0.5, %v5928_v58  ;;  %v2174_v12 = vmul.f32 0.5, %v5944_v8  ;;  %v2396_v58 = vld [vmem:[#allocation14 + $0x80] sm:$0xff]  ;;  %v2398_v8 = vld [vmem:[#allocation14 + $0x90] sm:$0xff]  ;;  %v2427_v10 = vld [vmem:[#allocation14 + $0x178] sm:$0xff] }
 0x8f0   :  { %6138 = vtanh.f32 %v2165_v62  ;;  %v2400_v62 = vld [vmem:[#allocation14 + $0xa0] sm:$0xff] }
 0x8f1   :  { %6140 = vtanh.f32 %v2169_v2  ;;  %v5259_v2 = vpack.c.bf16 %v2401_v41, %v2397_v34  ;;  %v2422_v41 = vld [vmem:[#allocation14 + $0x150] sm:$0xff] }
 0x8f2   :  { %6142 = vtanh.f32 %v5943_v5  ;;  %v5323_v5 = vpack.c.bf16 %v2403_v48, %v2399_v44  ;;  %v2426_v44 = vld [vmem:[#allocation14 + $0x170] sm:$0xff]  ;;  %v2429_v48 = vld [vmem:[#allocation14 + $0x188] sm:$0xff] }
 0x8f3   :  { %6144 = vtanh.f32 %v2174_v12  ;;  %v2402_v12 = vld [vmem:[#allocation14 + $0xb0] sm:$0xff] }
 0x8fa   :  { %v6139_v16 = vpop.eup %6138 }
 0x8fb   :  { %v6141_v22 = vpop.eup %6140  ;;  %v2167_v28 = vmul.f32 0.5, %v6139_v16  ;;  %v2405_v16 = vld [vmem:[#allocation14 + $0xc8] sm:$0xff] }
 0x8fc   :  { %v2171_v32 = vmul.f32 0.5, %v6141_v22  ;;  %v6143_v43 = vpop.eup %6142  ;;  %v2409_v22 = vld [vmem:[#allocation14 + $0xe8] sm:$0xff] }
 0x8fd   :  { %v2168_v38 = vadd.f32 0.5, %v2167_v28  ;;  %v6145_v36 = vpop.eup %6144  ;;  %v2411_v28 = vld [vmem:[#allocation14 + $0xf8] sm:$0xff] }
 0x8fe   :  { %v2172_v49 = vadd.f32 0.5, %v2171_v32  ;;  %v2176_v20 = vmul.f32 0.5, %v6145_v36  ;;  %v5261_v32 = vpack.c.bf16 %v2400_v62, %v2396_v58  ;;  %v2413_v36 = vld [vmem:[#allocation14 + $0x108] sm:$0xff]  ;;  %v2435_v58 = vld [vmem:[#allocation14 + $0x1b8] sm:$0xff]  ;;  %v5273_v62 = vpack.c.bf16 %v2424_v30, %v2420_v27 }
 0x8ff   :  { %v2179_v53 = vmul.f32 %v6143_v43, %v2168_v38  ;;  %v5325_v38 = vpack.c.bf16 %v2402_v12, %v2398_v8  ;;  %v2404_v43 = vld [vmem:[#allocation14 + $0xc0] sm:$0xff]  ;;  %v2457_v27 = vld [vmem:[#allocation14 + $0x268] sm:$0xff]  ;;  %v2455_v30 = vld [vmem:[#allocation14 + $0x258] sm:$0xff] }
 0x900   :  { %v2178_v63 = vmul.f32 %v2172_v49, %v7726_v46  ;;  %v2177_v42 = vadd.f32 0.5, %v2176_v20  ;;  %v2408_v49 = vld [vmem:[#allocation14 + $0xe0] sm:$0xff]  ;;  %v2417_v20 = vld [vmem:[#allocation14 + $0x128] sm:$0xff] }
 0x901   :  { %v5265_v14 = vpack.c.bf16 %v2408_v49, %v2404_v43  ;;  %v5267_v59 = vpack.c.bf16 %v2417_v20, %v2413_v36  ;;  %v2428_v12 = vld [vmem:[#allocation14 + $0x180] sm:$0xff]  ;;  %v2441_v43 = vld [vmem:[#allocation14 + $0x1e8] sm:$0xff]  ;;  %v2439_v49 = vld [vmem:[#allocation14 + $0x1d8] sm:$0xff] }
 0x902   :  { %v7777_v0 = vadd.f32 %v2179_v53, %v2178_v63  ;;  %v5263_v53 = vpack.c.bf16 %v2409_v22, %v2405_v16  ;;  %v2410_v63 = vld [vmem:[#allocation14 + $0xf0] sm:$0xff]  ;;  %v2432_v16 = vld [vmem:[#allocation14 + $0x1a0] sm:$0xff] }
 0x903   :  { %v5329_v35 = vpack.c.bf16 %v2410_v63, %v2406_v60  ;;  %v2430_v22 = vld [vmem:[#allocation14 + $0x190] sm:$0xff]  ;;  %v2436_v60 = vld [vmem:[#allocation14 + $0x1c0] sm:$0xff] }
 0x904   :  { %6146 = vtanh.f32 %v7777_v0  ;;  %v2184_v61 = vsel %vm7780_vm8, %v7777_v0, %v7726_v46  ;;  %v2440_v63 = vld [vmem:[#allocation14 + $0x1e0] sm:$0xff] }
 0x905   :  { %v5281_v20 = vpack.c.bf16 %v2440_v63, %v2436_v60  ;;  %v2471_v60 = vld [vmem:[#allocation14 + $0x2d8] sm:$0xff]  ;;  %v2796_v0 = vld [vmem:[#allocation15 + $0x40] sm:$0xff] }
 0x90e   :  { %v6147_v26 = vpop.eup %6146 }
 0x90f   :  { %v7789_v54 = vmul.f32 %v6147_v26, %v2177_v42  ;;  %v2416_v42 = vld [vmem:[#allocation14 + $0x120] sm:$0xff]  ;;  %v2418_v26 = vld [vmem:[#allocation14 + $0x130] sm:$0xff] }
 0x911   :  { %v2183_v37 = vsel %vm7780_vm8, %v7789_v54, %v7734_v13  ;;  %v2407_v13 = vld [vmem:[#allocation14 + $0xd8] sm:$0xff] }
 0x912   :  { %2260 = vmatmul.mubr.f32.vlgmr.msra.gmra.mrb[14].mxu0 %v2183_v37  ;;  %2331 = vmatmul.mubr.f32.vlgmr.msra.gmra.mrb[14].mxu1 %v2183_v37  ;;  %v5327_v56 = vpack.c.bf16 %v2411_v28, %v2407_v13  ;;  %v5335_v37 = vpack.c.bf16 %v2427_v10, %v2423_v3  ;;  %v5277_v13 = vpack.c.bf16 %v2432_v16, %v2428_v12  ;;  %v2434_v28 = vld [vmem:[#allocation14 + $0x1b0] sm:$0xff]  ;;  %v2467_v16 = vld [vmem:[#allocation14 + $0x2b8] sm:$0xff] }
 0x913   :  { %5254 = vmatpush1.bf16.msra.mxu0 %v5253_v57  ;;  %5318 = vmatpush1.bf16.msra.mxu1 %v5317_v17  ;;  %v2421_v57 = vld [vmem:[#allocation14 + $0x148] sm:$0xff]  ;;  %v2446_v3 = vld [vmem:[#allocation14 + $0x210] sm:$0xff] }
 0x914   :  { %5256 = vmatprep.subr.bf16.mxu0 %v5255_v19  ;;  %5320 = vmatprep.subr.bf16.mxu1 %v5319_v23  ;;  %v2425_v17 = vld [vmem:[#allocation14 + $0x168] sm:$0xff]  ;;  %v5269_v19 = vpack.c.bf16 %v2416_v42, %v2412_v45  ;;  %v5333_v23 = vpack.c.bf16 %v2418_v26, %v2414_v40  ;;  %v2447_v42 = vld [vmem:[#allocation14 + $0x218] sm:$0xff]  ;;  %v2444_v40 = vld [vmem:[#allocation14 + $0x200] sm:$0xff] }
 0x915   :  { %v5271_v34 = vpack.c.bf16 %v2425_v17, %v2421_v57  ;;  %v2449_v45 = vld [vmem:[#allocation14 + $0x228] sm:$0xff]  ;;  %v2448_v26 = vld [vmem:[#allocation14 + $0x220] sm:$0xff]  ;;  %v2450_v10 = vld [vmem:[#allocation14 + $0x230] sm:$0xff] }
 0x916   :  { %v5285_v17 = vpack.c.bf16 %v2448_v26, %v2444_v40  ;;  %v2479_v40 = vld [vmem:[#allocation14 + $0x318] sm:$0xff] }
 0x917   :  { %5258 = vmatpush1.bf16.msra.mxu0 %v5257_v51  ;;  %5322 = vmatpush1.bf16.msra.mxu1 %v5321_v55  ;;  %v2433_v51 = vld [vmem:[#allocation14 + $0x1a8] sm:$0xff]  ;;  %v2431_v55 = vld [vmem:[#allocation14 + $0x198] sm:$0xff] }
 0x918   :  { %5260 = vmatprep.subr.bf16.mxu0 %v5259_v2  ;;  %5324 = vmatprep.subr.bf16.mxu1 %v5323_v5  ;;  %v5337_v2 = vpack.c.bf16 %v2426_v44, %v2422_v41  ;;  %v5275_v5 = vpack.c.bf16 %v2433_v51, %v2429_v48  ;;  %v5339_v8 = vpack.c.bf16 %v2435_v58, %v2431_v55  ;;  %v2452_v41 = vld [vmem:[#allocation14 + $0x240] sm:$0xff]  ;;  %v2454_v55 = vld [vmem:[#allocation14 + $0x250] sm:$0xff] }
 0x919   :  { %v2456_v44 = vld [vmem:[#allocation14 + $0x260] sm:$0xff]  ;;  %v2458_v58 = vld [vmem:[#allocation14 + $0x270] sm:$0xff] }
 0x91a   :  { %v5289_v51 = vpack.c.bf16 %v2456_v44, %v2452_v41  ;;  %v2487_v41 = vld [vmem:[#allocation14 + $0x358] sm:$0xff] }
 0x91b   :  { %5262 = vmatpush1.bf16.msra.mxu0 %v5261_v32  ;;  %5326 = vmatpush1.bf16.msra.mxu1 %v5325_v38  ;;  %v5341_v32 = vpack.c.bf16 %v2434_v28, %v2430_v22  ;;  %v2437_v38 = vld [vmem:[#allocation14 + $0x1c8] sm:$0xff]  ;;  %v2460_v22 = vld [vmem:[#allocation14 + $0x280] sm:$0xff] }
 0x91c   :  { %5264 = vmatprep.subr.bf16.mxu0 %v5263_v53  ;;  %5328 = vmatprep.subr.bf16.mxu1 %v5327_v56  ;;  %v5279_v53 = vpack.c.bf16 %v2441_v43, %v2437_v38  ;;  %v2443_v56 = vld [vmem:[#allocation14 + $0x1f8] sm:$0xff]  ;;  %v2462_v38 = vld [vmem:[#allocation14 + $0x290] sm:$0xff] }
 0x91d   :  { %v5343_v36 = vpack.c.bf16 %v2443_v56, %v2439_v49  ;;  %v2466_v43 = vld [vmem:[#allocation14 + $0x2b0] sm:$0xff]  ;;  %v2473_v56 = vld [vmem:[#allocation14 + $0x2e8] sm:$0xff] }
 0x91e   :  { %v5357_v49 = vpack.c.bf16 %v2466_v43, %v2462_v38  ;;  %v2496_v38 = vld [vmem:[#allocation14 + $0x3a0] sm:$0xff] }
 0x91f   :  { %5266 = vmatpush1.bf16.msra.mxu0 %v5265_v14  ;;  %5330 = vmatpush1.bf16.msra.mxu1 %v5329_v35  ;;  %v5345_v14 = vpack.c.bf16 %v2442_v24, %v2438_v18  ;;  %v2445_v35 = vld [vmem:[#allocation14 + $0x208] sm:$0xff]  ;;  %v2472_v18 = vld [vmem:[#allocation14 + $0x2e0] sm:$0xff] }
 0x920   :  { %5268 = vmatprep.subr.bf16.mxu0 %v5267_v59  ;;  %5332 = vmatprep.subr.bf16.mxu1 %v5331_v6  ;;  %v5283_v59 = vpack.c.bf16 %v2449_v45, %v2445_v35  ;;  %v2451_v6 = vld [vmem:[#allocation14 + $0x238] sm:$0xff]  ;;  %v2470_v35 = vld [vmem:[#allocation14 + $0x2d0] sm:$0xff] }
 0x921   :  { %v5347_v57 = vpack.c.bf16 %v2451_v6, %v2447_v42  ;;  %v2474_v45 = vld [vmem:[#allocation14 + $0x2f0] sm:$0xff]  ;;  %v2481_v6 = vld [vmem:[#allocation14 + $0x328] sm:$0xff] }
 0x922   :  { %v5361_v42 = vpack.c.bf16 %v2474_v45, %v2470_v35  ;;  %v2504_v35 = vld [vmem:[#allocation14 + $0x3e0] sm:$0xff] }
 0x923   :  { %5270 = vmatpush1.bf16.msra.mxu0 %v5269_v19  ;;  %5334 = vmatpush1.bf16.msra.mxu1 %v5333_v23  ;;  %v5349_v19 = vpack.c.bf16 %v2450_v10, %v2446_v3  ;;  %v2453_v23 = vld [vmem:[#allocation14 + $0x248] sm:$0xff]  ;;  %v2480_v3 = vld [vmem:[#allocation14 + $0x320] sm:$0xff] }
 0x924   :  { %5272 = vmatprep.subr.bf16.mxu0 %v5271_v34  ;;  %5336 = vmatprep.subr.bf16.mxu1 %v5335_v37  ;;  %v5287_v34 = vpack.c.bf16 %v2457_v27, %v2453_v23  ;;  %v2459_v37 = vld [vmem:[#allocation14 + $0x278] sm:$0xff]  ;;  %v2478_v23 = vld [vmem:[#allocation14 + $0x310] sm:$0xff] }
 0x925   :  { %v5351_v48 = vpack.c.bf16 %v2459_v37, %v2455_v30  ;;  %v2482_v27 = vld [vmem:[#allocation14 + $0x330] sm:$0xff]  ;;  %v2489_v37 = vld [vmem:[#allocation14 + $0x368] sm:$0xff] }
 0x926   :  { %v5365_v30 = vpack.c.bf16 %v2482_v27, %v2478_v23 }
 0x927   :  { %5274 = vmatpush1.bf16.msra.mxu0 %v5273_v62  ;;  %5338 = vmatpush1.bf16.msra.mxu1 %v5337_v2  ;;  %v5353_v62 = vpack.c.bf16 %v2458_v58, %v2454_v55  ;;  %v2461_v2 = vld [vmem:[#allocation14 + $0x288] sm:$0xff]  ;;  %v2488_v55 = vld [vmem:[#allocation14 + $0x360] sm:$0xff] }
 0x928   :  { %5276 = vmatprep.subr.bf16.mxu0 %v5275_v5  ;;  %5340 = vmatprep.subr.bf16.mxu1 %v5339_v8  ;;  %v2465_v5 = vld [vmem:[#allocation14 + $0x2a8] sm:$0xff]  ;;  %v2463_v8 = vld [vmem:[#allocation14 + $0x298] sm:$0xff] }
 0x929   :  { %v5291_v12 = vpack.c.bf16 %v2465_v5, %v2461_v2  ;;  %v5355_v28 = vpack.c.bf16 %v2467_v16, %v2463_v8  ;;  %v2486_v2 = vld [vmem:[#allocation14 + $0x350] sm:$0xff]  ;;  %v2497_v16 = vld [vmem:[#allocation14 + $0x3a8] sm:$0xff] }
 0x92a   :  { %v2490_v5 = vld [vmem:[#allocation14 + $0x370] sm:$0xff] }
 0x92b   :  { %5278 = vmatpush1.bf16.msra.mxu0 %v5277_v13  ;;  %5342 = vmatpush1.bf16.msra.mxu1 %v5341_v32  ;;  %v2464_v13 = vld [vmem:[#allocation14 + $0x2a0] sm:$0xff]  ;;  %v5369_v8 = vpack.c.bf16 %v2490_v5, %v2486_v2 }
 0x92c   :  { %5280 = vmatprep.subr.bf16.mxu0 %v5279_v53  ;;  %5344 = vmatprep.subr.bf16.mxu1 %v5343_v36  ;;  %v5293_v32 = vpack.c.bf16 %v2464_v13, %v2460_v22  ;;  %v2469_v53 = vld [vmem:[#allocation14 + $0x2c8] sm:$0xff]  ;;  %v2475_v36 = vld [vmem:[#allocation14 + $0x2f8] sm:$0xff] }
 0x92d   :  { %v5295_v63 = vpack.c.bf16 %v2473_v56, %v2469_v53  ;;  %v5359_v24 = vpack.c.bf16 %v2475_v36, %v2471_v60  ;;  %v2495_v22 = vld [vmem:[#allocation14 + $0x398] sm:$0xff]  ;;  %v2494_v53 = vld [vmem:[#allocation14 + $0x390] sm:$0xff]  ;;  %v2505_v36 = vld [vmem:[#allocation14 + $0x3e8] sm:$0xff] }
 0x92e   :  { %v2498_v56 = vld [vmem:[#allocation14 + $0x3b0] sm:$0xff] }
 0x92f   :  { %5282 = vmatpush1.bf16.msra.mxu0 %v5281_v20  ;;  %5346 = vmatpush1.bf16.msra.mxu1 %v5345_v14  ;;  %v2468_v20 = vld [vmem:[#allocation14 + $0x2c0] sm:$0xff]  ;;  %v5373_v60 = vpack.c.bf16 %v2498_v56, %v2494_v53  ;;  %v2797_v53 = vld [vmem:[#allocation15 + $0x48] sm:$0xff] }
 0x930   :  { %5284 = vmatprep.subr.bf16.mxu0 %v5283_v59  ;;  %5348 = vmatprep.subr.bf16.mxu1 %v5347_v57  ;;  %v5297_v14 = vpack.c.bf16 %v2472_v18, %v2468_v20  ;;  %v2477_v59 = vld [vmem:[#allocation14 + $0x308] sm:$0xff]  ;;  %v2483_v57 = vld [vmem:[#allocation14 + $0x338] sm:$0xff] }
 0x931   :  { %v5299_v26 = vpack.c.bf16 %v2481_v6, %v2477_v59  ;;  %v5363_v10 = vpack.c.bf16 %v2483_v57, %v2479_v40  ;;  %v2503_v20 = vld [vmem:[#allocation14 + $0x3d8] sm:$0xff]  ;;  %v2502_v59 = vld [vmem:[#allocation14 + $0x3d0] sm:$0xff]  ;;  %v2793_v57 = vld [vmem:[#allocation15 + $0x28] sm:$0xff] }
 0x932   :  { %v2506_v6 = vld [vmem:[#allocation14 + $0x3f0] sm:$0xff] }
 0x933   :  { %5286 = vmatpush1.bf16.msra.mxu0 %v5285_v17  ;;  %5350 = vmatpush1.bf16.msra.mxu1 %v5349_v19  ;;  %v2476_v17 = vld [vmem:[#allocation14 + $0x300] sm:$0xff]  ;;  %v5377_v40 = vpack.c.bf16 %v2506_v6, %v2502_v59  ;;  %v2809_v59 = vld [vmem:[#allocation15 + $0xa8] sm:$0xff]  ;;  %v2807_v6 = vld [vmem:[#allocation15 + $0x98] sm:$0xff] }
 0x934   :  { %5288 = vmatprep.subr.bf16.mxu0 %v5287_v34  ;;  %5352 = vmatprep.subr.bf16.mxu1 %v5351_v48  ;;  %v5301_v19 = vpack.c.bf16 %v2480_v3, %v2476_v17  ;;  %v2485_v34 = vld [vmem:[#allocation14 + $0x348] sm:$0xff]  ;;  %v2491_v48 = vld [vmem:[#allocation14 + $0x378] sm:$0xff] }
 0x935   :  { %v5303_v44 = vpack.c.bf16 %v2489_v37, %v2485_v34  ;;  %v5367_v58 = vpack.c.bf16 %v2491_v48, %v2487_v41  ;;  %v2791_v17 = vld [vmem:[#allocation15 + $0x18] sm:$0xff] }
 0x937   :  { %5290 = vmatpush1.bf16.msra.mxu0 %v5289_v51  ;;  %5354 = vmatpush1.bf16.msra.mxu1 %v5353_v62  ;;  %v2484_v51 = vld [vmem:[#allocation14 + $0x340] sm:$0xff] }
 0x938   :  { %5292 = vmatprep.subr.bf16.mxu0 %v5291_v12  ;;  %5356 = vmatprep.subr.bf16.mxu1 %v5355_v28  ;;  %v5305_v62 = vpack.c.bf16 %v2488_v55, %v2484_v51  ;;  %v2493_v12 = vld [vmem:[#allocation14 + $0x388] sm:$0xff]  ;;  %v2499_v28 = vld [vmem:[#allocation14 + $0x3b8] sm:$0xff] }
 0x939   :  { %v5307_v13 = vpack.c.bf16 %v2497_v16, %v2493_v12  ;;  %v5371_v43 = vpack.c.bf16 %v2499_v28, %v2495_v22  ;;  %v2788_v28 = vld [vmem:[#allocation15] sm:$0xff] }
 0x93b   :  { %5294 = vmatpush1.bf16.msra.mxu0 %v5293_v32  ;;  %5358 = vmatpush1.bf16.msra.mxu1 %v5357_v49  ;;  %v2492_v32 = vld [vmem:[#allocation14 + $0x380] sm:$0xff] }
 0x93c   :  { %5296 = vmatprep.subr.bf16.mxu0 %v5295_v63  ;;  %5360 = vmatprep.subr.bf16.mxu1 %v5359_v24  ;;  %v5309_v49 = vpack.c.bf16 %v2496_v38, %v2492_v32  ;;  %v2501_v63 = vld [vmem:[#allocation14 + $0x3c8] sm:$0xff]  ;;  %v2507_v24 = vld [vmem:[#allocation14 + $0x3f8] sm:$0xff]  ;;  %v2792_v32 = vld [vmem:[#allocation15 + $0x20] sm:$0xff] }
 0x93d   :  { %v5311_v18 = vpack.c.bf16 %v2505_v36, %v2501_v63  ;;  %v5375_v45 = vpack.c.bf16 %v2507_v24, %v2503_v20  ;;  %v2799_v63 = vld [vmem:[#allocation15 + $0x58] sm:$0xff] }
 0x93e   :  { %v2803_v36 = vld [vmem:[#allocation15 + $0x78] sm:$0xff] }
 0x93f   :  { %5298 = vmatpush1.bf16.msra.mxu0 %v5297_v14  ;;  %5362 = vmatpush1.bf16.msra.mxu1 %v5361_v42  ;;  %v2500_v14 = vld [vmem:[#allocation14 + $0x3c0] sm:$0xff] }
 0x940   :  { %5300 = vmatprep.subr.bf16.mxu0 %v5299_v26  ;;  %5364 = vmatprep.subr.bf16.mxu1 %v5363_v10  ;;  %v5313_v42 = vpack.c.bf16 %v2504_v35, %v2500_v14  ;;  %v2789_v26 = vld [vmem:[#allocation15 + $0x8] sm:$0xff]  ;;  %v2795_v10 = vld [vmem:[#allocation15 + $0x38] sm:$0xff]  ;;  %v7824_v14 = vpack.c.bf16 %v2803_v36, %v2799_v63  ;;  %v2798_v35 = vld [vmem:[#allocation15 + $0x50] sm:$0xff] }
 0x941   :  { %v7795_v3 = vpack.c.bf16 %v2793_v57, %v2789_v26  ;;  %v8497_v63 = vld [vmem:[#allocation75_spill] sm:$0xff] }
 0x943   :  { %5302 = vmatpush1.bf16.msra.mxu0 %v5301_v19  ;;  %5366 = vmatpush1.bf16.msra.mxu1 %v5365_v30  ;;  %v7797_v19 = vpack.c.bf16 %v2795_v10, %v2791_v17  ;;  %v2804_v17 = vld [vmem:[#allocation15 + $0x80] sm:$0xff] }
 0x944   :  { %5304 = vmatprep.subr.bf16.mxu0 %v5303_v44  ;;  %5368 = vmatprep.subr.bf16.mxu1 %v5367_v58  ;;  %v2808_v10 = vld [vmem:[#allocation15 + $0xa0] sm:$0xff] }
 0x947   :  { %5306 = vmatpush1.bf16.msra.mxu0 %v5305_v62  ;;  %5370 = vmatpush1.bf16.msra.mxu1 %v5369_v8 }
 0x948   :  { %5308 = vmatprep.subr.bf16.mxu0 %v5307_v13  ;;  %5372 = vmatprep.subr.bf16.mxu1 %v5371_v43  ;;  %v2790_v43 = vld [vmem:[#allocation15 + $0x10] sm:$0xff] }
 0x94b   :  { %5310 = vmatpush1.bf16.msra.mxu0 %v5309_v49  ;;  %5374 = vmatpush1.bf16.msra.mxu1 %v5373_v60  ;;  %v2794_v49 = vld [vmem:[#allocation15 + $0x30] sm:$0xff]  ;;  %v2801_v60 = vld [vmem:[#allocation15 + $0x68] sm:$0xff] }
 0x94c   :  { %5312 = vmatprep.subr.bf16.mxu0 %v5311_v18  ;;  %5376 = vmatprep.subr.bf16.mxu1 %v5375_v45  ;;  %v7812_v18 = vpack.c.bf16 %v2792_v32, %v2788_v28  ;;  %v7814_v46 = vpack.c.bf16 %v2794_v49, %v2790_v43  ;;  %v7822_v24 = vpack.c.bf16 %v2801_v60, %v2797_v53  ;;  %v2802_v45 = vld [vmem:[#allocation15 + $0x70] sm:$0xff]  ;;  %v2820_v32 = vld [vmem:[#allocation15 + $0x100] sm:$0xff]  ;;  %v2829_v60 = vld [vmem:[#allocation15 + $0x148] sm:$0xff] }
 0x94d   :  { %v7842_v57 = vpack.c.bf16 %v2802_v45, %v2798_v35  ;;  %v2822_v53 = vld [vmem:[#allocation15 + $0x110] sm:$0xff]  ;;  %v2835_v35 = vld [vmem:[#allocation15 + $0x178] sm:$0xff] }
 0x94f   :  { %5314 = vmatpush1.bf16.msra.mxu0 %v5313_v42  ;;  %5378 = vmatpush1.bf16.msra.mxu1 %v5377_v40  ;;  %v2805_v42 = vld [vmem:[#allocation15 + $0x88] sm:$0xff]  ;;  %v2811_v40 = vld [vmem:[#allocation15 + $0xb8] sm:$0xff] }
 0x950   :  { %5380 = vmatprep.subr.bf16.mxu0 %v7795_v3  ;;  %5412 = vmatprep.subr.bf16.mxu1 %v7797_v19 }
 0x9e5   :  { %v2261_v23 = vpop.f32.mrb[14].mxu0  ;;  %v2332_v27 = vpop.f32.mrb[14].mxu1 }
 0x9e6   :  { %v5929_v30 = vadd.f32 %v2261_v23, %v7392_v1  ;;  %v2263_v34 = vpop.f32.mrb[15].mxu0  ;;  %v2334_v37 = vpop.f32.mrb[15].mxu1  ;;  %v5945_v51 = vadd.f32 %v2332_v27, %v7401_v25  ;;  %v7846_v23 = vpack.c.bf16 %v2809_v59, %v2805_v42  ;;  %v7848_v27 = vpack.c.bf16 %v2811_v40, %v2807_v6  ;;  %v2828_v59 = vld [vmem:[#allocation15 + $0x140] sm:$0xff] }
 0x9e7   :  { %v5930_v41 = vadd.f32 %v2263_v34, %v7397_v21  ;;  %v5946_v55 = vadd.f32 %v2334_v37, %v7408_v50  ;;  %v2810_v34 = vld [vmem:[#allocation15 + $0xb0] sm:$0xff]  ;;  %v2813_v37 = vld [vmem:[#allocation15 + $0xc8] sm:$0xff]  ;;  %v2832_v6 = vld [vmem:[#allocation15 + $0x160] sm:$0xff] }
 0x9e8   :  { %v2343_v44 = vmul.f32 0.5, %v5929_v30  ;;  %v2806_v30 = vld [vmem:[#allocation15 + $0x90] sm:$0xff] }
 0x9e9   :  { %v2347_v48 = vmul.f32 0.5, %v5930_v41  ;;  %v2352_v58 = vmul.f32 0.5, %v5946_v55  ;;  %v2817_v41 = vld [vmem:[#allocation15 + $0xe8] sm:$0xff]  ;;  %v7866_v55 = vpack.c.bf16 %v2810_v34, %v2806_v30  ;;  %v2834_v30 = vld [vmem:[#allocation15 + $0x170] sm:$0xff] }
 0x9ea   :  { %6148 = vtanh.f32 %v2343_v44  ;;  %v2815_v44 = vld [vmem:[#allocation15 + $0xd8] sm:$0xff]  ;;  %v2837_v34 = vld [vmem:[#allocation15 + $0x188] sm:$0xff] }
 0x9eb   :  { %6150 = vtanh.f32 %v2347_v48  ;;  %v2819_v48 = vld [vmem:[#allocation15 + $0xf8] sm:$0xff] }
 0x9ec   :  { %6152 = vtanh.f32 %v5945_v51  ;;  %v7864_v51 = vpack.c.bf16 %v2808_v10, %v2804_v17  ;;  %v2830_v10 = vld [vmem:[#allocation15 + $0x150] sm:$0xff] }
 0x9ed   :  { %6154 = vtanh.f32 %v2352_v58  ;;  %v2812_v58 = vld [vmem:[#allocation15 + $0xc0] sm:$0xff] }
 0x9f4   :  { %v6149_v62 = vpop.eup %6148 }
 0x9f5   :  { %v6151_v2 = vpop.eup %6150  ;;  %v2345_v5 = vmul.f32 0.5, %v6149_v62  ;;  %v2816_v62 = vld [vmem:[#allocation15 + $0xe0] sm:$0xff] }
 0x9f6   :  { %v2349_v8 = vmul.f32 0.5, %v6151_v2  ;;  %v6153_v12 = vpop.eup %6152  ;;  %v7870_v2 = vpack.c.bf16 %v2817_v41, %v2813_v37  ;;  %v2841_v37 = vld [vmem:[#allocation15 + $0x1a8] sm:$0xff]  ;;  %v2839_v41 = vld [vmem:[#allocation15 + $0x198] sm:$0xff] }
 0x9f7   :  { %v2346_v1 = vadd.f32 0.5, %v2345_v5  ;;  %v6155_v13 = vpop.eup %6154  ;;  %v7872_v5 = vpack.c.bf16 %v2819_v48, %v2815_v44  ;;  %v2843_v44 = vld [vmem:[#allocation15 + $0x1b8] sm:$0xff]  ;;  %v7936_v48 = vpack.c.bf16 %v2832_v6, %v2828_v59 }
 0x9f8   :  { %v2350_v16 = vadd.f32 0.5, %v2349_v8  ;;  %v2354_v50 = vmul.f32 0.5, %v6155_v13  ;;  %v2814_v8 = vld [vmem:[#allocation15 + $0xd0] sm:$0xff]  ;;  %v2827_v13 = vld [vmem:[#allocation15 + $0x138] sm:$0xff] }
 0x9f9   :  { %v2357_v22 = vmul.f32 %v6153_v12, %v2346_v1  ;;  %v2818_v1 = vld [vmem:[#allocation15 + $0xf0] sm:$0xff]  ;;  %v2821_v12 = vld [vmem:[#allocation15 + $0x108] sm:$0xff] }
 0x9fa   :  { %v2356_v21 = vmul.f32 %v2350_v16, %v2184_v61  ;;  %v2355_v38 = vadd.f32 0.5, %v2354_v50  ;;  %v2800_v61 = vld [vmem:[#allocation15 + $0x60] sm:$0xff]  ;;  %v8495_v16 = vld [vmem:[#allocation73_spill] sm:$0xff]  ;;  %v7888_v50 = vpack.c.bf16 %v2816_v62, %v2812_v58  ;;  %v7890_v28 = vpack.c.bf16 %v2818_v1, %v2814_v8 }
 0x9fb   :  { %v7840_v26 = vpack.c.bf16 %v2800_v61, %v2796_v0  ;;  %v2833_v0 = vld [vmem:[#allocation15 + $0x168] sm:$0xff]  ;;  %v2831_v61 = vld [vmem:[#allocation15 + $0x158] sm:$0xff]  ;;  %v7938_v58 = vpack.c.bf16 %v2834_v30, %v2830_v10  ;;  %v2840_v62 = vld [vmem:[#allocation15 + $0x1a0] sm:$0xff]  ;;  %v7942_v8 = vpack.c.bf16 %v2841_v37, %v2837_v34  ;;  %v7944_v1 = vpack.c.bf16 %v2843_v44, %v2839_v41 }
 0x9fc   :  { %v2358_v25 = vadd.f32 %v2357_v22, %v2356_v21  ;;  %v2825_v21 = vld [vmem:[#allocation15 + $0x128] sm:$0xff]  ;;  %v7918_v40 = vpack.c.bf16 %v2833_v0, %v2829_v60  ;;  %v7920_v17 = vpack.c.bf16 %v2835_v35, %v2831_v61  ;;  %v2846_v0 = vld [vmem:[#allocation15 + $0x1d0] sm:$0xff] }
 0x9fd   :  { %v7894_v43 = vpack.c.bf16 %v2825_v21, %v2821_v12  ;;  %v2838_v12 = vld [vmem:[#allocation15 + $0x190] sm:$0xff]  ;;  %v2845_v21 = vld [vmem:[#allocation15 + $0x1c8] sm:$0xff] }
 0x9fe   :  { %6156 = vtanh.f32 %v2358_v25  ;;  %v2823_v25 = vld [vmem:[#allocation15 + $0x118] sm:$0xff] }
 0x9ff   :  { %v7896_v49 = vpack.c.bf16 %v2827_v13, %v2823_v25  ;;  %v2849_v25 = vld [vmem:[#allocation15 + $0x1e8] sm:$0xff]  ;;  %v2847_v13 = vld [vmem:[#allocation15 + $0x1d8] sm:$0xff] }
 0xa08   :  { %v6157_v56 = vpop.eup %6156 }
 0xa09   :  { %v7810_v20 = vmul.f32 %v6157_v56, %v2355_v38  ;;  %v2824_v38 = vld [vmem:[#allocation15 + $0x120] sm:$0xff]  ;;  %v2826_v56 = vld [vmem:[#allocation15 + $0x130] sm:$0xff] }
 0xa0a   :  { %v7912_v45 = vpack.c.bf16 %v2824_v38, %v2820_v32  ;;  %v7914_v42 = vpack.c.bf16 %v2826_v56, %v2822_v53  ;;  %v2851_v32 = vld [vmem:[#allocation15 + $0x1f8] sm:$0xff]  ;;  %v7966_v56 = vpack.c.bf16 %v2849_v25, %v2845_v21 }
 0xa0b   :  { %4527 = vmatprep.mubr.msk.f32.mxu0 %vm7379_vm1, %v7810_v20  ;;  %4543 = vmatprep.mubr.msk.f32.mxu1 %vm7379_vm1, %v7810_v20  ;;  %v7968_v60 = vpack.c.bf16 %v2851_v32, %v2847_v13 }
 0xa0c   :  { %4528 = vmatmul.mubr.msk.f32.vlgmr.msra.gmra.mrb[16].mxu0 %vm7420_vm2, %v7417_v52  ;;  %4544 = vmatmul.mubr.msk.f32.vlgmr.msra.gmra.mrb[16].mxu1 %vm7420_vm2, %v7417_v52 }
 0xa0d   :  { %4529 = vmatprep.mubr.msk.f32.mxu0 %vm7780_vm8, %v7789_v54  ;;  %4545 = vmatprep.mubr.msk.f32.mxu1 %vm7780_vm8, %v7789_v54 }
 0xa0e   :  { %5382 = vmatpush1.bf16.msra.mxu0 %v7812_v18  ;;  %5414 = vmatpush1.bf16.msra.mxu1 %v7814_v46 }
 0xa0f   :  { %5384 = vmatprep.subr.bf16.mxu0 %v7822_v24  ;;  %5416 = vmatprep.subr.bf16.mxu1 %v7824_v14 }
 0xa10   :  { %4530 = vmatmul.mubr.msk.f32.gmra.mrb[18].mxu0 %vm7474_vm3, %v7482_v39  ;;  %4546 = vmatmul.mubr.msk.f32.gmra.mrb[18].mxu1 %vm7474_vm3, %v7482_v39 }
 0xa11   :  { %4531 = vmatprep.mubr.msk.f32.mxu0 %vm7719_vm7, %v7728_v31  ;;  %4547 = vmatprep.mubr.msk.f32.mxu1 %vm7719_vm7, %v7728_v31 }
 0xa12   :  { %5386 = vmatpush1.bf16.msra.mxu0 %v7840_v26  ;;  %5418 = vmatpush1.bf16.msra.mxu1 %v7842_v57 }
 0xa13   :  { %5388 = vmatprep.subr.bf16.mxu0 %v7846_v23  ;;  %5420 = vmatprep.subr.bf16.mxu1 %v7848_v27 }
 0xa14   :  { %4532 = vmatmul.mubr.msk.f32.gmra.mrb[20].mxu0 %vm7536_vm4, %v8495_v16  ;;  %4548 = vmatmul.mubr.msk.f32.gmra.mrb[20].mxu1 %vm7536_vm4, %v8495_v16 }
 0xa15   :  { %4533 = vmatprep.mubr.msk.f32.mxu0 %vm7658_vm6, %v7667_v29  ;;  %4549 = vmatprep.mubr.msk.f32.mxu1 %vm7658_vm6, %v7667_v29 }
 0xa16   :  { %5390 = vmatpush1.bf16.msra.mxu0 %v7864_v51  ;;  %5422 = vmatpush1.bf16.msra.mxu1 %v7866_v55 }
 0xa17   :  { %5392 = vmatprep.subr.bf16.mxu0 %v7870_v2  ;;  %5424 = vmatprep.subr.bf16.mxu1 %v7872_v5 }
 0xa18   :  { %4534 = vmatmul.mubr.msk.f32.gmra.mrb[22].mxu0 %vm7597_vm5, %v8497_v63  ;;  %4550 = vmatmul.mubr.msk.f32.gmra.mrb[22].mxu1 %vm7597_vm5, %v8497_v63 }
 0xa19   :  { %4535 = vmatprep.mubr.msk.f32.mxu0 %vm7597_vm5, %v8497_v63  ;;  %4551 = vmatprep.mubr.msk.f32.mxu1 %vm7597_vm5, %v8497_v63  ;;  %v2848_v63 = vld [vmem:[#allocation15 + $0x1e0] sm:$0xff] }
 0xa1a   :  { %5394 = vmatpush1.bf16.msra.mxu0 %v7888_v50  ;;  %5426 = vmatpush1.bf16.msra.mxu1 %v7890_v28 }
 0xa1b   :  { %5396 = vmatprep.subr.bf16.mxu0 %v7894_v43  ;;  %5428 = vmatprep.subr.bf16.mxu1 %v7896_v49 }
 0xa1c   :  { %4536 = vmatmul.mubr.msk.f32.gmra.mrb[24].mxu0 %vm7658_vm6, %v7667_v29  ;;  %4552 = vmatmul.mubr.msk.f32.gmra.mrb[24].mxu1 %vm7658_vm6, %v7667_v29  ;;  %v2836_v29 = vld [vmem:[#allocation15 + $0x180] sm:$0xff] }
 0xa1d   :  { %4537 = vmatprep.mubr.msk.f32.mxu0 %vm7536_vm4, %v8495_v16  ;;  %4553 = vmatprep.mubr.msk.f32.mxu1 %vm7536_vm4, %v8495_v16  ;;  %v2842_v16 = vld [vmem:[#allocation15 + $0x1b0] sm:$0xff]  ;;  %v7960_v38 = vpack.c.bf16 %v2840_v62, %v2836_v29 }
 0xa1e   :  { %5398 = vmatpush1.bf16.msra.mxu0 %v7912_v45  ;;  %5430 = vmatpush1.bf16.msra.mxu1 %v7914_v42  ;;  %v7962_v53 = vpack.c.bf16 %v2842_v16, %v2838_v12 }
 0xa1f   :  { %5400 = vmatprep.subr.bf16.mxu0 %v7918_v40  ;;  %5432 = vmatprep.subr.bf16.mxu1 %v7920_v17 }
 0xa20   :  { %4538 = vmatmul.mubr.msk.f32.gmra.mrb[26].mxu0 %vm7719_vm7, %v7728_v31  ;;  %4554 = vmatmul.mubr.msk.f32.gmra.mrb[26].mxu1 %vm7719_vm7, %v7728_v31  ;;  %v2844_v31 = vld [vmem:[#allocation15 + $0x1c0] sm:$0xff] }
 0xa21   :  { %4539 = vmatprep.mubr.msk.f32.mxu0 %vm7474_vm3, %v7482_v39  ;;  %4555 = vmatprep.mubr.msk.f32.mxu1 %vm7474_vm3, %v7482_v39  ;;  %v2850_v39 = vld [vmem:[#allocation15 + $0x1f0] sm:$0xff]  ;;  %v7984_v61 = vpack.c.bf16 %v2848_v63, %v2844_v31 }
 0xa22   :  { %5402 = vmatpush1.bf16.msra.mxu0 %v7936_v48  ;;  %5434 = vmatpush1.bf16.msra.mxu1 %v7938_v58  ;;  %v7986_v35 = vpack.c.bf16 %v2850_v39, %v2846_v0 }
 0xa23   :  { %5404 = vmatprep.subr.bf16.mxu0 %v7942_v8  ;;  %5436 = vmatprep.subr.bf16.mxu1 %v7944_v1 }
 0xa24   :  { %4540 = vmatmul.mubr.msk.f32.gmra.mrb[28].mxu0 %vm7780_vm8, %v7789_v54  ;;  %4556 = vmatmul.mubr.msk.f32.gmra.mrb[28].mxu1 %vm7780_vm8, %v7789_v54  ;;  %v8499_v54 = vld [vmem:[#allocation71_spill] sm:$0xff] }
 0xa25   :  { %4541 = vmatprep.mubr.msk.f32.mxu0 %vm7420_vm2, %v7417_v52  ;;  %4557 = vmatprep.mubr.msk.f32.mxu1 %vm7420_vm2, %v7417_v52  ;;  %v2508_v52 = vld [vmem:[%s8452_s7] sm:$0xf]  ;;  %v8501_v6 = vsub.s32 1, %v8499_v54  ;;  %v8502_v37 = vsub.s32 2, %v8499_v54  ;;  %v8503_v25 = vsub.s32 3, %v8499_v54 }
 0xa26   :  { %5406 = vmatpush1.bf16.msra.mxu0 %v7960_v38  ;;  %5438 = vmatpush1.bf16.msra.mxu1 %v7962_v53 }
 0xa27   :  { %5408 = vmatprep.subr.bf16.mxu0 %v7966_v56  ;;  %5440 = vmatprep.subr.bf16.mxu1 %v7968_v60  ;;  %v8047_v10 = vrot.slane %v2508_v52, %v8501_v6  ;;  %v8051_v41 = vrot.slane %v2508_v52, %v8502_v37  ;;  %v8057_v13 = vrot.slane %v2508_v52, %v8503_v25 }
 0xa28   :  { %4542 = vmatmul.mubr.msk.f32.gmra.mrb[30].mxu0 %vm7379_vm1, %v7810_v20  ;;  %4558 = vmatmul.mubr.msk.f32.gmra.mrb[30].mxu1 %vm7379_vm1, %v7810_v20  ;;  %v8500_v20 = vsub.s32 0, %v8499_v54 }
 0xa29   :  { %2920 = vmatprep.mubr.f32.mxu0 %v8484_v11  ;;  %2991 = vmatprep.mubr.f32.mxu1 %v8484_v11 }
 0xa2a   :  { %5410 = vmatpush1.bf16.msra.mxu0 %v7984_v61  ;;  %5442 = vmatpush1.bf16.msra.mxu1 %v7986_v35  ;;  %v8043_v59 = vrot.slane %v2508_v52, %v8500_v20 }
 0xa2b   :  { %5444 = vmatprep.subr.bf16.mxu0 %v7795_v3  ;;  %5476 = vmatprep.subr.bf16.mxu1 %v7797_v19 }
 0xa2d   :  { %2921 = vmatmul.mubr.f32.vlgmr.msra.gmra.mrb[16].mxu0 %v8484_v11  ;;  %2992 = vmatmul.mubr.f32.vlgmr.msra.gmra.mrb[16].mxu1 %v8484_v11 }
 0xa2e   :  { %5446 = vmatpush1.bf16.msra.mxu0 %v7812_v18  ;;  %5478 = vmatpush1.bf16.msra.mxu1 %v7814_v46 }
 0xa2f   :  { %5448 = vmatprep.subr.bf16.mxu0 %v7822_v24  ;;  %5480 = vmatprep.subr.bf16.mxu1 %v7824_v14 }
 0xa30   :  { %3090 = vmatprep.mubr.f32.mxu0 %v8484_v11  ;;  %3161 = vmatprep.mubr.f32.mxu1 %v8484_v11 }
 0xa32   :  { %5450 = vmatpush1.bf16.msra.mxu0 %v7840_v26  ;;  %5482 = vmatpush1.bf16.msra.mxu1 %v7842_v57 }
 0xa33   :  { %5452 = vmatprep.subr.bf16.mxu0 %v7846_v23  ;;  %5484 = vmatprep.subr.bf16.mxu1 %v7848_v27 }
 0xa36   :  { %5454 = vmatpush1.bf16.msra.mxu0 %v7864_v51  ;;  %5486 = vmatpush1.bf16.msra.mxu1 %v7866_v55 }
 0xa37   :  { %5456 = vmatprep.subr.bf16.mxu0 %v7870_v2  ;;  %5488 = vmatprep.subr.bf16.mxu1 %v7872_v5 }
 0xa3a   :  { %5458 = vmatpush1.bf16.msra.mxu0 %v7888_v50  ;;  %5490 = vmatpush1.bf16.msra.mxu1 %v7890_v28 }
 0xa3b   :  { %5460 = vmatprep.subr.bf16.mxu0 %v7894_v43  ;;  %5492 = vmatprep.subr.bf16.mxu1 %v7896_v49 }
 0xa3e   :  { %5462 = vmatpush1.bf16.msra.mxu0 %v7912_v45  ;;  %5494 = vmatpush1.bf16.msra.mxu1 %v7914_v42 }
 0xa3f   :  { %5464 = vmatprep.subr.bf16.mxu0 %v7918_v40  ;;  %5496 = vmatprep.subr.bf16.mxu1 %v7920_v17 }
 0xa42   :  { %5466 = vmatpush1.bf16.msra.mxu0 %v7936_v48  ;;  %5498 = vmatpush1.bf16.msra.mxu1 %v7938_v58 }
 0xa43   :  { %5468 = vmatprep.subr.bf16.mxu0 %v7942_v8  ;;  %5500 = vmatprep.subr.bf16.mxu1 %v7944_v1 }
 0xa46   :  { %5470 = vmatpush1.bf16.msra.mxu0 %v7960_v38  ;;  %5502 = vmatpush1.bf16.msra.mxu1 %v7962_v53 }
 0xa47   :  { %5472 = vmatprep.subr.bf16.mxu0 %v7966_v56  ;;  %5504 = vmatprep.subr.bf16.mxu1 %v7968_v60 }
 0xa4a   :  { %5474 = vmatpush1.bf16.msra.mxu0 %v7984_v61  ;;  %5506 = vmatpush1.bf16.msra.mxu1 %v7986_v35 }
 0xa4b   :  { %5508 = vmatprep.subr.bf16.mxu0 %v7795_v3  ;;  %5540 = vmatprep.subr.bf16.mxu1 %v7797_v19 }
 0xb00   :  { %v2922_v30 = vpop.f32.mrb[16].mxu0  ;;  %v2993_v34 = vpop.f32.mrb[16].mxu1 }
 0xb01   :  { %v5947_v44 = vadd.f32 %v2922_v30, %v8043_v59  ;;  %v2924_v29 = vpop.f32.mrb[17].mxu0  ;;  %v2995_v62 = vpop.f32.mrb[17].mxu1  ;;  %v5963_v32 = vadd.f32 %v2993_v34, %v8051_v41 }
 0xb02   :  { %v5948_v12 = vadd.f32 %v2924_v29, %v8047_v10  ;;  %v5964_v31 = vadd.f32 %v2995_v62, %v8057_v13 }
 0xb03   :  { %v3002_v16 = vmul.f32 0.5, %v5947_v44 }
 0xb04   :  { %v3006_v21 = vmul.f32 0.5, %v5948_v12  ;;  %v3011_v63 = vmul.f32 0.5, %v5964_v31 }
 0xb05   :  { %6158 = vtanh.f32 %v3002_v16 }
 0xb06   :  { %6160 = vtanh.f32 %v3006_v21 }
 0xb07   :  { %6162 = vtanh.f32 %v5963_v32 }
 0xb08   :  { %6164 = vtanh.f32 %v3011_v63 }
 0xb0f   :  { %v6159_v0 = vpop.eup %6158 }
 0xb10   :  { %v6161_v39 = vpop.eup %6160  ;;  %v3004_v20 = vmul.f32 0.5, %v6159_v0 }
 0xb11   :  { %v3008_v6 = vmul.f32 0.5, %v6161_v39  ;;  %v6163_v37 = vpop.eup %6162 }
 0xb12   :  { %v3005_v30 = vadd.f32 0.5, %v3004_v20  ;;  %v6165_v34 = vpop.eup %6164 }
 0xb13   :  { %v3009_v44 = vadd.f32 0.5, %v3008_v6  ;;  %v3013_v12 = vmul.f32 0.5, %v6165_v34 }
 0xb14   :  { %v3016_v29 = vmul.f32 %v6163_v37, %v3005_v30 }
 0xb15   :  { %v3015_v54 = vmul.f32 0.0, %v3009_v44  ;;  %v3014_v16 = vadd.f32 0.5, %v3013_v12 }
 0xb17   :  { %v8061_v52 = vadd.f32 %v3016_v29, %v3015_v54 }
 0xb19   :  { %6166 = vtanh.f32 %v8061_v52 }
 0xb23   :  { %v6167_v21 = vpop.eup %6166 }
 0xb24   :  { %v8064_v62 = vmul.f32 %v6167_v21, %v3014_v16 }
 0xb26   :  { %4508 = vmatmul.mubr.msk.f32.vlgmr.msra.gmra.mrb[18].mxu0 %vm7420_vm2, %v8064_v62  ;;  %4509 = vmatmul.mubr.msk.f32.vlgmr.msra.gmra.mrb[18].mxu1 %vm7420_vm2, %v8064_v62 }
 0xb27   :  { %5510 = vmatpush1.bf16.msra.mxu0 %v7812_v18  ;;  %5542 = vmatpush1.bf16.msra.mxu1 %v7814_v46 }
 0xb28   :  { %5512 = vmatprep.subr.bf16.mxu0 %v7822_v24  ;;  %5544 = vmatprep.subr.bf16.mxu1 %v7824_v14 }
 0xb29   :  { %3260 = vmatprep.mubr.f32.mxu0 %v8484_v11  ;;  %3331 = vmatprep.mubr.f32.mxu1 %v8484_v11 }
 0xb2b   :  { %5514 = vmatpush1.bf16.msra.mxu0 %v7840_v26  ;;  %5546 = vmatpush1.bf16.msra.mxu1 %v7842_v57 }
 0xb2c   :  { %5516 = vmatprep.subr.bf16.mxu0 %v7846_v23  ;;  %5548 = vmatprep.subr.bf16.mxu1 %v7848_v27 }
 0xb2f   :  { %5518 = vmatpush1.bf16.msra.mxu0 %v7864_v51  ;;  %5550 = vmatpush1.bf16.msra.mxu1 %v7866_v55 }
 0xb30   :  { %5520 = vmatprep.subr.bf16.mxu0 %v7870_v2  ;;  %5552 = vmatprep.subr.bf16.mxu1 %v7872_v5 }
 0xb33   :  { %5522 = vmatpush1.bf16.msra.mxu0 %v7888_v50  ;;  %5554 = vmatpush1.bf16.msra.mxu1 %v7890_v28 }
 0xb34   :  { %5524 = vmatprep.subr.bf16.mxu0 %v7894_v43  ;;  %5556 = vmatprep.subr.bf16.mxu1 %v7896_v49 }
 0xb37   :  { %5526 = vmatpush1.bf16.msra.mxu0 %v7912_v45  ;;  %5558 = vmatpush1.bf16.msra.mxu1 %v7914_v42 }
 0xb38   :  { %5528 = vmatprep.subr.bf16.mxu0 %v7918_v40  ;;  %5560 = vmatprep.subr.bf16.mxu1 %v7920_v17 }
 0xb3b   :  { %5530 = vmatpush1.bf16.msra.mxu0 %v7936_v48  ;;  %5562 = vmatpush1.bf16.msra.mxu1 %v7938_v58 }
 0xb3c   :  { %5532 = vmatprep.subr.bf16.mxu0 %v7942_v8  ;;  %5564 = vmatprep.subr.bf16.mxu1 %v7944_v1 }
 0xb3f   :  { %5534 = vmatpush1.bf16.msra.mxu0 %v7960_v38  ;;  %5566 = vmatpush1.bf16.msra.mxu1 %v7962_v53 }
 0xb40   :  { %5536 = vmatprep.subr.bf16.mxu0 %v7966_v56  ;;  %5568 = vmatprep.subr.bf16.mxu1 %v7968_v60 }
 0xb43   :  { %5538 = vmatpush1.bf16.msra.mxu0 %v7984_v61  ;;  %5570 = vmatpush1.bf16.msra.mxu1 %v7986_v35 }
 0xb44   :  { %5572 = vmatprep.subr.bf16.mxu0 %v7795_v3  ;;  %5604 = vmatprep.subr.bf16.mxu1 %v7797_v19 }
 0xbf9   :  { %v3092_v25 = vpop.f32.mrb[18].mxu0  ;;  %v3163_v32 = vpop.f32.mrb[18].mxu1 }
 0xbfa   :  { %v5949_v31 = vadd.f32 %v3092_v25, %v8043_v59  ;;  %v3094_v63 = vpop.f32.mrb[19].mxu0  ;;  %v3165_v0 = vpop.f32.mrb[19].mxu1  ;;  %v5965_v30 = vadd.f32 %v3163_v32, %v8051_v41 }
 0xbfb   :  { %v5950_v39 = vadd.f32 %v3094_v63, %v8047_v10  ;;  %v5966_v37 = vadd.f32 %v3165_v0, %v8057_v13 }
 0xbfc   :  { %v3172_v20 = vmul.f32 0.5, %v5949_v31  ;;  %v3021_v31 = vsel %vm7420_vm2, %v8061_v52, 0.0 }
 0xbfd   :  { %v3176_v6 = vmul.f32 0.5, %v5950_v39  ;;  %v3181_v44 = vmul.f32 0.5, %v5966_v37 }
 0xbfe   :  { %6168 = vtanh.f32 %v3172_v20 }
 0xbff   :  { %6170 = vtanh.f32 %v3176_v6 }
 0xc00   :  { %6172 = vtanh.f32 %v5965_v30 }
 0xc01   :  { %6174 = vtanh.f32 %v3181_v44 }
 0xc08   :  { %v6169_v29 = vpop.eup %6168 }
 0xc09   :  { %v6171_v54 = vpop.eup %6170  ;;  %v3174_v34 = vmul.f32 0.5, %v6169_v29  ;;  %v3020_v29 = vsel %vm7420_vm2, %v8064_v62, 0.0 }
 0xc0a   :  { %v3178_v12 = vmul.f32 0.5, %v6171_v54  ;;  %v6173_v21 = vpop.eup %6172 }
 0xc0b   :  { %v3175_v16 = vadd.f32 0.5, %v3174_v34  ;;  %v6175_v20 = vpop.eup %6174 }
 0xc0c   :  { %v3179_v25 = vadd.f32 0.5, %v3178_v12  ;;  %v3183_v6 = vmul.f32 0.5, %v6175_v20 }
 0xc0d   :  { %v3186_v63 = vmul.f32 %v6173_v21, %v3175_v16 }
 0xc0e   :  { %v3185_v39 = vmul.f32 %v3179_v25, %v3021_v31  ;;  %v3184_v30 = vadd.f32 0.5, %v3183_v6 }
 0xc10   :  { %v3187_v32 = vadd.f32 %v3186_v63, %v3185_v39 }
 0xc12   :  { %6176 = vtanh.f32 %v3187_v32  ;;  %v8115_v0 = vsel %vm7474_vm3, %v3187_v32, %v3021_v31 }
 0xc1c   :  { %v6177_v37 = vpop.eup %6176 }
 0xc1d   :  { %v3189_v44 = vmul.f32 %v6177_v37, %v3184_v30 }
 0xc1f   :  { %v8122_v52 = vsel %vm7474_vm3, %v3189_v44, %v3020_v29 }
 0xc20   :  { %3261 = vmatmul.mubr.f32.vlgmr.msra.gmra.mrb[20].mxu0 %v8122_v52  ;;  %3332 = vmatmul.mubr.f32.vlgmr.msra.gmra.mrb[20].mxu1 %v8122_v52 }
 0xc21   :  { %5574 = vmatpush1.bf16.msra.mxu0 %v7812_v18  ;;  %5606 = vmatpush1.bf16.msra.mxu1 %v7814_v46 }
 0xc22   :  { %5576 = vmatprep.subr.bf16.mxu0 %v7822_v24  ;;  %5608 = vmatprep.subr.bf16.mxu1 %v7824_v14 }
 0xc23   :  { %3430 = vmatprep.mubr.f32.mxu0 %v8484_v11  ;;  %3501 = vmatprep.mubr.f32.mxu1 %v8484_v11 }
 0xc25   :  { %5578 = vmatpush1.bf16.msra.mxu0 %v7840_v26  ;;  %5610 = vmatpush1.bf16.msra.mxu1 %v7842_v57 }
 0xc26   :  { %5580 = vmatprep.subr.bf16.mxu0 %v7846_v23  ;;  %5612 = vmatprep.subr.bf16.mxu1 %v7848_v27 }
 0xc29   :  { %5582 = vmatpush1.bf16.msra.mxu0 %v7864_v51  ;;  %5614 = vmatpush1.bf16.msra.mxu1 %v7866_v55 }
 0xc2a   :  { %5584 = vmatprep.subr.bf16.mxu0 %v7870_v2  ;;  %5616 = vmatprep.subr.bf16.mxu1 %v7872_v5 }
 0xc2d   :  { %5586 = vmatpush1.bf16.msra.mxu0 %v7888_v50  ;;  %5618 = vmatpush1.bf16.msra.mxu1 %v7890_v28 }
 0xc2e   :  { %5588 = vmatprep.subr.bf16.mxu0 %v7894_v43  ;;  %5620 = vmatprep.subr.bf16.mxu1 %v7896_v49 }
 0xc31   :  { %5590 = vmatpush1.bf16.msra.mxu0 %v7912_v45  ;;  %5622 = vmatpush1.bf16.msra.mxu1 %v7914_v42 }
 0xc32   :  { %5592 = vmatprep.subr.bf16.mxu0 %v7918_v40  ;;  %5624 = vmatprep.subr.bf16.mxu1 %v7920_v17 }
 0xc35   :  { %5594 = vmatpush1.bf16.msra.mxu0 %v7936_v48  ;;  %5626 = vmatpush1.bf16.msra.mxu1 %v7938_v58 }
 0xc36   :  { %5596 = vmatprep.subr.bf16.mxu0 %v7942_v8  ;;  %5628 = vmatprep.subr.bf16.mxu1 %v7944_v1 }
 0xc39   :  { %5598 = vmatpush1.bf16.msra.mxu0 %v7960_v38  ;;  %5630 = vmatpush1.bf16.msra.mxu1 %v7962_v53 }
 0xc3a   :  { %5600 = vmatprep.subr.bf16.mxu0 %v7966_v56  ;;  %5632 = vmatprep.subr.bf16.mxu1 %v7968_v60 }
 0xc3d   :  { %5602 = vmatpush1.bf16.msra.mxu0 %v7984_v61  ;;  %5634 = vmatpush1.bf16.msra.mxu1 %v7986_v35 }
 0xc3e   :  { %5636 = vmatprep.subr.bf16.mxu0 %v7795_v3  ;;  %5668 = vmatprep.subr.bf16.mxu1 %v7797_v19 }
 0xcf3   :  { %v3262_v47 = vpop.f32.mrb[20].mxu0  ;;  %v3333_v4 = vpop.f32.mrb[20].mxu1 }
 0xcf4   :  { %v5951_v62 = vadd.f32 %v3262_v47, %v8043_v59  ;;  %v3264_v54 = vpop.f32.mrb[21].mxu0  ;;  %v3335_v34 = vpop.f32.mrb[21].mxu1  ;;  %v5967_v25 = vadd.f32 %v3333_v4, %v8051_v41 }
 0xcf5   :  { %v5952_v12 = vadd.f32 %v3264_v54, %v8047_v10  ;;  %v5968_v31 = vadd.f32 %v3335_v34, %v8057_v13 }
 0xcf6   :  { %v3342_v16 = vmul.f32 0.5, %v5951_v62 }
 0xcf7   :  { %v3346_v21 = vmul.f32 0.5, %v5952_v12  ;;  %v3351_v63 = vmul.f32 0.5, %v5968_v31 }
 0xcf8   :  { %6178 = vtanh.f32 %v3342_v16 }
 0xcf9   :  { %6180 = vtanh.f32 %v3346_v21 }
 0xcfa   :  { %6182 = vtanh.f32 %v5967_v25 }
 0xcfb   :  { %6184 = vtanh.f32 %v3351_v63 }
 0xd02   :  { %v6179_v39 = vpop.eup %6178 }
 0xd03   :  { %v6181_v32 = vpop.eup %6180  ;;  %v3344_v20 = vmul.f32 0.5, %v6179_v39 }
 0xd04   :  { %v3348_v6 = vmul.f32 0.5, %v6181_v32  ;;  %v6183_v37 = vpop.eup %6182 }
 0xd05   :  { %v3345_v30 = vadd.f32 0.5, %v3344_v20  ;;  %v6185_v54 = vpop.eup %6184 }
 0xd06   :  { %v3349_v44 = vadd.f32 0.5, %v3348_v6  ;;  %v3353_v34 = vmul.f32 0.5, %v6185_v54 }
 0xd07   :  { %v3356_v29 = vmul.f32 %v6183_v37, %v3345_v30 }
 0xd08   :  { %v3355_v47 = vmul.f32 %v3349_v44, %v8115_v0  ;;  %v3354_v12 = vadd.f32 0.5, %v3353_v34 }
 0xd0a   :  { %v3357_v62 = vadd.f32 %v3356_v29, %v3355_v47 }
 0xd0c   :  { %6186 = vtanh.f32 %v3357_v62  ;;  %v8168_v4 = vsel %vm7536_vm4, %v3357_v62, %v8115_v0 }
 0xd16   :  { %v6187_v16 = vpop.eup %6186 }
 0xd17   :  { %v3359_v21 = vmul.f32 %v6187_v16, %v3354_v12 }
 0xd19   :  { %v8173_v25 = vsel %vm7536_vm4, %v3359_v21, %v8122_v52 }
 0xd1a   :  { %3431 = vmatmul.mubr.f32.vlgmr.msra.gmra.mrb[22].mxu0 %v8173_v25  ;;  %3502 = vmatmul.mubr.f32.vlgmr.msra.gmra.mrb[22].mxu1 %v8173_v25 }
 0xd1b   :  { %5638 = vmatpush1.bf16.msra.mxu0 %v7812_v18  ;;  %5670 = vmatpush1.bf16.msra.mxu1 %v7814_v46 }
 0xd1c   :  { %5640 = vmatprep.subr.bf16.mxu0 %v7822_v24  ;;  %5672 = vmatprep.subr.bf16.mxu1 %v7824_v14 }
 0xd1d   :  { %3600 = vmatprep.mubr.f32.mxu0 %v8484_v11  ;;  %3671 = vmatprep.mubr.f32.mxu1 %v8484_v11 }
 0xd1f   :  { %5642 = vmatpush1.bf16.msra.mxu0 %v7840_v26  ;;  %5674 = vmatpush1.bf16.msra.mxu1 %v7842_v57 }
 0xd20   :  { %5644 = vmatprep.subr.bf16.mxu0 %v7846_v23  ;;  %5676 = vmatprep.subr.bf16.mxu1 %v7848_v27 }
 0xd23   :  { %5646 = vmatpush1.bf16.msra.mxu0 %v7864_v51  ;;  %5678 = vmatpush1.bf16.msra.mxu1 %v7866_v55 }
 0xd24   :  { %5648 = vmatprep.subr.bf16.mxu0 %v7870_v2  ;;  %5680 = vmatprep.subr.bf16.mxu1 %v7872_v5 }
 0xd27   :  { %5650 = vmatpush1.bf16.msra.mxu0 %v7888_v50  ;;  %5682 = vmatpush1.bf16.msra.mxu1 %v7890_v28 }
 0xd28   :  { %5652 = vmatprep.subr.bf16.mxu0 %v7894_v43  ;;  %5684 = vmatprep.subr.bf16.mxu1 %v7896_v49 }
 0xd2b   :  { %5654 = vmatpush1.bf16.msra.mxu0 %v7912_v45  ;;  %5686 = vmatpush1.bf16.msra.mxu1 %v7914_v42 }
 0xd2c   :  { %5656 = vmatprep.subr.bf16.mxu0 %v7918_v40  ;;  %5688 = vmatprep.subr.bf16.mxu1 %v7920_v17 }
 0xd2f   :  { %5658 = vmatpush1.bf16.msra.mxu0 %v7936_v48  ;;  %5690 = vmatpush1.bf16.msra.mxu1 %v7938_v58 }
 0xd30   :  { %5660 = vmatprep.subr.bf16.mxu0 %v7942_v8  ;;  %5692 = vmatprep.subr.bf16.mxu1 %v7944_v1 }
 0xd33   :  { %5662 = vmatpush1.bf16.msra.mxu0 %v7960_v38  ;;  %5694 = vmatpush1.bf16.msra.mxu1 %v7962_v53 }
 0xd34   :  { %5664 = vmatprep.subr.bf16.mxu0 %v7966_v56  ;;  %5696 = vmatprep.subr.bf16.mxu1 %v7968_v60 }
 0xd37   :  { %5666 = vmatpush1.bf16.msra.mxu0 %v7984_v61  ;;  %5698 = vmatpush1.bf16.msra.mxu1 %v7986_v35 }
 0xd38   :  { %5700 = vmatprep.subr.bf16.mxu0 %v7795_v3  ;;  %5732 = vmatprep.subr.bf16.mxu1 %v7797_v19 }
 0xded   :  { %v3432_v22 = vpop.f32.mrb[22].mxu0  ;;  %v3503_v0 = vpop.f32.mrb[22].mxu1 }
 0xdee   :  { %v5953_v52 = vadd.f32 %v3432_v22, %v8043_v59  ;;  %v3434_v31 = vpop.f32.mrb[23].mxu0  ;;  %v3505_v63 = vpop.f32.mrb[23].mxu1  ;;  %v5969_v6 = vadd.f32 %v3503_v0, %v8051_v41 }
 0xdef   :  { %v5954_v39 = vadd.f32 %v3434_v31, %v8047_v10  ;;  %v5970_v30 = vadd.f32 %v3505_v63, %v8057_v13 }
 0xdf0   :  { %v3512_v32 = vmul.f32 0.5, %v5953_v52 }
 0xdf1   :  { %v3516_v20 = vmul.f32 0.5, %v5954_v39  ;;  %v3521_v37 = vmul.f32 0.5, %v5970_v30 }
 0xdf2   :  { %6188 = vtanh.f32 %v3512_v32 }
 0xdf3   :  { %6190 = vtanh.f32 %v3516_v20 }
 0xdf4   :  { %6192 = vtanh.f32 %v5969_v6 }
 0xdf5   :  { %6194 = vtanh.f32 %v3521_v37 }
 0xdfc   :  { %v6189_v44 = vpop.eup %6188 }
 0xdfd   :  { %v6191_v29 = vpop.eup %6190  ;;  %v3514_v47 = vmul.f32 0.5, %v6189_v44 }
 0xdfe   :  { %v3518_v62 = vmul.f32 0.5, %v6191_v29  ;;  %v6193_v34 = vpop.eup %6192 }
 0xdff   :  { %v3515_v54 = vadd.f32 0.5, %v3514_v47  ;;  %v6195_v52 = vpop.eup %6194 }
 0xe00   :  { %v3519_v12 = vadd.f32 0.5, %v3518_v62  ;;  %v3523_v31 = vmul.f32 0.5, %v6195_v52 }
 0xe01   :  { %v3526_v16 = vmul.f32 %v6193_v34, %v3515_v54 }
 0xe02   :  { %v3525_v21 = vmul.f32 %v3519_v12, %v8168_v4  ;;  %v3524_v63 = vadd.f32 0.5, %v3523_v31 }
 0xe04   :  { %v3527_v22 = vadd.f32 %v3526_v16, %v3525_v21 }
 0xe06   :  { %6196 = vtanh.f32 %v3527_v22  ;;  %v8219_v0 = vsel %vm7597_vm5, %v3527_v22, %v8168_v4 }
 0xe10   :  { %v6197_v39 = vpop.eup %6196 }
 0xe11   :  { %v3529_v32 = vmul.f32 %v6197_v39, %v3524_v63 }
 0xe13   :  { %v8224_v20 = vsel %vm7597_vm5, %v3529_v32, %v8173_v25 }
 0xe14   :  { %3601 = vmatmul.mubr.f32.vlgmr.msra.gmra.mrb[24].mxu0 %v8224_v20  ;;  %3672 = vmatmul.mubr.f32.vlgmr.msra.gmra.mrb[24].mxu1 %v8224_v20 }
 0xe15   :  { %5702 = vmatpush1.bf16.msra.mxu0 %v7812_v18  ;;  %5734 = vmatpush1.bf16.msra.mxu1 %v7814_v46 }
 0xe16   :  { %5704 = vmatprep.subr.bf16.mxu0 %v7822_v24  ;;  %5736 = vmatprep.subr.bf16.mxu1 %v7824_v14 }
 0xe17   :  { %3770 = vmatprep.mubr.f32.mxu0 %v8484_v11  ;;  %3841 = vmatprep.mubr.f32.mxu1 %v8484_v11 }
 0xe19   :  { %5706 = vmatpush1.bf16.msra.mxu0 %v7840_v26  ;;  %5738 = vmatpush1.bf16.msra.mxu1 %v7842_v57 }
 0xe1a   :  { %5708 = vmatprep.subr.bf16.mxu0 %v7846_v23  ;;  %5740 = vmatprep.subr.bf16.mxu1 %v7848_v27 }
 0xe1d   :  { %5710 = vmatpush1.bf16.msra.mxu0 %v7864_v51  ;;  %5742 = vmatpush1.bf16.msra.mxu1 %v7866_v55 }
 0xe1e   :  { %5712 = vmatprep.subr.bf16.mxu0 %v7870_v2  ;;  %5744 = vmatprep.subr.bf16.mxu1 %v7872_v5 }
 0xe21   :  { %5714 = vmatpush1.bf16.msra.mxu0 %v7888_v50  ;;  %5746 = vmatpush1.bf16.msra.mxu1 %v7890_v28 }
 0xe22   :  { %5716 = vmatprep.subr.bf16.mxu0 %v7894_v43  ;;  %5748 = vmatprep.subr.bf16.mxu1 %v7896_v49 }
 0xe25   :  { %5718 = vmatpush1.bf16.msra.mxu0 %v7912_v45  ;;  %5750 = vmatpush1.bf16.msra.mxu1 %v7914_v42 }
 0xe26   :  { %5720 = vmatprep.subr.bf16.mxu0 %v7918_v40  ;;  %5752 = vmatprep.subr.bf16.mxu1 %v7920_v17 }
 0xe29   :  { %5722 = vmatpush1.bf16.msra.mxu0 %v7936_v48  ;;  %5754 = vmatpush1.bf16.msra.mxu1 %v7938_v58 }
 0xe2a   :  { %5724 = vmatprep.subr.bf16.mxu0 %v7942_v8  ;;  %5756 = vmatprep.subr.bf16.mxu1 %v7944_v1 }
 0xe2d   :  { %5726 = vmatpush1.bf16.msra.mxu0 %v7960_v38  ;;  %5758 = vmatpush1.bf16.msra.mxu1 %v7962_v53 }
 0xe2e   :  { %5728 = vmatprep.subr.bf16.mxu0 %v7966_v56  ;;  %5760 = vmatprep.subr.bf16.mxu1 %v7968_v60 }
 0xe31   :  { %5730 = vmatpush1.bf16.msra.mxu0 %v7984_v61  ;;  %5762 = vmatpush1.bf16.msra.mxu1 %v7986_v35 }
 0xe32   :  { %5764 = vmatprep.subr.bf16.mxu0 %v7795_v3  ;;  %5796 = vmatprep.subr.bf16.mxu1 %v7797_v19 }
 0xee7   :  { %v3602_v36 = vpop.f32.mrb[24].mxu0  ;;  %v3673_v4 = vpop.f32.mrb[24].mxu1 }
 0xee8   :  { %v5955_v25 = vadd.f32 %v3602_v36, %v8043_v59  ;;  %v3604_v6 = vpop.f32.mrb[25].mxu0  ;;  %v3675_v30 = vpop.f32.mrb[25].mxu1  ;;  %v5971_v47 = vadd.f32 %v3673_v4, %v8051_v41 }
 0xee9   :  { %v5956_v37 = vadd.f32 %v3604_v6, %v8047_v10  ;;  %v5972_v62 = vadd.f32 %v3675_v30, %v8057_v13 }
 0xeea   :  { %v3682_v44 = vmul.f32 0.5, %v5955_v25 }
 0xeeb   :  { %v3686_v29 = vmul.f32 0.5, %v5956_v37  ;;  %v3691_v54 = vmul.f32 0.5, %v5972_v62 }
 0xeec   :  { %6198 = vtanh.f32 %v3682_v44 }
 0xeed   :  { %6200 = vtanh.f32 %v3686_v29 }
 0xeee   :  { %6202 = vtanh.f32 %v5971_v47 }
 0xeef   :  { %6204 = vtanh.f32 %v3691_v54 }
 0xef6   :  { %v6199_v34 = vpop.eup %6198 }
 0xef7   :  { %v6201_v12 = vpop.eup %6200  ;;  %v3684_v16 = vmul.f32 0.5, %v6199_v34 }
 0xef8   :  { %v3688_v21 = vmul.f32 0.5, %v6201_v12  ;;  %v6203_v52 = vpop.eup %6202 }
 0xef9   :  { %v3685_v22 = vadd.f32 0.5, %v3684_v16  ;;  %v6205_v4 = vpop.eup %6204 }
 0xefa   :  { %v3689_v31 = vadd.f32 0.5, %v3688_v21  ;;  %v3693_v25 = vmul.f32 0.5, %v6205_v4 }
 0xefb   :  { %v3696_v63 = vmul.f32 %v6203_v52, %v3685_v22 }
 0xefc   :  { %v3695_v39 = vmul.f32 %v3689_v31, %v8219_v0  ;;  %v3694_v6 = vadd.f32 0.5, %v3693_v25 }
 0xefe   :  { %v3697_v32 = vadd.f32 %v3696_v63, %v3695_v39 }
 0xf00   :  { %6206 = vtanh.f32 %v3697_v32  ;;  %v8270_v36 = vsel %vm7658_vm6, %v3697_v32, %v8219_v0 }
 0xf0a   :  { %v6207_v30 = vpop.eup %6206 }
 0xf0b   :  { %v3699_v37 = vmul.f32 %v6207_v30, %v3694_v6 }
 0xf0d   :  { %v8275_v44 = vsel %vm7658_vm6, %v3699_v37, %v8224_v20 }
 0xf0e   :  { %3771 = vmatmul.mubr.f32.vlgmr.msra.gmra.mrb[26].mxu0 %v8275_v44  ;;  %3842 = vmatmul.mubr.f32.vlgmr.msra.gmra.mrb[26].mxu1 %v8275_v44 }
 0xf0f   :  { %5766 = vmatpush1.bf16.msra.mxu0 %v7812_v18  ;;  %5798 = vmatpush1.bf16.msra.mxu1 %v7814_v46 }
 0xf10   :  { %5768 = vmatprep.subr.bf16.mxu0 %v7822_v24  ;;  %5800 = vmatprep.subr.bf16.mxu1 %v7824_v14 }
 0xf11   :  { %3940 = vmatprep.mubr.f32.mxu0 %v8484_v11  ;;  %4011 = vmatprep.mubr.f32.mxu1 %v8484_v11 }
 0xf13   :  { %5770 = vmatpush1.bf16.msra.mxu0 %v7840_v26  ;;  %5802 = vmatpush1.bf16.msra.mxu1 %v7842_v57 }
 0xf14   :  { %5772 = vmatprep.subr.bf16.mxu0 %v7846_v23  ;;  %5804 = vmatprep.subr.bf16.mxu1 %v7848_v27 }
 0xf17   :  { %5774 = vmatpush1.bf16.msra.mxu0 %v7864_v51  ;;  %5806 = vmatpush1.bf16.msra.mxu1 %v7866_v55 }
 0xf18   :  { %5776 = vmatprep.subr.bf16.mxu0 %v7870_v2  ;;  %5808 = vmatprep.subr.bf16.mxu1 %v7872_v5 }
 0xf1b   :  { %5778 = vmatpush1.bf16.msra.mxu0 %v7888_v50  ;;  %5810 = vmatpush1.bf16.msra.mxu1 %v7890_v28 }
 0xf1c   :  { %5780 = vmatprep.subr.bf16.mxu0 %v7894_v43  ;;  %5812 = vmatprep.subr.bf16.mxu1 %v7896_v49 }
 0xf1f   :  { %5782 = vmatpush1.bf16.msra.mxu0 %v7912_v45  ;;  %5814 = vmatpush1.bf16.msra.mxu1 %v7914_v42 }
 0xf20   :  { %5784 = vmatprep.subr.bf16.mxu0 %v7918_v40  ;;  %5816 = vmatprep.subr.bf16.mxu1 %v7920_v17 }
 0xf23   :  { %5786 = vmatpush1.bf16.msra.mxu0 %v7936_v48  ;;  %5818 = vmatpush1.bf16.msra.mxu1 %v7938_v58 }
 0xf24   :  { %5788 = vmatprep.subr.bf16.mxu0 %v7942_v8  ;;  %5820 = vmatprep.subr.bf16.mxu1 %v7944_v1 }
 0xf27   :  { %5790 = vmatpush1.bf16.msra.mxu0 %v7960_v38  ;;  %5822 = vmatpush1.bf16.msra.mxu1 %v7962_v53 }
 0xf28   :  { %5792 = vmatprep.subr.bf16.mxu0 %v7966_v56  ;;  %5824 = vmatprep.subr.bf16.mxu1 %v7968_v60 }
 0xf2b   :  { %5794 = vmatpush1.bf16.msra.mxu0 %v7984_v61  ;;  %5826 = vmatpush1.bf16.msra.mxu1 %v7986_v35 }
 0xf2c   :  { %5828 = vmatprep.subr.bf16.mxu0 %v7795_v3  ;;  %5860 = vmatprep.subr.bf16.mxu1 %v7797_v19 }
 0xfe1   :  { %v3772_v15 = vpop.f32.mrb[26].mxu0  ;;  %v3843_v0 = vpop.f32.mrb[26].mxu1 }
 0xfe2   :  { %v5957_v20 = vadd.f32 %v3772_v15, %v8043_v59  ;;  %v3774_v29 = vpop.f32.mrb[27].mxu0  ;;  %v3845_v47 = vpop.f32.mrb[27].mxu1  ;;  %v5973_v12 = vadd.f32 %v3843_v0, %v8051_v41 }
 0xfe3   :  { %v5958_v62 = vadd.f32 %v3774_v29, %v8047_v10  ;;  %v5974_v16 = vadd.f32 %v3845_v47, %v8057_v13  ;;  %v4214_v47 = vld [vmem:[%s8454_s9 + $0x18] sm:$0xff] }
 0xfe4   :  { %v3852_v54 = vmul.f32 0.5, %v5957_v20 }
 0xfe5   :  { %v3856_v34 = vmul.f32 0.5, %v5958_v62  ;;  %v3861_v3 = vmul.f32 0.5, %v5974_v16  ;;  %v4217_v16 = vld [vmem:[%s8454_s9 + $0x30] sm:$0xff] }
 0xfe6   :  { %6208 = vtanh.f32 %v3852_v54  ;;  %v4215_v54 = vld [vmem:[%s8454_s9 + $0x20] sm:$0xff] }
 0xfe7   :  { %6210 = vtanh.f32 %v3856_v34  ;;  %v4216_v34 = vld [vmem:[%s8454_s9 + $0x28] sm:$0xff] }
 0xfe8   :  { %6212 = vtanh.f32 %v5973_v12  ;;  %v5898_v12 = vpack.c.bf16 %v4216_v34, %v4215_v54 }
 0xfe9   :  { %6214 = vtanh.f32 %v3861_v3  ;;  %v4218_v3 = vld [vmem:[%s8454_s9 + $0x38] sm:$0xff] }
 0xff0   :  { %v6209_v21 = vpop.eup %6208 }
 0xff1   :  { %v6211_v19 = vpop.eup %6210  ;;  %v3854_v22 = vmul.f32 0.5, %v6209_v21  ;;  %v5901_v21 = vpack.c.bf16 %v4218_v3, %v4217_v16 }
 0xff2   :  { %v3858_v52 = vmul.f32 0.5, %v6211_v19  ;;  %v6213_v63 = vpop.eup %6212  ;;  %v4219_v19 = vld [vmem:[%s8454_s9 + $0x40] sm:$0xff] }
 0xff3   :  { %v3855_v31 = vadd.f32 0.5, %v3854_v22  ;;  %v6215_v30 = vpop.eup %6214  ;;  %v4220_v22 = vld [vmem:[%s8454_s9 + $0x48] sm:$0xff] }
 0xff4   :  { %v3859_v39 = vadd.f32 0.5, %v3858_v52  ;;  %v3863_v37 = vmul.f32 0.5, %v6215_v30  ;;  %v5904_v52 = vpack.c.bf16 %v4220_v22, %v4219_v19  ;;  %v4225_v30 = vld [vmem:[%s8454_s9 + $0x70] sm:$0xff] }
 0xff5   :  { %v3866_v32 = vmul.f32 %v6213_v63, %v3855_v31  ;;  %v4221_v31 = vld [vmem:[%s8454_s9 + $0x50] sm:$0xff]  ;;  %v4222_v63 = vld [vmem:[%s8454_s9 + $0x58] sm:$0xff] }
 0xff6   :  { %v3865_v4 = vmul.f32 %v3859_v39, %v8270_v36  ;;  %v3864_v15 = vadd.f32 0.5, %v3863_v37  ;;  %v5907_v39 = vpack.c.bf16 %v4222_v63, %v4221_v31  ;;  %v4226_v37 = vld [vmem:[%s8454_s9 + $0x78] sm:$0xff] }
 0xff8   :  { %v3867_v25 = vadd.f32 %v3866_v32, %v3865_v4  ;;  %v4223_v32 = vld [vmem:[%s8454_s9 + $0x60] sm:$0xff]  ;;  %v4224_v4 = vld [vmem:[%s8454_s9 + $0x68] sm:$0xff] }
 0xffa   :  { %6216 = vtanh.f32 %v3867_v25  ;;  %v8321_v6 = vsel %vm7719_vm7, %v3867_v25, %v8270_v36  ;;  %v6796_v36 = vmov 0.0|0.0   ;;  %v5910_v25 = vpack.c.bf16 %v4224_v4, %v4223_v32 }
0x1004   :  { %v6217_v0 = vpop.eup %6216 }
0x1005   :  { %v3869_v20 = vmul.f32 %v6217_v0, %v3864_v15  ;;  %v5913_v15 = vpack.c.bf16 %v4226_v37, %v4225_v30 }
0x1007   :  { %v8326_v29 = vsel %vm7719_vm7, %v3869_v20, %v8275_v44  ;;  %v4213_v44 = vld [vmem:[%s8454_s9 + $0x10] sm:$0xff] }
0x1008   :  { %3941 = vmatmul.mubr.f32.vlgmr.msra.gmra.mrb[28].mxu0 %v8326_v29  ;;  %4012 = vmatmul.mubr.f32.vlgmr.msra.gmra.mrb[28].mxu1 %v8326_v29  ;;  %v5895_v62 = vpack.c.bf16 %v4214_v47, %v4213_v44 }
0x1009   :  { %5830 = vmatpush1.bf16.msra.mxu0 %v7812_v18  ;;  %5862 = vmatpush1.bf16.msra.mxu1 %v7814_v46 }
0x100a   :  { %5832 = vmatprep.subr.bf16.mxu0 %v7822_v24  ;;  %5864 = vmatprep.subr.bf16.mxu1 %v7824_v14 }
0x100b   :  { %4110 = vmatprep.mubr.f32.mxu0 %v8484_v11  ;;  %4181 = vmatprep.mubr.f32.mxu1 %v8484_v11 }
0x100d   :  { %5834 = vmatpush1.bf16.msra.mxu0 %v7840_v26  ;;  %5866 = vmatpush1.bf16.msra.mxu1 %v7842_v57 }
0x100e   :  { %5836 = vmatprep.subr.bf16.mxu0 %v7846_v23  ;;  %5868 = vmatprep.subr.bf16.mxu1 %v7848_v27 }
0x1011   :  { %5838 = vmatpush1.bf16.msra.mxu0 %v7864_v51  ;;  %5870 = vmatpush1.bf16.msra.mxu1 %v7866_v55 }
0x1012   :  { %5840 = vmatprep.subr.bf16.mxu0 %v7870_v2  ;;  %5872 = vmatprep.subr.bf16.mxu1 %v7872_v5 }
0x1015   :  { %5842 = vmatpush1.bf16.msra.mxu0 %v7888_v50  ;;  %5874 = vmatpush1.bf16.msra.mxu1 %v7890_v28 }
0x1016   :  { %5844 = vmatprep.subr.bf16.mxu0 %v7894_v43  ;;  %5876 = vmatprep.subr.bf16.mxu1 %v7896_v49 }
0x1019   :  { %5846 = vmatpush1.bf16.msra.mxu0 %v7912_v45  ;;  %5878 = vmatpush1.bf16.msra.mxu1 %v7914_v42 }
0x101a   :  { %5848 = vmatprep.subr.bf16.mxu0 %v7918_v40  ;;  %5880 = vmatprep.subr.bf16.mxu1 %v7920_v17 }
0x101d   :  { %5850 = vmatpush1.bf16.msra.mxu0 %v7936_v48  ;;  %5882 = vmatpush1.bf16.msra.mxu1 %v7938_v58 }
0x101e   :  { %5852 = vmatprep.subr.bf16.mxu0 %v7942_v8  ;;  %5884 = vmatprep.subr.bf16.mxu1 %v7944_v1 }
0x1021   :  { %5854 = vmatpush1.bf16.msra.mxu0 %v7960_v38  ;;  %5886 = vmatpush1.bf16.msra.mxu1 %v7962_v53 }
0x1022   :  { %5856 = vmatprep.subr.bf16.mxu0 %v7966_v56  ;;  %5888 = vmatprep.subr.bf16.mxu1 %v7968_v60  ;;  %v4211_v60 = vld [vmem:[%s8454_s9] sm:$0xff] }
0x1025   :  { %5858 = vmatpush1.bf16.msra.mxu0 %v7984_v61  ;;  %5890 = vmatpush1.bf16.msra.mxu1 %v7986_v35  ;;  %v4212_v61 = vld [vmem:[%s8454_s9 + $0x8] sm:$0xff] }
0x1026   :  { %v5892_v35 = vpack.c.bf16 %v4212_v61, %v4211_v60  ;;  %5891 = vmatprep.subr.bf16.mxu0 %v6796_v36 }
0x10db   :  { %v3942_v9 = vpop.f32.mrb[28].mxu0  ;;  %v4013_v18 = vpop.f32.mrb[28].mxu1 }
0x10dc   :  { %v5959_v46 = vadd.f32 %v3942_v9, %v8043_v59  ;;  %v3944_v24 = vpop.f32.mrb[29].mxu0  ;;  %v4015_v14 = vpop.f32.mrb[29].mxu1  ;;  %v5975_v27 = vadd.f32 %v4013_v18, %v8051_v41 }
0x10dd   :  { %v5960_v26 = vadd.f32 %v3944_v24, %v8047_v10  ;;  %v5976_v51 = vadd.f32 %v4015_v14, %v8057_v13 }
0x10de   :  { %v4022_v57 = vmul.f32 0.5, %v5959_v46 }
0x10df   :  { %v4026_v23 = vmul.f32 0.5, %v5960_v26  ;;  %v4031_v55 = vmul.f32 0.5, %v5976_v51 }
0x10e0   :  { %6218 = vtanh.f32 %v4022_v57 }
0x10e1   :  { %6220 = vtanh.f32 %v4026_v23 }
0x10e2   :  { %6222 = vtanh.f32 %v5975_v27 }
0x10e3   :  { %6224 = vtanh.f32 %v4031_v55 }
0x10ea   :  { %v6219_v2 = vpop.eup %6218 }
0x10eb   :  { %v6221_v5 = vpop.eup %6220  ;;  %v4024_v50 = vmul.f32 0.5, %v6219_v2 }
0x10ec   :  { %v4028_v28 = vmul.f32 0.5, %v6221_v5  ;;  %v6223_v49 = vpop.eup %6222 }
0x10ed   :  { %v4025_v43 = vadd.f32 0.5, %v4024_v50  ;;  %v6225_v58 = vpop.eup %6224 }
0x10ee   :  { %v4029_v45 = vadd.f32 0.5, %v4028_v28  ;;  %v4033_v8 = vmul.f32 0.5, %v6225_v58 }
0x10ef   :  { %v4036_v42 = vmul.f32 %v6223_v49, %v4025_v43 }
0x10f0   :  { %v4035_v40 = vmul.f32 %v4029_v45, %v8321_v6  ;;  %v4034_v1 = vadd.f32 0.5, %v4033_v8 }
0x10f2   :  { %v8367_v17 = vadd.f32 %v4036_v42, %v4035_v40  ;;  %v4510_v40 = vld [vmem:[#allocation7] ss:$0 sm:$0xff] }
0x10f4   :  { %6226 = vtanh.f32 %v8367_v17  ;;  %v4041_v48 = vsel %vm7780_vm8, %v8367_v17, %v8321_v6 }
0x10fe   :  { %v6227_v38 = vpop.eup %6226 }
0x10ff   :  { %v4039_v53 = vmul.f32 %v6227_v38, %v4034_v1 }
0x1101   :  { %v8377_v56 = vsel %vm7780_vm8, %v4039_v53, %v8326_v29 }
0x1102   :  { %4111 = vmatmul.mubr.f32.vlgmr.msra.gmra.mrb[30].mxu0 %v8377_v56  ;;  %4182 = vmatmul.mubr.f32.vlgmr.msra.gmra.mrb[30].mxu1 %v8377_v56 }
0x1103   :  { %5893 = vmatpush3.bf16.msra.mxu0 %v5892_v35  ;;  %4608 = vmatprep.mubr.msk.f32.mxu0 %vm6797_vm9, %v8484_v11 }
0x1104   :  { %5894 = vmatprep.subr.bf16.mxu0 %v6796_v36 }
0x1107   :  { %5896 = vmatpush3.bf16.msra.mxu0 %v5895_v62 }
0x1108   :  { %5897 = vmatprep.subr.bf16.mxu0 %v6796_v36 }
0x110b   :  { %5899 = vmatpush3.bf16.msra.mxu0 %v5898_v12 }
0x110c   :  { %5900 = vmatprep.subr.bf16.mxu0 %v6796_v36 }
0x110f   :  { %5902 = vmatpush3.bf16.msra.mxu0 %v5901_v21 }
0x1110   :  { %5903 = vmatprep.subr.bf16.mxu0 %v6796_v36 }
0x1113   :  { %5905 = vmatpush3.bf16.msra.mxu0 %v5904_v52 }
0x1114   :  { %5906 = vmatprep.subr.bf16.mxu0 %v6796_v36 }
0x1117   :  { %5908 = vmatpush3.bf16.msra.mxu0 %v5907_v39 }
0x1118   :  { %5909 = vmatprep.subr.bf16.mxu0 %v6796_v36 }
0x111b   :  { %5911 = vmatpush3.bf16.msra.mxu0 %v5910_v25 }
0x111c   :  { %5912 = vmatprep.subr.bf16.mxu0 %v6796_v36 }
0x111f   :  { %5914 = vmatpush3.bf16.msra.mxu0 %v5913_v15 }
0x11d5   :  { %v4112_v0 = vpop.f32.mrb[30].mxu0  ;;  %v4183_v20 = vpop.f32.mrb[30].mxu1 }
0x11d6   :  { %v5961_v29 = vadd.f32 %v4112_v0, %v8043_v59  ;;  %v4114_v9 = vpop.f32.mrb[31].mxu0  ;;  %v4185_v18 = vpop.f32.mrb[31].mxu1  ;;  %v5977_v26 = vadd.f32 %v4183_v20, %v8051_v41 }
0x11d7   :  { %v5962_v46 = vadd.f32 %v4114_v9, %v8047_v10  ;;  %v5978_v57 = vadd.f32 %v4185_v18, %v8057_v13 }
0x11d8   :  { %v4192_v24 = vmul.f32 0.5, %v5961_v29 }
0x11d9   :  { %v4196_v14 = vmul.f32 0.5, %v5962_v46  ;;  %v4201_v23 = vmul.f32 0.5, %v5978_v57 }
0x11da   :  { %6228 = vtanh.f32 %v4192_v24 }
0x11db   :  { %6230 = vtanh.f32 %v4196_v14 }
0x11dc   :  { %6232 = vtanh.f32 %v5977_v26 }
0x11dd   :  { %6234 = vtanh.f32 %v4201_v23 }
0x11e4   :  { %v6229_v27 = vpop.eup %6228 }
0x11e5   :  { %v6231_v11 = vpop.eup %6230  ;;  %v4194_v51 = vmul.f32 0.5, %v6229_v27 }
0x11e6   :  { %v4198_v55 = vmul.f32 0.5, %v6231_v11  ;;  %v6233_v2 = vpop.eup %6232 }
0x11e7   :  { %v4195_v59 = vadd.f32 0.5, %v4194_v51  ;;  %v6235_v28 = vpop.eup %6234 }
0x11e8   :  { %v4199_v5 = vadd.f32 0.5, %v4198_v55  ;;  %v4203_v13 = vmul.f32 0.5, %v6235_v28 }
0x11e9   :  { %v4206_v50 = vmul.f32 %v6233_v2, %v4195_v59 }
0x11ea   :  { %v4205_v10 = vmul.f32 %v4199_v5, %v4041_v48  ;;  %v4204_v43 = vadd.f32 0.5, %v4203_v13 }
0x11ec   :  { %v4207_v41 = vadd.f32 %v4206_v50, %v4205_v10 }
0x11ee   :  { %6236 = vtanh.f32 %v4207_v41 }
0x11f8   :  { %v6237_v49 = vpop.eup %6236 }
0x11f9   :  { %v4209_v45 = vmul.f32 %v6237_v49, %v4204_v43 }
0x11fb   :  { %v4210_v42 = vsel %vm7379_vm1, %v4209_v45, %v8377_v56 }
0x11fc   :  { %4609 = vmatmul.mubr.f32.vlgmr.msra.gmra.mrb[32].mxu0 %v4210_v42 }
0x12cf   :  { %v4300_v58 = vpop.f32.mrb[32].mxu0 }
0x12d0   :  { %v4301_v8 = vadd.f32 %v4510_v40, %v4300_v58  ;;  %v4610_v33 = vpop.f32.mrb[33].mxu0 }
0x12d2   :  { %v4304_v1 = vmul.f32 0.5, %v4301_v8 }
0x12d4   :  { %6238 = vtanh.f32 %v4304_v1 }
0x12de   :  { %v6239_v6 = vpop.eup %6238 }
0x12df   :  { %v4306_v17 = vmul.f32 0.5, %v6239_v6 }
0x12e1   :  { %v4307_v48 = vadd.f32 0.5, %v4306_v17 }
0x12e3   :  { %4309 = vst.msk [vmem:[%s8456_s11] sm:$0xff] %vm4308_vm10, %v4307_v48 }
0x12e4   :  { %4314 = vsyncpa [#allocation9], 1 }
0x12e5   :  { %4315 = vsyncpa [#allocation13], 1 }
0x12e6   :  { %4316 = vsyncpa [#allocation16], 1 }
0x12e7   :  { %4317 = vsyncpa [#allocation10], 1 }
0x12e8   :  { %4318 = vsyncmov [#allocation6] }
0x12eb   :  { %s4319_s0 = vpop.sfrf %4318 }
0x12ec   :  { %p4511_p5 = scmp.ne.s32.totalorder %s4319_s0, 0 }
0x12ee   :  { %4323 = shalt.err (%p4511_p5)  }
0x12ef   :  { %4325 = vsyncmov [#allocation6 + $0x1] }
0x12f2   :  { %s4326_s19 = vpop.sfrf %4325 }
0x12f3   :  { %p4512_p6 = scmp.ne.s32.totalorder %s4326_s19, 0 }
0x12f5   :  { %4330 = shalt.err (%p4512_p6)  }
0x12f6   :  { %4332 = vsyncmov [#allocation6 + $0x2] }
0x12f9   :  { %s4333_s5 = vpop.sfrf %4332 }
0x12fa   :  { %p4513_p7 = scmp.ne.s32.totalorder %s4333_s5, 0 }
0x12fc   :  { %4337 = shalt.err (%p4513_p7)  }
0x12fd   :  { %4339 = vsyncmov [#allocation6 + $0x3] }
0x1300   :  { %s4340_s23 = vpop.sfrf %4339 }
0x1301   :  { %p4514_p8 = scmp.ne.s32.totalorder %s4340_s23, 0 }
0x1303   :  { %4344 = shalt.err (%p4514_p8)  }
0x1304   :  { %4346 = vsyncmov [#allocation6 + $0x4] }
0x1307   :  { %s4347_s11 = vpop.sfrf %4346 }
0x1308   :  { %p4515_p9 = scmp.ne.s32.totalorder %s4347_s11, 0 }
0x130a   :  { %4351 = shalt.err (%p4515_p9)  }
0x130b   :  { %4353 = vsyncmov [#allocation6 + $0x5] }
0x130e   :  { %s4354_s16 = vpop.sfrf %4353 }
0x130f   :  { %p4516_p10 = scmp.ne.s32.totalorder %s4354_s16, 0 }
0x1311   :  { %4358 = shalt.err (%p4516_p10)  }
0x1312   :  { %4360 = vsyncmov [#allocation6 + $0x6] }
0x1315   :  { %s4361_s8 = vpop.sfrf %4360 }
0x1316   :  { %p4517_p11 = scmp.ne.s32.totalorder %s4361_s8, 0 }
0x1318   :  { %4365 = shalt.err (%p4517_p11)  }
0x1319   :  { %4367 = vsyncmov [#allocation6 + $0x7] }
0x131c   :  { %s4368_s3 = vpop.sfrf %4367 }
0x131d   :  { %p4518_p12 = scmp.ne.s32.totalorder %s4368_s3, 0 }
0x131f   :  { %4372 = shalt.err (%p4518_p12)  }
0x1320   :  { %4374 = vsyncmov [#allocation6 + $0x8] }
0x1323   :  { %s4375_s17 = vpop.sfrf %4374 }
0x1324   :  { %p4519_p13 = scmp.ne.s32.totalorder %s4375_s17, 0 }
0x1326   :  { %4379 = shalt.err (%p4519_p13)  }
0x1327   :  { %4381 = vsyncmov [#allocation6 + $0x9] }
0x132a   :  { %s4382_s18 = vpop.sfrf %4381 }
0x132b   :  { %p4520_p0 = scmp.ne.s32.totalorder %s4382_s18, 0 }
0x132d   :  { %4386 = shalt.err (%p4520_p0)  }
0x132e   :  { %4388 = vsyncmov [#allocation6 + $0xa] }
0x1331   :  { %s4389_s24 = vpop.sfrf %4388 }
0x1332   :  { %p4521_p1 = scmp.ne.s32.totalorder %s4389_s24, 0 }
0x1334   :  { %4393 = shalt.err (%p4521_p1)  }
0x1335   :  { %4395 = vsyncmov [#allocation6 + $0xb] }
0x1338   :  { %s4396_s22 = vpop.sfrf %4395 }
0x1339   :  { %p4522_p2 = scmp.ne.s32.totalorder %s4396_s22, 0 }
0x133b   :  { %4400 = shalt.err (%p4522_p2)  }
0x133c   :  { %4402 = vsyncmov [#allocation6 + $0xc] }
0x133f   :  { %s4403_s25 = vpop.sfrf %4402 }
0x1340   :  { %p4523_p3 = scmp.ne.s32.totalorder %s4403_s25, 0 }
0x1342   :  { %4407 = shalt.err (%p4523_p3)  }
0x1343   :  { %4409 = vsyncmov [#allocation6 + $0xd] }
0x1346   :  { %s4410_s27 = vpop.sfrf %4409 }
0x1347   :  { %p4524_p4 = scmp.ne.s32.totalorder %s4410_s27, 0 }
0x1349   :  { %4414 = shalt.err (%p4524_p4)  }
0x134a   :  { %4416 = vsyncmov [#allocation6 + $0xe] }
0x134d   :  { %s4417_s12 = vpop.sfrf %4416 }
0x134e   :  { %p4525_p5 = scmp.ne.s32.totalorder %s4417_s12, 0 }
0x1350   :  { %4421 = shalt.err (%p4525_p5)  }
0x1351   :  { %4423 = vsyncmov [#allocation6 + $0xf] }
0x1354   :  { %s4424_s14 = vpop.sfrf %4423 }
0x1355   :  { %p4526_p6 = scmp.ne.s32.totalorder %s4424_s14, 0 }
0x1357   :  { %4428 = shalt.err (%p4526_p6)  }

</bundles_post_ra>
